<compile_context>
chip_gen: v5e
topology: v5e:2x2
jax: 0.10.0
libtpu: 0.0.40
codegen_flags: <defaults>
</compile_context>

<pallas_src>
import jax
import jax.numpy as jnp
from jax.experimental import pallas as pl
from jax.experimental.pallas import tpu as pltpu

IN_FEATURES = 64 * 64      # 4096
HIDDEN = 500
HIDDEN_PAD = 512           # pad to multiple of 128 for clean vreg/MXU tiling
NUM_CLASSES = 14
OUT_PAD = 128              # lane-dense output slab; wrapper slices [:, :14]
_MASK_VALUE = -1e30        # bias for padded class columns -> exp() == 0


def ann_kernel(x_ref, w1_ref, b1_ref, w2_ref, b2_ref, o_ref):
    # x_ref:  (TILE_B, 4096) bf16    w1_ref: (4096, 512) bf16   b1_ref: (1, 512) f32
    # w2_ref: (512, 128)     bf16    b2_ref: (1, 128)    f32    o_ref:  (TILE_B, 128) f32
    x = x_ref[...]

    # Linear(4096 -> 512-padded) + Tanh   (bf16 MXU, f32 accumulate, f32 VPU/EUP)
    h = jnp.dot(x, w1_ref[...], preferred_element_type=jnp.float32) + b1_ref[...]
    h = jnp.tanh(h)

    # Linear(512-padded -> 128-padded); padded class columns get -1e30 bias.
    logits = jnp.dot(h.astype(jnp.bfloat16), w2_ref[...],
                     preferred_element_type=jnp.float32) + b2_ref[...]

    # LogSoftmax(-1), numerically stable; padded columns contribute exp(.)==0.
    m = jnp.max(logits, axis=-1, keepdims=True)
    shifted = logits - m
    lse = jnp.log(jnp.sum(jnp.exp(shifted), axis=-1, keepdims=True))
    o_ref[...] = shifted - lse


def _round_up(a, b):
    return ((a + b - 1) // b) * b


def _vmem_limit_bytes():
    """96 MiB where physical VMEM is 128 MiB (v5e/v6e), 48 MiB otherwise (v7x)."""
    phys = 64 << 20  # conservative default (v7x-sized)
    try:
        info = pltpu.get_tpu_info()
        phys = int(getattr(info, "vmem_capacity_bytes", phys))
    except Exception:
        pass
    return (96 << 20) if phys >= (128 << 20) else (48 << 20)


def _default_tile_b(B):
    if B >= 1024:
        # Large batches: 512-row tiles. With bf16 x this is 2 x 4 MiB x-buffers
        # + <= 8 MiB of (possibly double-buffered) bf16 w1 + small f32 slabs,
        # comfortably under the 48 MiB v7x scoped limit.
        return 512
    if B >= 16:
        # Split into >= 2 grid steps so both v7x TensorCores get work
        # (dimension_semantics="parallel" only helps with >= 2 steps).
        return _round_up(pl.cdiv(B, 2), 8)
    # Tiny batches: one tile rounded to the 8-row sublane granule.
    return _round_up(max(B, 1), 8)


def ann_forward(x, w1p, b1p, w2p, b2p, *, tile_b=None):
    """x: (B, 1, 64, 64) or (B, 64, 64) float -> (B, 14) log-probs.

    w1p/b1p/w2p/b2p are the padded kernel-layout params from pack_params().
    """
    B = x.shape[0]
    # Flatten + cast to bf16 upstream of the kernel: the x stream is the
    # dominant HBM read, bf16 halves it (and halves the x tile VMEM footprint).
    x_flat = x.reshape(B, -1).astype(jnp.bfloat16)
    assert x_flat.shape[1] == IN_FEATURES

    if tile_b is None:
        tile_b = _default_tile_b(B)

    # No jnp.pad copy of x: let Pallas handle the ragged last block. Rows past
    # B in the final block read unspecified data and their outputs are masked;
    # real rows are unaffected (log-softmax is row-wise).
    grid = (pl.cdiv(B, tile_b),)

    out = pl.pallas_call(
        ann_kernel,
        out_shape=jax.ShapeDtypeStruct((B, OUT_PAD), jnp.float32),
        grid_spec=pltpu.PrefetchScalarGridSpec(
            num_scalar_prefetch=0,
            grid=grid,
            in_specs=[
                # x: tiled over batch (double-buffered by the pipeline)
                pl.BlockSpec((tile_b, IN_FEATURES), lambda i: (i, 0)),
                # weights/biases: constant block index -> VMEM-resident,
                # fetched from HBM once for the whole grid.
                pl.BlockSpec((IN_FEATURES, HIDDEN_PAD), lambda i: (0, 0)),
                pl.BlockSpec((1, HIDDEN_PAD), lambda i: (0, 0)),
                pl.BlockSpec((HIDDEN_PAD, OUT_PAD), lambda i: (0, 0)),
                pl.BlockSpec((1, OUT_PAD), lambda i: (0, 0)),
            ],
            out_specs=pl.BlockSpec((tile_b, OUT_PAD), lambda i: (i, 0)),
        ),
        compiler_params=pltpu.CompilerParams(
            dimension_semantics=("parallel",),   # independent batch tiles
            vmem_limit_bytes=_vmem_limit_bytes(),
        ),
    )(x_flat, w1p, b1p, w2p, b2p)

    return out[:, :NUM_CLASSES]


def init_params(key):
    """Deterministic init matching the PyTorch module's parameter shapes.

    nn.Linear(in, out): weight (out, in), bias (out,), U(-1/sqrt(in), 1/sqrt(in)).
    Returned here transposed as (in, out) in f32, unpadded.
    """
    k1, k2, k3, k4 = jax.random.split(key, 4)
    bound1 = 1.0 / jnp.sqrt(IN_FEATURES)
    bound2 = 1.0 / jnp.sqrt(HIDDEN)
    w1 = jax.random.uniform(k1, (IN_FEATURES, HIDDEN), jnp.float32, -bound1, bound1)
    b1 = jax.random.uniform(k2, (1, HIDDEN), jnp.float32, -bound1, bound1)
    w2 = jax.random.uniform(k3, (HIDDEN, NUM_CLASSES), jnp.float32, -bound2, bound2)
    b2 = jax.random.uniform(k4, (1, NUM_CLASSES), jnp.float32, -bound2, bound2)
    return w1, b1, w2, b2


def pack_params(w1, b1, w2, b2):
    """Pad to kernel layout and cast the matmul weights to bf16.

    - W1 columns / b1 entries 500..511 are zero  -> h pad cols == tanh(0) == 0.
    - W2 rows 500..511 and columns 14..127 zero  -> padded K rows contribute 0.
    - b2 entries 14..127 are -1e30               -> padded logits vanish in the
      log-softmax normalizer (exp == 0), so real columns are exact.
    """
    w1p = (jnp.zeros((IN_FEATURES, HIDDEN_PAD), jnp.float32)
           .at[:, :HIDDEN].set(w1).astype(jnp.bfloat16))
    b1p = jnp.zeros((1, HIDDEN_PAD), jnp.float32).at[:, :HIDDEN].set(b1)
    w2p = (jnp.zeros((HIDDEN_PAD, OUT_PAD), jnp.float32)
           .at[:HIDDEN, :NUM_CLASSES].set(w2).astype(jnp.bfloat16))
    b2p = (jnp.full((1, OUT_PAD), _MASK_VALUE, jnp.float32)
           .at[:, :NUM_CLASSES].set(b2))
    return w1p, b1p, w2p, b2p


def _reference(x, w1p, b1p, w2p, b2p):
    """Plain-JAX reference mimicking the kernel's bf16-rounded operands.

    Note: x/h are rounded to bf16 before each matmul (f32 accumulation), so
    log-probs deviate ~1e-2 from a pure-f32 PyTorch run -- fine for
    classification; the argmax is unaffected in practice.
    """
    B = x.shape[0]
    xb = x.reshape(B, -1).astype(jnp.bfloat16).astype(jnp.float32)
    w1f = w1p[:, :HIDDEN].astype(jnp.float32)
    w2f = w2p[:HIDDEN, :NUM_CLASSES].astype(jnp.float32)
    h = jnp.tanh(xb @ w1f + b1p[:, :HIDDEN])
    hb = h.astype(jnp.bfloat16).astype(jnp.float32)
    logits = hb @ w2f + b2p[:, :NUM_CLASSES]
    return jax.nn.log_softmax(logits, axis=-1)


if __name__ == "__main__":
    key = jax.random.PRNGKey(0)
    k_params, k_x1, k_x2 = jax.random.split(key, 3)

    w1, b1, w2, b2 = init_params(k_params)
    w1p, b1p, w2p, b2p = pack_params(w1, b1, w2, b2)

    # Test 1: small batch, NCHW single-channel 64x64 input, single grid step.
    B1 = 8
    x1 = jax.random.normal(k_x1, (B1, 1, 64, 64), jnp.float32)
    out1 = jax.block_until_ready(ann_forward(x1, w1p, b1p, w2p, b2p))
    ref1 = _reference(x1, w1p, b1p, w2p, b2p)
    assert out1.shape == (B1, NUM_CLASSES)
    assert jnp.allclose(out1, ref1, atol=1e-2, rtol=1e-2), "mismatch (test 1)"

    # Test 2: B=20 with the default heuristic -> 2 grid steps (megacore split)
    # and a ragged last block (no wrapper-side padding).
    B2 = 20
    x2 = jax.random.normal(k_x2, (B2, 1, 64, 64), jnp.float32)
    out2 = jax.block_until_ready(ann_forward(x2, w1p, b1p, w2p, b2p))
    ref2 = _reference(x2, w1p, b1p, w2p, b2p)
    assert out2.shape == (B2, NUM_CLASSES)
    assert jnp.allclose(out2, ref2, atol=1e-2, rtol=1e-2), "mismatch (test 2)"

    # Test 3: explicit small tile -> 3 grid steps, last one partial.
    out3 = jax.block_until_ready(ann_forward(x2, w1p, b1p, w2p, b2p, tile_b=8))
    assert out3.shape == (B2, NUM_CLASSES)
    assert jnp.allclose(out3, ref2, atol=1e-2, rtol=1e-2), "mismatch (test 3)"

    print("KERNEL_OK")
</pallas_src>

<mosaic_0001>
module attributes {stable_mosaic.version = 11 : i64} {
  func.func @ann_kernel(%arg0: i32, %arg1: memref<8x4096xbf16, #tpu.memory_space<vmem>>, %arg2: memref<4096x512xbf16, #tpu.memory_space<vmem>>, %arg3: memref<1x512xf32, #tpu.memory_space<vmem>>, %arg4: memref<512x128xbf16, #tpu.memory_space<vmem>>, %arg5: memref<1x128xf32, #tpu.memory_space<vmem>>, %arg6: memref<8x128xf32, #tpu.memory_space<vmem>>) attributes {dimension_semantics = [#tpu.dimension_semantics<parallel>], iteration_bounds = array<i64: 1>, scalar_prefetch = 0 : i64, scratch_operands = 0 : i64, tpu.core_type = #tpu.core_type<tc>, window_params = [{transform_indices = @transform_0, window_bounds = array<i64: 8, 4096>}, {pipeline_mode = #tpu.pipeline_mode<synchronous>, transform_indices = @transform_1, window_bounds = array<i64: 4096, 512>}, {pipeline_mode = #tpu.pipeline_mode<synchronous>, transform_indices = @transform_2, window_bounds = array<i64: 1, 512>}, {pipeline_mode = #tpu.pipeline_mode<synchronous>, transform_indices = @transform_3, window_bounds = array<i64: 512, 128>}, {pipeline_mode = #tpu.pipeline_mode<synchronous>, transform_indices = @transform_4, window_bounds = array<i64: 1, 128>}, {transform_indices = @transform_5, window_bounds = array<i64: 8, 128>}]} {
    %c0 = arith.constant 0 : index
    %c0_0 = arith.constant 0 : index
    %0 = vector.load %arg1[%c0, %c0_0] : memref<8x4096xbf16, #tpu.memory_space<vmem>>, vector<8x4096xbf16>
    %c0_1 = arith.constant 0 : index
    %c0_2 = arith.constant 0 : index
    %1 = vector.load %arg2[%c0_1, %c0_2] : memref<4096x512xbf16, #tpu.memory_space<vmem>>, vector<4096x512xbf16>
    %cst = arith.constant dense<0.000000e+00> : vector<8x512xf32>
    %2 = tpu.matmul %0, %1, %cst {dimension_numbers = #tpu.dot_dimension_numbers<[1], [0], [0], [1], [0, 0, 1, 1], [], []>} : vector<8x4096xbf16>, vector<4096x512xbf16>, vector<8x512xf32> -> vector<8x512xf32>
    %c0_3 = arith.constant 0 : index
    %c0_4 = arith.constant 0 : index
    %3 = vector.load %arg3[%c0_3, %c0_4] : memref<1x512xf32, #tpu.memory_space<vmem>>, vector<1x512xf32>
    %4 = vector.broadcast %3 : vector<1x512xf32> to vector<8x512xf32>
    %5 = arith.addf %2, %4 : vector<8x512xf32>
    %6 = math.tanh %5 : vector<8x512xf32>
    %7 = arith.truncf %6 : vector<8x512xf32> to vector<8x512xbf16>
    %c0_5 = arith.constant 0 : index
    %c0_6 = arith.constant 0 : index
    %8 = vector.load %arg4[%c0_5, %c0_6] : memref<512x128xbf16, #tpu.memory_space<vmem>>, vector<512x128xbf16>
    %cst_7 = arith.constant dense<0.000000e+00> : vector<8x128xf32>
    %9 = tpu.matmul %7, %8, %cst_7 {dimension_numbers = #tpu.dot_dimension_numbers<[1], [0], [0], [1], [0, 0, 1, 1], [], []>} : vector<8x512xbf16>, vector<512x128xbf16>, vector<8x128xf32> -> vector<8x128xf32>
    %c0_8 = arith.constant 0 : index
    %c0_9 = arith.constant 0 : index
    %10 = vector.load %arg5[%c0_8, %c0_9] : memref<1x128xf32, #tpu.memory_space<vmem>>, vector<1x128xf32>
    %11 = vector.broadcast %10 : vector<1x128xf32> to vector<8x128xf32>
    %12 = arith.addf %9, %11 : vector<8x128xf32>
    %cst_10 = arith.constant dense<0xFF800000> : vector<8xf32>
    %13 = vector.multi_reduction <maximumf>, %12, %cst_10 [1] : vector<8x128xf32> to vector<8xf32>
    %14 = vector.shape_cast %13 : vector<8xf32> to vector<8x1xf32>
    %15 = vector.broadcast %14 : vector<8x1xf32> to vector<8x128xf32>
    %16 = arith.subf %12, %15 : vector<8x128xf32>
    %17 = math.exp %16 : vector<8x128xf32>
    %cst_11 = arith.constant dense<0.000000e+00> : vector<8xf32>
    %18 = vector.multi_reduction <add>, %17, %cst_11 [1] : vector<8x128xf32> to vector<8xf32>
    %19 = vector.shape_cast %18 : vector<8xf32> to vector<8x1xf32>
    %20 = math.log %19 : vector<8x1xf32>
    %21 = vector.broadcast %20 : vector<8x1xf32> to vector<8x128xf32>
    %22 = arith.subf %16, %21 : vector<8x128xf32>
    %c0_12 = arith.constant 0 : index
    %c0_13 = arith.constant 0 : index
    %23 = vector.load %arg6[%c0_12, %c0_13] : memref<8x128xf32, #tpu.memory_space<vmem>>, vector<8x128xf32>
    tpu.vector_store %arg6[%c0_12, %c0_13], %22 {strides = array<i32>} : memref<8x128xf32, #tpu.memory_space<vmem>>, vector<8x128xf32>,
    return
  }
  func.func @transform_0(%arg0: i32) -> (i32, i32) {
    %c0_i32 = arith.constant 0 : i32
    %c0_i32_0 = arith.constant 0 : i32
    return %arg0, %c0_i32 : i32, i32
  }
  func.func @transform_1(%arg0: i32) -> (i32, i32) {
    %c0_i32 = arith.constant 0 : i32
    %c0_i32_0 = arith.constant 0 : i32
    %c0_i32_1 = arith.constant 0 : i32
    return %c0_i32, %c0_i32_0 : i32, i32
  }
  func.func @transform_2(%arg0: i32) -> (i32, i32) {
    %c0_i32 = arith.constant 0 : i32
    %c0_i32_0 = arith.constant 0 : i32
    %c0_i32_1 = arith.constant 0 : i32
    return %c0_i32, %c0_i32_0 : i32, i32
  }
  func.func @transform_3(%arg0: i32) -> (i32, i32) {
    %c0_i32 = arith.constant 0 : i32
    %c0_i32_0 = arith.constant 0 : i32
    %c0_i32_1 = arith.constant 0 : i32
    return %c0_i32, %c0_i32_0 : i32, i32
  }
  func.func @transform_4(%arg0: i32) -> (i32, i32) {
    %c0_i32 = arith.constant 0 : i32
    %c0_i32_0 = arith.constant 0 : i32
    %c0_i32_1 = arith.constant 0 : i32
    return %c0_i32, %c0_i32_0 : i32, i32
  }
  func.func @transform_5(%arg0: i32) -> (i32, i32) {
    %c0_i32 = arith.constant 0 : i32
    %c0_i32_0 = arith.constant 0 : i32
    return %arg0, %c0_i32 : i32, i32
  }
}

</mosaic_0001>

<bundles_post_ra>
// kernel: tpu_custom_call.1
= control target key start
LH: loop header
LB: loop body
LE: loop exit
PB: predicated region body
PF: predicated region fallthrough
CT: control target
= control target key end

     0   :  { %10 = vsyncpa [#allocation3], 0  ;;  %s14178_s0 = inlined_call_operand.hbm [shape: bf16[8,4096], index: 0, kind: input, shape index: {}]   ;;  %s14179_s1 = inlined_call_operand.hbm [shape: bf16[4096,512], index: 1, kind: input, shape index: {}]   ;;  %s14180_s2 = inlined_call_operand.hbm [shape: f32[1,512], index: 2, kind: input, shape index: {}]   ;;  %s14181_s3 = inlined_call_operand.hbm [shape: bf16[512,128], index: 3, kind: input, shape index: {}]   ;;  %s14182_s4 = inlined_call_operand.hbm [shape: f32[1,128], index: 4, kind: input, shape index: {}]   ;;  %s14183_s5 = inlined_call_operand.hbm [shape: f32[8,128], index: 5, kind: output, shape index: {}]  }
   0x1   :  { %11 = vsyncpa [#allocation6], 0 }
   0x2   :  { %12 = vsyncpa [#allocation9], 0  ;;  %s29_s20 = sshll.u32 %s14179_s1, 4  ;;  %s30_s20 = int_to_ptr.hbm [resolvable:$true] %s29_s20 }
   0x3   :  { %13 = vsyncpa [#allocation4], 0  ;;  %s13847_s21 = smov [#allocation5]   ;;  %s53_s25 = sshll.u32 %s14181_s3, 4  ;;  %s54_s25 = int_to_ptr.hbm [resolvable:$true] %s53_s25 }
   0x4   :  { %s31_s22 = sshll.u32 %s13847_s21, 4  ;;  %s13848_s26 = smov 256   ;;  %s32_s22 = int_to_ptr.vmem [resolvable:$true] %s31_s22 }
   0x5   :  { %s13849_s27 = smov 16   ;;  %s13850_s28 = smov [#allocation8]  }
   0x6   :  { %37 = dma.hbm_to_vmem [thread:$0]  %s30_s20, 131072, %s32_s22, [#allocation6], %s13848_s26, %s13848_s26, %s13849_s27  }
   0x7   :  { %s55_s29 = sshll.u32 %s13850_s28, 4  ;;  %s13851_s30 = smov 64   ;;  %s56_s29 = int_to_ptr.vmem [resolvable:$true] %s55_s29 }
   0x8   :  { %s13852_s6 = smov 4   ;;  %s19_s8 = sshll.u32 %s14178_s0, 4  ;;  %s20_s8 = int_to_ptr.hbm [resolvable:$true] %s19_s8 }
   0x9   :  { %61 = dma.hbm_to_vmem [thread:$0]  %s54_s25, 4096, %s56_s29, [#allocation9], %s13851_s30, %s13851_s30, %s13852_s6  }
   0xa   :  { %s13853_s9 = smov [#allocation2]   ;;  %s43_s12 = sshll.u32 %s14180_s2, 4  ;;  %s44_s12 = int_to_ptr.hbm [resolvable:$true] %s43_s12 }
   0xb   :  { %s21_s10 = sshll.u32 %s13853_s9, 4  ;;  %s13854_s13 = smov [#allocation7]   ;;  %s22_s10 = int_to_ptr.vmem [resolvable:$true] %s21_s10 }
   0xc   :  { %24 = dma.hbm_to_vmem [thread:$0]  %s20_s8, 2048, %s22_s10, [#allocation3]  }
   0xd   :  { %s45_s14 = sshll.u32 %s13854_s13, 4  ;;  %s67_s17 = sshll.u32 %s14182_s4, 4  ;;  %s46_s14 = int_to_ptr.vmem [resolvable:$true] %s45_s14  ;;  %s68_s17 = int_to_ptr.hbm [resolvable:$true] %s67_s17 }
   0xe   :  { %48 = dma.hbm_to_vmem [thread:$0]  %s44_s12, 64, %s46_s14, [#allocation6]  }
   0xf   :  { %s13855_s0 = smov [#allocation10]  }
  0x10   :  { %s69_s18 = sshll.u32 %s13855_s0, 4  ;;  %s70_s18 = int_to_ptr.vmem [resolvable:$true] %s69_s18 }
  0x11   :  { %72 = dma.hbm_to_vmem [thread:$0]  %s68_s17, 16, %s70_s18, [#allocation9]  }
  0x12   :  { %13839 = dma.done.wait [#allocation3], 2048  }
  0x13   :  { %13840 = vsyncadd [#allocation3], 4294965248 }
  0x14   :  { %13841 = dma.done.wait [#allocation6], 131136  }
  0x15   :  { %13842 = vsyncadd [#allocation6], 4294836160 }
  0x16   :  { %13843 = dma.done.wait [#allocation9], 4112  }
  0x17   :  { %13844 = vsyncadd [#allocation9], 4294963184  ;;  %v8503_v0 = vld [vmem:[#allocation5 + $0xe0] sm:$0xf]  ;;  %v12643_v1 = vld [vmem:[#allocation5 + $0xec] sm:$0xf0] }
  0x18   :  { %v8631_v2 = vld [vmem:[#allocation5 + $0x1e0] sm:$0xf]  ;;  %v8504_v3 = vor.u32 %v12643_v1, %v8503_v0  ;;  %v12675_v4 = vld [vmem:[#allocation5 + $0x1ec] sm:$0xf0]  ;;  %s13856_s2 = smov [#allocation11]   ;;  %s8377_s21 = sshll.u32 %s14183_s5, 4  ;;  %s8378_s21 = int_to_ptr.hbm [resolvable:$true] %s8377_s21 }
  0x19   :  { %v8759_v5 = vld [vmem:[#allocation5 + $0x2e0] sm:$0xf]  ;;  %v12707_v6 = vld [vmem:[#allocation5 + $0x2ec] sm:$0xf0]  ;;  %v8632_v7 = vor.u32 %v12675_v4, %v8631_v2  ;;  %s8375_s4 = sshll.u32 %s13856_s2, 4  ;;  %s8376_s4 = int_to_ptr.vmem [resolvable:$true] %s8375_s4 }
  0x1a   :  { %v8760_v8 = vor.u32 %v12707_v6, %v8759_v5  ;;  %v8887_v9 = vld [vmem:[#allocation5 + $0x3e0] sm:$0xf]  ;;  %v12739_v10 = vld [vmem:[#allocation5 + $0x3ec] sm:$0xf0]  ;;  %6375 = vmatpush.bf16.msra.mxu0 %v8504_v3 }
  0x1b   :  { %v8487_v11 = vld [vmem:[#allocation5 + $0xc0] sm:$0xf]  ;;  %v8888_v12 = vor.u32 %v12739_v10, %v8887_v9  ;;  %v12639_v13 = vld [vmem:[#allocation5 + $0xcc] sm:$0xf0]  ;;  %6388 = vmatpush.bf16.msra.mxu1 %v8632_v7 }
  0x1c   :  { %v8615_v14 = vld [vmem:[#allocation5 + $0x1c0] sm:$0xf]  ;;  %v12671_v15 = vld [vmem:[#allocation5 + $0x1cc] sm:$0xf0]  ;;  %6401 = vmatpush.bf16.msra.mxu2 %v8760_v8  ;;  %v8488_v16 = vor.u32 %v12639_v13, %v8487_v11 }
  0x1d   :  { %v8616_v17 = vor.u32 %v12671_v15, %v8615_v14  ;;  %v8743_v18 = vld [vmem:[#allocation5 + $0x2c0] sm:$0xf]  ;;  %v12703_v19 = vld [vmem:[#allocation5 + $0x2cc] sm:$0xf0]  ;;  %6414 = vmatpush.bf16.msra.mxu3 %v8888_v12 }
  0x1e   :  { %v8871_v20 = vld [vmem:[#allocation5 + $0x3c0] sm:$0xf]  ;;  %v8744_v21 = vor.u32 %v12703_v19, %v8743_v18  ;;  %v12735_v22 = vld [vmem:[#allocation5 + $0x3cc] sm:$0xf0]  ;;  %6376 = vmatpush.bf16.msra.mxu0 %v8488_v16 }
  0x1f   :  { %v8471_v23 = vld [vmem:[#allocation5 + $0xa0] sm:$0xf]  ;;  %v12635_v24 = vld [vmem:[#allocation5 + $0xac] sm:$0xf0]  ;;  %v8872_v25 = vor.u32 %v12735_v22, %v8871_v20  ;;  %6389 = vmatpush.bf16.msra.mxu1 %v8616_v17 }
  0x20   :  { %v8599_v26 = vld [vmem:[#allocation5 + $0x1a0] sm:$0xf]  ;;  %v12667_v27 = vld [vmem:[#allocation5 + $0x1ac] sm:$0xf0]  ;;  %v8472_v29 = vor.u32 %v12635_v24, %v8471_v23  ;;  %6402 = vmatpush.bf16.msra.mxu2 %v8744_v21 }
  0x21   :  { %v8727_v28 = vld [vmem:[#allocation5 + $0x2a0] sm:$0xf]  ;;  %v12699_v30 = vld [vmem:[#allocation5 + $0x2ac] sm:$0xf0]  ;;  %v8600_v33 = vor.u32 %v12667_v27, %v8599_v26  ;;  %6415 = vmatpush.bf16.msra.mxu3 %v8872_v25 }
  0x22   :  { %v8855_v31 = vld [vmem:[#allocation5 + $0x3a0] sm:$0xf]  ;;  %v12731_v32 = vld [vmem:[#allocation5 + $0x3ac] sm:$0xf0]  ;;  %v8728_v34 = vor.u32 %v12699_v30, %v8727_v28  ;;  %6377 = vmatpush.bf16.msra.mxu0 %v8472_v29 }
  0x23   :  { %v8455_v35 = vld [vmem:[#allocation5 + $0x80] sm:$0xf]  ;;  %v12631_v36 = vld [vmem:[#allocation5 + $0x8c] sm:$0xf0]  ;;  %v8856_v38 = vor.u32 %v12731_v32, %v8855_v31  ;;  %6390 = vmatpush.bf16.msra.mxu1 %v8600_v33 }
  0x24   :  { %v8583_v37 = vld [vmem:[#allocation5 + $0x180] sm:$0xf]  ;;  %v12663_v39 = vld [vmem:[#allocation5 + $0x18c] sm:$0xf0]  ;;  %v8456_v44 = vor.u32 %v12631_v36, %v8455_v35  ;;  %6403 = vmatpush.bf16.msra.mxu2 %v8728_v34 }
  0x25   :  { %v8711_v40 = vld [vmem:[#allocation5 + $0x280] sm:$0xf]  ;;  %v12695_v41 = vld [vmem:[#allocation5 + $0x28c] sm:$0xf0]  ;;  %v8584_v45 = vor.u32 %v12663_v39, %v8583_v37  ;;  %6416 = vmatpush.bf16.msra.mxu3 %v8856_v38 }
  0x26   :  { %v8839_v42 = vld [vmem:[#allocation5 + $0x380] sm:$0xf]  ;;  %v12727_v43 = vld [vmem:[#allocation5 + $0x38c] sm:$0xf0]  ;;  %v8712_v46 = vor.u32 %v12695_v41, %v8711_v40  ;;  %6378 = vmatpush.bf16.msra.mxu0 %v8456_v44 }
  0x27   :  { %v8439_v47 = vld [vmem:[#allocation5 + $0x60] sm:$0xf]  ;;  %v12627_v48 = vld [vmem:[#allocation5 + $0x6c] sm:$0xf0]  ;;  %v8840_v50 = vor.u32 %v12727_v43, %v8839_v42  ;;  %6391 = vmatpush.bf16.msra.mxu1 %v8584_v45 }
  0x28   :  { %v8567_v49 = vld [vmem:[#allocation5 + $0x160] sm:$0xf]  ;;  %v12659_v51 = vld [vmem:[#allocation5 + $0x16c] sm:$0xf0]  ;;  %v8440_v56 = vor.u32 %v12627_v48, %v8439_v47  ;;  %6404 = vmatpush.bf16.msra.mxu2 %v8712_v46 }
  0x29   :  { %v8695_v52 = vld [vmem:[#allocation5 + $0x260] sm:$0xf]  ;;  %v12691_v53 = vld [vmem:[#allocation5 + $0x26c] sm:$0xf0]  ;;  %v8568_v57 = vor.u32 %v12659_v51, %v8567_v49  ;;  %6417 = vmatpush.bf16.msra.mxu3 %v8840_v50 }
  0x2a   :  { %v8823_v54 = vld [vmem:[#allocation5 + $0x360] sm:$0xf]  ;;  %v12723_v55 = vld [vmem:[#allocation5 + $0x36c] sm:$0xf0]  ;;  %v8696_v58 = vor.u32 %v12691_v53, %v8695_v52  ;;  %6379 = vmatpush.bf16.msra.mxu0 %v8440_v56 }
  0x2b   :  { %v8423_v59 = vld [vmem:[#allocation5 + $0x40] sm:$0xf]  ;;  %v12623_v60 = vld [vmem:[#allocation5 + $0x4c] sm:$0xf0]  ;;  %v8824_v62 = vor.u32 %v12723_v55, %v8823_v54  ;;  %6392 = vmatpush.bf16.msra.mxu1 %v8568_v57 }
  0x2c   :  { %v8551_v61 = vld [vmem:[#allocation5 + $0x140] sm:$0xf]  ;;  %v12655_v63 = vld [vmem:[#allocation5 + $0x14c] sm:$0xf0]  ;;  %v8424_v4 = vor.u32 %v12623_v60, %v8423_v59  ;;  %6405 = vmatpush.bf16.msra.mxu2 %v8696_v58 }
  0x2d   :  { %v8679_v0 = vld [vmem:[#allocation5 + $0x240] sm:$0xf]  ;;  %v12687_v1 = vld [vmem:[#allocation5 + $0x24c] sm:$0xf0]  ;;  %v8552_v5 = vor.u32 %v12655_v63, %v8551_v61  ;;  %6418 = vmatpush.bf16.msra.mxu3 %v8824_v62 }
  0x2e   :  { %v8807_v2 = vld [vmem:[#allocation5 + $0x340] sm:$0xf]  ;;  %v12719_v3 = vld [vmem:[#allocation5 + $0x34c] sm:$0xf0]  ;;  %v8680_v6 = vor.u32 %v12687_v1, %v8679_v0  ;;  %6380 = vmatpush.bf16.msra.mxu0 %v8424_v4 }
  0x2f   :  { %v8407_v7 = vld [vmem:[#allocation5 + $0x20] sm:$0xf]  ;;  %v12619_v8 = vld [vmem:[#allocation5 + $0x2c] sm:$0xf0]  ;;  %v8808_v10 = vor.u32 %v12719_v3, %v8807_v2  ;;  %6393 = vmatpush.bf16.msra.mxu1 %v8552_v5  ;;  %v94_v2 = vld [vmem:[#allocation2 + $0x8] sm:$0xff] }
  0x30   :  { %v8535_v9 = vld [vmem:[#allocation5 + $0x120] sm:$0xf]  ;;  %v12651_v11 = vld [vmem:[#allocation5 + $0x12c] sm:$0xf0]  ;;  %v8408_v16 = vor.u32 %v12619_v8, %v8407_v7  ;;  %6406 = vmatpush.bf16.msra.mxu2 %v8680_v6  ;;  %v1161_v8 = vunpack.c.l.b16 %v94_v2 }
  0x31   :  { %v8663_v12 = vld [vmem:[#allocation5 + $0x220] sm:$0xf]  ;;  %v12683_v13 = vld [vmem:[#allocation5 + $0x22c] sm:$0xf0]  ;;  %v8536_v19 = vor.u32 %v12651_v11, %v8535_v9  ;;  %6419 = vmatpush.bf16.msra.mxu3 %v8808_v10  ;;  %v1162_v10 = vunpack.c.h.b16 %v94_v2 }
  0x32   :  { %v8791_v14 = vld [vmem:[#allocation5 + $0x320] sm:$0xf]  ;;  %v12715_v15 = vld [vmem:[#allocation5 + $0x32c] sm:$0xf0]  ;;  %v8664_v20 = vor.u32 %v12683_v13, %v8663_v12  ;;  %6381 = vmatpush.bf16.msra.mxu0 %v8408_v16 }
  0x33   :  { %v8391_v17 = vld [vmem:[#allocation5] sm:$0xf]  ;;  %v12615_v18 = vld [vmem:[#allocation5 + $0xc] sm:$0xf0]  ;;  %v8792_v24 = vor.u32 %v12715_v15, %v8791_v14  ;;  %6394 = vmatpush.bf16.msra.mxu1 %v8536_v19 }
  0x34   :  { %v8519_v21 = vld [vmem:[#allocation5 + $0x100] sm:$0xf]  ;;  %v12647_v22 = vld [vmem:[#allocation5 + $0x10c] sm:$0xf0]  ;;  %v8392_v31 = vor.u32 %v12615_v18, %v8391_v17  ;;  %6407 = vmatpush.bf16.msra.mxu2 %v8664_v20  ;;  %v13902_v18 = vpack.c.b16 %v1161_v8, %v1161_v8  ;;  %v13906_v20 = vpack.c.b16 %v1162_v10, %v1162_v10 }
  0x35   :  { %v8647_v23 = vld [vmem:[#allocation5 + $0x200] sm:$0xf]  ;;  %v12679_v25 = vld [vmem:[#allocation5 + $0x20c] sm:$0xf0]  ;;  %v8520_v35 = vor.u32 %v12647_v22, %v8519_v21  ;;  %6420 = vmatpush.bf16.msra.mxu3 %v8792_v24 }
  0x36   :  { %v8775_v26 = vld [vmem:[#allocation5 + $0x300] sm:$0xf]  ;;  %v12711_v27 = vld [vmem:[#allocation5 + $0x30c] sm:$0xf0]  ;;  %v8648_v36 = vor.u32 %v12679_v25, %v8647_v23  ;;  %6382 = vmatpush.bf16.msra.mxu0 %v8392_v31 }
  0x37   :  { %v9015_v28 = vld [vmem:[#allocation5 + $0x4e0] sm:$0xf]  ;;  %v12771_v29 = vld [vmem:[#allocation5 + $0x4ec] sm:$0xf0]  ;;  %v8776_v39 = vor.u32 %v12711_v27, %v8775_v26  ;;  %6395 = vmatpush.bf16.msra.mxu1 %v8520_v35 }
  0x38   :  { %v9143_v30 = vld [vmem:[#allocation5 + $0x5e0] sm:$0xf]  ;;  %v12803_v32 = vld [vmem:[#allocation5 + $0x5ec] sm:$0xf0]  ;;  %v9016_v40 = vor.u32 %v12771_v29, %v9015_v28  ;;  %6408 = vmatpush.bf16.msra.mxu2 %v8648_v36 }
  0x39   :  { %v9271_v33 = vld [vmem:[#allocation5 + $0x6e0] sm:$0xf]  ;;  %v12835_v34 = vld [vmem:[#allocation5 + $0x6ec] sm:$0xf0]  ;;  %v9144_v41 = vor.u32 %v12803_v32, %v9143_v30  ;;  %6421 = vmatpush.bf16.msra.mxu3 %v8776_v39 }
  0x3a   :  { %v9399_v37 = vld [vmem:[#allocation5 + $0x7e0] sm:$0xf]  ;;  %v12867_v38 = vld [vmem:[#allocation5 + $0x7ec] sm:$0xf0]  ;;  %v9272_v42 = vor.u32 %v12835_v34, %v9271_v33  ;;  %6427 = vmatpush.bf16.msrb.mxu0 %v9016_v40 }
  0x3b   :  { %v8999_v43 = vld [vmem:[#allocation5 + $0x4c0] sm:$0xf]  ;;  %v12767_v44 = vld [vmem:[#allocation5 + $0x4cc] sm:$0xf0]  ;;  %v9400_v46 = vor.u32 %v12867_v38, %v9399_v37  ;;  %6440 = vmatpush.bf16.msrb.mxu1 %v9144_v41  ;;  %6409 = vmatmul.bf16.vlgmr.msra.gmra.mxu2 %v13902_v18 }
  0x3c   :  { %v9127_v45 = vld [vmem:[#allocation5 + $0x5c0] sm:$0xf]  ;;  %v12799_v47 = vld [vmem:[#allocation5 + $0x5cc] sm:$0xf0]  ;;  %v9000_v52 = vor.u32 %v12767_v44, %v8999_v43  ;;  %6453 = vmatpush.bf16.msrb.mxu2 %v9272_v42  ;;  %6422 = vmatmul.bf16.vlgmr.msra.gmra.mxu3 %v13906_v20 }
  0x3d   :  { %v9255_v48 = vld [vmem:[#allocation5 + $0x6c0] sm:$0xf]  ;;  %v12831_v49 = vld [vmem:[#allocation5 + $0x6cc] sm:$0xf0]  ;;  %v9128_v54 = vor.u32 %v12799_v47, %v9127_v45  ;;  %6466 = vmatpush.bf16.msrb.mxu3 %v9400_v46 }
  0x3e   :  { %v9383_v50 = vld [vmem:[#allocation5 + $0x7c0] sm:$0xf]  ;;  %v12863_v51 = vld [vmem:[#allocation5 + $0x7cc] sm:$0xf0]  ;;  %v9256_v55 = vor.u32 %v12831_v49, %v9255_v48  ;;  %6428 = vmatpush.bf16.msrb.mxu0 %v9000_v52 }
  0x3f   :  { %v8983_v53 = vld [vmem:[#allocation5 + $0x4a0] sm:$0xf]  ;;  %v12763_v56 = vld [vmem:[#allocation5 + $0x4ac] sm:$0xf0]  ;;  %v9384_v59 = vor.u32 %v12863_v51, %v9383_v50  ;;  %6441 = vmatpush.bf16.msrb.mxu1 %v9128_v54 }
  0x40   :  { %v9111_v57 = vld [vmem:[#allocation5 + $0x5a0] sm:$0xf]  ;;  %v12795_v58 = vld [vmem:[#allocation5 + $0x5ac] sm:$0xf0]  ;;  %v8984_v0 = vor.u32 %v12763_v56, %v8983_v53  ;;  %6454 = vmatpush.bf16.msrb.mxu2 %v9256_v55 }
  0x41   :  { %v9239_v60 = vld [vmem:[#allocation5 + $0x6a0] sm:$0xf]  ;;  %v12827_v61 = vld [vmem:[#allocation5 + $0x6ac] sm:$0xf0]  ;;  %v9112_v1 = vor.u32 %v12795_v58, %v9111_v57  ;;  %6467 = vmatpush.bf16.msrb.mxu3 %v9384_v59 }
  0x42   :  { %v9367_v62 = vld [vmem:[#allocation5 + $0x7a0] sm:$0xf]  ;;  %v12859_v63 = vld [vmem:[#allocation5 + $0x7ac] sm:$0xf0]  ;;  %v9240_v4 = vor.u32 %v12827_v61, %v9239_v60  ;;  %6429 = vmatpush.bf16.msrb.mxu0 %v8984_v0 }
  0x43   :  { %v93_v3 = vld [vmem:[#allocation2] sm:$0xff]  ;;  %v12759_v6 = vld [vmem:[#allocation5 + $0x48c] sm:$0xf0]  ;;  %v9368_v11 = vor.u32 %v12859_v63, %v9367_v62  ;;  %6442 = vmatpush.bf16.msrb.mxu1 %v9112_v1 }
  0x44   :  { %v8967_v5 = vld [vmem:[#allocation5 + $0x480] sm:$0xf]  ;;  %v1159_v9 = vunpack.c.l.b16 %v93_v3  ;;  %v12791_v12 = vld [vmem:[#allocation5 + $0x58c] sm:$0xf0]  ;;  %v1160_v15 = vunpack.c.h.b16 %v93_v3  ;;  %6455 = vmatpush.bf16.msrb.mxu2 %v9240_v4  ;;  %v96_v3 = vld [vmem:[#allocation2 + $0x18] sm:$0xff] }
  0x45   :  { %v9095_v7 = vld [vmem:[#allocation5 + $0x580] sm:$0xf]  ;;  %v12823_v14 = vld [vmem:[#allocation5 + $0x68c] sm:$0xf0]  ;;  %v8968_v21 = vor.u32 %v12759_v6, %v8967_v5  ;;  %6468 = vmatpush.bf16.msrb.mxu3 %v9368_v11 }
  0x46   :  { %v9223_v13 = vld [vmem:[#allocation5 + $0x680] sm:$0xf]  ;;  %v12855_v17 = vld [vmem:[#allocation5 + $0x78c] sm:$0xf0]  ;;  %v13904_v19 = vpack.c.b16 %v1159_v9, %v1159_v9  ;;  %v13908_v22 = vpack.c.b16 %v1160_v15, %v1160_v15  ;;  %v9096_v23 = vor.u32 %v12791_v12, %v9095_v7  ;;  %v1165_v15 = vunpack.c.l.b16 %v96_v3 }
  0x47   :  { %v9351_v16 = vld [vmem:[#allocation5 + $0x780] sm:$0xf]  ;;  %v9224_v24 = vor.u32 %v12823_v14, %v9223_v13  ;;  %v12755_v26 = vld [vmem:[#allocation5 + $0x46c] sm:$0xf0]  ;;  %6430 = vmatpush.bf16.msrb.mxu0 %v8968_v21 }
  0x48   :  { %v8951_v25 = vld [vmem:[#allocation5 + $0x460] sm:$0xf]  ;;  %v9352_v28 = vor.u32 %v12855_v17, %v9351_v16  ;;  %v12787_v29 = vld [vmem:[#allocation5 + $0x56c] sm:$0xf0]  ;;  %6383 = vmatmul.bf16.vlgmr.msra.gmra.mxu0 %v13904_v19  ;;  %6396 = vmatmul.bf16.vlgmr.msra.gmra.mxu1 %v13908_v22 }
  0x49   :  { %v9079_v27 = vld [vmem:[#allocation5 + $0x560] sm:$0xf]  ;;  %v12819_v31 = vld [vmem:[#allocation5 + $0x66c] sm:$0xf0]  ;;  %v8952_v34 = vor.u32 %v12755_v26, %v8951_v25  ;;  %6443 = vmatpush.bf16.msrb.mxu1 %v9096_v23  ;;  %6456 = vmatpush.bf16.msrb.mxu2 %v9224_v24  ;;  %v1166_v25 = vunpack.c.h.b16 %v96_v3 }
  0x4a   :  { %v9207_v30 = vld [vmem:[#allocation5 + $0x660] sm:$0xf]  ;;  %v12851_v33 = vld [vmem:[#allocation5 + $0x76c] sm:$0xf0]  ;;  %v9080_v35 = vor.u32 %v12787_v29, %v9079_v27  ;;  %6469 = vmatpush.bf16.msrb.mxu3 %v9352_v28 }
  0x4b   :  { %v9335_v32 = vld [vmem:[#allocation5 + $0x760] sm:$0xf]  ;;  %v9208_v36 = vor.u32 %v12819_v31, %v9207_v30  ;;  %v12751_v38 = vld [vmem:[#allocation5 + $0x44c] sm:$0xf0]  ;;  %6431 = vmatpush.bf16.msrb.mxu0 %v8952_v34 }
  0x4c   :  { %v8935_v37 = vld [vmem:[#allocation5 + $0x440] sm:$0xf]  ;;  %v9336_v40 = vor.u32 %v12851_v33, %v9335_v32  ;;  %v12783_v41 = vld [vmem:[#allocation5 + $0x54c] sm:$0xf0] }
  0x4d   :  { %v9063_v39 = vld [vmem:[#allocation5 + $0x540] sm:$0xf]  ;;  %v12815_v43 = vld [vmem:[#allocation5 + $0x64c] sm:$0xf0]  ;;  %v8936_v46 = vor.u32 %v12751_v38, %v8935_v37  ;;  %6444 = vmatpush.bf16.msrb.mxu1 %v9080_v35  ;;  %6457 = vmatpush.bf16.msrb.mxu2 %v9208_v36  ;;  %v13914_v38 = vpack.c.b16 %v1165_v15, %v1165_v15 }
  0x4e   :  { %v9191_v42 = vld [vmem:[#allocation5 + $0x640] sm:$0xf]  ;;  %v12847_v45 = vld [vmem:[#allocation5 + $0x74c] sm:$0xf0]  ;;  %v9064_v47 = vor.u32 %v12783_v41, %v9063_v39  ;;  %6470 = vmatpush.bf16.msrb.mxu3 %v9336_v40 }
  0x4f   :  { %v9319_v44 = vld [vmem:[#allocation5 + $0x740] sm:$0xf]  ;;  %v9192_v48 = vor.u32 %v12815_v43, %v9191_v42  ;;  %v12747_v50 = vld [vmem:[#allocation5 + $0x42c] sm:$0xf0]  ;;  %6432 = vmatpush.bf16.msrb.mxu0 %v8936_v46  ;;  %v13918_v42 = vpack.c.b16 %v1166_v25, %v1166_v25 }
  0x50   :  { %v8919_v49 = vld [vmem:[#allocation5 + $0x420] sm:$0xf]  ;;  %v9320_v52 = vor.u32 %v12847_v45, %v9319_v44  ;;  %v12779_v53 = vld [vmem:[#allocation5 + $0x52c] sm:$0xf0] }
  0x51   :  { %v9047_v51 = vld [vmem:[#allocation5 + $0x520] sm:$0xf]  ;;  %v12811_v55 = vld [vmem:[#allocation5 + $0x62c] sm:$0xf0]  ;;  %v8920_v59 = vor.u32 %v12747_v50, %v8919_v49  ;;  %6445 = vmatpush.bf16.msrb.mxu1 %v9064_v47  ;;  %6458 = vmatpush.bf16.msrb.mxu2 %v9192_v48 }
  0x52   :  { %v9175_v54 = vld [vmem:[#allocation5 + $0x620] sm:$0xf]  ;;  %v12843_v57 = vld [vmem:[#allocation5 + $0x72c] sm:$0xf0]  ;;  %v9048_v63 = vor.u32 %v12779_v53, %v9047_v51  ;;  %6471 = vmatpush.bf16.msrb.mxu3 %v9320_v52 }
  0x53   :  { %v9303_v56 = vld [vmem:[#allocation5 + $0x720] sm:$0xf]  ;;  %v12743_v60 = vld [vmem:[#allocation5 + $0x40c] sm:$0xf0]  ;;  %v9176_v0 = vor.u32 %v12811_v55, %v9175_v54  ;;  %6433 = vmatpush.bf16.msrb.mxu0 %v8920_v59 }
  0x54   :  { %v8903_v58 = vld [vmem:[#allocation5 + $0x400] sm:$0xf]  ;;  %v12775_v62 = vld [vmem:[#allocation5 + $0x50c] sm:$0xf0]  ;;  %v9304_v4 = vor.u32 %v12843_v57, %v9303_v56 }
  0x55   :  { %v9031_v61 = vld [vmem:[#allocation5 + $0x500] sm:$0xf]  ;;  %v12807_v2 = vld [vmem:[#allocation5 + $0x60c] sm:$0xf0]  ;;  %v8904_v11 = vor.u32 %v12743_v60, %v8903_v58  ;;  %6446 = vmatpush.bf16.msrb.mxu1 %v9048_v63  ;;  %6459 = vmatpush.bf16.msrb.mxu2 %v9176_v0 }
  0x56   :  { %v9159_v1 = vld [vmem:[#allocation5 + $0x600] sm:$0xf]  ;;  %v12839_v6 = vld [vmem:[#allocation5 + $0x70c] sm:$0xf0]  ;;  %v9032_v16 = vor.u32 %v12775_v62, %v9031_v61  ;;  %6472 = vmatpush.bf16.msrb.mxu3 %v9304_v4 }
  0x57   :  { %v9287_v5 = vld [vmem:[#allocation5 + $0x700] sm:$0xf]  ;;  %v95_v7 = vld [vmem:[#allocation2 + $0x10] sm:$0xff]  ;;  %v9160_v17 = vor.u32 %v12807_v2, %v9159_v1  ;;  %6434 = vmatpush.bf16.msrb.mxu0 %v8904_v11 }
  0x58   :  { %v9527_v8 = vld [vmem:[#allocation5 + $0x8e0] sm:$0xf]  ;;  %v12899_v9 = vld [vmem:[#allocation5 + $0x8ec] sm:$0xf0]  ;;  %v1163_v24 = vunpack.c.l.b16 %v95_v7  ;;  %v9288_v26 = vor.u32 %v12839_v6, %v9287_v5  ;;  %v1164_v28 = vunpack.c.h.b16 %v95_v7 }
  0x59   :  { %v9655_v10 = vld [vmem:[#allocation5 + $0x9e0] sm:$0xf]  ;;  %v12931_v12 = vld [vmem:[#allocation5 + $0x9ec] sm:$0xf0]  ;;  %v9528_v27 = vor.u32 %v12899_v9, %v9527_v8  ;;  %6447 = vmatpush.bf16.msrb.mxu1 %v9032_v16  ;;  %6460 = vmatpush.bf16.msrb.mxu2 %v9160_v17 }
  0x5a   :  { %v9783_v13 = vld [vmem:[#allocation5 + $0xae0] sm:$0xf]  ;;  %v12963_v14 = vld [vmem:[#allocation5 + $0xaec] sm:$0xf0]  ;;  %v9656_v29 = vor.u32 %v12931_v12, %v9655_v10  ;;  %v13916_v41 = vpack.c.b16 %v1163_v24, %v1163_v24  ;;  %6473 = vmatpush.bf16.msrb.mxu3 %v9288_v26  ;;  %v13920_v44 = vpack.c.b16 %v1164_v28, %v1164_v28 }
  0x5b   :  { %v9911_v21 = vld [vmem:[#allocation5 + $0xbe0] sm:$0xf]  ;;  %v12995_v23 = vld [vmem:[#allocation5 + $0xbec] sm:$0xf0]  ;;  %v9784_v30 = vor.u32 %v12963_v14, %v9783_v13  ;;  %6479 = vmatpush.bf16.msra.mxu0 %v9528_v27 }
  0x5c   :  { %v9511_v31 = vld [vmem:[#allocation5 + $0x8c0] sm:$0xf]  ;;  %v12895_v32 = vld [vmem:[#allocation5 + $0x8cc] sm:$0xf0]  ;;  %v9912_v34 = vor.u32 %v12995_v23, %v9911_v21  ;;  %6461 = vmatmul.bf16.vlgmr.msrb.gmra.mxu2 %v13914_v38  ;;  %6435 = vmatmul.bf16.vlgmr.msrb.gmra.mxu0 %v13916_v41 }
  0x5d   :  { %v9639_v33 = vld [vmem:[#allocation5 + $0x9c0] sm:$0xf]  ;;  %v12927_v35 = vld [vmem:[#allocation5 + $0x9cc] sm:$0xf0]  ;;  %v9512_v43 = vor.u32 %v12895_v32, %v9511_v31  ;;  %6492 = vmatpush.bf16.msra.mxu1 %v9656_v29  ;;  %6505 = vmatpush.bf16.msra.mxu2 %v9784_v30 }
  0x5e   :  { %v9767_v36 = vld [vmem:[#allocation5 + $0xac0] sm:$0xf]  ;;  %v12959_v37 = vld [vmem:[#allocation5 + $0xacc] sm:$0xf0]  ;;  %v9640_v45 = vor.u32 %v12927_v35, %v9639_v33  ;;  %6518 = vmatpush.bf16.msra.mxu3 %v9912_v34  ;;  %6448 = vmatmul.bf16.vlgmr.msrb.gmra.mxu1 %v13920_v44 }
  0x5f   :  { %v9895_v39 = vld [vmem:[#allocation5 + $0xbc0] sm:$0xf]  ;;  %v12991_v40 = vld [vmem:[#allocation5 + $0xbcc] sm:$0xf0]  ;;  %v9768_v46 = vor.u32 %v12959_v37, %v9767_v36  ;;  %6474 = vmatmul.bf16.vlgmr.msrb.gmra.mxu3 %v13918_v42  ;;  %6480 = vmatpush.bf16.msra.mxu0 %v9512_v43 }
  0x60   :  { %v9495_v47 = vld [vmem:[#allocation5 + $0x8a0] sm:$0xf]  ;;  %v12891_v48 = vld [vmem:[#allocation5 + $0x8ac] sm:$0xf0]  ;;  %v9896_v50 = vor.u32 %v12991_v40, %v9895_v39 }
  0x61   :  { %v9623_v49 = vld [vmem:[#allocation5 + $0x9a0] sm:$0xf]  ;;  %v12923_v51 = vld [vmem:[#allocation5 + $0x9ac] sm:$0xf0]  ;;  %v9496_v56 = vor.u32 %v12891_v48, %v9495_v47  ;;  %6493 = vmatpush.bf16.msra.mxu1 %v9640_v45  ;;  %6506 = vmatpush.bf16.msra.mxu2 %v9768_v46 }
  0x62   :  { %v9751_v52 = vld [vmem:[#allocation5 + $0xaa0] sm:$0xf]  ;;  %v12955_v53 = vld [vmem:[#allocation5 + $0xaac] sm:$0xf0]  ;;  %v9624_v57 = vor.u32 %v12923_v51, %v9623_v49  ;;  %6519 = vmatpush.bf16.msra.mxu3 %v9896_v50 }
  0x63   :  { %v9879_v54 = vld [vmem:[#allocation5 + $0xba0] sm:$0xf]  ;;  %v12987_v55 = vld [vmem:[#allocation5 + $0xbac] sm:$0xf0]  ;;  %v9752_v58 = vor.u32 %v12955_v53, %v9751_v52  ;;  %6481 = vmatpush.bf16.msra.mxu0 %v9496_v56 }
  0x64   :  { %v9479_v59 = vld [vmem:[#allocation5 + $0x880] sm:$0xf]  ;;  %v12887_v60 = vld [vmem:[#allocation5 + $0x88c] sm:$0xf0]  ;;  %v9880_v62 = vor.u32 %v12987_v55, %v9879_v54 }
  0x65   :  { %v9607_v61 = vld [vmem:[#allocation5 + $0x980] sm:$0xf]  ;;  %v12919_v63 = vld [vmem:[#allocation5 + $0x98c] sm:$0xf0]  ;;  %v9480_v4 = vor.u32 %v12887_v60, %v9479_v59  ;;  %6494 = vmatpush.bf16.msra.mxu1 %v9624_v57  ;;  %6507 = vmatpush.bf16.msra.mxu2 %v9752_v58 }
  0x66   :  { %v9735_v0 = vld [vmem:[#allocation5 + $0xa80] sm:$0xf]  ;;  %v12951_v1 = vld [vmem:[#allocation5 + $0xa8c] sm:$0xf0]  ;;  %v9608_v5 = vor.u32 %v12919_v63, %v9607_v61  ;;  %6520 = vmatpush.bf16.msra.mxu3 %v9880_v62  ;;  %v98_v61 = vld [vmem:[#allocation2 + $0x28] sm:$0xff] }
  0x67   :  { %v9863_v2 = vld [vmem:[#allocation5 + $0xb80] sm:$0xf]  ;;  %v12983_v3 = vld [vmem:[#allocation5 + $0xb8c] sm:$0xf0]  ;;  %v9736_v6 = vor.u32 %v12951_v1, %v9735_v0  ;;  %6482 = vmatpush.bf16.msra.mxu0 %v9480_v4 }
  0x68   :  { %v9463_v7 = vld [vmem:[#allocation5 + $0x860] sm:$0xf]  ;;  %v12883_v8 = vld [vmem:[#allocation5 + $0x86c] sm:$0xf0]  ;;  %v9864_v10 = vor.u32 %v12983_v3, %v9863_v2 }
  0x69   :  { %v9591_v9 = vld [vmem:[#allocation5 + $0x960] sm:$0xf]  ;;  %v12915_v11 = vld [vmem:[#allocation5 + $0x96c] sm:$0xf0]  ;;  %v9464_v16 = vor.u32 %v12883_v8, %v9463_v7  ;;  %6495 = vmatpush.bf16.msra.mxu1 %v9608_v5  ;;  %6508 = vmatpush.bf16.msra.mxu2 %v9736_v6 }
  0x6a   :  { %v9719_v12 = vld [vmem:[#allocation5 + $0xa60] sm:$0xf]  ;;  %v12947_v13 = vld [vmem:[#allocation5 + $0xa6c] sm:$0xf0]  ;;  %v9592_v17 = vor.u32 %v12915_v11, %v9591_v9  ;;  %6521 = vmatpush.bf16.msra.mxu3 %v9864_v10  ;;  %v1169_v10 = vunpack.c.l.b16 %v98_v61 }
  0x6b   :  { %v9847_v14 = vld [vmem:[#allocation5 + $0xb60] sm:$0xf]  ;;  %v12979_v15 = vld [vmem:[#allocation5 + $0xb6c] sm:$0xf0]  ;;  %v9720_v21 = vor.u32 %v12947_v13, %v9719_v12  ;;  %6483 = vmatpush.bf16.msra.mxu0 %v9464_v16 }
  0x6c   :  { %v9447_v23 = vld [vmem:[#allocation5 + $0x840] sm:$0xf]  ;;  %v12879_v24 = vld [vmem:[#allocation5 + $0x84c] sm:$0xf0]  ;;  %v9848_v26 = vor.u32 %v12979_v15, %v9847_v14  ;;  %v1170_v14 = vunpack.c.h.b16 %v98_v61 }
  0x6d   :  { %v9575_v25 = vld [vmem:[#allocation5 + $0x940] sm:$0xf]  ;;  %v12911_v27 = vld [vmem:[#allocation5 + $0x94c] sm:$0xf0]  ;;  %v9448_v32 = vor.u32 %v12879_v24, %v9447_v23  ;;  %6496 = vmatpush.bf16.msra.mxu1 %v9592_v17  ;;  %6509 = vmatpush.bf16.msra.mxu2 %v9720_v21 }
  0x6e   :  { %v9703_v28 = vld [vmem:[#allocation5 + $0xa40] sm:$0xf]  ;;  %v12943_v29 = vld [vmem:[#allocation5 + $0xa4c] sm:$0xf0]  ;;  %v9576_v34 = vor.u32 %v12911_v27, %v9575_v25  ;;  %6522 = vmatpush.bf16.msra.mxu3 %v9848_v26 }
  0x6f   :  { %v9831_v30 = vld [vmem:[#allocation5 + $0xb40] sm:$0xf]  ;;  %v12975_v31 = vld [vmem:[#allocation5 + $0xb4c] sm:$0xf0]  ;;  %v9704_v35 = vor.u32 %v12943_v29, %v9703_v28  ;;  %6484 = vmatpush.bf16.msra.mxu0 %v9448_v32  ;;  %v13928_v29 = vpack.c.b16 %v1169_v10, %v1169_v10 }
  0x70   :  { %v9431_v33 = vld [vmem:[#allocation5 + $0x820] sm:$0xf]  ;;  %v12875_v36 = vld [vmem:[#allocation5 + $0x82c] sm:$0xf0]  ;;  %v9832_v40 = vor.u32 %v12975_v31, %v9831_v30 }
  0x71   :  { %v9559_v37 = vld [vmem:[#allocation5 + $0x920] sm:$0xf]  ;;  %v12907_v39 = vld [vmem:[#allocation5 + $0x92c] sm:$0xf0]  ;;  %v9432_v49 = vor.u32 %v12875_v36, %v9431_v33  ;;  %6497 = vmatpush.bf16.msra.mxu1 %v9576_v34  ;;  %6510 = vmatpush.bf16.msra.mxu2 %v9704_v35  ;;  %v13932_v33 = vpack.c.b16 %v1170_v14, %v1170_v14 }
  0x72   :  { %v9687_v43 = vld [vmem:[#allocation5 + $0xa20] sm:$0xf]  ;;  %v12939_v45 = vld [vmem:[#allocation5 + $0xa2c] sm:$0xf0]  ;;  %v9560_v53 = vor.u32 %v12907_v39, %v9559_v37  ;;  %6523 = vmatpush.bf16.msra.mxu3 %v9832_v40 }
  0x73   :  { %v9815_v46 = vld [vmem:[#allocation5 + $0xb20] sm:$0xf]  ;;  %v12971_v47 = vld [vmem:[#allocation5 + $0xb2c] sm:$0xf0]  ;;  %v9688_v54 = vor.u32 %v12939_v45, %v9687_v43  ;;  %6485 = vmatpush.bf16.msra.mxu0 %v9432_v49 }
  0x74   :  { %v9415_v48 = vld [vmem:[#allocation5 + $0x800] sm:$0xf]  ;;  %v12871_v50 = vld [vmem:[#allocation5 + $0x80c] sm:$0xf0]  ;;  %v9816_v58 = vor.u32 %v12971_v47, %v9815_v46 }
  0x75   :  { %v9543_v51 = vld [vmem:[#allocation5 + $0x900] sm:$0xf]  ;;  %v12903_v52 = vld [vmem:[#allocation5 + $0x90c] sm:$0xf0]  ;;  %v9416_v1 = vor.u32 %v12871_v50, %v9415_v48  ;;  %6498 = vmatpush.bf16.msra.mxu1 %v9560_v53  ;;  %6511 = vmatpush.bf16.msra.mxu2 %v9688_v54 }
  0x76   :  { %v9671_v55 = vld [vmem:[#allocation5 + $0xa00] sm:$0xf]  ;;  %v12935_v56 = vld [vmem:[#allocation5 + $0xa0c] sm:$0xf0]  ;;  %v9544_v6 = vor.u32 %v12903_v52, %v9543_v51  ;;  %6524 = vmatpush.bf16.msra.mxu3 %v9816_v58 }
  0x77   :  { %v97_v57 = vld [vmem:[#allocation2 + $0x20] sm:$0xff]  ;;  %v12967_v60 = vld [vmem:[#allocation5 + $0xb0c] sm:$0xf0]  ;;  %v9672_v7 = vor.u32 %v12935_v56, %v9671_v55  ;;  %6486 = vmatpush.bf16.msra.mxu0 %v9416_v1 }
  0x78   :  { %v9799_v59 = vld [vmem:[#allocation5 + $0xb00] sm:$0xf]  ;;  %v13027_v63 = vld [vmem:[#allocation5 + $0xcec] sm:$0xf0]  ;;  %v1167_v5 = vunpack.c.l.b16 %v97_v57  ;;  %v1168_v11 = vunpack.c.h.b16 %v97_v57 }
  0x79   :  { %v10039_v62 = vld [vmem:[#allocation5 + $0xce0] sm:$0xf]  ;;  %v13059_v2 = vld [vmem:[#allocation5 + $0xdec] sm:$0xf0]  ;;  %v9800_v12 = vor.u32 %v12967_v60, %v9799_v59  ;;  %6499 = vmatpush.bf16.msra.mxu1 %v9544_v6  ;;  %6512 = vmatpush.bf16.msra.mxu2 %v9672_v7 }
  0x7a   :  { %v10167_v0 = vld [vmem:[#allocation5 + $0xde0] sm:$0xf]  ;;  %v13091_v4 = vld [vmem:[#allocation5 + $0xeec] sm:$0xf0]  ;;  %v10040_v13 = vor.u32 %v13027_v63, %v10039_v62  ;;  %v13926_v25 = vpack.c.b16 %v1167_v5, %v1167_v5  ;;  %v13930_v30 = vpack.c.b16 %v1168_v11, %v1168_v11 }
  0x7b   :  { %v10295_v3 = vld [vmem:[#allocation5 + $0xee0] sm:$0xf]  ;;  %v13123_v9 = vld [vmem:[#allocation5 + $0xfec] sm:$0xf0]  ;;  %v10168_v15 = vor.u32 %v13059_v2, %v10167_v0  ;;  %6525 = vmatpush.bf16.msra.mxu3 %v9800_v12 }
  0x7c   :  { %v10423_v8 = vld [vmem:[#allocation5 + $0xfe0] sm:$0xf]  ;;  %v10296_v16 = vor.u32 %v13091_v4, %v10295_v3  ;;  %v13023_v21 = vld [vmem:[#allocation5 + $0xccc] sm:$0xf0]  ;;  %6531 = vmatpush.bf16.msrb.mxu0 %v10040_v13  ;;  %6513 = vmatmul.bf16.vlgmr.msra.gmra.mxu2 %v13928_v29 }
  0x7d   :  { %v10023_v17 = vld [vmem:[#allocation5 + $0xcc0] sm:$0xf]  ;;  %v10424_v24 = vor.u32 %v13123_v9, %v10423_v8  ;;  %v13055_v26 = vld [vmem:[#allocation5 + $0xdcc] sm:$0xf0]  ;;  %6544 = vmatpush.bf16.msrb.mxu1 %v10168_v15  ;;  %6487 = vmatmul.bf16.vlgmr.msra.gmra.mxu0 %v13926_v25 }
  0x7e   :  { %v10151_v23 = vld [vmem:[#allocation5 + $0xdc0] sm:$0xf]  ;;  %v13087_v28 = vld [vmem:[#allocation5 + $0xecc] sm:$0xf0]  ;;  %v10024_v34 = vor.u32 %v13023_v21, %v10023_v17  ;;  %6557 = vmatpush.bf16.msrb.mxu2 %v10296_v16  ;;  %6500 = vmatmul.bf16.vlgmr.msra.gmra.mxu1 %v13930_v30 }
  0x7f   :  { %v10279_v27 = vld [vmem:[#allocation5 + $0xec0] sm:$0xf]  ;;  %v13119_v32 = vld [vmem:[#allocation5 + $0xfcc] sm:$0xf0]  ;;  %v10152_v35 = vor.u32 %v13055_v26, %v10151_v23  ;;  %6570 = vmatpush.bf16.msrb.mxu3 %v10424_v24 }
  0x80   :  { %v10407_v31 = vld [vmem:[#allocation5 + $0xfc0] sm:$0xf]  ;;  %v10280_v36 = vor.u32 %v13087_v28, %v10279_v27  ;;  %v13019_v39 = vld [vmem:[#allocation5 + $0xcac] sm:$0xf0]  ;;  %6526 = vmatmul.bf16.vlgmr.msra.gmra.mxu3 %v13932_v33  ;;  %6532 = vmatpush.bf16.msrb.mxu0 %v10024_v34 }
  0x81   :  { %v10007_v37 = vld [vmem:[#allocation5 + $0xca0] sm:$0xf]  ;;  %v10408_v43 = vor.u32 %v13119_v32, %v10407_v31  ;;  %v13051_v45 = vld [vmem:[#allocation5 + $0xdac] sm:$0xf0]  ;;  %6545 = vmatpush.bf16.msrb.mxu1 %v10152_v35 }
  0x82   :  { %v10135_v40 = vld [vmem:[#allocation5 + $0xda0] sm:$0xf]  ;;  %v13083_v47 = vld [vmem:[#allocation5 + $0xeac] sm:$0xf0]  ;;  %v10008_v50 = vor.u32 %v13019_v39, %v10007_v37  ;;  %6558 = vmatpush.bf16.msrb.mxu2 %v10280_v36 }
  0x83   :  { %v10263_v46 = vld [vmem:[#allocation5 + $0xea0] sm:$0xf]  ;;  %v13115_v49 = vld [vmem:[#allocation5 + $0xfac] sm:$0xf0]  ;;  %v10136_v51 = vor.u32 %v13051_v45, %v10135_v40  ;;  %6571 = vmatpush.bf16.msrb.mxu3 %v10408_v43 }
  0x84   :  { %v10391_v48 = vld [vmem:[#allocation5 + $0xfa0] sm:$0xf]  ;;  %v10264_v52 = vor.u32 %v13083_v47, %v10263_v46  ;;  %v13015_v54 = vld [vmem:[#allocation5 + $0xc8c] sm:$0xf0]  ;;  %6533 = vmatpush.bf16.msrb.mxu0 %v10008_v50 }
  0x85   :  { %v9991_v53 = vld [vmem:[#allocation5 + $0xc80] sm:$0xf]  ;;  %v10392_v56 = vor.u32 %v13115_v49, %v10391_v48  ;;  %v13047_v57 = vld [vmem:[#allocation5 + $0xd8c] sm:$0xf0]  ;;  %6546 = vmatpush.bf16.msrb.mxu1 %v10136_v51 }
  0x86   :  { %v10119_v55 = vld [vmem:[#allocation5 + $0xd80] sm:$0xf]  ;;  %v13079_v59 = vld [vmem:[#allocation5 + $0xe8c] sm:$0xf0]  ;;  %v9992_v62 = vor.u32 %v13015_v54, %v9991_v53  ;;  %6559 = vmatpush.bf16.msrb.mxu2 %v10264_v52 }
  0x87   :  { %v10247_v58 = vld [vmem:[#allocation5 + $0xe80] sm:$0xf]  ;;  %v13111_v61 = vld [vmem:[#allocation5 + $0xf8c] sm:$0xf0]  ;;  %v10120_v63 = vor.u32 %v13047_v57, %v10119_v55  ;;  %6572 = vmatpush.bf16.msrb.mxu3 %v10392_v56 }
  0x88   :  { %v10375_v60 = vld [vmem:[#allocation5 + $0xf80] sm:$0xf]  ;;  %v10248_v0 = vor.u32 %v13079_v59, %v10247_v58  ;;  %v13011_v2 = vld [vmem:[#allocation5 + $0xc6c] sm:$0xf0]  ;;  %6534 = vmatpush.bf16.msrb.mxu0 %v9992_v62  ;;  %v100_v59 = vld [vmem:[#allocation2 + $0x38] sm:$0xff] }
  0x89   :  { %v9975_v1 = vld [vmem:[#allocation5 + $0xc60] sm:$0xf]  ;;  %v10376_v4 = vor.u32 %v13111_v61, %v10375_v60  ;;  %v13043_v5 = vld [vmem:[#allocation5 + $0xd6c] sm:$0xf0]  ;;  %6547 = vmatpush.bf16.msrb.mxu1 %v10120_v63 }
  0x8a   :  { %v10103_v3 = vld [vmem:[#allocation5 + $0xd60] sm:$0xf]  ;;  %v13075_v7 = vld [vmem:[#allocation5 + $0xe6c] sm:$0xf0]  ;;  %v9976_v10 = vor.u32 %v13011_v2, %v9975_v1  ;;  %6560 = vmatpush.bf16.msrb.mxu2 %v10248_v0 }
  0x8b   :  { %v10231_v6 = vld [vmem:[#allocation5 + $0xe60] sm:$0xf]  ;;  %v13107_v9 = vld [vmem:[#allocation5 + $0xf6c] sm:$0xf0]  ;;  %v10104_v11 = vor.u32 %v13043_v5, %v10103_v3  ;;  %6573 = vmatpush.bf16.msrb.mxu3 %v10376_v4 }
  0x8c   :  { %v10359_v8 = vld [vmem:[#allocation5 + $0xf60] sm:$0xf]  ;;  %v10232_v12 = vor.u32 %v13075_v7, %v10231_v6  ;;  %v13007_v14 = vld [vmem:[#allocation5 + $0xc4c] sm:$0xf0]  ;;  %6535 = vmatpush.bf16.msrb.mxu0 %v9976_v10 }
  0x8d   :  { %v9959_v13 = vld [vmem:[#allocation5 + $0xc40] sm:$0xf]  ;;  %v10360_v16 = vor.u32 %v13107_v9, %v10359_v8  ;;  %v13039_v17 = vld [vmem:[#allocation5 + $0xd4c] sm:$0xf0]  ;;  %6548 = vmatpush.bf16.msrb.mxu1 %v10104_v11  ;;  %v1173_v8 = vunpack.c.l.b16 %v100_v59 }
  0x8e   :  { %v10087_v15 = vld [vmem:[#allocation5 + $0xd40] sm:$0xf]  ;;  %v13071_v23 = vld [vmem:[#allocation5 + $0xe4c] sm:$0xf0]  ;;  %v9960_v27 = vor.u32 %v13007_v14, %v9959_v13  ;;  %6561 = vmatpush.bf16.msrb.mxu2 %v10232_v12  ;;  %v1174_v12 = vunpack.c.h.b16 %v100_v59 }
  0x8f   :  { %v10215_v21 = vld [vmem:[#allocation5 + $0xe40] sm:$0xf]  ;;  %v13103_v26 = vld [vmem:[#allocation5 + $0xf4c] sm:$0xf0]  ;;  %v10088_v28 = vor.u32 %v13039_v17, %v10087_v15  ;;  %6574 = vmatpush.bf16.msrb.mxu3 %v10360_v16 }
  0x90   :  { %v10343_v24 = vld [vmem:[#allocation5 + $0xf40] sm:$0xf]  ;;  %v10216_v31 = vor.u32 %v13071_v23, %v10215_v21  ;;  %v13003_v34 = vld [vmem:[#allocation5 + $0xc2c] sm:$0xf0]  ;;  %6536 = vmatpush.bf16.msrb.mxu0 %v9960_v27 }
  0x91   :  { %v9943_v32 = vld [vmem:[#allocation5 + $0xc20] sm:$0xf]  ;;  %v10344_v36 = vor.u32 %v13103_v26, %v10343_v24  ;;  %v13035_v37 = vld [vmem:[#allocation5 + $0xd2c] sm:$0xf0]  ;;  %6549 = vmatpush.bf16.msrb.mxu1 %v10088_v28  ;;  %v13940_v28 = vpack.c.b16 %v1173_v8, %v1173_v8 }
  0x92   :  { %v10071_v35 = vld [vmem:[#allocation5 + $0xd20] sm:$0xf]  ;;  %v13067_v40 = vld [vmem:[#allocation5 + $0xe2c] sm:$0xf0]  ;;  %v9944_v47 = vor.u32 %v13003_v34, %v9943_v32  ;;  %6562 = vmatpush.bf16.msrb.mxu2 %v10216_v31 }
  0x93   :  { %v10199_v39 = vld [vmem:[#allocation5 + $0xe20] sm:$0xf]  ;;  %v13099_v45 = vld [vmem:[#allocation5 + $0xf2c] sm:$0xf0]  ;;  %v10072_v51 = vor.u32 %v13035_v37, %v10071_v35  ;;  %6575 = vmatpush.bf16.msrb.mxu3 %v10344_v36  ;;  %v13944_v35 = vpack.c.b16 %v1174_v12, %v1174_v12 }
  0x94   :  { %v10327_v43 = vld [vmem:[#allocation5 + $0xf20] sm:$0xf]  ;;  %v12999_v48 = vld [vmem:[#allocation5 + $0xc0c] sm:$0xf0]  ;;  %v10200_v52 = vor.u32 %v13067_v40, %v10199_v39  ;;  %6537 = vmatpush.bf16.msrb.mxu0 %v9944_v47 }
  0x95   :  { %v9927_v46 = vld [vmem:[#allocation5 + $0xc00] sm:$0xf]  ;;  %v13031_v50 = vld [vmem:[#allocation5 + $0xd0c] sm:$0xf0]  ;;  %v10328_v56 = vor.u32 %v13099_v45, %v10327_v43  ;;  %6550 = vmatpush.bf16.msrb.mxu1 %v10072_v51 }
  0x96   :  { %v10055_v49 = vld [vmem:[#allocation5 + $0xd00] sm:$0xf]  ;;  %v13063_v54 = vld [vmem:[#allocation5 + $0xe0c] sm:$0xf0]  ;;  %v9928_v63 = vor.u32 %v12999_v48, %v9927_v46  ;;  %6563 = vmatpush.bf16.msrb.mxu2 %v10200_v52 }
  0x97   :  { %v10183_v53 = vld [vmem:[#allocation5 + $0xe00] sm:$0xf]  ;;  %v99_v55 = vld [vmem:[#allocation2 + $0x30] sm:$0xff]  ;;  %v10056_v4 = vor.u32 %v13031_v50, %v10055_v49  ;;  %6576 = vmatpush.bf16.msrb.mxu3 %v10328_v56 }
  0x98   :  { %v10311_v57 = vld [vmem:[#allocation5 + $0xf00] sm:$0xf]  ;;  %v13095_v58 = vld [vmem:[#allocation5 + $0xf0c] sm:$0xf0]  ;;  %v1171_v3 = vunpack.c.l.b16 %v99_v55  ;;  %v10184_v5 = vor.u32 %v13063_v54, %v10183_v53  ;;  %v1172_v9 = vunpack.c.h.b16 %v99_v55  ;;  %6538 = vmatpush.bf16.msrb.mxu0 %v9928_v63 }
  0x99   :  { %v10551_v60 = vld [vmem:[#allocation5 + $0x10e0] sm:$0xf]  ;;  %v13155_v61 = vld [vmem:[#allocation5 + $0x10ec] sm:$0xf0]  ;;  %v10312_v10 = vor.u32 %v13095_v58, %v10311_v57  ;;  %6551 = vmatpush.bf16.msrb.mxu1 %v10056_v4 }
  0x9a   :  { %v10679_v62 = vld [vmem:[#allocation5 + $0x11e0] sm:$0xf]  ;;  %v13187_v0 = vld [vmem:[#allocation5 + $0x11ec] sm:$0xf0]  ;;  %v10552_v11 = vor.u32 %v13155_v61, %v10551_v60  ;;  %v13938_v23 = vpack.c.b16 %v1171_v3, %v1171_v3  ;;  %6564 = vmatpush.bf16.msrb.mxu2 %v10184_v5  ;;  %v13942_v31 = vpack.c.b16 %v1172_v9, %v1172_v9 }
  0x9b   :  { %v10807_v1 = vld [vmem:[#allocation5 + $0x12e0] sm:$0xf]  ;;  %v13219_v2 = vld [vmem:[#allocation5 + $0x12ec] sm:$0xf0]  ;;  %v10680_v13 = vor.u32 %v13187_v0, %v10679_v62  ;;  %6577 = vmatpush.bf16.msrb.mxu3 %v10312_v10 }
  0x9c   :  { %v10935_v6 = vld [vmem:[#allocation5 + $0x13e0] sm:$0xf]  ;;  %v13251_v7 = vld [vmem:[#allocation5 + $0x13ec] sm:$0xf0]  ;;  %v10808_v14 = vor.u32 %v13219_v2, %v10807_v1  ;;  %6583 = vmatpush.bf16.msra.mxu0 %v10552_v11  ;;  %6552 = vmatmul.bf16.vlgmr.msrb.gmra.mxu1 %v13942_v31 }
  0x9d   :  { %v10535_v15 = vld [vmem:[#allocation5 + $0x10c0] sm:$0xf]  ;;  %v13151_v16 = vld [vmem:[#allocation5 + $0x10cc] sm:$0xf0]  ;;  %v10936_v21 = vor.u32 %v13251_v7, %v10935_v6  ;;  %6596 = vmatpush.bf16.msra.mxu1 %v10680_v13  ;;  %6539 = vmatmul.bf16.vlgmr.msrb.gmra.mxu0 %v13938_v23 }
  0x9e   :  { %v10663_v17 = vld [vmem:[#allocation5 + $0x11c0] sm:$0xf]  ;;  %v13183_v24 = vld [vmem:[#allocation5 + $0x11cc] sm:$0xf0]  ;;  %v10536_v36 = vor.u32 %v13151_v16, %v10535_v15  ;;  %6609 = vmatpush.bf16.msra.mxu2 %v10808_v14  ;;  %6578 = vmatmul.bf16.vlgmr.msrb.gmra.mxu3 %v13944_v35 }
  0x9f   :  { %v10791_v26 = vld [vmem:[#allocation5 + $0x12c0] sm:$0xf]  ;;  %v13215_v27 = vld [vmem:[#allocation5 + $0x12cc] sm:$0xf0]  ;;  %v10664_v37 = vor.u32 %v13183_v24, %v10663_v17  ;;  %6622 = vmatpush.bf16.msra.mxu3 %v10936_v21  ;;  %6565 = vmatmul.bf16.vlgmr.msrb.gmra.mxu2 %v13940_v28 }
  0xa0   :  { %v10919_v32 = vld [vmem:[#allocation5 + $0x13c0] sm:$0xf]  ;;  %v13247_v34 = vld [vmem:[#allocation5 + $0x13cc] sm:$0xf0]  ;;  %v10792_v39 = vor.u32 %v13215_v27, %v10791_v26  ;;  %6584 = vmatpush.bf16.msra.mxu0 %v10536_v36 }
  0xa1   :  { %v10519_v40 = vld [vmem:[#allocation5 + $0x10a0] sm:$0xf]  ;;  %v13147_v43 = vld [vmem:[#allocation5 + $0x10ac] sm:$0xf0]  ;;  %v10920_v46 = vor.u32 %v13247_v34, %v10919_v32  ;;  %6597 = vmatpush.bf16.msra.mxu1 %v10664_v37 }
  0xa2   :  { %v10647_v45 = vld [vmem:[#allocation5 + $0x11a0] sm:$0xf]  ;;  %v13179_v47 = vld [vmem:[#allocation5 + $0x11ac] sm:$0xf0]  ;;  %v10520_v52 = vor.u32 %v13147_v43, %v10519_v40  ;;  %6610 = vmatpush.bf16.msra.mxu2 %v10792_v39 }
  0xa3   :  { %v10775_v48 = vld [vmem:[#allocation5 + $0x12a0] sm:$0xf]  ;;  %v13211_v49 = vld [vmem:[#allocation5 + $0x12ac] sm:$0xf0]  ;;  %v10648_v53 = vor.u32 %v13179_v47, %v10647_v45  ;;  %6623 = vmatpush.bf16.msra.mxu3 %v10920_v46 }
  0xa4   :  { %v10903_v50 = vld [vmem:[#allocation5 + $0x13a0] sm:$0xf]  ;;  %v13243_v51 = vld [vmem:[#allocation5 + $0x13ac] sm:$0xf0]  ;;  %v10776_v54 = vor.u32 %v13211_v49, %v10775_v48  ;;  %6585 = vmatpush.bf16.msra.mxu0 %v10520_v52 }
  0xa5   :  { %v10503_v55 = vld [vmem:[#allocation5 + $0x1080] sm:$0xf]  ;;  %v13143_v56 = vld [vmem:[#allocation5 + $0x108c] sm:$0xf0]  ;;  %v10904_v58 = vor.u32 %v13243_v51, %v10903_v50  ;;  %6598 = vmatpush.bf16.msra.mxu1 %v10648_v53 }
  0xa6   :  { %v10631_v57 = vld [vmem:[#allocation5 + $0x1180] sm:$0xf]  ;;  %v13175_v59 = vld [vmem:[#allocation5 + $0x118c] sm:$0xf0]  ;;  %v10504_v0 = vor.u32 %v13143_v56, %v10503_v55  ;;  %6611 = vmatpush.bf16.msra.mxu2 %v10776_v54 }
  0xa7   :  { %v10759_v60 = vld [vmem:[#allocation5 + $0x1280] sm:$0xf]  ;;  %v13207_v61 = vld [vmem:[#allocation5 + $0x128c] sm:$0xf0]  ;;  %v10632_v1 = vor.u32 %v13175_v59, %v10631_v57  ;;  %6624 = vmatpush.bf16.msra.mxu3 %v10904_v58 }
  0xa8   :  { %v10887_v62 = vld [vmem:[#allocation5 + $0x1380] sm:$0xf]  ;;  %v13239_v63 = vld [vmem:[#allocation5 + $0x138c] sm:$0xf0]  ;;  %v10760_v2 = vor.u32 %v13207_v61, %v10759_v60  ;;  %6586 = vmatpush.bf16.msra.mxu0 %v10504_v0 }
  0xa9   :  { %v10487_v3 = vld [vmem:[#allocation5 + $0x1060] sm:$0xf]  ;;  %v13139_v4 = vld [vmem:[#allocation5 + $0x106c] sm:$0xf0]  ;;  %v10888_v6 = vor.u32 %v13239_v63, %v10887_v62  ;;  %6599 = vmatpush.bf16.msra.mxu1 %v10632_v1  ;;  %v102_v1 = vld [vmem:[#allocation2 + $0x48] sm:$0xff] }
  0xaa   :  { %v10615_v5 = vld [vmem:[#allocation5 + $0x1160] sm:$0xf]  ;;  %v13171_v7 = vld [vmem:[#allocation5 + $0x116c] sm:$0xf0]  ;;  %v10488_v12 = vor.u32 %v13139_v4, %v10487_v3  ;;  %6612 = vmatpush.bf16.msra.mxu2 %v10760_v2 }
  0xab   :  { %v10743_v8 = vld [vmem:[#allocation5 + $0x1260] sm:$0xf]  ;;  %v13203_v9 = vld [vmem:[#allocation5 + $0x126c] sm:$0xf0]  ;;  %v10616_v13 = vor.u32 %v13171_v7, %v10615_v5  ;;  %6625 = vmatpush.bf16.msra.mxu3 %v10888_v6 }
  0xac   :  { %v10871_v10 = vld [vmem:[#allocation5 + $0x1360] sm:$0xf]  ;;  %v13235_v11 = vld [vmem:[#allocation5 + $0x136c] sm:$0xf0]  ;;  %v10744_v14 = vor.u32 %v13203_v9, %v10743_v8  ;;  %6587 = vmatpush.bf16.msra.mxu0 %v10488_v12 }
  0xad   :  { %v10471_v15 = vld [vmem:[#allocation5 + $0x1040] sm:$0xf]  ;;  %v13135_v16 = vld [vmem:[#allocation5 + $0x104c] sm:$0xf0]  ;;  %v10872_v21 = vor.u32 %v13235_v11, %v10871_v10  ;;  %6600 = vmatpush.bf16.msra.mxu1 %v10616_v13 }
  0xae   :  { %v10599_v17 = vld [vmem:[#allocation5 + $0x1140] sm:$0xf]  ;;  %v13167_v24 = vld [vmem:[#allocation5 + $0x114c] sm:$0xf0]  ;;  %v10472_v36 = vor.u32 %v13135_v16, %v10471_v15  ;;  %6613 = vmatpush.bf16.msra.mxu2 %v10744_v14  ;;  %v1177_v14 = vunpack.c.l.b16 %v102_v1 }
  0xaf   :  { %v10727_v26 = vld [vmem:[#allocation5 + $0x1240] sm:$0xf]  ;;  %v13199_v27 = vld [vmem:[#allocation5 + $0x124c] sm:$0xf0]  ;;  %v10600_v37 = vor.u32 %v13167_v24, %v10599_v17  ;;  %6626 = vmatpush.bf16.msra.mxu3 %v10872_v21  ;;  %v1178_v21 = vunpack.c.h.b16 %v102_v1 }
  0xb0   :  { %v10855_v32 = vld [vmem:[#allocation5 + $0x1340] sm:$0xf]  ;;  %v13231_v34 = vld [vmem:[#allocation5 + $0x134c] sm:$0xf0]  ;;  %v10728_v39 = vor.u32 %v13199_v27, %v10727_v26  ;;  %6588 = vmatpush.bf16.msra.mxu0 %v10472_v36 }
  0xb1   :  { %v10455_v40 = vld [vmem:[#allocation5 + $0x1020] sm:$0xf]  ;;  %v13131_v43 = vld [vmem:[#allocation5 + $0x102c] sm:$0xf0]  ;;  %v10856_v46 = vor.u32 %v13231_v34, %v10855_v32  ;;  %6601 = vmatpush.bf16.msra.mxu1 %v10600_v37 }
  0xb2   :  { %v10583_v45 = vld [vmem:[#allocation5 + $0x1120] sm:$0xf]  ;;  %v13163_v47 = vld [vmem:[#allocation5 + $0x112c] sm:$0xf0]  ;;  %v10456_v53 = vor.u32 %v13131_v43, %v10455_v40  ;;  %6614 = vmatpush.bf16.msra.mxu2 %v10728_v39 }
  0xb3   :  { %v10711_v48 = vld [vmem:[#allocation5 + $0x1220] sm:$0xf]  ;;  %v13195_v49 = vld [vmem:[#allocation5 + $0x122c] sm:$0xf0]  ;;  %v10584_v57 = vor.u32 %v13163_v47, %v10583_v45  ;;  %6627 = vmatpush.bf16.msra.mxu3 %v10856_v46  ;;  %v13952_v45 = vpack.c.b16 %v1177_v14, %v1177_v14 }
  0xb4   :  { %v10839_v50 = vld [vmem:[#allocation5 + $0x1320] sm:$0xf]  ;;  %v13227_v51 = vld [vmem:[#allocation5 + $0x132c] sm:$0xf0]  ;;  %v10712_v58 = vor.u32 %v13195_v49, %v10711_v48  ;;  %6589 = vmatpush.bf16.msra.mxu0 %v10456_v53  ;;  %v13956_v49 = vpack.c.b16 %v1178_v21, %v1178_v21 }
  0xb5   :  { %v10439_v52 = vld [vmem:[#allocation5 + $0x1000] sm:$0xf]  ;;  %v13127_v54 = vld [vmem:[#allocation5 + $0x100c] sm:$0xf0]  ;;  %v10840_v62 = vor.u32 %v13227_v51, %v10839_v50  ;;  %6602 = vmatpush.bf16.msra.mxu1 %v10584_v57 }
  0xb6   :  { %v10567_v55 = vld [vmem:[#allocation5 + $0x1100] sm:$0xf]  ;;  %v13159_v56 = vld [vmem:[#allocation5 + $0x110c] sm:$0xf0]  ;;  %v10440_v5 = vor.u32 %v13127_v54, %v10439_v52  ;;  %6615 = vmatpush.bf16.msra.mxu2 %v10712_v58 }
  0xb7   :  { %v10695_v59 = vld [vmem:[#allocation5 + $0x1200] sm:$0xf]  ;;  %v13191_v60 = vld [vmem:[#allocation5 + $0x120c] sm:$0xf0]  ;;  %v10568_v10 = vor.u32 %v13159_v56, %v10567_v55  ;;  %6628 = vmatpush.bf16.msra.mxu3 %v10840_v62 }
  0xb8   :  { %v101_v61 = vld [vmem:[#allocation2 + $0x40] sm:$0xff]  ;;  %v13223_v0 = vld [vmem:[#allocation5 + $0x130c] sm:$0xf0]  ;;  %v10696_v11 = vor.u32 %v13191_v60, %v10695_v59  ;;  %6590 = vmatpush.bf16.msra.mxu0 %v10440_v5 }
  0xb9   :  { %v10823_v63 = vld [vmem:[#allocation5 + $0x1300] sm:$0xf]  ;;  %v13283_v3 = vld [vmem:[#allocation5 + $0x14ec] sm:$0xf0]  ;;  %v1175_v9 = vunpack.c.l.b16 %v101_v61  ;;  %v1176_v15 = vunpack.c.h.b16 %v101_v61  ;;  %6603 = vmatpush.bf16.msra.mxu1 %v10568_v10 }
  0xba   :  { %v11063_v2 = vld [vmem:[#allocation5 + $0x14e0] sm:$0xf]  ;;  %v13315_v6 = vld [vmem:[#allocation5 + $0x15ec] sm:$0xf0]  ;;  %v10824_v16 = vor.u32 %v13223_v0, %v10823_v63  ;;  %6616 = vmatpush.bf16.msra.mxu2 %v10696_v11 }
  0xbb   :  { %v11191_v4 = vld [vmem:[#allocation5 + $0x15e0] sm:$0xf]  ;;  %v13347_v8 = vld [vmem:[#allocation5 + $0x16ec] sm:$0xf0]  ;;  %v11064_v17 = vor.u32 %v13283_v3, %v11063_v2  ;;  %v13950_v37 = vpack.c.b16 %v1175_v9, %v1175_v9  ;;  %v13954_v46 = vpack.c.b16 %v1176_v15, %v1176_v15 }
  0xbc   :  { %v11319_v7 = vld [vmem:[#allocation5 + $0x16e0] sm:$0xf]  ;;  %v13379_v13 = vld [vmem:[#allocation5 + $0x17ec] sm:$0xf0]  ;;  %v11192_v24 = vor.u32 %v13315_v6, %v11191_v4  ;;  %6629 = vmatpush.bf16.msra.mxu3 %v10824_v16 }
  0xbd   :  { %v11447_v12 = vld [vmem:[#allocation5 + $0x17e0] sm:$0xf]  ;;  %v11320_v26 = vor.u32 %v13347_v8, %v11319_v7  ;;  %v13279_v32 = vld [vmem:[#allocation5 + $0x14cc] sm:$0xf0]  ;;  %6635 = vmatpush.bf16.msrb.mxu0 %v11064_v17  ;;  %6617 = vmatmul.bf16.vlgmr.msra.gmra.mxu2 %v13952_v45 }
  0xbe   :  { %v11047_v27 = vld [vmem:[#allocation5 + $0x14c0] sm:$0xf]  ;;  %v11448_v36 = vor.u32 %v13379_v13, %v11447_v12  ;;  %v13311_v39 = vld [vmem:[#allocation5 + $0x15cc] sm:$0xf0]  ;;  %6648 = vmatpush.bf16.msrb.mxu1 %v11192_v24  ;;  %6591 = vmatmul.bf16.vlgmr.msra.gmra.mxu0 %v13950_v37 }
  0xbf   :  { %v11175_v34 = vld [vmem:[#allocation5 + $0x15c0] sm:$0xf]  ;;  %v13343_v43 = vld [vmem:[#allocation5 + $0x16cc] sm:$0xf0]  ;;  %v11048_v50 = vor.u32 %v13279_v32, %v11047_v27  ;;  %6661 = vmatpush.bf16.msrb.mxu2 %v11320_v26  ;;  %6604 = vmatmul.bf16.vlgmr.msra.gmra.mxu1 %v13954_v46 }
  0xc0   :  { %v11303_v40 = vld [vmem:[#allocation5 + $0x16c0] sm:$0xf]  ;;  %v13375_v48 = vld [vmem:[#allocation5 + $0x17cc] sm:$0xf0]  ;;  %v11176_v51 = vor.u32 %v13311_v39, %v11175_v34  ;;  %6674 = vmatpush.bf16.msrb.mxu3 %v11448_v36 }
  0xc1   :  { %v11431_v47 = vld [vmem:[#allocation5 + $0x17c0] sm:$0xf]  ;;  %v11304_v52 = vor.u32 %v13343_v43, %v11303_v40  ;;  %v13275_v54 = vld [vmem:[#allocation5 + $0x14ac] sm:$0xf0]  ;;  %6630 = vmatmul.bf16.vlgmr.msra.gmra.mxu3 %v13956_v49  ;;  %6636 = vmatpush.bf16.msrb.mxu0 %v11048_v50 }
  0xc2   :  { %v11031_v53 = vld [vmem:[#allocation5 + $0x14a0] sm:$0xf]  ;;  %v11432_v56 = vor.u32 %v13375_v48, %v11431_v47  ;;  %v13307_v57 = vld [vmem:[#allocation5 + $0x15ac] sm:$0xf0]  ;;  %6649 = vmatpush.bf16.msrb.mxu1 %v11176_v51 }
  0xc3   :  { %v11159_v55 = vld [vmem:[#allocation5 + $0x15a0] sm:$0xf]  ;;  %v13339_v59 = vld [vmem:[#allocation5 + $0x16ac] sm:$0xf0]  ;;  %v11032_v62 = vor.u32 %v13275_v54, %v11031_v53  ;;  %6662 = vmatpush.bf16.msrb.mxu2 %v11304_v52 }
  0xc4   :  { %v11287_v58 = vld [vmem:[#allocation5 + $0x16a0] sm:$0xf]  ;;  %v13371_v61 = vld [vmem:[#allocation5 + $0x17ac] sm:$0xf0]  ;;  %v11160_v63 = vor.u32 %v13307_v57, %v11159_v55  ;;  %6675 = vmatpush.bf16.msrb.mxu3 %v11432_v56 }
  0xc5   :  { %v11415_v60 = vld [vmem:[#allocation5 + $0x17a0] sm:$0xf]  ;;  %v11288_v0 = vor.u32 %v13339_v59, %v11287_v58  ;;  %v13271_v2 = vld [vmem:[#allocation5 + $0x148c] sm:$0xf0]  ;;  %6637 = vmatpush.bf16.msrb.mxu0 %v11032_v62  ;;  %v6384_v57 = vpop.f32.mrf.mxu0 }
  0xc6   :  { %v11015_v1 = vld [vmem:[#allocation5 + $0x1480] sm:$0xf]  ;;  %v11416_v4 = vor.u32 %v13371_v61, %v11415_v60  ;;  %v13303_v5 = vld [vmem:[#allocation5 + $0x158c] sm:$0xf0]  ;;  %6650 = vmatpush.bf16.msrb.mxu1 %v11160_v63 }
  0xc7   :  { %v11143_v3 = vld [vmem:[#allocation5 + $0x1580] sm:$0xf]  ;;  %v13335_v7 = vld [vmem:[#allocation5 + $0x168c] sm:$0xf0]  ;;  %v11016_v10 = vor.u32 %v13271_v2, %v11015_v1  ;;  %6663 = vmatpush.bf16.msrb.mxu2 %v11288_v0  ;;  %v6397_v0 = vpop.f32.mrf.mxu1 }
  0xc8   :  { %v11271_v6 = vld [vmem:[#allocation5 + $0x1680] sm:$0xf]  ;;  %v13367_v9 = vld [vmem:[#allocation5 + $0x178c] sm:$0xf0]  ;;  %v11144_v12 = vor.u32 %v13303_v5, %v11143_v3  ;;  %6676 = vmatpush.bf16.msrb.mxu3 %v11416_v4 }
  0xc9   :  { %v11399_v8 = vld [vmem:[#allocation5 + $0x1780] sm:$0xf]  ;;  %v11272_v13 = vor.u32 %v13335_v7, %v11271_v6  ;;  %v13267_v14 = vld [vmem:[#allocation5 + $0x146c] sm:$0xf0]  ;;  %6638 = vmatpush.bf16.msrb.mxu0 %v11016_v10 }
  0xca   :  { %v10999_v11 = vld [vmem:[#allocation5 + $0x1460] sm:$0xf]  ;;  %v13299_v16 = vld [vmem:[#allocation5 + $0x156c] sm:$0xf0]  ;;  %v11400_v17 = vor.u32 %v13367_v9, %v11399_v8  ;;  %6651 = vmatpush.bf16.msrb.mxu1 %v11144_v12 }
  0xcb   :  { %v11127_v15 = vld [vmem:[#allocation5 + $0x1560] sm:$0xf]  ;;  %v13331_v24 = vld [vmem:[#allocation5 + $0x166c] sm:$0xf0]  ;;  %v11000_v34 = vor.u32 %v13267_v14, %v10999_v11  ;;  %6664 = vmatpush.bf16.msrb.mxu2 %v11272_v13 }
  0xcc   :  { %v11255_v21 = vld [vmem:[#allocation5 + $0x1660] sm:$0xf]  ;;  %v13363_v32 = vld [vmem:[#allocation5 + $0x176c] sm:$0xf0]  ;;  %v11128_v39 = vor.u32 %v13299_v16, %v11127_v15  ;;  %6677 = vmatpush.bf16.msrb.mxu3 %v11400_v17 }
  0xcd   :  { %v1133_v26 = vld [vmem:[#allocation7] sm:$0xf]  ;;  %v11256_v40 = vor.u32 %v13331_v24, %v11255_v21  ;;  %v13263_v43 = vld [vmem:[#allocation5 + $0x144c] sm:$0xf0]  ;;  %6639 = vmatpush.bf16.msrb.mxu0 %v11000_v34  ;;  %v6410_v21 = vpop.f32.mrf.mxu2 }
  0xce   :  { %v11383_v27 = vld [vmem:[#allocation5 + $0x1760] sm:$0xf]  ;;  %v1135_v48 = vperm.slane %v1133_v26, 0  ;;  %v13295_v51 = vld [vmem:[#allocation5 + $0x154c] sm:$0xf0]  ;;  %6652 = vmatpush.bf16.msrb.mxu1 %v11128_v39 }
  0xcf   :  { %v10983_v36 = vld [vmem:[#allocation5 + $0x1440] sm:$0xf]  ;;  %v11384_v50 = vor.u32 %v13363_v32, %v11383_v27  ;;  %v13327_v53 = vld [vmem:[#allocation5 + $0x164c] sm:$0xf0]  ;;  %6665 = vmatpush.bf16.msrb.mxu2 %v11256_v40  ;;  %v104_v32 = vld [vmem:[#allocation2 + $0x58] sm:$0xff] }
  0xd0   :  { %v11111_v47 = vld [vmem:[#allocation5 + $0x1540] sm:$0xf]  ;;  %v13359_v55 = vld [vmem:[#allocation5 + $0x174c] sm:$0xf0]  ;;  %v10984_v56 = vor.u32 %v13263_v43, %v10983_v36  ;;  %v6385_v63 = vadd.f32 %v6384_v57, %v1135_v48  ;;  %v6423_v36 = vpop.f32.mrf.mxu3 }
  0xd1   :  { %v11239_v52 = vld [vmem:[#allocation5 + $0x1640] sm:$0xf]  ;;  %v11112_v58 = vor.u32 %v13295_v51, %v11111_v47  ;;  %v13259_v61 = vld [vmem:[#allocation5 + $0x142c] sm:$0xf0]  ;;  %6678 = vmatpush.bf16.msrb.mxu3 %v11384_v50 }
  0xd2   :  { %v11367_v54 = vld [vmem:[#allocation5 + $0x1740] sm:$0xf]  ;;  %v11240_v59 = vor.u32 %v13327_v53, %v11239_v52  ;;  %v13291_v2 = vld [vmem:[#allocation5 + $0x152c] sm:$0xf0]  ;;  %v6398_v8 = vadd.f32 %v6397_v0, %v6385_v63  ;;  %6640 = vmatpush.bf16.msrb.mxu0 %v10984_v56  ;;  %v1182_v0 = vunpack.c.h.b16 %v104_v32 }
  0xd3   :  { %v10967_v60 = vld [vmem:[#allocation5 + $0x1420] sm:$0xf]  ;;  %v11368_v1 = vor.u32 %v13359_v55, %v11367_v54  ;;  %v13323_v4 = vld [vmem:[#allocation5 + $0x162c] sm:$0xf0]  ;;  %6653 = vmatpush.bf16.msrb.mxu1 %v11112_v58  ;;  %v6386_v54 = vpop.f32.mrf.mxu0 }
  0xd4   :  { %v11095_v62 = vld [vmem:[#allocation5 + $0x1520] sm:$0xf]  ;;  %v13355_v6 = vld [vmem:[#allocation5 + $0x172c] sm:$0xf0]  ;;  %v10968_v9 = vor.u32 %v13259_v61, %v10967_v60  ;;  %6666 = vmatpush.bf16.msrb.mxu2 %v11240_v59  ;;  %v6411_v34 = vadd.f32 %v6410_v21, %v6398_v8  ;;  %v1181_v59 = vunpack.c.l.b16 %v104_v32  ;;  %v6399_v61 = vpop.f32.mrf.mxu1 }
  0xd5   :  { %v11223_v3 = vld [vmem:[#allocation5 + $0x1620] sm:$0xf]  ;;  %v13255_v10 = vld [vmem:[#allocation5 + $0x140c] sm:$0xf0]  ;;  %v11096_v13 = vor.u32 %v13291_v2, %v11095_v62  ;;  %6679 = vmatpush.bf16.msrb.mxu3 %v11368_v1 }
  0xd6   :  { %v11351_v5 = vld [vmem:[#allocation5 + $0x1720] sm:$0xf]  ;;  %v13287_v12 = vld [vmem:[#allocation5 + $0x150c] sm:$0xf0]  ;;  %v11224_v14 = vor.u32 %v13323_v4, %v11223_v3  ;;  %6641 = vmatpush.bf16.msrb.mxu0 %v10968_v9  ;;  %v13962_v53 = vadd.f32 %v6423_v36, %v6411_v34 }
  0xd7   :  { %v10951_v7 = vld [vmem:[#allocation5 + $0x1400] sm:$0xf]  ;;  %v13319_v16 = vld [vmem:[#allocation5 + $0x160c] sm:$0xf0]  ;;  %v11352_v24 = vor.u32 %v13355_v6, %v11351_v5  ;;  %6654 = vmatpush.bf16.msrb.mxu1 %v11096_v13 }
  0xd8   :  { %v11079_v11 = vld [vmem:[#allocation5 + $0x1500] sm:$0xf]  ;;  %v103_v17 = vld [vmem:[#allocation2 + $0x50] sm:$0xff]  ;;  %v10952_v47 = vor.u32 %v13255_v10, %v10951_v7  ;;  %6667 = vmatpush.bf16.msrb.mxu2 %v11224_v14  ;;  %v6425_v21 = vpop.f32.mrf.mxu3 }
  0xd9   :  { %v11207_v15 = vld [vmem:[#allocation5 + $0x1600] sm:$0xf]  ;;  %v13351_v27 = vld [vmem:[#allocation5 + $0x170c] sm:$0xf0]  ;;  %v1179_v52 = vunpack.c.l.b16 %v103_v17  ;;  %v11080_v55 = vor.u32 %v13287_v12, %v11079_v11  ;;  %v1180_v60 = vunpack.c.h.b16 %v103_v17  ;;  %6680 = vmatpush.bf16.msrb.mxu3 %v11352_v24  ;;  %v13966_v11 = vpack.c.b16 %v1181_v59, %v1181_v59 }
  0xda   :  { %v11335_v26 = vld [vmem:[#allocation5 + $0x1700] sm:$0xf]  ;;  %v13411_v40 = vld [vmem:[#allocation5 + $0x18ec] sm:$0xf0]  ;;  %v11208_v56 = vor.u32 %v13319_v16, %v11207_v15  ;;  %6642 = vmatpush.bf16.msrb.mxu0 %v10952_v47  ;;  %v6412_v15 = vpop.f32.mrf.mxu2  ;;  %v13970_v16 = vpack.c.b16 %v1182_v0, %v1182_v0 }
  0xdb   :  { %v11575_v39 = vld [vmem:[#allocation5 + $0x18e0] sm:$0xf]  ;;  %v13443_v48 = vld [vmem:[#allocation5 + $0x19ec] sm:$0xf0]  ;;  %v11336_v62 = vor.u32 %v13351_v27, %v11335_v26  ;;  %v13964_v7 = vpack.c.b16 %v1179_v52, %v1179_v52  ;;  %6655 = vmatpush.bf16.msrb.mxu1 %v11080_v55  ;;  %v13968_v12 = vpack.c.b16 %v1180_v60, %v1180_v60  ;;  %v6436_v0 = vpop.f32.mrf.mxu0 }
  0xdc   :  { %v11703_v43 = vld [vmem:[#allocation5 + $0x19e0] sm:$0xf]  ;;  %v13475_v51 = vld [vmem:[#allocation5 + $0x1aec] sm:$0xf0]  ;;  %v11576_v63 = vor.u32 %v13411_v40, %v11575_v39  ;;  %6668 = vmatpush.bf16.msrb.mxu2 %v11208_v56 }
  0xdd   :  { %v11831_v50 = vld [vmem:[#allocation5 + $0x1ae0] sm:$0xf]  ;;  %v13507_v58 = vld [vmem:[#allocation5 + $0x1bec] sm:$0xf0]  ;;  %v11704_v1 = vor.u32 %v13443_v48, %v11703_v43  ;;  %6681 = vmatpush.bf16.msrb.mxu3 %v11336_v62  ;;  %6643 = vmatmul.bf16.vlgmr.msrb.gmra.mxu0 %v13964_v7 }
  0xde   :  { %v11959_v57 = vld [vmem:[#allocation5 + $0x1be0] sm:$0xf]  ;;  %v11832_v2 = vor.u32 %v13475_v51, %v11831_v50  ;;  %v13407_v4 = vld [vmem:[#allocation5 + $0x18cc] sm:$0xf0]  ;;  %6687 = vmatpush.bf16.msra.mxu0 %v11576_v63  ;;  %6656 = vmatmul.bf16.vlgmr.msrb.gmra.mxu1 %v13968_v12 }
  0xdf   :  { %v11559_v3 = vld [vmem:[#allocation5 + $0x18c0] sm:$0xf]  ;;  %v11960_v6 = vor.u32 %v13507_v58, %v11959_v57  ;;  %v13439_v8 = vld [vmem:[#allocation5 + $0x19cc] sm:$0xf0]  ;;  %6700 = vmatpush.bf16.msra.mxu1 %v11704_v1  ;;  %6669 = vmatmul.bf16.vlgmr.msrb.gmra.mxu2 %v13966_v11 }
  0xe0   :  { %v11687_v5 = vld [vmem:[#allocation5 + $0x19c0] sm:$0xf]  ;;  %v13471_v10 = vld [vmem:[#allocation5 + $0x1acc] sm:$0xf0]  ;;  %v11560_v17 = vor.u32 %v13407_v4, %v11559_v3  ;;  %6713 = vmatpush.bf16.msra.mxu2 %v11832_v2  ;;  %6682 = vmatmul.bf16.vlgmr.msrb.gmra.mxu3 %v13970_v16 }
  0xe1   :  { %v11815_v9 = vld [vmem:[#allocation5 + $0x1ac0] sm:$0xf]  ;;  %v13503_v14 = vld [vmem:[#allocation5 + $0x1bcc] sm:$0xf0]  ;;  %v11688_v24 = vor.u32 %v13439_v8, %v11687_v5  ;;  %6726 = vmatpush.bf16.msra.mxu3 %v11960_v6  ;;  %v6437_v6 = vadd.f32 %v6436_v0, %v13962_v53  ;;  %v6449_v8 = vpop.f32.mrf.mxu1 }
  0xe2   :  { %v11943_v13 = vld [vmem:[#allocation5 + $0x1bc0] sm:$0xf]  ;;  %v11816_v26 = vor.u32 %v13471_v10, %v11815_v9  ;;  %v13403_v32 = vld [vmem:[#allocation5 + $0x18ac] sm:$0xf0]  ;;  %6688 = vmatpush.bf16.msra.mxu0 %v11560_v17 }
  0xe3   :  { %v11543_v27 = vld [vmem:[#allocation5 + $0x18a0] sm:$0xf]  ;;  %v11944_v36 = vor.u32 %v13503_v14, %v11943_v13  ;;  %v13435_v39 = vld [vmem:[#allocation5 + $0x19ac] sm:$0xf0]  ;;  %6701 = vmatpush.bf16.msra.mxu1 %v11688_v24  ;;  %v6450_v21 = vadd.f32 %v6449_v8, %v6437_v6 }
  0xe4   :  { %v11671_v34 = vld [vmem:[#allocation5 + $0x19a0] sm:$0xf]  ;;  %v13467_v43 = vld [vmem:[#allocation5 + $0x1aac] sm:$0xf0]  ;;  %v11544_v50 = vor.u32 %v13403_v32, %v11543_v27  ;;  %6714 = vmatpush.bf16.msra.mxu2 %v11816_v26 }
  0xe5   :  { %v11799_v40 = vld [vmem:[#allocation5 + $0x1aa0] sm:$0xf]  ;;  %v13499_v48 = vld [vmem:[#allocation5 + $0x1bac] sm:$0xf0]  ;;  %v11672_v51 = vor.u32 %v13435_v39, %v11671_v34  ;;  %6727 = vmatpush.bf16.msra.mxu3 %v11944_v36  ;;  %v6462_v39 = vpop.f32.mrf.mxu2 }
  0xe6   :  { %v11927_v47 = vld [vmem:[#allocation5 + $0x1ba0] sm:$0xf]  ;;  %v11800_v52 = vor.u32 %v13467_v43, %v11799_v40  ;;  %v13399_v55 = vld [vmem:[#allocation5 + $0x188c] sm:$0xf0]  ;;  %6689 = vmatpush.bf16.msra.mxu0 %v11544_v50  ;;  %v6475_v50 = vpop.f32.mrf.mxu3 }
  0xe7   :  { %v11527_v54 = vld [vmem:[#allocation5 + $0x1880] sm:$0xf]  ;;  %v11928_v57 = vor.u32 %v13499_v48, %v11927_v47  ;;  %v13431_v58 = vld [vmem:[#allocation5 + $0x198c] sm:$0xf0]  ;;  %6702 = vmatpush.bf16.msra.mxu1 %v11672_v51  ;;  %v6463_v48 = vadd.f32 %v6462_v39, %v6450_v21 }
  0xe8   :  { %v11655_v56 = vld [vmem:[#allocation5 + $0x1980] sm:$0xf]  ;;  %v13463_v60 = vld [vmem:[#allocation5 + $0x1a8c] sm:$0xf0]  ;;  %v11528_v63 = vor.u32 %v13399_v55, %v11527_v54  ;;  %6715 = vmatpush.bf16.msra.mxu2 %v11800_v52 }
  0xe9   :  { %v11783_v59 = vld [vmem:[#allocation5 + $0x1a80] sm:$0xf]  ;;  %v13495_v62 = vld [vmem:[#allocation5 + $0x1b8c] sm:$0xf0]  ;;  %v11656_v1 = vor.u32 %v13431_v58, %v11655_v56  ;;  %6728 = vmatpush.bf16.msra.mxu3 %v11928_v57  ;;  %v13977_v55 = vadd.f32 %v6475_v50, %v6463_v48  ;;  %v6438_v56 = vpop.f32.mrf.mxu0 }
  0xea   :  { %v11911_v61 = vld [vmem:[#allocation5 + $0x1b80] sm:$0xf]  ;;  %v11784_v2 = vor.u32 %v13463_v60, %v11783_v59  ;;  %v13395_v4 = vld [vmem:[#allocation5 + $0x186c] sm:$0xf0]  ;;  %6690 = vmatpush.bf16.msra.mxu0 %v11528_v63 }
  0xeb   :  { %v11511_v3 = vld [vmem:[#allocation5 + $0x1860] sm:$0xf]  ;;  %v11912_v9 = vor.u32 %v13495_v62, %v11911_v61  ;;  %v13427_v10 = vld [vmem:[#allocation5 + $0x196c] sm:$0xf0]  ;;  %6703 = vmatpush.bf16.msra.mxu1 %v11656_v1  ;;  %v6451_v62 = vpop.f32.mrf.mxu1 }
  0xec   :  { %v11639_v5 = vld [vmem:[#allocation5 + $0x1960] sm:$0xf]  ;;  %v13459_v14 = vld [vmem:[#allocation5 + $0x1a6c] sm:$0xf0]  ;;  %v11512_v24 = vor.u32 %v13395_v4, %v11511_v3  ;;  %6716 = vmatpush.bf16.msra.mxu2 %v11784_v2 }
  0xed   :  { %v11767_v13 = vld [vmem:[#allocation5 + $0x1a60] sm:$0xf]  ;;  %v13491_v17 = vld [vmem:[#allocation5 + $0x1b6c] sm:$0xf0]  ;;  %v11640_v26 = vor.u32 %v13427_v10, %v11639_v5  ;;  %6729 = vmatpush.bf16.msra.mxu3 %v11912_v9 }
  0xee   :  { %v11895_v15 = vld [vmem:[#allocation5 + $0x1b60] sm:$0xf]  ;;  %v11768_v27 = vor.u32 %v13459_v14, %v11767_v13  ;;  %v13391_v34 = vld [vmem:[#allocation5 + $0x184c] sm:$0xf0]  ;;  %6691 = vmatpush.bf16.msra.mxu0 %v11512_v24  ;;  %v6464_v24 = vpop.f32.mrf.mxu2 }
  0xef   :  { %v11495_v32 = vld [vmem:[#allocation5 + $0x1840] sm:$0xf]  ;;  %v11896_v53 = vor.u32 %v13491_v17, %v11895_v15  ;;  %v13423_v40 = vld [vmem:[#allocation5 + $0x194c] sm:$0xf0]  ;;  %6704 = vmatpush.bf16.msra.mxu1 %v11640_v26 }
  0xf0   :  { %v11623_v36 = vld [vmem:[#allocation5 + $0x1940] sm:$0xf]  ;;  %v13455_v47 = vld [vmem:[#allocation5 + $0x1a4c] sm:$0xf0]  ;;  %v11496_v54 = vor.u32 %v13391_v34, %v11495_v32  ;;  %6717 = vmatpush.bf16.msra.mxu2 %v11768_v27  ;;  %v106_v34 = vld [vmem:[#allocation2 + $0x68] sm:$0xff] }
  0xf1   :  { %v11751_v43 = vld [vmem:[#allocation5 + $0x1a40] sm:$0xf]  ;;  %v13487_v52 = vld [vmem:[#allocation5 + $0x1b4c] sm:$0xf0]  ;;  %v11624_v57 = vor.u32 %v13423_v40, %v11623_v36  ;;  %6730 = vmatpush.bf16.msra.mxu3 %v11896_v53  ;;  %v6477_v36 = vpop.f32.mrf.mxu3  ;;  %v1186_v62 = vunpack.c.h.b16 %v106_v34 }
  0xf2   :  { %v11879_v51 = vld [vmem:[#allocation5 + $0x1b40] sm:$0xf]  ;;  %v11752_v58 = vor.u32 %v13455_v47, %v11751_v43  ;;  %v13387_v60 = vld [vmem:[#allocation5 + $0x182c] sm:$0xf0]  ;;  %6692 = vmatpush.bf16.msra.mxu0 %v11496_v54 }
  0xf3   :  { %v11479_v59 = vld [vmem:[#allocation5 + $0x1820] sm:$0xf]  ;;  %v11880_v63 = vor.u32 %v13487_v52, %v11879_v51  ;;  %v13419_v0 = vld [vmem:[#allocation5 + $0x192c] sm:$0xf0]  ;;  %6705 = vmatpush.bf16.msra.mxu1 %v11624_v57 }
  0xf4   :  { %v11607_v61 = vld [vmem:[#allocation5 + $0x1920] sm:$0xf]  ;;  %v13451_v2 = vld [vmem:[#allocation5 + $0x1a2c] sm:$0xf0]  ;;  %v11480_v6 = vor.u32 %v13387_v60, %v11479_v59  ;;  %6718 = vmatpush.bf16.msra.mxu2 %v11752_v58  ;;  %v1185_v58 = vunpack.c.l.b16 %v106_v34 }
  0xf5   :  { %v11735_v1 = vld [vmem:[#allocation5 + $0x1a20] sm:$0xf]  ;;  %v13483_v4 = vld [vmem:[#allocation5 + $0x1b2c] sm:$0xf0]  ;;  %v11608_v13 = vor.u32 %v13419_v0, %v11607_v61  ;;  %6731 = vmatpush.bf16.msra.mxu3 %v11880_v63 }
  0xf6   :  { %v11863_v3 = vld [vmem:[#allocation5 + $0x1b20] sm:$0xf]  ;;  %v13383_v8 = vld [vmem:[#allocation5 + $0x180c] sm:$0xf0]  ;;  %v11736_v14 = vor.u32 %v13451_v2, %v11735_v1  ;;  %6693 = vmatpush.bf16.msra.mxu0 %v11480_v6 }
  0xf7   :  { %v11463_v5 = vld [vmem:[#allocation5 + $0x1800] sm:$0xf]  ;;  %v13415_v10 = vld [vmem:[#allocation5 + $0x190c] sm:$0xf0]  ;;  %v11864_v26 = vor.u32 %v13483_v4, %v11863_v3  ;;  %6706 = vmatpush.bf16.msra.mxu1 %v11608_v13 }
  0xf8   :  { %v11591_v9 = vld [vmem:[#allocation5 + $0x1900] sm:$0xf]  ;;  %v13447_v17 = vld [vmem:[#allocation5 + $0x1a0c] sm:$0xf0]  ;;  %v11464_v43 = vor.u32 %v13383_v8, %v11463_v5  ;;  %6719 = vmatpush.bf16.msra.mxu2 %v11736_v14 }
  0xf9   :  { %v11719_v15 = vld [vmem:[#allocation5 + $0x1a00] sm:$0xf]  ;;  %v13479_v32 = vld [vmem:[#allocation5 + $0x1b0c] sm:$0xf0]  ;;  %v11592_v52 = vor.u32 %v13415_v10, %v11591_v9  ;;  %6732 = vmatpush.bf16.msra.mxu3 %v11864_v26  ;;  %v13981_v10 = vpack.c.b16 %v1185_v58, %v1185_v58 }
  0xfa   :  { %v105_v21 = vld [vmem:[#allocation2 + $0x60] sm:$0xff]  ;;  %v13539_v53 = vld [vmem:[#allocation5 + $0x1cec] sm:$0xf0]  ;;  %v11720_v54 = vor.u32 %v13447_v17, %v11719_v15  ;;  %6694 = vmatpush.bf16.msra.mxu0 %v11464_v43  ;;  %v13985_v17 = vpack.c.b16 %v1186_v62, %v1186_v62 }
  0xfb   :  { %v11847_v27 = vld [vmem:[#allocation5 + $0x1b00] sm:$0xf]  ;;  %v13571_v47 = vld [vmem:[#allocation5 + $0x1dec] sm:$0xf0]  ;;  %v1183_v51 = vunpack.c.l.b16 %v105_v21  ;;  %v1184_v59 = vunpack.c.h.b16 %v105_v21  ;;  %6707 = vmatpush.bf16.msra.mxu1 %v11592_v52 }
  0xfc   :  { %v12087_v39 = vld [vmem:[#allocation5 + $0x1ce0] sm:$0xf]  ;;  %v13603_v50 = vld [vmem:[#allocation5 + $0x1eec] sm:$0xf0]  ;;  %v11848_v60 = vor.u32 %v13479_v32, %v11847_v27  ;;  %6720 = vmatpush.bf16.msra.mxu2 %v11720_v54 }
  0xfd   :  { %v12215_v40 = vld [vmem:[#allocation5 + $0x1de0] sm:$0xf]  ;;  %v13635_v57 = vld [vmem:[#allocation5 + $0x1fec] sm:$0xf0]  ;;  %v12088_v61 = vor.u32 %v13539_v53, %v12087_v39  ;;  %v13979_v5 = vpack.c.b16 %v1183_v51, %v1183_v51  ;;  %v13983_v13 = vpack.c.b16 %v1184_v59, %v1184_v59 }
  0xfe   :  { %v12343_v48 = vld [vmem:[#allocation5 + $0x1ee0] sm:$0xf]  ;;  %v12216_v63 = vor.u32 %v13571_v47, %v12215_v40  ;;  %v13535_v2 = vld [vmem:[#allocation5 + $0x1ccc] sm:$0xf0]  ;;  %6733 = vmatpush.bf16.msra.mxu3 %v11848_v60 }
  0xff   :  { %v12471_v56 = vld [vmem:[#allocation5 + $0x1fe0] sm:$0xf]  ;;  %v12344_v0 = vor.u32 %v13603_v50, %v12343_v48  ;;  %v13567_v6 = vld [vmem:[#allocation5 + $0x1dcc] sm:$0xf0]  ;;  %6739 = vmatpush.bf16.msrb.mxu0 %v12088_v61  ;;  %6721 = vmatmul.bf16.vlgmr.msra.gmra.mxu2 %v13981_v10  ;;  %v6488_v61 = vpop.f32.mrf.mxu0 }
 0x100   :  { %v12071_v1 = vld [vmem:[#allocation5 + $0x1cc0] sm:$0xf]  ;;  %v12472_v4 = vor.u32 %v13635_v57, %v12471_v56  ;;  %v13599_v9 = vld [vmem:[#allocation5 + $0x1ecc] sm:$0xf0]  ;;  %6752 = vmatpush.bf16.msrb.mxu1 %v12216_v63  ;;  %6695 = vmatmul.bf16.vlgmr.msra.gmra.mxu0 %v13979_v5 }
 0x101   :  { %v12199_v3 = vld [vmem:[#allocation5 + $0x1dc0] sm:$0xf]  ;;  %v13631_v15 = vld [vmem:[#allocation5 + $0x1fcc] sm:$0xf0]  ;;  %v12072_v21 = vor.u32 %v13535_v2, %v12071_v1  ;;  %6765 = vmatpush.bf16.msrb.mxu2 %v12344_v0  ;;  %6708 = vmatmul.bf16.vlgmr.msra.gmra.mxu1 %v13983_v13  ;;  %v6489_v0 = vadd.f32 %v6488_v61, %v13977_v55  ;;  %v6501_v2 = vpop.f32.mrf.mxu1 }
 0x102   :  { %v12327_v8 = vld [vmem:[#allocation5 + $0x1ec0] sm:$0xf]  ;;  %v12200_v24 = vor.u32 %v13567_v6, %v12199_v3  ;;  %v13531_v32 = vld [vmem:[#allocation5 + $0x1cac] sm:$0xf0]  ;;  %6778 = vmatpush.bf16.msrb.mxu3 %v12472_v4 }
 0x103   :  { %v12455_v14 = vld [vmem:[#allocation5 + $0x1fc0] sm:$0xf]  ;;  %v12328_v26 = vor.u32 %v13599_v9, %v12327_v8  ;;  %v13563_v39 = vld [vmem:[#allocation5 + $0x1dac] sm:$0xf0]  ;;  %6734 = vmatmul.bf16.vlgmr.msra.gmra.mxu3 %v13985_v17  ;;  %6740 = vmatpush.bf16.msrb.mxu0 %v12072_v21 }
 0x104   :  { %v12055_v27 = vld [vmem:[#allocation5 + $0x1ca0] sm:$0xf]  ;;  %v12456_v36 = vor.u32 %v13631_v15, %v12455_v14  ;;  %v13595_v40 = vld [vmem:[#allocation5 + $0x1eac] sm:$0xf0]  ;;  %6753 = vmatpush.bf16.msrb.mxu1 %v12200_v24  ;;  %v6502_v15 = vadd.f32 %v6501_v2, %v6489_v0 }
 0x105   :  { %v12183_v34 = vld [vmem:[#allocation5 + $0x1da0] sm:$0xf]  ;;  %v13627_v47 = vld [vmem:[#allocation5 + $0x1fac] sm:$0xf0]  ;;  %v12056_v48 = vor.u32 %v13531_v32, %v12055_v27  ;;  %6766 = vmatpush.bf16.msrb.mxu2 %v12328_v26 }
 0x106   :  { %v12311_v53 = vld [vmem:[#allocation5 + $0x1ea0] sm:$0xf]  ;;  %v12184_v50 = vor.u32 %v13563_v39, %v12183_v34  ;;  %v13527_v54 = vld [vmem:[#allocation5 + $0x1c8c] sm:$0xf0]  ;;  %6779 = vmatpush.bf16.msrb.mxu3 %v12456_v36 }
 0x107   :  { %v12439_v43 = vld [vmem:[#allocation5 + $0x1fa0] sm:$0xf]  ;;  %v12312_v51 = vor.u32 %v13595_v40, %v12311_v53  ;;  %v13559_v58 = vld [vmem:[#allocation5 + $0x1d8c] sm:$0xf0]  ;;  %6741 = vmatpush.bf16.msrb.mxu0 %v12056_v48 }
 0x108   :  { %v12039_v52 = vld [vmem:[#allocation5 + $0x1c80] sm:$0xf]  ;;  %v12440_v57 = vor.u32 %v13627_v47, %v12439_v43  ;;  %v13591_v60 = vld [vmem:[#allocation5 + $0x1e8c] sm:$0xf0]  ;;  %6754 = vmatpush.bf16.msrb.mxu1 %v12184_v50  ;;  %v6514_v47 = vpop.f32.mrf.mxu2 }
 0x109   :  { %v12167_v56 = vld [vmem:[#allocation5 + $0x1d80] sm:$0xf]  ;;  %v13623_v63 = vld [vmem:[#allocation5 + $0x1f8c] sm:$0xf0]  ;;  %v12040_v1 = vor.u32 %v13527_v54, %v12039_v52  ;;  %6767 = vmatpush.bf16.msrb.mxu2 %v12312_v51  ;;  %v6515_v52 = vadd.f32 %v6514_v47, %v6502_v15  ;;  %v6527_v54 = vpop.f32.mrf.mxu3  ;;  %v108_v47 = vld [vmem:[#allocation2 + $0x78] sm:$0xff] }
 0x10a   :  { %v12295_v59 = vld [vmem:[#allocation5 + $0x1e80] sm:$0xf]  ;;  %v12168_v3 = vor.u32 %v13559_v58, %v12167_v56  ;;  %v13523_v8 = vld [vmem:[#allocation5 + $0x1c6c] sm:$0xf0]  ;;  %6780 = vmatpush.bf16.msrb.mxu3 %v12440_v57  ;;  %v6490_v58 = vpop.f32.mrf.mxu0 }
 0x10b   :  { %v12423_v62 = vld [vmem:[#allocation5 + $0x1f80] sm:$0xf]  ;;  %v12296_v4 = vor.u32 %v13591_v60, %v12295_v59  ;;  %v13555_v21 = vld [vmem:[#allocation5 + $0x1d6c] sm:$0xf0]  ;;  %6742 = vmatpush.bf16.msrb.mxu0 %v12040_v1  ;;  %v6503_v60 = vpop.f32.mrf.mxu1  ;;  %v13992_v61 = vadd.f32 %v6527_v54, %v6515_v52  ;;  %v12673_v52 = vld [vmem:[#allocation5 + $0x1e4] sm:$0xf] }
 0x10c   :  { %v12023_v6 = vld [vmem:[#allocation5 + $0x1c60] sm:$0xf]  ;;  %v12424_v14 = vor.u32 %v13623_v63, %v12423_v62  ;;  %v13587_v26 = vld [vmem:[#allocation5 + $0x1e6c] sm:$0xf0]  ;;  %6755 = vmatpush.bf16.msrb.mxu1 %v12168_v3  ;;  %v12705_v58 = vld [vmem:[#allocation5 + $0x2e4] sm:$0xf] }
 0x10d   :  { %v12151_v9 = vld [vmem:[#allocation5 + $0x1d60] sm:$0xf]  ;;  %v13619_v32 = vld [vmem:[#allocation5 + $0x1f6c] sm:$0xf0]  ;;  %v12024_v34 = vor.u32 %v13523_v8, %v12023_v6  ;;  %6768 = vmatpush.bf16.msrb.mxu2 %v12296_v4 }
 0x10e   :  { %v12279_v24 = vld [vmem:[#allocation5 + $0x1e60] sm:$0xf]  ;;  %v12152_v55 = vor.u32 %v13555_v21, %v12151_v9  ;;  %v13519_v53 = vld [vmem:[#allocation5 + $0x1c4c] sm:$0xf0]  ;;  %6781 = vmatpush.bf16.msrb.mxu3 %v12424_v14 }
 0x10f   :  { %v12407_v27 = vld [vmem:[#allocation5 + $0x1f60] sm:$0xf]  ;;  %v12280_v36 = vor.u32 %v13587_v26, %v12279_v24  ;;  %v13551_v48 = vld [vmem:[#allocation5 + $0x1d4c] sm:$0xf0]  ;;  %6743 = vmatpush.bf16.msrb.mxu0 %v12024_v34 }
 0x110   :  { %v12007_v39 = vld [vmem:[#allocation5 + $0x1c40] sm:$0xf]  ;;  %v12408_v43 = vor.u32 %v13619_v32, %v12407_v27  ;;  %v13583_v51 = vld [vmem:[#allocation5 + $0x1e4c] sm:$0xf0]  ;;  %6756 = vmatpush.bf16.msrb.mxu1 %v12152_v55 }
 0x111   :  { %v12135_v40 = vld [vmem:[#allocation5 + $0x1d40] sm:$0xf]  ;;  %v13615_v57 = vld [vmem:[#allocation5 + $0x1f4c] sm:$0xf0]  ;;  %v12008_v59 = vor.u32 %v13519_v53, %v12007_v39  ;;  %6769 = vmatpush.bf16.msrb.mxu2 %v12280_v36  ;;  %v6529_v54 = vpop.f32.mrf.mxu3 }
 0x112   :  { %v12263_v50 = vld [vmem:[#allocation5 + $0x1e40] sm:$0xf]  ;;  %v12136_v62 = vor.u32 %v13551_v48, %v12135_v40  ;;  %v13515_v1 = vld [vmem:[#allocation5 + $0x1c2c] sm:$0xf0]  ;;  %6782 = vmatpush.bf16.msrb.mxu3 %v12408_v43  ;;  %v6516_v48 = vpop.f32.mrf.mxu2 }
 0x113   :  { %v12391_v56 = vld [vmem:[#allocation5 + $0x1f40] sm:$0xf]  ;;  %v12264_v63 = vor.u32 %v13583_v51, %v12263_v50  ;;  %v13547_v4 = vld [vmem:[#allocation5 + $0x1d2c] sm:$0xf0]  ;;  %6744 = vmatpush.bf16.msrb.mxu0 %v12008_v59  ;;  %v12641_v50 = vld [vmem:[#allocation5 + $0xe4] sm:$0xf] }
 0x114   :  { %v11991_v0 = vld [vmem:[#allocation5 + $0x1c20] sm:$0xf]  ;;  %v12392_v3 = vor.u32 %v13615_v57, %v12391_v56  ;;  %v13579_v8 = vld [vmem:[#allocation5 + $0x1e2c] sm:$0xf0]  ;;  %6757 = vmatpush.bf16.msrb.mxu1 %v12136_v62  ;;  %v8505_v51 = vld [vmem:[#allocation5 + $0xf0] sm:$0xf0] }
 0x115   :  { %v12119_v2 = vld [vmem:[#allocation5 + $0x1d20] sm:$0xf]  ;;  %v13611_v14 = vld [vmem:[#allocation5 + $0x1f2c] sm:$0xf0]  ;;  %v11992_v21 = vor.u32 %v13515_v1, %v11991_v0  ;;  %6770 = vmatpush.bf16.msrb.mxu2 %v12264_v63  ;;  %v8633_v57 = vld [vmem:[#allocation5 + $0x1f0] sm:$0xf0] }
 0x116   :  { %v12247_v6 = vld [vmem:[#allocation5 + $0x1e20] sm:$0xf]  ;;  %v13511_v24 = vld [vmem:[#allocation5 + $0x1c0c] sm:$0xf0]  ;;  %v12120_v32 = vor.u32 %v13547_v4, %v12119_v2  ;;  %6783 = vmatpush.bf16.msrb.mxu3 %v12392_v3  ;;  %v8761_v59 = vld [vmem:[#allocation5 + $0x2f0] sm:$0xf0]  ;;  %v1189_v2 = vunpack.c.l.b16 %v108_v47 }
 0x117   :  { %v12375_v9 = vld [vmem:[#allocation5 + $0x1f20] sm:$0xf]  ;;  %v13543_v27 = vld [vmem:[#allocation5 + $0x1d0c] sm:$0xf0]  ;;  %v12248_v34 = vor.u32 %v13579_v8, %v12247_v6  ;;  %6745 = vmatpush.bf16.msrb.mxu0 %v11992_v21  ;;  %v12737_v0 = vld [vmem:[#allocation5 + $0x3e4] sm:$0xf]  ;;  %v8508_v6 = vor.u32 %v12641_v50, %v8505_v51  ;;  %v1190_v8 = vunpack.c.h.b16 %v108_v47 }
 0x118   :  { %v11975_v15 = vld [vmem:[#allocation5 + $0x1c00] sm:$0xf]  ;;  %v13575_v36 = vld [vmem:[#allocation5 + $0x1e0c] sm:$0xf0]  ;;  %v12376_v53 = vor.u32 %v13611_v14, %v12375_v9  ;;  %6758 = vmatpush.bf16.msrb.mxu1 %v12120_v32  ;;  %v8889_v1 = vld [vmem:[#allocation5 + $0x3f0] sm:$0xf0]  ;;  %v8636_v9 = vor.u32 %v12673_v52, %v8633_v57  ;;  %v8764_v14 = vor.u32 %v12705_v58, %v8761_v59 }
 0x119   :  { %v12103_v26 = vld [vmem:[#allocation5 + $0x1d00] sm:$0xf]  ;;  %v107_v39 = vld [vmem:[#allocation2 + $0x70] sm:$0xff]  ;;  %v11976_v56 = vor.u32 %v13511_v24, %v11975_v15  ;;  %6771 = vmatpush.bf16.msrb.mxu2 %v12248_v34  ;;  %v12637_v21 = vld [vmem:[#allocation5 + $0xc4] sm:$0xf]  ;;  %v8892_v48 = vor.u32 %v12737_v0, %v8889_v1  ;;  %v13996_v34 = vpack.c.b16 %v1189_v2, %v1189_v2 }
 0x11a   :  { %v12231_v55 = vld [vmem:[#allocation5 + $0x1e00] sm:$0xf]  ;;  %v13607_v43 = vld [vmem:[#allocation5 + $0x1f0c] sm:$0xf0]  ;;  %v1187_v60 = vunpack.c.l.b16 %v107_v39  ;;  %v12104_v62 = vor.u32 %v13543_v27, %v12103_v26  ;;  %v1188_v3 = vunpack.c.h.b16 %v107_v39  ;;  %6784 = vmatpush.bf16.msrb.mxu3 %v12376_v53  ;;  %v8489_v15 = vld [vmem:[#allocation5 + $0xd0] sm:$0xf0]  ;;  %v14000_v53 = vpack.c.b16 %v1190_v8, %v1190_v8 }
 0x11b   :  { %v12359_v40 = vld [vmem:[#allocation5 + $0x1f00] sm:$0xf]  ;;  %v12232_v63 = vor.u32 %v13575_v36, %v12231_v55  ;;  %v12669_v24 = vld [vmem:[#allocation5 + $0x1c4] sm:$0xf]  ;;  %6746 = vmatpush.bf16.msrb.mxu0 %v11976_v56  ;;  %v8617_v32 = vld [vmem:[#allocation5 + $0x1d0] sm:$0xf0] }
 0x11c   :  { %v12360_v4 = vor.u32 %v13607_v43, %v12359_v40  ;;  %v13994_v54 = vpack.c.b16 %v1187_v60, %v1187_v60  ;;  %v12701_v26 = vld [vmem:[#allocation5 + $0x2c4] sm:$0xf]  ;;  %v8745_v27 = vld [vmem:[#allocation5 + $0x2d0] sm:$0xf0]  ;;  %6759 = vmatpush.bf16.msrb.mxu1 %v12104_v62  ;;  %v13998_v55 = vpack.c.b16 %v1188_v3, %v1188_v3  ;;  %v8492_v40 = vor.u32 %v12637_v21, %v8489_v15  ;;  %v6540_v21 = vpop.f32.mrf.mxu0 }
 0x11d   :  { %6772 = vmatpush.bf16.msrb.mxu2 %v12232_v63  ;;  %v12733_v36 = vld [vmem:[#allocation5 + $0x3c4] sm:$0xf]  ;;  %v8873_v39 = vld [vmem:[#allocation5 + $0x3d0] sm:$0xf0]  ;;  %v8620_v43 = vor.u32 %v12669_v24, %v8617_v32  ;;  %v8748_v47 = vor.u32 %v12701_v26, %v8745_v27  ;;  %v6553_v26 = vpop.f32.mrf.mxu1 }
 0x11e   :  { %6785 = vmatpush.bf16.msrb.mxu3 %v12360_v4  ;;  %v12633_v50 = vld [vmem:[#allocation5 + $0xa4] sm:$0xf]  ;;  %v8473_v51 = vld [vmem:[#allocation5 + $0xb0] sm:$0xf0]  ;;  %6747 = vmatmul.bf16.vlgmr.msrb.gmra.mxu0 %v13994_v54  ;;  %v8876_v56 = vor.u32 %v12733_v36, %v8873_v39 }
 0x11f   :  { %6791 = vmatpush.bf16.msra.mxu0 %v8508_v6  ;;  %v12665_v52 = vld [vmem:[#allocation5 + $0x1a4] sm:$0xf]  ;;  %v8601_v57 = vld [vmem:[#allocation5 + $0x1b0] sm:$0xf0]  ;;  %6760 = vmatmul.bf16.vlgmr.msrb.gmra.mxu1 %v13998_v55  ;;  %v8476_v63 = vor.u32 %v12633_v50, %v8473_v51 }
 0x120   :  { %6804 = vmatpush.bf16.msra.mxu1 %v8636_v9  ;;  %v12697_v58 = vld [vmem:[#allocation5 + $0x2a4] sm:$0xf]  ;;  %v8729_v59 = vld [vmem:[#allocation5 + $0x2b0] sm:$0xf0]  ;;  %6773 = vmatmul.bf16.vlgmr.msrb.gmra.mxu2 %v13996_v34  ;;  %v8604_v0 = vor.u32 %v12665_v52, %v8601_v57 }
 0x121   :  { %6817 = vmatpush.bf16.msra.mxu2 %v8764_v14  ;;  %v12729_v60 = vld [vmem:[#allocation5 + $0x3a4] sm:$0xf]  ;;  %v8857_v62 = vld [vmem:[#allocation5 + $0x3b0] sm:$0xf0]  ;;  %6786 = vmatmul.bf16.vlgmr.msrb.gmra.mxu3 %v14000_v53  ;;  %v8732_v1 = vor.u32 %v12697_v58, %v8729_v59 }
 0x122   :  { %6830 = vmatpush.bf16.msra.mxu3 %v8892_v48  ;;  %v12629_v2 = vld [vmem:[#allocation5 + $0x84] sm:$0xf]  ;;  %v8457_v3 = vld [vmem:[#allocation5 + $0x90] sm:$0xf0]  ;;  %v8860_v6 = vor.u32 %v12729_v60, %v8857_v62  ;;  %v6541_v48 = vadd.f32 %v6540_v21, %v13992_v61 }
 0x123   :  { %6792 = vmatpush.bf16.msra.mxu0 %v8492_v40  ;;  %v12661_v4 = vld [vmem:[#allocation5 + $0x184] sm:$0xf]  ;;  %v8585_v8 = vld [vmem:[#allocation5 + $0x190] sm:$0xf0]  ;;  %v8460_v32 = vor.u32 %v12629_v2, %v8457_v3  ;;  %v6566_v2 = vpop.f32.mrf.mxu2 }
 0x124   :  { %6805 = vmatpush.bf16.msra.mxu1 %v8620_v43  ;;  %v12693_v9 = vld [vmem:[#allocation5 + $0x284] sm:$0xf]  ;;  %v8713_v14 = vld [vmem:[#allocation5 + $0x290] sm:$0xf0]  ;;  %v8588_v27 = vor.u32 %v12661_v4, %v8585_v8  ;;  %v6554_v50 = vadd.f32 %v6553_v26, %v6541_v48 }
 0x125   :  { %6818 = vmatpush.bf16.msra.mxu2 %v8748_v47  ;;  %v12725_v15 = vld [vmem:[#allocation5 + $0x384] sm:$0xf]  ;;  %v8841_v24 = vld [vmem:[#allocation5 + $0x390] sm:$0xf0]  ;;  %v8716_v36 = vor.u32 %v12693_v9, %v8713_v14  ;;  %v6579_v9 = vpop.f32.mrf.mxu3  ;;  %v6555_v48 = vpop.f32.mrf.mxu1 }
 0x126   :  { %6831 = vmatpush.bf16.msra.mxu3 %v8876_v56  ;;  %v12625_v39 = vld [vmem:[#allocation5 + $0x64] sm:$0xf]  ;;  %v8441_v40 = vld [vmem:[#allocation5 + $0x70] sm:$0xf0]  ;;  %v8844_v47 = vor.u32 %v12725_v15, %v8841_v24  ;;  %v6567_v8 = vadd.f32 %v6566_v2, %v6554_v50  ;;  %v6542_v15 = vpop.f32.mrf.mxu0 }
 0x127   :  { %6793 = vmatpush.bf16.msra.mxu0 %v8476_v63  ;;  %v12657_v43 = vld [vmem:[#allocation5 + $0x164] sm:$0xf]  ;;  %v8569_v51 = vld [vmem:[#allocation5 + $0x170] sm:$0xf0]  ;;  %v8444_v59 = vor.u32 %v12625_v39, %v8441_v40 }
 0x128   :  { %6806 = vmatpush.bf16.msra.mxu1 %v8604_v0  ;;  %v12689_v52 = vld [vmem:[#allocation5 + $0x264] sm:$0xf]  ;;  %v8697_v56 = vld [vmem:[#allocation5 + $0x270] sm:$0xf0]  ;;  %v8572_v61 = vor.u32 %v12657_v43, %v8569_v51 }
 0x129   :  { %6819 = vmatpush.bf16.msra.mxu2 %v8732_v1  ;;  %v12721_v57 = vld [vmem:[#allocation5 + $0x364] sm:$0xf]  ;;  %v8825_v58 = vld [vmem:[#allocation5 + $0x370] sm:$0xf0]  ;;  %v8700_v60 = vor.u32 %v12689_v52, %v8697_v56 }
 0x12a   :  { %6832 = vmatpush.bf16.msra.mxu3 %v8860_v6  ;;  %v12621_v62 = vld [vmem:[#allocation5 + $0x44] sm:$0xf]  ;;  %v8425_v63 = vld [vmem:[#allocation5 + $0x50] sm:$0xf0]  ;;  %v8828_v1 = vor.u32 %v12721_v57, %v8825_v58 }
 0x12b   :  { %6794 = vmatpush.bf16.msra.mxu0 %v8460_v32  ;;  %v12653_v0 = vld [vmem:[#allocation5 + $0x144] sm:$0xf]  ;;  %v8553_v3 = vld [vmem:[#allocation5 + $0x150] sm:$0xf0]  ;;  %v8428_v24 = vor.u32 %v12621_v62, %v8425_v63  ;;  %v14007_v32 = vadd.f32 %v6579_v9, %v6567_v8 }
 0x12c   :  { %6807 = vmatpush.bf16.msra.mxu1 %v8588_v27  ;;  %v12685_v4 = vld [vmem:[#allocation5 + $0x244] sm:$0xf]  ;;  %v8681_v6 = vld [vmem:[#allocation5 + $0x250] sm:$0xf0]  ;;  %v8556_v26 = vor.u32 %v12653_v0, %v8553_v3 }
 0x12d   :  { %6820 = vmatpush.bf16.msra.mxu2 %v8716_v36  ;;  %v12717_v14 = vld [vmem:[#allocation5 + $0x344] sm:$0xf]  ;;  %v8809_v21 = vld [vmem:[#allocation5 + $0x350] sm:$0xf0]  ;;  %v8684_v27 = vor.u32 %v12685_v4, %v8681_v6  ;;  %v6568_v6 = vpop.f32.mrf.mxu2 }
 0x12e   :  { %6833 = vmatpush.bf16.msra.mxu3 %v8844_v47  ;;  %v12617_v36 = vld [vmem:[#allocation5 + $0x24] sm:$0xf]  ;;  %v8409_v39 = vld [vmem:[#allocation5 + $0x30] sm:$0xf0]  ;;  %v8812_v43 = vor.u32 %v12717_v14, %v8809_v21  ;;  %v6581_v21 = vpop.f32.mrf.mxu3 }
 0x12f   :  { %6795 = vmatpush.bf16.msra.mxu0 %v8444_v59  ;;  %v12649_v40 = vld [vmem:[#allocation5 + $0x124] sm:$0xf]  ;;  %v8537_v47 = vld [vmem:[#allocation5 + $0x130] sm:$0xf0]  ;;  %v8412_v57 = vor.u32 %v12617_v36, %v8409_v39 }
 0x130   :  { %6808 = vmatpush.bf16.msra.mxu1 %v8572_v61  ;;  %v12681_v50 = vld [vmem:[#allocation5 + $0x224] sm:$0xf]  ;;  %v8665_v51 = vld [vmem:[#allocation5 + $0x230] sm:$0xf0]  ;;  %v8540_v61 = vor.u32 %v12649_v40, %v8537_v47 }
 0x131   :  { %6821 = vmatpush.bf16.msra.mxu2 %v8700_v60  ;;  %v12713_v52 = vld [vmem:[#allocation5 + $0x324] sm:$0xf]  ;;  %v8793_v56 = vld [vmem:[#allocation5 + $0x330] sm:$0xf0]  ;;  %v8668_v60 = vor.u32 %v12681_v50, %v8665_v51 }
 0x132   :  { %6834 = vmatpush.bf16.msra.mxu3 %v8828_v1  ;;  %v12613_v58 = vld [vmem:[#allocation5 + $0x4] sm:$0xf]  ;;  %v8393_v59 = vld [vmem:[#allocation5 + $0x10] sm:$0xf0]  ;;  %v8796_v2 = vor.u32 %v12713_v52, %v8793_v56 }
 0x133   :  { %6796 = vmatpush.bf16.msra.mxu0 %v8428_v24  ;;  %v12645_v62 = vld [vmem:[#allocation5 + $0x104] sm:$0xf]  ;;  %v8521_v63 = vld [vmem:[#allocation5 + $0x110] sm:$0xf0]  ;;  %v8396_v15 = vor.u32 %v12613_v58, %v8393_v59 }
 0x134   :  { %6809 = vmatpush.bf16.msra.mxu1 %v8556_v26  ;;  %v12677_v0 = vld [vmem:[#allocation5 + $0x204] sm:$0xf]  ;;  %v8649_v1 = vld [vmem:[#allocation5 + $0x210] sm:$0xf0] }
 0x135   :  { %6822 = vmatpush.bf16.msra.mxu2 %v8684_v27  ;;  %v12709_v3 = vld [vmem:[#allocation5 + $0x304] sm:$0xf]  ;;  %v8777_v4 = vld [vmem:[#allocation5 + $0x310] sm:$0xf0]  ;;  %v8524_v27 = vor.u32 %v12645_v62, %v8521_v63  ;;  %v8652_v36 = vor.u32 %v12677_v0, %v8649_v1 }
 0x136   :  { %6835 = vmatpush.bf16.msra.mxu3 %v8812_v43  ;;  %v12769_v8 = vld [vmem:[#allocation5 + $0x4e4] sm:$0xf]  ;;  %v9017_v9 = vld [vmem:[#allocation5 + $0x4f0] sm:$0xf0]  ;;  %v8780_v43 = vor.u32 %v12709_v3, %v8777_v4 }
 0x137   :  { %v12801_v14 = vld [vmem:[#allocation5 + $0x5e4] sm:$0xf]  ;;  %6797 = vmatpush.bf16.msra.mxu0 %v8412_v57  ;;  %v9145_v24 = vld [vmem:[#allocation5 + $0x5f0] sm:$0xf0]  ;;  %v9020_v47 = vor.u32 %v12769_v8, %v9017_v9 }
 0x138   :  { %v12833_v48 = vld [vmem:[#allocation5 + $0x6e4] sm:$0xf]  ;;  %v9273_v26 = vld [vmem:[#allocation5 + $0x6f0] sm:$0xf0]  ;;  %6810 = vmatpush.bf16.msra.mxu1 %v8540_v61  ;;  %v9148_v50 = vor.u32 %v12801_v14, %v9145_v24 }
 0x139   :  { %6823 = vmatpush.bf16.msra.mxu2 %v8668_v60  ;;  %v12865_v39 = vld [vmem:[#allocation5 + $0x7e4] sm:$0xf]  ;;  %v9401_v40 = vld [vmem:[#allocation5 + $0x7f0] sm:$0xf0]  ;;  %v9276_v51 = vor.u32 %v12833_v48, %v9273_v26 }
 0x13a   :  { %6836 = vmatpush.bf16.msra.mxu3 %v8796_v2  ;;  %v12765_v52 = vld [vmem:[#allocation5 + $0x4c4] sm:$0xf]  ;;  %v9001_v56 = vld [vmem:[#allocation5 + $0x4d0] sm:$0xf0]  ;;  %v9404_v57 = vor.u32 %v12865_v39, %v9401_v40 }
 0x13b   :  { %v12797_v6 = vld [vmem:[#allocation5 + $0x5c4] sm:$0xf]  ;;  %6798 = vmatpush.bf16.msra.mxu0 %v8396_v15  ;;  %v9129_v58 = vld [vmem:[#allocation5 + $0x5d0] sm:$0xf0]  ;;  %v9004_v62 = vor.u32 %v12765_v52, %v9001_v56  ;;  %v6592_v52 = vpop.f32.mrf.mxu0 }
 0x13c   :  { %v12829_v59 = vld [vmem:[#allocation5 + $0x6c4] sm:$0xf]  ;;  %v9257_v21 = vld [vmem:[#allocation5 + $0x6d0] sm:$0xf0]  ;;  %6811 = vmatpush.bf16.msra.mxu1 %v8524_v27  ;;  %v9132_v63 = vor.u32 %v12797_v6, %v9129_v58 }
 0x13d   :  { %6824 = vmatpush.bf16.msra.mxu2 %v8652_v36  ;;  %v12861_v61 = vld [vmem:[#allocation5 + $0x7c4] sm:$0xf]  ;;  %v9385_v60 = vld [vmem:[#allocation5 + $0x7d0] sm:$0xf0]  ;;  %v9260_v0 = vor.u32 %v12829_v59, %v9257_v21  ;;  %v6605_v59 = vpop.f32.mrf.mxu1 }
 0x13e   :  { %6837 = vmatpush.bf16.msra.mxu3 %v8780_v43  ;;  %v12761_v2 = vld [vmem:[#allocation5 + $0x4a4] sm:$0xf]  ;;  %v8985_v1 = vld [vmem:[#allocation5 + $0x4b0] sm:$0xf0]  ;;  %v9388_v4 = vor.u32 %v12861_v61, %v9385_v60  ;;  %6799 = vmatmul.bf16.vlgmr.msra.gmra.mxu0 %v13904_v19 }
 0x13f   :  { %6843 = vmatpush.bf16.msrb.mxu0 %v9020_v47  ;;  %v12793_v3 = vld [vmem:[#allocation5 + $0x5a4] sm:$0xf]  ;;  %v9113_v8 = vld [vmem:[#allocation5 + $0x5b0] sm:$0xf0]  ;;  %v8988_v48 = vor.u32 %v12761_v2, %v8985_v1  ;;  %6812 = vmatmul.bf16.vlgmr.msra.gmra.mxu1 %v13908_v22 }
 0x140   :  { %6856 = vmatpush.bf16.msrb.mxu1 %v9148_v50  ;;  %v12825_v9 = vld [vmem:[#allocation5 + $0x6a4] sm:$0xf]  ;;  %v9241_v14 = vld [vmem:[#allocation5 + $0x6b0] sm:$0xf0]  ;;  %6825 = vmatmul.bf16.vlgmr.msra.gmra.mxu2 %v13902_v18  ;;  %v9116_v26 = vor.u32 %v12793_v3, %v9113_v8 }
 0x141   :  { %6869 = vmatpush.bf16.msrb.mxu2 %v9276_v51  ;;  %v12857_v15 = vld [vmem:[#allocation5 + $0x7a4] sm:$0xf]  ;;  %v9369_v24 = vld [vmem:[#allocation5 + $0x7b0] sm:$0xf0]  ;;  %6838 = vmatmul.bf16.vlgmr.msra.gmra.mxu3 %v13906_v20  ;;  %v9244_v27 = vor.u32 %v12825_v9, %v9241_v14 }
 0x142   :  { %6882 = vmatpush.bf16.msrb.mxu3 %v9404_v57  ;;  %v12757_v36 = vld [vmem:[#allocation5 + $0x484] sm:$0xf]  ;;  %v8969_v39 = vld [vmem:[#allocation5 + $0x490] sm:$0xf0]  ;;  %v9372_v43 = vor.u32 %v12857_v15, %v9369_v24  ;;  %v6593_v57 = vadd.f32 %v6592_v52, %v14007_v32 }
 0x143   :  { %6844 = vmatpush.bf16.msrb.mxu0 %v9004_v62  ;;  %v12789_v40 = vld [vmem:[#allocation5 + $0x584] sm:$0xf]  ;;  %v9097_v47 = vld [vmem:[#allocation5 + $0x590] sm:$0xf0]  ;;  %v8972_v58 = vor.u32 %v12757_v36, %v8969_v39  ;;  %v6618_v36 = vpop.f32.mrf.mxu2 }
 0x144   :  { %6857 = vmatpush.bf16.msrb.mxu1 %v9132_v63  ;;  %v12821_v50 = vld [vmem:[#allocation5 + $0x684] sm:$0xf]  ;;  %v9225_v51 = vld [vmem:[#allocation5 + $0x690] sm:$0xf0]  ;;  %v9100_v21 = vor.u32 %v12789_v40, %v9097_v47  ;;  %v6606_v2 = vadd.f32 %v6605_v59, %v6593_v57 }
 0x145   :  { %6870 = vmatpush.bf16.msrb.mxu2 %v9260_v0  ;;  %v12853_v56 = vld [vmem:[#allocation5 + $0x784] sm:$0xf]  ;;  %v9353_v6 = vld [vmem:[#allocation5 + $0x790] sm:$0xf0]  ;;  %v9228_v61 = vor.u32 %v12821_v50, %v9225_v51  ;;  %v6631_v50 = vpop.f32.mrf.mxu3  ;;  %v6607_v57 = vpop.f32.mrf.mxu1 }
 0x146   :  { %6883 = vmatpush.bf16.msrb.mxu3 %v9388_v4  ;;  %v12753_v60 = vld [vmem:[#allocation5 + $0x464] sm:$0xf]  ;;  %v8953_v62 = vld [vmem:[#allocation5 + $0x470] sm:$0xf0]  ;;  %v9356_v0 = vor.u32 %v12853_v56, %v9353_v6  ;;  %v6619_v47 = vadd.f32 %v6618_v36, %v6606_v2  ;;  %v6594_v56 = vpop.f32.mrf.mxu0 }
 0x147   :  { %6845 = vmatpush.bf16.msrb.mxu0 %v8988_v48  ;;  %v12785_v63 = vld [vmem:[#allocation5 + $0x564] sm:$0xf]  ;;  %v9081_v1 = vld [vmem:[#allocation5 + $0x570] sm:$0xf0]  ;;  %v8956_v14 = vor.u32 %v12753_v60, %v8953_v62 }
 0x148   :  { %6858 = vmatpush.bf16.msrb.mxu1 %v9116_v26  ;;  %v12817_v3 = vld [vmem:[#allocation5 + $0x664] sm:$0xf]  ;;  %v9209_v4 = vld [vmem:[#allocation5 + $0x670] sm:$0xf0]  ;;  %v9084_v32 = vor.u32 %v12785_v63, %v9081_v1 }
 0x149   :  { %6871 = vmatpush.bf16.msrb.mxu2 %v9244_v27  ;;  %v12849_v8 = vld [vmem:[#allocation5 + $0x764] sm:$0xf]  ;;  %v9337_v9 = vld [vmem:[#allocation5 + $0x770] sm:$0xf0]  ;;  %v9212_v15 = vor.u32 %v12817_v3, %v9209_v4 }
 0x14a   :  { %6884 = vmatpush.bf16.msrb.mxu3 %v9372_v43  ;;  %v12749_v24 = vld [vmem:[#allocation5 + $0x444] sm:$0xf]  ;;  %v8937_v48 = vld [vmem:[#allocation5 + $0x450] sm:$0xf0]  ;;  %v9340_v27 = vor.u32 %v12849_v8, %v9337_v9 }
 0x14b   :  { %6846 = vmatpush.bf16.msrb.mxu0 %v8972_v58  ;;  %v12781_v26 = vld [vmem:[#allocation5 + $0x544] sm:$0xf]  ;;  %v9065_v39 = vld [vmem:[#allocation5 + $0x550] sm:$0xf0]  ;;  %v8940_v6 = vor.u32 %v12749_v24, %v8937_v48  ;;  %v14014_v58 = vadd.f32 %v6631_v50, %v6619_v47 }
 0x14c   :  { %6859 = vmatpush.bf16.msrb.mxu1 %v9100_v21  ;;  %v12813_v40 = vld [vmem:[#allocation5 + $0x644] sm:$0xf]  ;;  %v9193_v43 = vld [vmem:[#allocation5 + $0x650] sm:$0xf0]  ;;  %v9068_v59 = vor.u32 %v12781_v26, %v9065_v39 }
 0x14d   :  { %6872 = vmatpush.bf16.msrb.mxu2 %v9228_v61  ;;  %v12845_v51 = vld [vmem:[#allocation5 + $0x744] sm:$0xf]  ;;  %v9321_v52 = vld [vmem:[#allocation5 + $0x750] sm:$0xf0]  ;;  %v9196_v21 = vor.u32 %v12813_v40, %v9193_v43  ;;  %v6620_v43 = vpop.f32.mrf.mxu2 }
 0x14e   :  { %6885 = vmatpush.bf16.msrb.mxu3 %v9356_v0  ;;  %v12745_v61 = vld [vmem:[#allocation5 + $0x424] sm:$0xf]  ;;  %v8921_v60 = vld [vmem:[#allocation5 + $0x430] sm:$0xf0]  ;;  %v9324_v63 = vor.u32 %v12845_v51, %v9321_v52  ;;  %v6633_v52 = vpop.f32.mrf.mxu3 }
 0x14f   :  { %6847 = vmatpush.bf16.msrb.mxu0 %v8956_v14  ;;  %v12777_v62 = vld [vmem:[#allocation5 + $0x524] sm:$0xf]  ;;  %v9049_v0 = vld [vmem:[#allocation5 + $0x530] sm:$0xf0]  ;;  %v8924_v8 = vor.u32 %v12745_v61, %v8921_v60 }
 0x150   :  { %6860 = vmatpush.bf16.msrb.mxu1 %v9084_v32  ;;  %v12809_v2 = vld [vmem:[#allocation5 + $0x624] sm:$0xf]  ;;  %v9177_v1 = vld [vmem:[#allocation5 + $0x630] sm:$0xf0]  ;;  %v9052_v32 = vor.u32 %v12777_v62, %v9049_v0 }
 0x151   :  { %6873 = vmatpush.bf16.msrb.mxu2 %v9212_v15  ;;  %v12841_v3 = vld [vmem:[#allocation5 + $0x724] sm:$0xf]  ;;  %v9305_v4 = vld [vmem:[#allocation5 + $0x730] sm:$0xf0]  ;;  %v9180_v15 = vor.u32 %v12809_v2, %v9177_v1 }
 0x152   :  { %6886 = vmatpush.bf16.msrb.mxu3 %v9340_v27  ;;  %v12741_v9 = vld [vmem:[#allocation5 + $0x404] sm:$0xf]  ;;  %v8905_v14 = vld [vmem:[#allocation5 + $0x410] sm:$0xf0]  ;;  %v9308_v36 = vor.u32 %v12841_v3, %v9305_v4 }
 0x153   :  { %6848 = vmatpush.bf16.msrb.mxu0 %v8940_v6  ;;  %v12773_v24 = vld [vmem:[#allocation5 + $0x504] sm:$0xf]  ;;  %v9033_v48 = vld [vmem:[#allocation5 + $0x510] sm:$0xf0]  ;;  %v8908_v56 = vor.u32 %v12741_v9, %v8905_v14 }
 0x154   :  { %6861 = vmatpush.bf16.msrb.mxu1 %v9068_v59  ;;  %v12805_v26 = vld [vmem:[#allocation5 + $0x604] sm:$0xf]  ;;  %v9161_v27 = vld [vmem:[#allocation5 + $0x610] sm:$0xf0] }
 0x155   :  { %6874 = vmatpush.bf16.msrb.mxu2 %v9196_v21  ;;  %v12837_v39 = vld [vmem:[#allocation5 + $0x704] sm:$0xf]  ;;  %v9289_v40 = vld [vmem:[#allocation5 + $0x710] sm:$0xf0]  ;;  %v9036_v21 = vor.u32 %v12773_v24, %v9033_v48  ;;  %v9164_v61 = vor.u32 %v12805_v26, %v9161_v27 }
 0x156   :  { %6887 = vmatpush.bf16.msrb.mxu3 %v9324_v63  ;;  %v12897_v47 = vld [vmem:[#allocation5 + $0x8e4] sm:$0xf]  ;;  %v9529_v50 = vld [vmem:[#allocation5 + $0x8f0] sm:$0xf0]  ;;  %v9292_v63 = vor.u32 %v12837_v39, %v9289_v40 }
 0x157   :  { %v12929_v51 = vld [vmem:[#allocation5 + $0x9e4] sm:$0xf]  ;;  %6849 = vmatpush.bf16.msrb.mxu0 %v8924_v8  ;;  %v9657_v6 = vld [vmem:[#allocation5 + $0x9f0] sm:$0xf0]  ;;  %v9532_v0 = vor.u32 %v12897_v47, %v9529_v50 }
 0x158   :  { %v12961_v57 = vld [vmem:[#allocation5 + $0xae4] sm:$0xf]  ;;  %v9785_v59 = vld [vmem:[#allocation5 + $0xaf0] sm:$0xf0]  ;;  %6862 = vmatpush.bf16.msrb.mxu1 %v9052_v32  ;;  %v9660_v2 = vor.u32 %v12929_v51, %v9657_v6 }
 0x159   :  { %6875 = vmatpush.bf16.msrb.mxu2 %v9180_v15  ;;  %v12993_v60 = vld [vmem:[#allocation5 + $0xbe4] sm:$0xf]  ;;  %v9913_v62 = vld [vmem:[#allocation5 + $0xbf0] sm:$0xf0]  ;;  %v9788_v1 = vor.u32 %v12961_v57, %v9785_v59 }
 0x15a   :  { %6888 = vmatpush.bf16.msrb.mxu3 %v9308_v36  ;;  %v12893_v3 = vld [vmem:[#allocation5 + $0x8c4] sm:$0xf]  ;;  %v9513_v4 = vld [vmem:[#allocation5 + $0x8d0] sm:$0xf0]  ;;  %v9916_v8 = vor.u32 %v12993_v60, %v9913_v62 }
 0x15b   :  { %v12925_v43 = vld [vmem:[#allocation5 + $0x9c4] sm:$0xf]  ;;  %6850 = vmatpush.bf16.msrb.mxu0 %v8908_v56  ;;  %v9641_v9 = vld [vmem:[#allocation5 + $0x9d0] sm:$0xf0]  ;;  %v9516_v24 = vor.u32 %v12893_v3, %v9513_v4  ;;  %v6644_v3 = vpop.f32.mrf.mxu0 }
 0x15c   :  { %v12957_v14 = vld [vmem:[#allocation5 + $0xac4] sm:$0xf]  ;;  %v9769_v52 = vld [vmem:[#allocation5 + $0xad0] sm:$0xf0]  ;;  %6863 = vmatpush.bf16.msrb.mxu1 %v9036_v21  ;;  %v9644_v48 = vor.u32 %v12925_v43, %v9641_v9 }
 0x15d   :  { %6876 = vmatpush.bf16.msrb.mxu2 %v9164_v61  ;;  %v12989_v32 = vld [vmem:[#allocation5 + $0xbc4] sm:$0xf]  ;;  %v9897_v15 = vld [vmem:[#allocation5 + $0xbd0] sm:$0xf0]  ;;  %v9772_v26 = vor.u32 %v12957_v14, %v9769_v52  ;;  %v6657_v14 = vpop.f32.mrf.mxu1 }
 0x15e   :  { %6889 = vmatpush.bf16.msrb.mxu3 %v9292_v63  ;;  %v12889_v36 = vld [vmem:[#allocation5 + $0x8a4] sm:$0xf]  ;;  %v9497_v27 = vld [vmem:[#allocation5 + $0x8b0] sm:$0xf0]  ;;  %v9900_v40 = vor.u32 %v12989_v32, %v9897_v15  ;;  %6851 = vmatmul.bf16.vlgmr.msrb.gmra.mxu0 %v13916_v41 }
 0x15f   :  { %6895 = vmatpush.bf16.msra.mxu0 %v9532_v0  ;;  %v12921_v39 = vld [vmem:[#allocation5 + $0x9a4] sm:$0xf]  ;;  %v9625_v47 = vld [vmem:[#allocation5 + $0x9b0] sm:$0xf0]  ;;  %v9500_v57 = vor.u32 %v12889_v36, %v9497_v27  ;;  %6864 = vmatmul.bf16.vlgmr.msrb.gmra.mxu1 %v13920_v44 }
 0x160   :  { %6908 = vmatpush.bf16.msra.mxu1 %v9660_v2  ;;  %6877 = vmatmul.bf16.vlgmr.msrb.gmra.mxu2 %v13914_v38  ;;  %v12953_v50 = vld [vmem:[#allocation5 + $0xaa4] sm:$0xf]  ;;  %v9753_v51 = vld [vmem:[#allocation5 + $0xab0] sm:$0xf0]  ;;  %v9628_v59 = vor.u32 %v12921_v39, %v9625_v47 }
 0x161   :  { %6921 = vmatpush.bf16.msra.mxu2 %v9788_v1  ;;  %v12985_v56 = vld [vmem:[#allocation5 + $0xba4] sm:$0xf]  ;;  %v9881_v6 = vld [vmem:[#allocation5 + $0xbb0] sm:$0xf0]  ;;  %6890 = vmatmul.bf16.vlgmr.msrb.gmra.mxu3 %v13918_v42  ;;  %v9756_v21 = vor.u32 %v12953_v50, %v9753_v51 }
 0x162   :  { %6934 = vmatpush.bf16.msra.mxu3 %v9916_v8  ;;  %v12885_v61 = vld [vmem:[#allocation5 + $0x884] sm:$0xf]  ;;  %v9481_v60 = vld [vmem:[#allocation5 + $0x890] sm:$0xf0]  ;;  %v9884_v63 = vor.u32 %v12985_v56, %v9881_v6  ;;  %v6645_v8 = vadd.f32 %v6644_v3, %v14014_v58 }
 0x163   :  { %6896 = vmatpush.bf16.msra.mxu0 %v9516_v24  ;;  %v12917_v62 = vld [vmem:[#allocation5 + $0x984] sm:$0xf]  ;;  %v9609_v0 = vld [vmem:[#allocation5 + $0x990] sm:$0xf0]  ;;  %v9484_v9 = vor.u32 %v12885_v61, %v9481_v60  ;;  %v6670_v61 = vpop.f32.mrf.mxu2 }
 0x164   :  { %6909 = vmatpush.bf16.msra.mxu1 %v9644_v48  ;;  %v12949_v2 = vld [vmem:[#allocation5 + $0xa84] sm:$0xf]  ;;  %v9737_v1 = vld [vmem:[#allocation5 + $0xa90] sm:$0xf0]  ;;  %v9612_v52 = vor.u32 %v12917_v62, %v9609_v0  ;;  %v6658_v36 = vadd.f32 %v6657_v14, %v6645_v8 }
 0x165   :  { %6922 = vmatpush.bf16.msra.mxu2 %v9772_v26  ;;  %v12981_v4 = vld [vmem:[#allocation5 + $0xb84] sm:$0xf]  ;;  %v9865_v43 = vld [vmem:[#allocation5 + $0xb90] sm:$0xf0]  ;;  %v9740_v32 = vor.u32 %v12949_v2, %v9737_v1  ;;  %v6683_v2 = vpop.f32.mrf.mxu3  ;;  %v6659_v8 = vpop.f32.mrf.mxu1 }
 0x166   :  { %6935 = vmatpush.bf16.msra.mxu3 %v9900_v40  ;;  %v12881_v15 = vld [vmem:[#allocation5 + $0x864] sm:$0xf]  ;;  %v9465_v24 = vld [vmem:[#allocation5 + $0x870] sm:$0xf0]  ;;  %v9868_v26 = vor.u32 %v12981_v4, %v9865_v43  ;;  %v6671_v0 = vadd.f32 %v6670_v61, %v6658_v36  ;;  %v6646_v4 = vpop.f32.mrf.mxu0 }
 0x167   :  { %6897 = vmatpush.bf16.msra.mxu0 %v9500_v57  ;;  %v12913_v48 = vld [vmem:[#allocation5 + $0x964] sm:$0xf]  ;;  %v9593_v27 = vld [vmem:[#allocation5 + $0x970] sm:$0xf0]  ;;  %v9468_v51 = vor.u32 %v12881_v15, %v9465_v24 }
 0x168   :  { %6910 = vmatpush.bf16.msra.mxu1 %v9628_v59  ;;  %v12945_v39 = vld [vmem:[#allocation5 + $0xa64] sm:$0xf]  ;;  %v9721_v40 = vld [vmem:[#allocation5 + $0xa70] sm:$0xf0]  ;;  %v9596_v58 = vor.u32 %v12913_v48, %v9593_v27 }
 0x169   :  { %6923 = vmatpush.bf16.msra.mxu2 %v9756_v21  ;;  %v12977_v47 = vld [vmem:[#allocation5 + $0xb64] sm:$0xf]  ;;  %v9849_v50 = vld [vmem:[#allocation5 + $0xb70] sm:$0xf0]  ;;  %v9724_v56 = vor.u32 %v12945_v39, %v9721_v40 }
 0x16a   :  { %6936 = vmatpush.bf16.msra.mxu3 %v9884_v63  ;;  %v12877_v6 = vld [vmem:[#allocation5 + $0x844] sm:$0xf]  ;;  %v9449_v57 = vld [vmem:[#allocation5 + $0x850] sm:$0xf0]  ;;  %v9852_v21 = vor.u32 %v12977_v47, %v9849_v50 }
 0x16b   :  { %6898 = vmatpush.bf16.msra.mxu0 %v9484_v9  ;;  %v12909_v59 = vld [vmem:[#allocation5 + $0x944] sm:$0xf]  ;;  %v9577_v60 = vld [vmem:[#allocation5 + $0x950] sm:$0xf0]  ;;  %v9452_v43 = vor.u32 %v12877_v6, %v9449_v57  ;;  %v14021_v9 = vadd.f32 %v6683_v2, %v6671_v0 }
 0x16c   :  { %6911 = vmatpush.bf16.msra.mxu1 %v9612_v52  ;;  %v12941_v62 = vld [vmem:[#allocation5 + $0xa44] sm:$0xf]  ;;  %v9705_v63 = vld [vmem:[#allocation5 + $0xa50] sm:$0xf0]  ;;  %v9580_v14 = vor.u32 %v12909_v59, %v9577_v60 }
 0x16d   :  { %6924 = vmatpush.bf16.msra.mxu2 %v9740_v32  ;;  %v12973_v1 = vld [vmem:[#allocation5 + $0xb44] sm:$0xf]  ;;  %v9833_v3 = vld [vmem:[#allocation5 + $0xb50] sm:$0xf0]  ;;  %v9708_v52 = vor.u32 %v12941_v62, %v9705_v63  ;;  %v6672_v63 = vpop.f32.mrf.mxu2 }
 0x16e   :  { %6937 = vmatpush.bf16.msra.mxu3 %v9868_v26  ;;  %v12873_v32 = vld [vmem:[#allocation5 + $0x824] sm:$0xf]  ;;  %v9433_v15 = vld [vmem:[#allocation5 + $0x830] sm:$0xf0]  ;;  %v9836_v48 = vor.u32 %v12973_v1, %v9833_v3  ;;  %v6685_v3 = vpop.f32.mrf.mxu3 }
 0x16f   :  { %6899 = vmatpush.bf16.msra.mxu0 %v9468_v51  ;;  %v12905_v24 = vld [vmem:[#allocation5 + $0x924] sm:$0xf]  ;;  %v9561_v26 = vld [vmem:[#allocation5 + $0x930] sm:$0xf0]  ;;  %v9436_v47 = vor.u32 %v12873_v32, %v9433_v15 }
 0x170   :  { %6912 = vmatpush.bf16.msra.mxu1 %v9596_v58  ;;  %v12937_v36 = vld [vmem:[#allocation5 + $0xa24] sm:$0xf]  ;;  %v9689_v27 = vld [vmem:[#allocation5 + $0xa30] sm:$0xf0]  ;;  %v9564_v58 = vor.u32 %v12905_v24, %v9561_v26 }
 0x171   :  { %6925 = vmatpush.bf16.msra.mxu2 %v9724_v56  ;;  %v12969_v39 = vld [vmem:[#allocation5 + $0xb24] sm:$0xf]  ;;  %v9817_v40 = vld [vmem:[#allocation5 + $0xb30] sm:$0xf0]  ;;  %v9692_v56 = vor.u32 %v12937_v36, %v9689_v27 }
 0x172   :  { %6938 = vmatpush.bf16.msra.mxu3 %v9852_v21  ;;  %v12869_v50 = vld [vmem:[#allocation5 + $0x804] sm:$0xf]  ;;  %v9417_v51 = vld [vmem:[#allocation5 + $0x810] sm:$0xf0]  ;;  %v9820_v61 = vor.u32 %v12969_v39, %v9817_v40 }
 0x173   :  { %6900 = vmatpush.bf16.msra.mxu0 %v9452_v43  ;;  %v12901_v6 = vld [vmem:[#allocation5 + $0x904] sm:$0xf]  ;;  %v9545_v57 = vld [vmem:[#allocation5 + $0x910] sm:$0xf0]  ;;  %v9420_v4 = vor.u32 %v12869_v50, %v9417_v51 }
 0x174   :  { %6913 = vmatpush.bf16.msra.mxu1 %v9580_v14  ;;  %v12933_v59 = vld [vmem:[#allocation5 + $0xa04] sm:$0xf]  ;;  %v9673_v21 = vld [vmem:[#allocation5 + $0xa10] sm:$0xf0] }
 0x175   :  { %6926 = vmatpush.bf16.msra.mxu2 %v9708_v52  ;;  %v12965_v60 = vld [vmem:[#allocation5 + $0xb04] sm:$0xf]  ;;  %v9801_v62 = vld [vmem:[#allocation5 + $0xb10] sm:$0xf0]  ;;  %v9548_v52 = vor.u32 %v12901_v6, %v9545_v57  ;;  %v9676_v32 = vor.u32 %v12933_v59, %v9673_v21 }
 0x176   :  { %6939 = vmatpush.bf16.msra.mxu3 %v9836_v48  ;;  %v13025_v0 = vld [vmem:[#allocation5 + $0xce4] sm:$0xf]  ;;  %v10041_v2 = vld [vmem:[#allocation5 + $0xcf0] sm:$0xf0]  ;;  %v9804_v48 = vor.u32 %v12965_v60, %v9801_v62 }
 0x177   :  { %v13057_v1 = vld [vmem:[#allocation5 + $0xde4] sm:$0xf]  ;;  %6901 = vmatpush.bf16.msra.mxu0 %v9436_v47  ;;  %v10169_v43 = vld [vmem:[#allocation5 + $0xdf0] sm:$0xf0]  ;;  %v10044_v26 = vor.u32 %v13025_v0, %v10041_v2 }
 0x178   :  { %v13089_v8 = vld [vmem:[#allocation5 + $0xee4] sm:$0xf]  ;;  %v10297_v14 = vld [vmem:[#allocation5 + $0xef0] sm:$0xf0]  ;;  %6914 = vmatpush.bf16.msra.mxu1 %v9564_v58  ;;  %v10172_v36 = vor.u32 %v13057_v1, %v10169_v43 }
 0x179   :  { %6927 = vmatpush.bf16.msra.mxu2 %v9692_v56  ;;  %v13121_v15 = vld [vmem:[#allocation5 + $0xfe4] sm:$0xf]  ;;  %v10425_v24 = vld [vmem:[#allocation5 + $0xff0] sm:$0xf0]  ;;  %v10300_v27 = vor.u32 %v13089_v8, %v10297_v14 }
 0x17a   :  { %6940 = vmatpush.bf16.msra.mxu3 %v9820_v61  ;;  %v13021_v39 = vld [vmem:[#allocation5 + $0xcc4] sm:$0xf]  ;;  %v10025_v40 = vld [vmem:[#allocation5 + $0xcd0] sm:$0xf0]  ;;  %v10428_v47 = vor.u32 %v13121_v15, %v10425_v24 }
 0x17b   :  { %v13053_v63 = vld [vmem:[#allocation5 + $0xdc4] sm:$0xf]  ;;  %6902 = vmatpush.bf16.msra.mxu0 %v9420_v4  ;;  %v10153_v50 = vld [vmem:[#allocation5 + $0xdd0] sm:$0xf0]  ;;  %v10028_v6 = vor.u32 %v13021_v39, %v10025_v40 }
 0x17c   :  { %v13085_v51 = vld [vmem:[#allocation5 + $0xec4] sm:$0xf]  ;;  %v10281_v3 = vld [vmem:[#allocation5 + $0xed0] sm:$0xf0]  ;;  %6915 = vmatpush.bf16.msra.mxu1 %v9548_v52  ;;  %v10156_v57 = vor.u32 %v13053_v63, %v10153_v50 }
 0x17d   :  { %6928 = vmatpush.bf16.msra.mxu2 %v9676_v32  ;;  %v13117_v58 = vld [vmem:[#allocation5 + $0xfc4] sm:$0xf]  ;;  %v10409_v56 = vld [vmem:[#allocation5 + $0xfd0] sm:$0xf0]  ;;  %v10284_v59 = vor.u32 %v13085_v51, %v10281_v3  ;;  %v6696_v39 = vpop.f32.mrf.mxu0 }
 0x17e   :  { %6941 = vmatpush.bf16.msra.mxu3 %v9804_v48  ;;  %v13017_v61 = vld [vmem:[#allocation5 + $0xca4] sm:$0xf]  ;;  %v10009_v21 = vld [vmem:[#allocation5 + $0xcb0] sm:$0xf0]  ;;  %6903 = vmatmul.bf16.vlgmr.msra.gmra.mxu0 %v13926_v25  ;;  %v10412_v62 = vor.u32 %v13117_v58, %v10409_v56  ;;  %v6709_v51 = vpop.f32.mrf.mxu1 }
 0x17f   :  { %6947 = vmatpush.bf16.msrb.mxu0 %v10044_v26  ;;  %v13049_v60 = vld [vmem:[#allocation5 + $0xda4] sm:$0xf]  ;;  %v10137_v0 = vld [vmem:[#allocation5 + $0xdb0] sm:$0xf0]  ;;  %6916 = vmatmul.bf16.vlgmr.msra.gmra.mxu1 %v13930_v30  ;;  %v10012_v8 = vor.u32 %v13017_v61, %v10009_v21 }
 0x180   :  { %6960 = vmatpush.bf16.msrb.mxu1 %v10172_v36  ;;  %v13081_v2 = vld [vmem:[#allocation5 + $0xea4] sm:$0xf]  ;;  %v10265_v1 = vld [vmem:[#allocation5 + $0xeb0] sm:$0xf0]  ;;  %6929 = vmatmul.bf16.vlgmr.msra.gmra.mxu2 %v13928_v29  ;;  %v10140_v14 = vor.u32 %v13049_v60, %v10137_v0 }
 0x181   :  { %6973 = vmatpush.bf16.msrb.mxu2 %v10300_v27  ;;  %v13113_v4 = vld [vmem:[#allocation5 + $0xfa4] sm:$0xf]  ;;  %v10393_v43 = vld [vmem:[#allocation5 + $0xfb0] sm:$0xf0]  ;;  %6942 = vmatmul.bf16.vlgmr.msra.gmra.mxu3 %v13932_v33  ;;  %v10268_v52 = vor.u32 %v13081_v2, %v10265_v1 }
 0x182   :  { %6986 = vmatpush.bf16.msrb.mxu3 %v10428_v47  ;;  %v13013_v32 = vld [vmem:[#allocation5 + $0xc84] sm:$0xf]  ;;  %v9993_v15 = vld [vmem:[#allocation5 + $0xc90] sm:$0xf0]  ;;  %v10396_v48 = vor.u32 %v13113_v4, %v10393_v43  ;;  %v6697_v47 = vadd.f32 %v6696_v39, %v14021_v9 }
 0x183   :  { %6948 = vmatpush.bf16.msrb.mxu0 %v10028_v6  ;;  %v13045_v24 = vld [vmem:[#allocation5 + $0xd84] sm:$0xf]  ;;  %v10121_v26 = vld [vmem:[#allocation5 + $0xd90] sm:$0xf0]  ;;  %v9996_v50 = vor.u32 %v13013_v32, %v9993_v15  ;;  %v6722_v32 = vpop.f32.mrf.mxu2 }
 0x184   :  { %6961 = vmatpush.bf16.msrb.mxu1 %v10156_v57  ;;  %v13077_v36 = vld [vmem:[#allocation5 + $0xe84] sm:$0xf]  ;;  %v10249_v27 = vld [vmem:[#allocation5 + $0xe90] sm:$0xf0]  ;;  %v10124_v3 = vor.u32 %v13045_v24, %v10121_v26  ;;  %v6710_v61 = vadd.f32 %v6709_v51, %v6697_v47 }
 0x185   :  { %6974 = vmatpush.bf16.msrb.mxu2 %v10284_v59  ;;  %v13109_v40 = vld [vmem:[#allocation5 + $0xf84] sm:$0xf]  ;;  %v10377_v63 = vld [vmem:[#allocation5 + $0xf90] sm:$0xf0]  ;;  %v10252_v58 = vor.u32 %v13077_v36, %v10249_v27 }
 0x186   :  { %6987 = vmatpush.bf16.msrb.mxu3 %v10412_v62  ;;  %v13009_v56 = vld [vmem:[#allocation5 + $0xc64] sm:$0xf]  ;;  %v9977_v6 = vld [vmem:[#allocation5 + $0xc70] sm:$0xf0]  ;;  %v10380_v59 = vor.u32 %v13109_v40, %v10377_v63  ;;  %v6723_v26 = vadd.f32 %v6722_v32, %v6710_v61  ;;  %v6735_v36 = vpop.f32.mrf.mxu3  ;;  %v6698_v40 = vpop.f32.mrf.mxu0 }
 0x187   :  { %6949 = vmatpush.bf16.msrb.mxu0 %v10012_v8  ;;  %v13041_v57 = vld [vmem:[#allocation5 + $0xd64] sm:$0xf]  ;;  %v10105_v21 = vld [vmem:[#allocation5 + $0xd70] sm:$0xf0]  ;;  %v9980_v1 = vor.u32 %v13009_v56, %v9977_v6  ;;  %v6711_v47 = vpop.f32.mrf.mxu1 }
 0x188   :  { %6962 = vmatpush.bf16.msrb.mxu1 %v10140_v14  ;;  %v13073_v60 = vld [vmem:[#allocation5 + $0xe64] sm:$0xf]  ;;  %v10233_v62 = vld [vmem:[#allocation5 + $0xe70] sm:$0xf0]  ;;  %v10108_v9 = vor.u32 %v13041_v57, %v10105_v21 }
 0x189   :  { %6975 = vmatpush.bf16.msrb.mxu2 %v10268_v52  ;;  %v13105_v0 = vld [vmem:[#allocation5 + $0xf64] sm:$0xf]  ;;  %v10361_v2 = vld [vmem:[#allocation5 + $0xf70] sm:$0xf0]  ;;  %v10236_v4 = vor.u32 %v13073_v60, %v10233_v62 }
 0x18a   :  { %6988 = vmatpush.bf16.msrb.mxu3 %v10396_v48  ;;  %v13005_v43 = vld [vmem:[#allocation5 + $0xc44] sm:$0xf]  ;;  %v9961_v8 = vld [vmem:[#allocation5 + $0xc50] sm:$0xf0]  ;;  %v10364_v52 = vor.u32 %v13105_v0, %v10361_v2 }
 0x18b   :  { %6950 = vmatpush.bf16.msrb.mxu0 %v9996_v50  ;;  %v13037_v14 = vld [vmem:[#allocation5 + $0xd44] sm:$0xf]  ;;  %v10089_v15 = vld [vmem:[#allocation5 + $0xd50] sm:$0xf0]  ;;  %v9964_v63 = vor.u32 %v13005_v43, %v9961_v8  ;;  %v14028_v50 = vadd.f32 %v6735_v36, %v6723_v26 }
 0x18c   :  { %6963 = vmatpush.bf16.msrb.mxu1 %v10124_v3  ;;  %v13069_v24 = vld [vmem:[#allocation5 + $0xe44] sm:$0xf]  ;;  %v10217_v48 = vld [vmem:[#allocation5 + $0xe50] sm:$0xf0]  ;;  %v10092_v51 = vor.u32 %v13037_v14, %v10089_v15 }
 0x18d   :  { %6976 = vmatpush.bf16.msrb.mxu2 %v10252_v58  ;;  %v13101_v27 = vld [vmem:[#allocation5 + $0xf44] sm:$0xf]  ;;  %v10345_v39 = vld [vmem:[#allocation5 + $0xf50] sm:$0xf0]  ;;  %v10220_v3 = vor.u32 %v13069_v24, %v10217_v48  ;;  %v6724_v48 = vpop.f32.mrf.mxu2 }
 0x18e   :  { %6989 = vmatpush.bf16.msrb.mxu3 %v10380_v59  ;;  %v13001_v58 = vld [vmem:[#allocation5 + $0xc24] sm:$0xf]  ;;  %v9945_v56 = vld [vmem:[#allocation5 + $0xc30] sm:$0xf0]  ;;  %v10348_v57 = vor.u32 %v13101_v27, %v10345_v39  ;;  %v6737_v39 = vpop.f32.mrf.mxu3 }
 0x18f   :  { %6951 = vmatpush.bf16.msrb.mxu0 %v9980_v1  ;;  %v13033_v6 = vld [vmem:[#allocation5 + $0xd24] sm:$0xf]  ;;  %v10073_v59 = vld [vmem:[#allocation5 + $0xd30] sm:$0xf0]  ;;  %v9948_v0 = vor.u32 %v13001_v58, %v9945_v56 }
 0x190   :  { %6964 = vmatpush.bf16.msrb.mxu1 %v10108_v9  ;;  %v13065_v61 = vld [vmem:[#allocation5 + $0xe24] sm:$0xf]  ;;  %v10201_v21 = vld [vmem:[#allocation5 + $0xe30] sm:$0xf0]  ;;  %v10076_v9 = vor.u32 %v13033_v6, %v10073_v59 }
 0x191   :  { %6977 = vmatpush.bf16.msrb.mxu2 %v10236_v4  ;;  %v13097_v60 = vld [vmem:[#allocation5 + $0xf24] sm:$0xf]  ;;  %v10329_v62 = vld [vmem:[#allocation5 + $0xf30] sm:$0xf0]  ;;  %v10204_v4 = vor.u32 %v13065_v61, %v10201_v21 }
 0x192   :  { %6990 = vmatpush.bf16.msrb.mxu3 %v10364_v52  ;;  %v12997_v2 = vld [vmem:[#allocation5 + $0xc04] sm:$0xf]  ;;  %v9929_v1 = vld [vmem:[#allocation5 + $0xc10] sm:$0xf0]  ;;  %v10332_v32 = vor.u32 %v13097_v60, %v10329_v62 }
 0x193   :  { %6952 = vmatpush.bf16.msrb.mxu0 %v9964_v63  ;;  %v13029_v43 = vld [vmem:[#allocation5 + $0xd04] sm:$0xf]  ;;  %v10057_v8 = vld [vmem:[#allocation5 + $0xd10] sm:$0xf0]  ;;  %v9932_v40 = vor.u32 %v12997_v2, %v9929_v1 }
 0x194   :  { %6965 = vmatpush.bf16.msrb.mxu1 %v10092_v51  ;;  %v13061_v14 = vld [vmem:[#allocation5 + $0xe04] sm:$0xf]  ;;  %v10185_v52 = vld [vmem:[#allocation5 + $0xe10] sm:$0xf0] }
 0x195   :  { %6978 = vmatpush.bf16.msrb.mxu2 %v10220_v3  ;;  %v13093_v15 = vld [vmem:[#allocation5 + $0xf04] sm:$0xf]  ;;  %v10313_v24 = vld [vmem:[#allocation5 + $0xf10] sm:$0xf0]  ;;  %v10060_v3 = vor.u32 %v13029_v43, %v10057_v8  ;;  %v10188_v58 = vor.u32 %v13061_v14, %v10185_v52 }
 0x196   :  { %6991 = vmatpush.bf16.msrb.mxu3 %v10348_v57  ;;  %v13153_v26 = vld [vmem:[#allocation5 + $0x10e4] sm:$0xf]  ;;  %v10553_v36 = vld [vmem:[#allocation5 + $0x10f0] sm:$0xf0]  ;;  %v10316_v57 = vor.u32 %v13093_v15, %v10313_v24 }
 0x197   :  { %v13185_v27 = vld [vmem:[#allocation5 + $0x11e4] sm:$0xf]  ;;  %6953 = vmatpush.bf16.msrb.mxu0 %v9948_v0  ;;  %v10681_v63 = vld [vmem:[#allocation5 + $0x11f0] sm:$0xf0]  ;;  %v10556_v59 = vor.u32 %v13153_v26, %v10553_v36 }
 0x198   :  { %v13217_v47 = vld [vmem:[#allocation5 + $0x12e4] sm:$0xf]  ;;  %v10809_v51 = vld [vmem:[#allocation5 + $0x12f0] sm:$0xf0]  ;;  %6966 = vmatpush.bf16.msrb.mxu1 %v10076_v9  ;;  %v10684_v61 = vor.u32 %v13185_v27, %v10681_v63 }
 0x199   :  { %6979 = vmatpush.bf16.msrb.mxu2 %v10204_v4  ;;  %v13249_v56 = vld [vmem:[#allocation5 + $0x13e4] sm:$0xf]  ;;  %v10937_v6 = vld [vmem:[#allocation5 + $0x13f0] sm:$0xf0]  ;;  %v10812_v21 = vor.u32 %v13217_v47, %v10809_v51 }
 0x19a   :  { %6992 = vmatpush.bf16.msrb.mxu3 %v10332_v32  ;;  %v13149_v60 = vld [vmem:[#allocation5 + $0x10c4] sm:$0xf]  ;;  %v10537_v62 = vld [vmem:[#allocation5 + $0x10d0] sm:$0xf0]  ;;  %v10940_v0 = vor.u32 %v13249_v56, %v10937_v6 }
 0x19b   :  { %v13181_v48 = vld [vmem:[#allocation5 + $0x11c4] sm:$0xf]  ;;  %6954 = vmatpush.bf16.msrb.mxu0 %v9932_v40  ;;  %v10665_v2 = vld [vmem:[#allocation5 + $0x11d0] sm:$0xf0]  ;;  %v10540_v43 = vor.u32 %v13149_v60, %v10537_v62  ;;  %v6748_v60 = vpop.f32.mrf.mxu0 }
 0x19c   :  { %v13213_v1 = vld [vmem:[#allocation5 + $0x12c4] sm:$0xf]  ;;  %v10793_v39 = vld [vmem:[#allocation5 + $0x12d0] sm:$0xf0]  ;;  %6967 = vmatpush.bf16.msrb.mxu1 %v10060_v3  ;;  %v10668_v8 = vor.u32 %v13181_v48, %v10665_v2 }
 0x19d   :  { %6980 = vmatpush.bf16.msrb.mxu2 %v10188_v58  ;;  %v13245_v9 = vld [vmem:[#allocation5 + $0x13c4] sm:$0xf]  ;;  %v10921_v4 = vld [vmem:[#allocation5 + $0x13d0] sm:$0xf0]  ;;  %v10796_v14 = vor.u32 %v13213_v1, %v10793_v39  ;;  %v6761_v1 = vpop.f32.mrf.mxu1 }
 0x19e   :  { %6993 = vmatpush.bf16.msrb.mxu3 %v10316_v57  ;;  %v13145_v32 = vld [vmem:[#allocation5 + $0x10a4] sm:$0xf]  ;;  %v10521_v52 = vld [vmem:[#allocation5 + $0x10b0] sm:$0xf0]  ;;  %6955 = vmatmul.bf16.vlgmr.msrb.gmra.mxu0 %v13938_v23  ;;  %v10924_v24 = vor.u32 %v13245_v9, %v10921_v4 }
 0x19f   :  { %6999 = vmatpush.bf16.msra.mxu0 %v10556_v59  ;;  %v13177_v15 = vld [vmem:[#allocation5 + $0x11a4] sm:$0xf]  ;;  %v10649_v26 = vld [vmem:[#allocation5 + $0x11b0] sm:$0xf0]  ;;  %6968 = vmatmul.bf16.vlgmr.msrb.gmra.mxu1 %v13942_v31  ;;  %v10524_v47 = vor.u32 %v13145_v32, %v10521_v52 }
 0x1a0   :  { %7012 = vmatpush.bf16.msra.mxu1 %v10684_v61  ;;  %v13209_v36 = vld [vmem:[#allocation5 + $0x12a4] sm:$0xf]  ;;  %v10777_v27 = vld [vmem:[#allocation5 + $0x12b0] sm:$0xf0]  ;;  %6981 = vmatmul.bf16.vlgmr.msrb.gmra.mxu2 %v13940_v28  ;;  %v10652_v51 = vor.u32 %v13177_v15, %v10649_v26 }
 0x1a1   :  { %7025 = vmatpush.bf16.msra.mxu2 %v10812_v21  ;;  %v13241_v40 = vld [vmem:[#allocation5 + $0x13a4] sm:$0xf]  ;;  %v10905_v63 = vld [vmem:[#allocation5 + $0x13b0] sm:$0xf0]  ;;  %6994 = vmatmul.bf16.vlgmr.msrb.gmra.mxu3 %v13944_v35  ;;  %v10780_v3 = vor.u32 %v13209_v36, %v10777_v27 }
 0x1a2   :  { %7038 = vmatpush.bf16.msra.mxu3 %v10940_v0  ;;  %v13141_v58 = vld [vmem:[#allocation5 + $0x1084] sm:$0xf]  ;;  %v10505_v56 = vld [vmem:[#allocation5 + $0x1090] sm:$0xf0]  ;;  %v10908_v57 = vor.u32 %v13241_v40, %v10905_v63  ;;  %v6749_v0 = vadd.f32 %v6748_v60, %v14028_v50 }
 0x1a3   :  { %7000 = vmatpush.bf16.msra.mxu0 %v10540_v43  ;;  %v13173_v6 = vld [vmem:[#allocation5 + $0x1184] sm:$0xf]  ;;  %v10633_v59 = vld [vmem:[#allocation5 + $0x1190] sm:$0xf0]  ;;  %v10508_v2 = vor.u32 %v13141_v58, %v10505_v56  ;;  %v6774_v58 = vpop.f32.mrf.mxu2 }
 0x1a4   :  { %7013 = vmatpush.bf16.msra.mxu1 %v10668_v8  ;;  %v13205_v61 = vld [vmem:[#allocation5 + $0x1284] sm:$0xf]  ;;  %v10761_v21 = vld [vmem:[#allocation5 + $0x1290] sm:$0xf0]  ;;  %v10636_v39 = vor.u32 %v13173_v6, %v10633_v59  ;;  %v6762_v32 = vadd.f32 %v6761_v1, %v6749_v0 }
 0x1a5   :  { %7026 = vmatpush.bf16.msra.mxu2 %v10796_v14  ;;  %v13237_v62 = vld [vmem:[#allocation5 + $0x1384] sm:$0xf]  ;;  %v10889_v48 = vld [vmem:[#allocation5 + $0x1390] sm:$0xf0]  ;;  %v10764_v9 = vor.u32 %v13205_v61, %v10761_v21  ;;  %v6787_v61 = vpop.f32.mrf.mxu3  ;;  %v6763_v0 = vpop.f32.mrf.mxu1 }
 0x1a6   :  { %7039 = vmatpush.bf16.msra.mxu3 %v10924_v24  ;;  %v13137_v4 = vld [vmem:[#allocation5 + $0x1064] sm:$0xf]  ;;  %v10489_v43 = vld [vmem:[#allocation5 + $0x1070] sm:$0xf0]  ;;  %v10892_v14 = vor.u32 %v13237_v62, %v10889_v48  ;;  %v6775_v59 = vadd.f32 %v6774_v58, %v6762_v32  ;;  %v6750_v62 = vpop.f32.mrf.mxu0 }
 0x1a7   :  { %7001 = vmatpush.bf16.msra.mxu0 %v10524_v47  ;;  %v13169_v8 = vld [vmem:[#allocation5 + $0x1164] sm:$0xf]  ;;  %v10617_v52 = vld [vmem:[#allocation5 + $0x1170] sm:$0xf0]  ;;  %v10492_v27 = vor.u32 %v13137_v4, %v10489_v43 }
 0x1a8   :  { %7014 = vmatpush.bf16.msra.mxu1 %v10652_v51  ;;  %v13201_v15 = vld [vmem:[#allocation5 + $0x1264] sm:$0xf]  ;;  %v10745_v24 = vld [vmem:[#allocation5 + $0x1270] sm:$0xf0]  ;;  %v10620_v50 = vor.u32 %v13169_v8, %v10617_v52 }
 0x1a9   :  { %7027 = vmatpush.bf16.msra.mxu2 %v10780_v3  ;;  %v13233_v26 = vld [vmem:[#allocation5 + $0x1364] sm:$0xf]  ;;  %v10873_v36 = vld [vmem:[#allocation5 + $0x1370] sm:$0xf0]  ;;  %v10748_v40 = vor.u32 %v13201_v15, %v10745_v24 }
 0x1aa   :  { %7040 = vmatpush.bf16.msra.mxu3 %v10908_v57  ;;  %v13133_v63 = vld [vmem:[#allocation5 + $0x1044] sm:$0xf]  ;;  %v10473_v47 = vld [vmem:[#allocation5 + $0x1050] sm:$0xf0]  ;;  %v10876_v3 = vor.u32 %v13233_v26, %v10873_v36 }
 0x1ab   :  { %7002 = vmatpush.bf16.msra.mxu0 %v10508_v2  ;;  %v13165_v51 = vld [vmem:[#allocation5 + $0x1144] sm:$0xf]  ;;  %v10601_v56 = vld [vmem:[#allocation5 + $0x1150] sm:$0xf0]  ;;  %v10476_v48 = vor.u32 %v13133_v63, %v10473_v47  ;;  %v14035_v2 = vadd.f32 %v6787_v61, %v6775_v59 }
 0x1ac   :  { %7015 = vmatpush.bf16.msra.mxu1 %v10636_v39  ;;  %v13197_v6 = vld [vmem:[#allocation5 + $0x1244] sm:$0xf]  ;;  %v10729_v57 = vld [vmem:[#allocation5 + $0x1250] sm:$0xf0]  ;;  %v10604_v1 = vor.u32 %v13165_v51, %v10601_v56 }
 0x1ad   :  { %7028 = vmatpush.bf16.msra.mxu2 %v10764_v9  ;;  %v13229_v21 = vld [vmem:[#allocation5 + $0x1344] sm:$0xf]  ;;  %v10857_v60 = vld [vmem:[#allocation5 + $0x1350] sm:$0xf0]  ;;  %14184 = vst [vmem:[#allocation16_spill] sm:$0xff] %v14035_v2  ;;  %v10732_v39 = vor.u32 %v13197_v6, %v10729_v57  ;;  %v6776_v57 = vpop.f32.mrf.mxu2 }
 0x1ae   :  { %7041 = vmatpush.bf16.msra.mxu3 %v10892_v14  ;;  %v13129_v9 = vld [vmem:[#allocation5 + $0x1024] sm:$0xf]  ;;  %v10457_v4 = vld [vmem:[#allocation5 + $0x1030] sm:$0xf0]  ;;  %v10860_v8 = vor.u32 %v13229_v21, %v10857_v60  ;;  %v6789_v60 = vpop.f32.mrf.mxu3 }
 0x1af   :  { %7003 = vmatpush.bf16.msra.mxu0 %v10492_v27  ;;  %v13161_v43 = vld [vmem:[#allocation5 + $0x1124] sm:$0xf]  ;;  %v10585_v14 = vld [vmem:[#allocation5 + $0x1130] sm:$0xf0]  ;;  %v10460_v26 = vor.u32 %v13129_v9, %v10457_v4 }
 0x1b0   :  { %7016 = vmatpush.bf16.msra.mxu1 %v10620_v50  ;;  %v13193_v32 = vld [vmem:[#allocation5 + $0x1224] sm:$0xf]  ;;  %v10713_v52 = vld [vmem:[#allocation5 + $0x1230] sm:$0xf0]  ;;  %v10588_v50 = vor.u32 %v13161_v43, %v10585_v14 }
 0x1b1   :  { %7029 = vmatpush.bf16.msra.mxu2 %v10748_v40  ;;  %v13225_v15 = vld [vmem:[#allocation5 + $0x1324] sm:$0xf]  ;;  %v10841_v24 = vld [vmem:[#allocation5 + $0x1330] sm:$0xf0]  ;;  %v10716_v40 = vor.u32 %v13193_v32, %v10713_v52 }
 0x1b2   :  { %7042 = vmatpush.bf16.msra.mxu3 %v10876_v3  ;;  %v13125_v36 = vld [vmem:[#allocation5 + $0x1004] sm:$0xf]  ;;  %v10441_v27 = vld [vmem:[#allocation5 + $0x1010] sm:$0xf0]  ;;  %v10844_v58 = vor.u32 %v13225_v15, %v10841_v24 }
 0x1b3   :  { %7004 = vmatpush.bf16.msra.mxu0 %v10476_v48  ;;  %v13157_v63 = vld [vmem:[#allocation5 + $0x1104] sm:$0xf]  ;;  %v10569_v47 = vld [vmem:[#allocation5 + $0x1110] sm:$0xf0]  ;;  %v10444_v62 = vor.u32 %v13125_v36, %v10441_v27 }
 0x1b4   :  { %7017 = vmatpush.bf16.msra.mxu1 %v10604_v1  ;;  %v13189_v51 = vld [vmem:[#allocation5 + $0x1204] sm:$0xf]  ;;  %v10697_v3 = vld [vmem:[#allocation5 + $0x1210] sm:$0xf0] }
 0x1b5   :  { %7030 = vmatpush.bf16.msra.mxu2 %v10732_v39  ;;  %v13221_v56 = vld [vmem:[#allocation5 + $0x1304] sm:$0xf]  ;;  %v10825_v6 = vld [vmem:[#allocation5 + $0x1310] sm:$0xf0]  ;;  %v10572_v39 = vor.u32 %v13157_v63, %v10569_v47  ;;  %v10700_v9 = vor.u32 %v13189_v51, %v10697_v3 }
 0x1b6   :  { %7043 = vmatpush.bf16.msra.mxu3 %v10860_v8  ;;  %v13281_v59 = vld [vmem:[#allocation5 + $0x14e4] sm:$0xf]  ;;  %v11065_v61 = vld [vmem:[#allocation5 + $0x14f0] sm:$0xf0]  ;;  %v10828_v8 = vor.u32 %v13221_v56, %v10825_v6 }
 0x1b7   :  { %v13313_v21 = vld [vmem:[#allocation5 + $0x15e4] sm:$0xf]  ;;  %7005 = vmatpush.bf16.msra.mxu0 %v10460_v26  ;;  %v11193_v48 = vld [vmem:[#allocation5 + $0x15f0] sm:$0xf0]  ;;  %v11068_v14 = vor.u32 %v13281_v59, %v11065_v61 }
 0x1b8   :  { %v13345_v0 = vld [vmem:[#allocation5 + $0x16e4] sm:$0xf]  ;;  %v11321_v1 = vld [vmem:[#allocation5 + $0x16f0] sm:$0xf0]  ;;  %7018 = vmatpush.bf16.msra.mxu1 %v10588_v50  ;;  %v11196_v32 = vor.u32 %v13313_v21, %v11193_v48 }
 0x1b9   :  { %7031 = vmatpush.bf16.msra.mxu2 %v10716_v40  ;;  %v13377_v4 = vld [vmem:[#allocation5 + $0x17e4] sm:$0xf]  ;;  %v11449_v43 = vld [vmem:[#allocation5 + $0x17f0] sm:$0xf0]  ;;  %v11324_v52 = vor.u32 %v13345_v0, %v11321_v1 }
 0x1ba   :  { %7044 = vmatpush.bf16.msra.mxu3 %v10844_v58  ;;  %v13277_v15 = vld [vmem:[#allocation5 + $0x14c4] sm:$0xf]  ;;  %v11049_v24 = vld [vmem:[#allocation5 + $0x14d0] sm:$0xf0]  ;;  %v11452_v26 = vor.u32 %v13377_v4, %v11449_v43 }
 0x1bb   :  { %v13309_v57 = vld [vmem:[#allocation5 + $0x15c4] sm:$0xf]  ;;  %7006 = vmatpush.bf16.msra.mxu0 %v10444_v62  ;;  %v11177_v36 = vld [vmem:[#allocation5 + $0x15d0] sm:$0xf0]  ;;  %v11052_v63 = vor.u32 %v13277_v15, %v11049_v24 }
 0x1bc   :  { %v13341_v27 = vld [vmem:[#allocation5 + $0x16c4] sm:$0xf]  ;;  %v11305_v60 = vld [vmem:[#allocation5 + $0x16d0] sm:$0xf0]  ;;  %7019 = vmatpush.bf16.msra.mxu1 %v10572_v39  ;;  %v11180_v47 = vor.u32 %v13309_v57, %v11177_v36 }
 0x1bd   :  { %7032 = vmatpush.bf16.msra.mxu2 %v10700_v9  ;;  %v13373_v50 = vld [vmem:[#allocation5 + $0x17c4] sm:$0xf]  ;;  %v11433_v40 = vld [vmem:[#allocation5 + $0x17d0] sm:$0xf0]  ;;  %v11308_v51 = vor.u32 %v13341_v27, %v11305_v60  ;;  %v6800_v27 = vpop.f32.mrf.mxu0 }
 0x1be   :  { %7045 = vmatpush.bf16.msra.mxu3 %v10828_v8  ;;  %v13273_v58 = vld [vmem:[#allocation5 + $0x14a4] sm:$0xf]  ;;  %v11033_v3 = vld [vmem:[#allocation5 + $0x14b0] sm:$0xf0]  ;;  %7007 = vmatmul.bf16.vlgmr.msra.gmra.mxu0 %v13950_v37  ;;  %v11436_v6 = vor.u32 %v13373_v50, %v11433_v40  ;;  %v13692_v8 = vld [vmem:[#allocation7] sm:$0xf] }
 0x1bf   :  { %7051 = vmatpush.bf16.msrb.mxu0 %v11068_v14  ;;  %v13305_v56 = vld [vmem:[#allocation5 + $0x15a4] sm:$0xf]  ;;  %v11161_v59 = vld [vmem:[#allocation5 + $0x15b0] sm:$0xf0]  ;;  %7020 = vmatmul.bf16.vlgmr.msra.gmra.mxu1 %v13954_v46  ;;  %v11036_v0 = vor.u32 %v13273_v58, %v11033_v3  ;;  %v1136_v14 = vperm.slane %v13692_v8, 1  ;;  %v6813_v58 = vpop.f32.mrf.mxu1 }
 0x1c0   :  { %7064 = vmatpush.bf16.msrb.mxu1 %v11196_v32  ;;  %v13337_v61 = vld [vmem:[#allocation5 + $0x16a4] sm:$0xf]  ;;  %v11289_v21 = vld [vmem:[#allocation5 + $0x16b0] sm:$0xf0]  ;;  %7033 = vmatmul.bf16.vlgmr.msra.gmra.mxu2 %v13952_v45  ;;  %v11164_v39 = vor.u32 %v13305_v56, %v11161_v59 }
 0x1c1   :  { %7077 = vmatpush.bf16.msrb.mxu2 %v11324_v52  ;;  %v13369_v62 = vld [vmem:[#allocation5 + $0x17a4] sm:$0xf]  ;;  %v11417_v48 = vld [vmem:[#allocation5 + $0x17b0] sm:$0xf0]  ;;  %7046 = vmatmul.bf16.vlgmr.msra.gmra.mxu3 %v13956_v49  ;;  %v11292_v9 = vor.u32 %v13337_v61, %v11289_v21 }
 0x1c2   :  { %7090 = vmatpush.bf16.msrb.mxu3 %v11452_v26  ;;  %v13269_v1 = vld [vmem:[#allocation5 + $0x1484] sm:$0xf]  ;;  %v11017_v4 = vld [vmem:[#allocation5 + $0x1490] sm:$0xf0]  ;;  %v11420_v32 = vor.u32 %v13369_v62, %v11417_v48 }
 0x1c3   :  { %7052 = vmatpush.bf16.msrb.mxu0 %v11052_v63  ;;  %v13301_v43 = vld [vmem:[#allocation5 + $0x1584] sm:$0xf]  ;;  %v11145_v52 = vld [vmem:[#allocation5 + $0x1590] sm:$0xf0]  ;;  %v11020_v36 = vor.u32 %v13269_v1, %v11017_v4 }
 0x1c4   :  { %7065 = vmatpush.bf16.msrb.mxu1 %v11180_v47  ;;  %v13333_v15 = vld [vmem:[#allocation5 + $0x1684] sm:$0xf]  ;;  %v11273_v24 = vld [vmem:[#allocation5 + $0x1690] sm:$0xf0]  ;;  %v11148_v60 = vor.u32 %v13301_v43, %v11145_v52  ;;  %v6826_v43 = vpop.f32.mrf.mxu2 }
 0x1c5   :  { %7078 = vmatpush.bf16.msrb.mxu2 %v11308_v51  ;;  %v13365_v57 = vld [vmem:[#allocation5 + $0x1784] sm:$0xf]  ;;  %v11401_v26 = vld [vmem:[#allocation5 + $0x1790] sm:$0xf0]  ;;  %v11276_v50 = vor.u32 %v13333_v15, %v11273_v24  ;;  %v6801_v51 = vadd.f32 %v6800_v27, %v1136_v14  ;;  %v6839_v24 = vpop.f32.mrf.mxu3 }
 0x1c6   :  { %7091 = vmatpush.bf16.msrb.mxu3 %v11436_v6  ;;  %v13265_v40 = vld [vmem:[#allocation5 + $0x1464] sm:$0xf]  ;;  %v11001_v63 = vld [vmem:[#allocation5 + $0x1470] sm:$0xf0]  ;;  %v11404_v3 = vor.u32 %v13365_v57, %v11401_v26 }
 0x1c7   :  { %7053 = vmatpush.bf16.msrb.mxu0 %v11036_v0  ;;  %v13297_v47 = vld [vmem:[#allocation5 + $0x1564] sm:$0xf]  ;;  %v11129_v56 = vld [vmem:[#allocation5 + $0x1570] sm:$0xf0]  ;;  %v6814_v62 = vadd.f32 %v6813_v58, %v6801_v51  ;;  %v11004_v48 = vor.u32 %v13265_v40, %v11001_v63  ;;  %v6815_v58 = vpop.f32.mrf.mxu1 }
 0x1c8   :  { %7066 = vmatpush.bf16.msrb.mxu1 %v11164_v39  ;;  %v13329_v6 = vld [vmem:[#allocation5 + $0x1664] sm:$0xf]  ;;  %v11257_v59 = vld [vmem:[#allocation5 + $0x1670] sm:$0xf0]  ;;  %v11132_v0 = vor.u32 %v13297_v47, %v11129_v56 }
 0x1c9   :  { %7079 = vmatpush.bf16.msrb.mxu2 %v11292_v9  ;;  %v13361_v61 = vld [vmem:[#allocation5 + $0x1764] sm:$0xf]  ;;  %v11385_v21 = vld [vmem:[#allocation5 + $0x1770] sm:$0xf0]  ;;  %v11260_v1 = vor.u32 %v13329_v6, %v11257_v59  ;;  %v6827_v15 = vadd.f32 %v6826_v43, %v6814_v62 }
 0x1ca   :  { %7092 = vmatpush.bf16.msrb.mxu3 %v11420_v32  ;;  %v13261_v39 = vld [vmem:[#allocation5 + $0x1444] sm:$0xf]  ;;  %v10985_v9 = vld [vmem:[#allocation5 + $0x1450] sm:$0xf0]  ;;  %v11388_v8 = vor.u32 %v13361_v61, %v11385_v21 }
 0x1cb   :  { %7054 = vmatpush.bf16.msrb.mxu0 %v11020_v36  ;;  %v13293_v4 = vld [vmem:[#allocation5 + $0x1544] sm:$0xf]  ;;  %v11113_v14 = vld [vmem:[#allocation5 + $0x1550] sm:$0xf0]  ;;  %v10988_v36 = vor.u32 %v13261_v39, %v10985_v9  ;;  %v14041_v27 = vadd.f32 %v6839_v24, %v6827_v15 }
 0x1cc   :  { %7067 = vmatpush.bf16.msrb.mxu1 %v11148_v60  ;;  %v13325_v32 = vld [vmem:[#allocation5 + $0x1644] sm:$0xf]  ;;  %v11241_v52 = vld [vmem:[#allocation5 + $0x1650] sm:$0xf0]  ;;  %v6802_v60 = vpop.f32.mrf.mxu0 }
 0x1cd   :  { %7080 = vmatpush.bf16.msrb.mxu2 %v11276_v50  ;;  %v13357_v57 = vld [vmem:[#allocation5 + $0x1744] sm:$0xf]  ;;  %v11369_v26 = vld [vmem:[#allocation5 + $0x1750] sm:$0xf0]  ;;  %v11116_v50 = vor.u32 %v13293_v4, %v11113_v14  ;;  %v11244_v40 = vor.u32 %v13325_v32, %v11241_v52  ;;  %v6828_v14 = vpop.f32.mrf.mxu2  ;;  %v6841_v24 = vpop.f32.mrf.mxu3 }
 0x1ce   :  { %7093 = vmatpush.bf16.msrb.mxu3 %v11404_v3  ;;  %v13257_v63 = vld [vmem:[#allocation5 + $0x1424] sm:$0xf]  ;;  %v10969_v47 = vld [vmem:[#allocation5 + $0x1430] sm:$0xf0]  ;;  %v11372_v3 = vor.u32 %v13357_v57, %v11369_v26 }
 0x1cf   :  { %7055 = vmatpush.bf16.msrb.mxu0 %v11004_v48  ;;  %v13289_v51 = vld [vmem:[#allocation5 + $0x1524] sm:$0xf]  ;;  %v11097_v56 = vld [vmem:[#allocation5 + $0x1530] sm:$0xf0]  ;;  %v10972_v62 = vor.u32 %v13257_v63, %v10969_v47 }
 0x1d0   :  { %7068 = vmatpush.bf16.msrb.mxu1 %v11132_v0  ;;  %v13321_v6 = vld [vmem:[#allocation5 + $0x1624] sm:$0xf]  ;;  %v11225_v59 = vld [vmem:[#allocation5 + $0x1630] sm:$0xf0]  ;;  %v11100_v0 = vor.u32 %v13289_v51, %v11097_v56 }
 0x1d1   :  { %7081 = vmatpush.bf16.msrb.mxu2 %v11260_v1  ;;  %v13353_v61 = vld [vmem:[#allocation5 + $0x1724] sm:$0xf]  ;;  %v11353_v21 = vld [vmem:[#allocation5 + $0x1730] sm:$0xf0]  ;;  %v11228_v1 = vor.u32 %v13321_v6, %v11225_v59 }
 0x1d2   :  { %7094 = vmatpush.bf16.msrb.mxu3 %v11388_v8  ;;  %v13253_v48 = vld [vmem:[#allocation5 + $0x1404] sm:$0xf]  ;;  %v10953_v39 = vld [vmem:[#allocation5 + $0x1410] sm:$0xf0]  ;;  %v11356_v8 = vor.u32 %v13353_v61, %v11353_v21 }
 0x1d3   :  { %7056 = vmatpush.bf16.msrb.mxu0 %v10988_v36  ;;  %v13285_v9 = vld [vmem:[#allocation5 + $0x1504] sm:$0xf]  ;;  %v11081_v4 = vld [vmem:[#allocation5 + $0x1510] sm:$0xf0]  ;;  %v10956_v60 = vor.u32 %v13253_v48, %v10953_v39 }
 0x1d4   :  { %7069 = vmatpush.bf16.msrb.mxu1 %v11116_v50  ;;  %v13317_v43 = vld [vmem:[#allocation5 + $0x1604] sm:$0xf]  ;;  %v11209_v32 = vld [vmem:[#allocation5 + $0x1610] sm:$0xf0]  ;;  %v11084_v47 = vor.u32 %v13285_v9, %v11081_v4 }
 0x1d5   :  { %7082 = vmatpush.bf16.msrb.mxu2 %v11244_v40  ;;  %v13349_v52 = vld [vmem:[#allocation5 + $0x1704] sm:$0xf]  ;;  %v11337_v15 = vld [vmem:[#allocation5 + $0x1710] sm:$0xf0]  ;;  %v11212_v51 = vor.u32 %v13317_v43, %v11209_v32 }
 0x1d6   :  { %7095 = vmatpush.bf16.msrb.mxu3 %v11372_v3  ;;  %v13409_v57 = vld [vmem:[#allocation5 + $0x18e4] sm:$0xf]  ;;  %v11577_v26 = vld [vmem:[#allocation5 + $0x18f0] sm:$0xf0]  ;;  %v11340_v3 = vor.u32 %v13349_v52, %v11337_v15 }
 0x1d7   :  { %v13441_v36 = vld [vmem:[#allocation5 + $0x19e4] sm:$0xf]  ;;  %7057 = vmatpush.bf16.msrb.mxu0 %v10972_v62  ;;  %v11705_v63 = vld [vmem:[#allocation5 + $0x19f0] sm:$0xf0]  ;;  %v11580_v6 = vor.u32 %v13409_v57, %v11577_v26 }
 0x1d8   :  { %v13473_v50 = vld [vmem:[#allocation5 + $0x1ae4] sm:$0xf]  ;;  %v11833_v40 = vld [vmem:[#allocation5 + $0x1af0] sm:$0xf0]  ;;  %7070 = vmatpush.bf16.msrb.mxu1 %v11100_v0  ;;  %v11708_v59 = vor.u32 %v13441_v36, %v11705_v63 }
 0x1d9   :  { %7083 = vmatpush.bf16.msrb.mxu2 %v11228_v1  ;;  %v13505_v58 = vld [vmem:[#allocation5 + $0x1be4] sm:$0xf]  ;;  %v11961_v56 = vld [vmem:[#allocation5 + $0x1bf0] sm:$0xf0]  ;;  %v11836_v61 = vor.u32 %v13473_v50, %v11833_v40 }
 0x1da   :  { %7096 = vmatpush.bf16.msrb.mxu3 %v11356_v8  ;;  %v13405_v21 = vld [vmem:[#allocation5 + $0x18c4] sm:$0xf]  ;;  %v11561_v14 = vld [vmem:[#allocation5 + $0x18d0] sm:$0xf0]  ;;  %v11964_v62 = vor.u32 %v13505_v58, %v11961_v56 }
 0x1db   :  { %v13437_v24 = vld [vmem:[#allocation5 + $0x19c4] sm:$0xf]  ;;  %7058 = vmatpush.bf16.msrb.mxu0 %v10956_v60  ;;  %v11689_v48 = vld [vmem:[#allocation5 + $0x19d0] sm:$0xf0]  ;;  %v11564_v9 = vor.u32 %v13405_v21, %v11561_v14 }
 0x1dc   :  { %v13469_v39 = vld [vmem:[#allocation5 + $0x1ac4] sm:$0xf]  ;;  %v11817_v2 = vld [vmem:[#allocation5 + $0x1ad0] sm:$0xf0]  ;;  %7071 = vmatpush.bf16.msrb.mxu1 %v11084_v47  ;;  %v11692_v4 = vor.u32 %v13437_v24, %v11689_v48  ;;  %v6852_v24 = vpop.f32.mrf.mxu0 }
 0x1dd   :  { %7084 = vmatpush.bf16.msrb.mxu2 %v11212_v51  ;;  %v13501_v0 = vld [vmem:[#allocation5 + $0x1bc4] sm:$0xf]  ;;  %v11945_v1 = vld [vmem:[#allocation5 + $0x1bd0] sm:$0xf0]  ;;  %v11820_v43 = vor.u32 %v13469_v39, %v11817_v2 }
 0x1de   :  { %7097 = vmatpush.bf16.msrb.mxu3 %v11340_v3  ;;  %v13401_v8 = vld [vmem:[#allocation5 + $0x18a4] sm:$0xf]  ;;  %v11545_v32 = vld [vmem:[#allocation5 + $0x18b0] sm:$0xf0]  ;;  %7059 = vmatmul.bf16.vlgmr.msrb.gmra.mxu0 %v13964_v7  ;;  %v11948_v15 = vor.u32 %v13501_v0, %v11945_v1 }
 0x1df   :  { %7103 = vmatpush.bf16.msra.mxu0 %v11580_v6  ;;  %v13433_v52 = vld [vmem:[#allocation5 + $0x19a4] sm:$0xf]  ;;  %v11673_v57 = vld [vmem:[#allocation5 + $0x19b0] sm:$0xf0]  ;;  %7072 = vmatmul.bf16.vlgmr.msrb.gmra.mxu1 %v13968_v12  ;;  %v11548_v2 = vor.u32 %v13401_v8, %v11545_v32 }
 0x1e0   :  { %7116 = vmatpush.bf16.msra.mxu1 %v11708_v59  ;;  %v13465_v26 = vld [vmem:[#allocation5 + $0x1aa4] sm:$0xf]  ;;  %v11801_v36 = vld [vmem:[#allocation5 + $0x1ab0] sm:$0xf0]  ;;  %7085 = vmatmul.bf16.vlgmr.msrb.gmra.mxu2 %v13966_v11  ;;  %v11676_v50 = vor.u32 %v13433_v52, %v11673_v57 }
 0x1e1   :  { %7129 = vmatpush.bf16.msra.mxu2 %v11836_v61  ;;  %v13497_v60 = vld [vmem:[#allocation5 + $0x1ba4] sm:$0xf]  ;;  %v11929_v63 = vld [vmem:[#allocation5 + $0x1bb0] sm:$0xf0]  ;;  %7098 = vmatmul.bf16.vlgmr.msrb.gmra.mxu3 %v13970_v16  ;;  %v11804_v40 = vor.u32 %v13465_v26, %v11801_v36 }
 0x1e2   :  { %7142 = vmatpush.bf16.msra.mxu3 %v11964_v62  ;;  %v13397_v47 = vld [vmem:[#allocation5 + $0x1884] sm:$0xf]  ;;  %v11529_v51 = vld [vmem:[#allocation5 + $0x1890] sm:$0xf0]  ;;  %v11932_v56 = vor.u32 %v13497_v60, %v11929_v63 }
 0x1e3   :  { %7104 = vmatpush.bf16.msra.mxu0 %v11564_v9  ;;  %v13429_v58 = vld [vmem:[#allocation5 + $0x1984] sm:$0xf]  ;;  %v11657_v3 = vld [vmem:[#allocation5 + $0x1990] sm:$0xf0]  ;;  %v11532_v14 = vor.u32 %v13397_v47, %v11529_v51  ;;  %v6853_v9 = vadd.f32 %v6852_v24, %v14041_v27  ;;  %v6878_v47 = vpop.f32.mrf.mxu2 }
 0x1e4   :  { %7117 = vmatpush.bf16.msra.mxu1 %v11692_v4  ;;  %v13461_v6 = vld [vmem:[#allocation5 + $0x1a84] sm:$0xf]  ;;  %v11785_v59 = vld [vmem:[#allocation5 + $0x1a90] sm:$0xf0]  ;;  %v11660_v62 = vor.u32 %v13429_v58, %v11657_v3  ;;  %v6865_v4 = vpop.f32.mrf.mxu1  ;;  %v6854_v24 = vpop.f32.mrf.mxu0 }
 0x1e5   :  { %7130 = vmatpush.bf16.msra.mxu2 %v11820_v43  ;;  %v13493_v61 = vld [vmem:[#allocation5 + $0x1b84] sm:$0xf]  ;;  %v11913_v21 = vld [vmem:[#allocation5 + $0x1b90] sm:$0xf0]  ;;  %v11788_v48 = vor.u32 %v13461_v6, %v11785_v59  ;;  %v6866_v26 = vadd.f32 %v6865_v4, %v6853_v9  ;;  %v6891_v6 = vpop.f32.mrf.mxu3 }
 0x1e6   :  { %7143 = vmatpush.bf16.msra.mxu3 %v11948_v15  ;;  %v13393_v39 = vld [vmem:[#allocation5 + $0x1864] sm:$0xf]  ;;  %v11513_v0 = vld [vmem:[#allocation5 + $0x1870] sm:$0xf0]  ;;  %v11916_v43 = vor.u32 %v13493_v61, %v11913_v21 }
 0x1e7   :  { %7105 = vmatpush.bf16.msra.mxu0 %v11548_v2  ;;  %v13425_v1 = vld [vmem:[#allocation5 + $0x1964] sm:$0xf]  ;;  %v11641_v8 = vld [vmem:[#allocation5 + $0x1970] sm:$0xf0]  ;;  %v11516_v36 = vor.u32 %v13393_v39, %v11513_v0  ;;  %v6879_v3 = vadd.f32 %v6878_v47, %v6866_v26 }
 0x1e8   :  { %7118 = vmatpush.bf16.msra.mxu1 %v11676_v50  ;;  %v13457_v32 = vld [vmem:[#allocation5 + $0x1a64] sm:$0xf]  ;;  %v11769_v52 = vld [vmem:[#allocation5 + $0x1a70] sm:$0xf0]  ;;  %v11644_v60 = vor.u32 %v13425_v1, %v11641_v8 }
 0x1e9   :  { %7131 = vmatpush.bf16.msra.mxu2 %v11804_v40  ;;  %v13489_v15 = vld [vmem:[#allocation5 + $0x1b64] sm:$0xf]  ;;  %v11897_v57 = vld [vmem:[#allocation5 + $0x1b70] sm:$0xf0]  ;;  %v11772_v63 = vor.u32 %v13457_v32, %v11769_v52 }
 0x1ea   :  { %7144 = vmatpush.bf16.msra.mxu3 %v11932_v56  ;;  %v13389_v2 = vld [vmem:[#allocation5 + $0x1844] sm:$0xf]  ;;  %v11497_v50 = vld [vmem:[#allocation5 + $0x1850] sm:$0xf0]  ;;  %v11900_v27 = vor.u32 %v13489_v15, %v11897_v57 }
 0x1eb   :  { %7106 = vmatpush.bf16.msra.mxu0 %v11532_v14  ;;  %v13421_v40 = vld [vmem:[#allocation5 + $0x1944] sm:$0xf]  ;;  %v11625_v51 = vld [vmem:[#allocation5 + $0x1950] sm:$0xf0]  ;;  %v11500_v21 = vor.u32 %v13389_v2, %v11497_v50  ;;  %v14048_v14 = vadd.f32 %v6891_v6, %v6879_v3  ;;  %v6880_v47 = vpop.f32.mrf.mxu2 }
 0x1ec   :  { %7119 = vmatpush.bf16.msra.mxu1 %v11660_v62  ;;  %v13453_v58 = vld [vmem:[#allocation5 + $0x1a44] sm:$0xf]  ;;  %v11753_v56 = vld [vmem:[#allocation5 + $0x1a50] sm:$0xf0]  ;;  %v11628_v62 = vor.u32 %v13421_v40, %v11625_v51  ;;  %v6867_v9 = vpop.f32.mrf.mxu1 }
 0x1ed   :  { %7132 = vmatpush.bf16.msra.mxu2 %v11788_v48  ;;  %v13485_v59 = vld [vmem:[#allocation5 + $0x1b44] sm:$0xf]  ;;  %v11881_v61 = vld [vmem:[#allocation5 + $0x1b50] sm:$0xf0]  ;;  %v11756_v48 = vor.u32 %v13453_v58, %v11753_v56  ;;  %v6893_v3 = vpop.f32.mrf.mxu3 }
 0x1ee   :  { %7145 = vmatpush.bf16.msra.mxu3 %v11916_v43  ;;  %v13385_v39 = vld [vmem:[#allocation5 + $0x1824] sm:$0xf]  ;;  %v11481_v0 = vld [vmem:[#allocation5 + $0x1830] sm:$0xf0]  ;;  %v11884_v4 = vor.u32 %v13485_v59, %v11881_v61 }
 0x1ef   :  { %7107 = vmatpush.bf16.msra.mxu0 %v11516_v36  ;;  %v13417_v1 = vld [vmem:[#allocation5 + $0x1924] sm:$0xf]  ;;  %v11609_v43 = vld [vmem:[#allocation5 + $0x1930] sm:$0xf0]  ;;  %v11484_v57 = vor.u32 %v13385_v39, %v11481_v0 }
 0x1f0   :  { %7120 = vmatpush.bf16.msra.mxu1 %v11644_v60  ;;  %v13449_v8 = vld [vmem:[#allocation5 + $0x1a24] sm:$0xf]  ;;  %v11737_v32 = vld [vmem:[#allocation5 + $0x1a30] sm:$0xf0]  ;;  %v11612_v60 = vor.u32 %v13417_v1, %v11609_v43 }
 0x1f1   :  { %7133 = vmatpush.bf16.msra.mxu2 %v11772_v63  ;;  %v13481_v52 = vld [vmem:[#allocation5 + $0x1b24] sm:$0xf]  ;;  %v11865_v15 = vld [vmem:[#allocation5 + $0x1b30] sm:$0xf0]  ;;  %v11740_v63 = vor.u32 %v13449_v8, %v11737_v32 }
 0x1f2   :  { %7146 = vmatpush.bf16.msra.mxu3 %v11900_v27  ;;  %v13381_v26 = vld [vmem:[#allocation5 + $0x1804] sm:$0xf]  ;;  %v11465_v36 = vld [vmem:[#allocation5 + $0x1810] sm:$0xf0]  ;;  %v11868_v27 = vor.u32 %v13481_v52, %v11865_v15 }
 0x1f3   :  { %7108 = vmatpush.bf16.msra.mxu0 %v11500_v21  ;;  %v13413_v2 = vld [vmem:[#allocation5 + $0x1904] sm:$0xf]  ;;  %v11593_v50 = vld [vmem:[#allocation5 + $0x1910] sm:$0xf0]  ;;  %v11468_v21 = vor.u32 %v13381_v26, %v11465_v36 }
 0x1f4   :  { %7121 = vmatpush.bf16.msra.mxu1 %v11628_v62  ;;  %v13445_v40 = vld [vmem:[#allocation5 + $0x1a04] sm:$0xf]  ;;  %v11721_v51 = vld [vmem:[#allocation5 + $0x1a10] sm:$0xf0]  ;;  %v11596_v39 = vor.u32 %v13413_v2, %v11593_v50 }
 0x1f5   :  { %7134 = vmatpush.bf16.msra.mxu2 %v11756_v48  ;;  %v13477_v58 = vld [vmem:[#allocation5 + $0x1b04] sm:$0xf]  ;;  %v11849_v56 = vld [vmem:[#allocation5 + $0x1b10] sm:$0xf0]  ;;  %v11724_v0 = vor.u32 %v13445_v40, %v11721_v51 }
 0x1f6   :  { %7147 = vmatpush.bf16.msra.mxu3 %v11884_v4  ;;  %v13537_v6 = vld [vmem:[#allocation5 + $0x1ce4] sm:$0xf]  ;;  %v12089_v59 = vld [vmem:[#allocation5 + $0x1cf0] sm:$0xf0]  ;;  %v11852_v4 = vor.u32 %v13477_v58, %v11849_v56 }
 0x1f7   :  { %v13569_v61 = vld [vmem:[#allocation5 + $0x1de4] sm:$0xf]  ;;  %7109 = vmatpush.bf16.msra.mxu0 %v11484_v57  ;;  %v12217_v24 = vld [vmem:[#allocation5 + $0x1df0] sm:$0xf0]  ;;  %v12092_v43 = vor.u32 %v13537_v6, %v12089_v59 }
 0x1f8   :  { %v13601_v62 = vld [vmem:[#allocation5 + $0x1ee4] sm:$0xf]  ;;  %v12345_v48 = vld [vmem:[#allocation5 + $0x1ef0] sm:$0xf0]  ;;  %7122 = vmatpush.bf16.msra.mxu1 %v11612_v60  ;;  %v12220_v8 = vor.u32 %v13569_v61, %v12217_v24 }
 0x1f9   :  { %7135 = vmatpush.bf16.msra.mxu2 %v11740_v63  ;;  %v13633_v1 = vld [vmem:[#allocation5 + $0x1fe4] sm:$0xf]  ;;  %v12473_v9 = vld [vmem:[#allocation5 + $0x1ff0] sm:$0xf0]  ;;  %v12348_v32 = vor.u32 %v13601_v62, %v12345_v48 }
 0x1fa   :  { %7148 = vmatpush.bf16.msra.mxu3 %v11868_v27  ;;  %v13533_v52 = vld [vmem:[#allocation5 + $0x1cc4] sm:$0xf]  ;;  %v12073_v15 = vld [vmem:[#allocation5 + $0x1cd0] sm:$0xf0]  ;;  %v12476_v57 = vor.u32 %v13633_v1, %v12473_v9 }
 0x1fb   :  { %v13565_v47 = vld [vmem:[#allocation5 + $0x1dc4] sm:$0xf]  ;;  %7110 = vmatpush.bf16.msra.mxu0 %v11468_v21  ;;  %v12201_v26 = vld [vmem:[#allocation5 + $0x1dd0] sm:$0xf0]  ;;  %v12076_v2 = vor.u32 %v13533_v52, %v12073_v15  ;;  %v6904_v52 = vpop.f32.mrf.mxu0 }
 0x1fc   :  { %v13597_v36 = vld [vmem:[#allocation5 + $0x1ec4] sm:$0xf]  ;;  %v12329_v3 = vld [vmem:[#allocation5 + $0x1ed0] sm:$0xf0]  ;;  %7123 = vmatpush.bf16.msra.mxu1 %v11596_v39  ;;  %v12204_v50 = vor.u32 %v13565_v47, %v12201_v26 }
 0x1fd   :  { %7136 = vmatpush.bf16.msra.mxu2 %v11724_v0  ;;  %v13629_v60 = vld [vmem:[#allocation5 + $0x1fc4] sm:$0xf]  ;;  %v12457_v63 = vld [vmem:[#allocation5 + $0x1fd0] sm:$0xf0]  ;;  %v12332_v40 = vor.u32 %v13597_v36, %v12329_v3  ;;  %v6917_v36 = vpop.f32.mrf.mxu1 }
 0x1fe   :  { %7149 = vmatpush.bf16.msra.mxu3 %v11852_v4  ;;  %v13529_v27 = vld [vmem:[#allocation5 + $0x1ca4] sm:$0xf]  ;;  %v12057_v51 = vld [vmem:[#allocation5 + $0x1cb0] sm:$0xf0]  ;;  %7111 = vmatmul.bf16.vlgmr.msra.gmra.mxu0 %v13979_v5  ;;  %v12460_v56 = vor.u32 %v13629_v60, %v12457_v63 }
 0x1ff   :  { %7155 = vmatpush.bf16.msrb.mxu0 %v12092_v43  ;;  %v13561_v58 = vld [vmem:[#allocation5 + $0x1da4] sm:$0xf]  ;;  %v12185_v6 = vld [vmem:[#allocation5 + $0x1db0] sm:$0xf0]  ;;  %7124 = vmatmul.bf16.vlgmr.msra.gmra.mxu1 %v13983_v13  ;;  %v12060_v62 = vor.u32 %v13529_v27, %v12057_v51 }
 0x200   :  { %7168 = vmatpush.bf16.msrb.mxu1 %v12220_v8  ;;  %v13593_v59 = vld [vmem:[#allocation5 + $0x1ea4] sm:$0xf]  ;;  %v12313_v61 = vld [vmem:[#allocation5 + $0x1eb0] sm:$0xf0]  ;;  %7137 = vmatmul.bf16.vlgmr.msra.gmra.mxu2 %v13981_v10  ;;  %v12188_v48 = vor.u32 %v13561_v58, %v12185_v6 }
 0x201   :  { %7181 = vmatpush.bf16.msrb.mxu2 %v12348_v32  ;;  %v13625_v21 = vld [vmem:[#allocation5 + $0x1fa4] sm:$0xf]  ;;  %v12441_v24 = vld [vmem:[#allocation5 + $0x1fb0] sm:$0xf0]  ;;  %7150 = vmatmul.bf16.vlgmr.msra.gmra.mxu3 %v13985_v17  ;;  %v12316_v39 = vor.u32 %v13593_v59, %v12313_v61 }
 0x202   :  { %7194 = vmatpush.bf16.msrb.mxu3 %v12476_v57  ;;  %v13525_v0 = vld [vmem:[#allocation5 + $0x1c84] sm:$0xf]  ;;  %v12041_v1 = vld [vmem:[#allocation5 + $0x1c90] sm:$0xf0]  ;;  %v12444_v4 = vor.u32 %v13625_v21, %v12441_v24  ;;  %v6905_v57 = vadd.f32 %v6904_v52, %v14048_v14 }
 0x203   :  { %7156 = vmatpush.bf16.msrb.mxu0 %v12076_v2  ;;  %v13557_v9 = vld [vmem:[#allocation5 + $0x1d84] sm:$0xf]  ;;  %v12169_v43 = vld [vmem:[#allocation5 + $0x1d90] sm:$0xf0]  ;;  %v12044_v26 = vor.u32 %v13525_v0, %v12041_v1  ;;  %v6930_v0 = vpop.f32.mrf.mxu2 }
 0x204   :  { %7169 = vmatpush.bf16.msrb.mxu1 %v12204_v50  ;;  %v13589_v8 = vld [vmem:[#allocation5 + $0x1e84] sm:$0xf]  ;;  %v12297_v32 = vld [vmem:[#allocation5 + $0x1e90] sm:$0xf0]  ;;  %v12172_v3 = vor.u32 %v13557_v9, %v12169_v43  ;;  %v6918_v27 = vadd.f32 %v6917_v36, %v6905_v57 }
 0x205   :  { %7182 = vmatpush.bf16.msrb.mxu2 %v12332_v40  ;;  %v13621_v15 = vld [vmem:[#allocation5 + $0x1f84] sm:$0xf]  ;;  %v12425_v47 = vld [vmem:[#allocation5 + $0x1f90] sm:$0xf0]  ;;  %v12300_v60 = vor.u32 %v13589_v8, %v12297_v32  ;;  %v6943_v8 = vpop.f32.mrf.mxu3  ;;  %v6919_v57 = vpop.f32.mrf.mxu1 }
 0x206   :  { %7195 = vmatpush.bf16.msrb.mxu3 %v12460_v56  ;;  %v13521_v63 = vld [vmem:[#allocation5 + $0x1c64] sm:$0xf]  ;;  %v12025_v2 = vld [vmem:[#allocation5 + $0x1c70] sm:$0xf0]  ;;  %v12428_v40 = vor.u32 %v13621_v15, %v12425_v47  ;;  %v6931_v43 = vadd.f32 %v6930_v0, %v6918_v27  ;;  %v6906_v15 = vpop.f32.mrf.mxu0  ;;  %v8767_v57 = vld [vmem:[#allocation5 + $0x2e8] sm:$0xf] }
 0x207   :  { %7157 = vmatpush.bf16.msrb.mxu0 %v12060_v62  ;;  %v13553_v50 = vld [vmem:[#allocation5 + $0x1d64] sm:$0xf]  ;;  %v12153_v51 = vld [vmem:[#allocation5 + $0x1d70] sm:$0xf0]  ;;  %v12028_v61 = vor.u32 %v13521_v63, %v12025_v2 }
 0x208   :  { %7170 = vmatpush.bf16.msrb.mxu1 %v12188_v48  ;;  %v13585_v58 = vld [vmem:[#allocation5 + $0x1e64] sm:$0xf]  ;;  %v12281_v56 = vld [vmem:[#allocation5 + $0x1e70] sm:$0xf0]  ;;  %v12156_v14 = vor.u32 %v13553_v50, %v12153_v51 }
 0x209   :  { %7183 = vmatpush.bf16.msrb.mxu2 %v12316_v39  ;;  %v13617_v6 = vld [vmem:[#allocation5 + $0x1f64] sm:$0xf]  ;;  %v12409_v59 = vld [vmem:[#allocation5 + $0x1f70] sm:$0xf0]  ;;  %v12284_v21 = vor.u32 %v13585_v58, %v12281_v56 }
 0x20a   :  { %7196 = vmatpush.bf16.msrb.mxu3 %v12444_v4  ;;  %v13517_v24 = vld [vmem:[#allocation5 + $0x1c44] sm:$0xf]  ;;  %v12009_v62 = vld [vmem:[#allocation5 + $0x1c50] sm:$0xf0]  ;;  %v12412_v39 = vor.u32 %v13617_v6, %v12409_v59 }
 0x20b   :  { %7158 = vmatpush.bf16.msrb.mxu0 %v12044_v26  ;;  %v13549_v48 = vld [vmem:[#allocation5 + $0x1d44] sm:$0xf]  ;;  %v12137_v1 = vld [vmem:[#allocation5 + $0x1d50] sm:$0xf0]  ;;  %v12012_v47 = vor.u32 %v13517_v24, %v12009_v62  ;;  %v14055_v26 = vadd.f32 %v6943_v8, %v6931_v43  ;;  %v8511_v43 = vld [vmem:[#allocation5 + $0xe8] sm:$0xf] }
 0x20c   :  { %7171 = vmatpush.bf16.msrb.mxu1 %v12172_v3  ;;  %v13581_v9 = vld [vmem:[#allocation5 + $0x1e44] sm:$0xf]  ;;  %v12265_v4 = vld [vmem:[#allocation5 + $0x1e50] sm:$0xf0]  ;;  %v12140_v36 = vor.u32 %v13549_v48, %v12137_v1  ;;  %v12644_v8 = vld [vmem:[#allocation5 + $0xf4] sm:$0xf0] }
 0x20d   :  { %7184 = vmatpush.bf16.msrb.mxu2 %v12300_v60  ;;  %v13613_v32 = vld [vmem:[#allocation5 + $0x1f44] sm:$0xf]  ;;  %v12393_v52 = vld [vmem:[#allocation5 + $0x1f50] sm:$0xf0]  ;;  %v12268_v3 = vor.u32 %v13581_v9, %v12265_v4  ;;  %v6932_v4 = vpop.f32.mrf.mxu2 }
 0x20e   :  { %7197 = vmatpush.bf16.msrb.mxu3 %v12428_v40  ;;  %v13513_v60 = vld [vmem:[#allocation5 + $0x1c24] sm:$0xf]  ;;  %v11993_v63 = vld [vmem:[#allocation5 + $0x1c30] sm:$0xf0]  ;;  %v12396_v50 = vor.u32 %v13613_v32, %v12393_v52  ;;  %v8639_v32 = vld [vmem:[#allocation5 + $0x1e8] sm:$0xf]  ;;  %v6945_v52 = vpop.f32.mrf.mxu3 }
 0x20f   :  { %7159 = vmatpush.bf16.msrb.mxu0 %v12028_v61  ;;  %v13545_v2 = vld [vmem:[#allocation5 + $0x1d24] sm:$0xf]  ;;  %v12121_v40 = vld [vmem:[#allocation5 + $0x1d30] sm:$0xf0]  ;;  %v11996_v6 = vor.u32 %v13513_v60, %v11993_v63  ;;  %v8895_v63 = vld [vmem:[#allocation5 + $0x3e8] sm:$0xf] }
 0x210   :  { %7172 = vmatpush.bf16.msrb.mxu1 %v12156_v14  ;;  %v13577_v27 = vld [vmem:[#allocation5 + $0x1e24] sm:$0xf]  ;;  %v12249_v51 = vld [vmem:[#allocation5 + $0x1e30] sm:$0xf0]  ;;  %v12124_v14 = vor.u32 %v13545_v2, %v12121_v40  ;;  %v12740_v2 = vld [vmem:[#allocation5 + $0x3f4] sm:$0xf0]  ;;  %v8512_v40 = vor.u32 %v12644_v8, %v8511_v43 }
 0x211   :  { %7185 = vmatpush.bf16.msrb.mxu2 %v12284_v21  ;;  %v13609_v58 = vld [vmem:[#allocation5 + $0x1f24] sm:$0xf]  ;;  %v12377_v56 = vld [vmem:[#allocation5 + $0x1f30] sm:$0xf0]  ;;  %v12252_v21 = vor.u32 %v13577_v27, %v12249_v51  ;;  %v8623_v4 = vld [vmem:[#allocation5 + $0x1c8] sm:$0xf] }
 0x212   :  { %7198 = vmatpush.bf16.msrb.mxu3 %v12412_v39  ;;  %v13509_v59 = vld [vmem:[#allocation5 + $0x1c04] sm:$0xf]  ;;  %v11977_v61 = vld [vmem:[#allocation5 + $0x1c10] sm:$0xf0]  ;;  %v12380_v0 = vor.u32 %v13609_v58, %v12377_v56  ;;  %v8495_v58 = vld [vmem:[#allocation5 + $0xc8] sm:$0xf] }
 0x213   :  { %7160 = vmatpush.bf16.msrb.mxu0 %v12012_v47  ;;  %v13541_v24 = vld [vmem:[#allocation5 + $0x1d04] sm:$0xf]  ;;  %v12105_v62 = vld [vmem:[#allocation5 + $0x1d10] sm:$0xf0]  ;;  %v11980_v15 = vor.u32 %v13509_v59, %v11977_v61  ;;  %v12676_v47 = vld [vmem:[#allocation5 + $0x1f4] sm:$0xf0] }
 0x214   :  { %7173 = vmatpush.bf16.msrb.mxu1 %v12140_v36  ;;  %v13573_v48 = vld [vmem:[#allocation5 + $0x1e04] sm:$0xf]  ;;  %v12233_v39 = vld [vmem:[#allocation5 + $0x1e10] sm:$0xf0]  ;;  %v12708_v36 = vld [vmem:[#allocation5 + $0x2f4] sm:$0xf0]  ;;  %v8640_v27 = vor.u32 %v12676_v47, %v8639_v32 }
 0x215   :  { %7186 = vmatpush.bf16.msrb.mxu2 %v12268_v3  ;;  %v13605_v1 = vld [vmem:[#allocation5 + $0x1f04] sm:$0xf]  ;;  %v12361_v9 = vld [vmem:[#allocation5 + $0x1f10] sm:$0xf0]  ;;  %v12108_v3 = vor.u32 %v13541_v24, %v12105_v62  ;;  %v12236_v60 = vor.u32 %v13573_v48, %v12233_v39  ;;  %v8768_v51 = vor.u32 %v12708_v36, %v8767_v57  ;;  %v12640_v56 = vld [vmem:[#allocation5 + $0xd4] sm:$0xf0] }
 0x216   :  { %7199 = vmatpush.bf16.msrb.mxu3 %v12396_v50  ;;  %v12364_v50 = vor.u32 %v13605_v1, %v12361_v9  ;;  %v12672_v59 = vld [vmem:[#allocation5 + $0x1d4] sm:$0xf0]  ;;  %v8751_v61 = vld [vmem:[#allocation5 + $0x2c8] sm:$0xf]  ;;  %v8496_v24 = vor.u32 %v12640_v56, %v8495_v58 }
 0x217   :  { %7161 = vmatpush.bf16.msrb.mxu0 %v11996_v6  ;;  %v8896_v6 = vor.u32 %v12740_v2, %v8895_v63  ;;  %v12704_v52 = vld [vmem:[#allocation5 + $0x2d4] sm:$0xf0]  ;;  %v8624_v62 = vor.u32 %v12672_v59, %v8623_v4  ;;  %v8607_v1 = vld [vmem:[#allocation5 + $0x1a8] sm:$0xf] }
 0x218   :  { %7174 = vmatpush.bf16.msrb.mxu1 %v12124_v14  ;;  %v8879_v14 = vld [vmem:[#allocation5 + $0x3c8] sm:$0xf]  ;;  %v8752_v48 = vor.u32 %v12704_v52, %v8751_v61  ;;  %v12636_v39 = vld [vmem:[#allocation5 + $0xb4] sm:$0xf0] }
 0x219   :  { %7187 = vmatpush.bf16.msrb.mxu2 %v12252_v21  ;;  %v12736_v21 = vld [vmem:[#allocation5 + $0x3d4] sm:$0xf0]  ;;  %v8735_v8 = vld [vmem:[#allocation5 + $0x2a8] sm:$0xf] }
 0x21a   :  { %7200 = vmatpush.bf16.msrb.mxu3 %v12380_v0  ;;  %v8479_v0 = vld [vmem:[#allocation5 + $0xa8] sm:$0xf]  ;;  %v8880_v9 = vor.u32 %v12736_v21, %v8879_v14  ;;  %v12668_v43 = vld [vmem:[#allocation5 + $0x1b4] sm:$0xf0] }
 0x21b   :  { %7162 = vmatpush.bf16.msrb.mxu0 %v11980_v15  ;;  %v12700_v32 = vld [vmem:[#allocation5 + $0x2b4] sm:$0xf0]  ;;  %v8863_v15 = vld [vmem:[#allocation5 + $0x3a8] sm:$0xf]  ;;  %v8480_v57 = vor.u32 %v12636_v39, %v8479_v0  ;;  %v8608_v36 = vor.u32 %v12668_v43, %v8607_v1  ;;  %v6956_v58 = vpop.f32.mrf.mxu0 }
 0x21c   :  { %7175 = vmatpush.bf16.msrb.mxu1 %v12108_v3  ;;  %v12732_v47 = vld [vmem:[#allocation5 + $0x3b4] sm:$0xf0]  ;;  %v8736_v3 = vor.u32 %v12700_v32, %v8735_v8  ;;  %v8591_v2 = vld [vmem:[#allocation5 + $0x188] sm:$0xf]  ;;  %v6969_v61 = vpop.f32.mrf.mxu1 }
 0x21d   :  { %7188 = vmatpush.bf16.msrb.mxu2 %v12236_v60  ;;  %v8463_v60 = vld [vmem:[#allocation5 + $0x88] sm:$0xf]  ;;  %v12632_v63 = vld [vmem:[#allocation5 + $0x94] sm:$0xf0] }
 0x21e   :  { %7201 = vmatpush.bf16.msrb.mxu3 %v12364_v50  ;;  %7163 = vmatmul.bf16.vlgmr.msrb.gmra.mxu0 %v13994_v54  ;;  %v8864_v50 = vor.u32 %v12732_v47, %v8863_v15  ;;  %v8847_v56 = vld [vmem:[#allocation5 + $0x388] sm:$0xf]  ;;  %v12728_v4 = vld [vmem:[#allocation5 + $0x394] sm:$0xf0]  ;;  %v8464_v59 = vor.u32 %v12632_v63, %v8463_v60 }
 0x21f   :  { %7207 = vmatpush.bf16.msra.mxu0 %v8512_v40  ;;  %7176 = vmatmul.bf16.vlgmr.msrb.gmra.mxu1 %v13998_v55  ;;  %v12664_v40 = vld [vmem:[#allocation5 + $0x194] sm:$0xf0]  ;;  %v8447_v21 = vld [vmem:[#allocation5 + $0x68] sm:$0xf] }
 0x220   :  { %7220 = vmatpush.bf16.msra.mxu1 %v8640_v27  ;;  %7189 = vmatmul.bf16.vlgmr.msrb.gmra.mxu2 %v13996_v34  ;;  %v8719_v27 = vld [vmem:[#allocation5 + $0x288] sm:$0xf]  ;;  %v8592_v52 = vor.u32 %v12664_v40, %v8591_v2  ;;  %v12660_v39 = vld [vmem:[#allocation5 + $0x174] sm:$0xf0] }
 0x221   :  { %7233 = vmatpush.bf16.msra.mxu2 %v8768_v51  ;;  %7202 = vmatmul.bf16.vlgmr.msrb.gmra.mxu3 %v14000_v53  ;;  %v12696_v51 = vld [vmem:[#allocation5 + $0x294] sm:$0xf0]  ;;  %v8703_v1 = vld [vmem:[#allocation5 + $0x268] sm:$0xf] }
 0x222   :  { %7246 = vmatpush.bf16.msra.mxu3 %v8896_v6  ;;  %v6957_v6 = vadd.f32 %v6956_v58, %v14055_v26  ;;  %v8720_v14 = vor.u32 %v12696_v51, %v8719_v27  ;;  %v8831_v43 = vld [vmem:[#allocation5 + $0x368] sm:$0xf]  ;;  %v12724_v8 = vld [vmem:[#allocation5 + $0x374] sm:$0xf0] }
 0x223   :  { %7208 = vmatpush.bf16.msra.mxu0 %v8496_v24  ;;  %v12628_v24 = vld [vmem:[#allocation5 + $0x74] sm:$0xf0]  ;;  %v8431_v47 = vld [vmem:[#allocation5 + $0x48] sm:$0xf]  ;;  %v6982_v60 = vpop.f32.mrf.mxu2 }
 0x224   :  { %7221 = vmatpush.bf16.msra.mxu1 %v8624_v62  ;;  %v8575_v62 = vld [vmem:[#allocation5 + $0x168] sm:$0xf]  ;;  %v6970_v0 = vadd.f32 %v6969_v61, %v6957_v6  ;;  %v8448_v32 = vor.u32 %v12628_v24, %v8447_v21  ;;  %v12656_v63 = vld [vmem:[#allocation5 + $0x154] sm:$0xf0]  ;;  %v6995_v27 = vpop.f32.mrf.mxu3  ;;  %v6971_v6 = vpop.f32.mrf.mxu1 }
 0x225   :  { %7234 = vmatpush.bf16.msra.mxu2 %v8752_v48  ;;  %v8848_v48 = vor.u32 %v12728_v4, %v8847_v56  ;;  %v8576_v26 = vor.u32 %v12660_v39, %v8575_v62  ;;  %v8687_v2 = vld [vmem:[#allocation5 + $0x248] sm:$0xf]  ;;  %v12720_v58 = vld [vmem:[#allocation5 + $0x354] sm:$0xf0]  ;;  %v6958_v56 = vpop.f32.mrf.mxu0 }
 0x226   :  { %7247 = vmatpush.bf16.msra.mxu3 %v8880_v9  ;;  %v12692_v9 = vld [vmem:[#allocation5 + $0x274] sm:$0xf0]  ;;  %v6983_v40 = vadd.f32 %v6982_v60, %v6970_v0  ;;  %v8815_v51 = vld [vmem:[#allocation5 + $0x348] sm:$0xf] }
 0x227   :  { %7209 = vmatpush.bf16.msra.mxu0 %v8480_v57  ;;  %v8704_v15 = vor.u32 %v12692_v9, %v8703_v1  ;;  %v12624_v57 = vld [vmem:[#allocation5 + $0x54] sm:$0xf0]  ;;  %v8543_v24 = vld [vmem:[#allocation5 + $0x128] sm:$0xf]  ;;  %v8816_v62 = vor.u32 %v12720_v58, %v8815_v51 }
 0x228   :  { %7222 = vmatpush.bf16.msra.mxu1 %v8608_v36  ;;  %v8559_v36 = vld [vmem:[#allocation5 + $0x148] sm:$0xf]  ;;  %v8432_v4 = vor.u32 %v12624_v57, %v8431_v47  ;;  %v12620_v21 = vld [vmem:[#allocation5 + $0x34] sm:$0xf0] }
 0x229   :  { %7235 = vmatpush.bf16.msra.mxu2 %v8736_v3  ;;  %v8832_v3 = vor.u32 %v12724_v8, %v8831_v43  ;;  %v8560_v61 = vor.u32 %v12656_v63, %v8559_v36  ;;  %v8671_v0 = vld [vmem:[#allocation5 + $0x228] sm:$0xf]  ;;  %v12684_v39 = vld [vmem:[#allocation5 + $0x234] sm:$0xf0] }
 0x22a   :  { %7248 = vmatpush.bf16.msra.mxu3 %v8864_v50  ;;  %v12688_v50 = vld [vmem:[#allocation5 + $0x254] sm:$0xf0]  ;;  %v8799_v1 = vld [vmem:[#allocation5 + $0x328] sm:$0xf] }
 0x22b   :  { %7210 = vmatpush.bf16.msra.mxu0 %v8464_v59  ;;  %v14062_v59 = vadd.f32 %v6995_v27, %v6983_v40  ;;  %v12716_v9 = vld [vmem:[#allocation5 + $0x334] sm:$0xf0]  ;;  %v8399_v8 = vld [vmem:[#allocation5 + $0x8] sm:$0xf] }
 0x22c   :  { %7223 = vmatpush.bf16.msra.mxu1 %v8592_v52  ;;  %v8688_v52 = vor.u32 %v12688_v50, %v8687_v2  ;;  %v8527_v47 = vld [vmem:[#allocation5 + $0x108] sm:$0xf]  ;;  %v12648_v57 = vld [vmem:[#allocation5 + $0x114] sm:$0xf0]  ;;  %v8800_v60 = vor.u32 %v12716_v9, %v8799_v1  ;;  %v6984_v50 = vpop.f32.mrf.mxu2  ;;  %v6997_v58 = vpop.f32.mrf.mxu3 }
 0x22d   :  { %7236 = vmatpush.bf16.msra.mxu2 %v8720_v14  ;;  %v8415_v14 = vld [vmem:[#allocation5 + $0x28] sm:$0xf]  ;;  %v12712_v2 = vld [vmem:[#allocation5 + $0x314] sm:$0xf0] }
 0x22e   :  { %7249 = vmatpush.bf16.msra.mxu3 %v8848_v48  ;;  %v12652_v48 = vld [vmem:[#allocation5 + $0x134] sm:$0xf0]  ;;  %v8416_v43 = vor.u32 %v12620_v21, %v8415_v14  ;;  %v8655_v36 = vld [vmem:[#allocation5 + $0x208] sm:$0xf] }
 0x22f   :  { %7211 = vmatpush.bf16.msra.mxu0 %v8448_v32  ;;  %v12616_v32 = vld [vmem:[#allocation5 + $0x14] sm:$0xf0]  ;;  %v8783_v63 = vld [vmem:[#allocation5 + $0x308] sm:$0xf] }
 0x230   :  { %7224 = vmatpush.bf16.msra.mxu1 %v8576_v26  ;;  %v8544_v26 = vor.u32 %v12652_v48, %v8543_v24  ;;  %v9023_v40 = vld [vmem:[#allocation5 + $0x4e8] sm:$0xf]  ;;  %v12772_v27 = vld [vmem:[#allocation5 + $0x4f4] sm:$0xf0]  ;;  %v8400_v56 = vor.u32 %v12616_v32, %v8399_v8 }
 0x231   :  { %7237 = vmatpush.bf16.msra.mxu2 %v8704_v15  ;;  %v8672_v15 = vor.u32 %v12684_v39, %v8671_v0  ;;  %v9151_v51 = vld [vmem:[#allocation5 + $0x5e8] sm:$0xf]  ;;  %v12868_v24 = vld [vmem:[#allocation5 + $0x7f4] sm:$0xf0]  ;;  %v9024_v48 = vor.u32 %v12772_v27, %v9023_v40 }
 0x232   :  { %7250 = vmatpush.bf16.msra.mxu3 %v8832_v3  ;;  %v12680_v3 = vld [vmem:[#allocation5 + $0x214] sm:$0xf0]  ;;  %v9279_v6 = vld [vmem:[#allocation5 + $0x6e8] sm:$0xf] }
 0x233   :  { %7212 = vmatpush.bf16.msra.mxu0 %v8432_v4  ;;  %v12804_v4 = vld [vmem:[#allocation5 + $0x5f4] sm:$0xf0]  ;;  %v8656_v14 = vor.u32 %v12680_v3, %v8655_v36  ;;  %v9407_v21 = vld [vmem:[#allocation5 + $0x7e8] sm:$0xf] }
 0x234   :  { %7225 = vmatpush.bf16.msra.mxu1 %v8560_v61  ;;  %v12836_v61 = vld [vmem:[#allocation5 + $0x6f4] sm:$0xf0]  ;;  %v9152_v0 = vor.u32 %v12804_v4, %v9151_v51  ;;  %v9007_v1 = vld [vmem:[#allocation5 + $0x4c8] sm:$0xf] }
 0x235   :  { %7238 = vmatpush.bf16.msra.mxu2 %v8688_v52  ;;  %v8528_v52 = vor.u32 %v12648_v57, %v8527_v47  ;;  %v9280_v39 = vor.u32 %v12836_v61, %v9279_v6  ;;  %v12768_v9 = vld [vmem:[#allocation5 + $0x4d4] sm:$0xf0]  ;;  %v9135_v50 = vld [vmem:[#allocation5 + $0x5c8] sm:$0xf] }
 0x236   :  { %7251 = vmatpush.bf16.msra.mxu3 %v8816_v62  ;;  %v8784_v62 = vor.u32 %v12712_v2, %v8783_v63  ;;  %v12800_v8 = vld [vmem:[#allocation5 + $0x5d4] sm:$0xf0]  ;;  %v9263_v32 = vld [vmem:[#allocation5 + $0x6c8] sm:$0xf]  ;;  %v9008_v47 = vor.u32 %v12768_v9, %v9007_v1 }
 0x237   :  { %7213 = vmatpush.bf16.msra.mxu0 %v8416_v43  ;;  %v9408_v43 = vor.u32 %v12868_v24, %v9407_v21  ;;  %v12832_v58 = vld [vmem:[#allocation5 + $0x6d4] sm:$0xf0]  ;;  %v9136_v57 = vor.u32 %v12800_v8, %v9135_v50  ;;  %v9119_v63 = vld [vmem:[#allocation5 + $0x5a8] sm:$0xf] }
 0x238   :  { %7226 = vmatpush.bf16.msra.mxu1 %v8544_v26  ;;  %v9391_v26 = vld [vmem:[#allocation5 + $0x7c8] sm:$0xf]  ;;  %v9264_v36 = vor.u32 %v12832_v58, %v9263_v32  ;;  %v12764_v3 = vld [vmem:[#allocation5 + $0x4b4] sm:$0xf0] }
 0x239   :  { %7239 = vmatpush.bf16.msra.mxu2 %v8672_v15  ;;  %v12864_v15 = vld [vmem:[#allocation5 + $0x7d4] sm:$0xf0]  ;;  %v9247_v27 = vld [vmem:[#allocation5 + $0x6a8] sm:$0xf] }
 0x23a   :  { %7252 = vmatpush.bf16.msra.mxu3 %v8800_v60  ;;  %v8991_v60 = vld [vmem:[#allocation5 + $0x4a8] sm:$0xf]  ;;  %v9392_v2 = vor.u32 %v12864_v15, %v9391_v26  ;;  %v12796_v40 = vld [vmem:[#allocation5 + $0x5b4] sm:$0xf0] }
 0x23b   :  { %7214 = vmatpush.bf16.msra.mxu0 %v8400_v56  ;;  %v12828_v51 = vld [vmem:[#allocation5 + $0x6b4] sm:$0xf0]  ;;  %v9375_v56 = vld [vmem:[#allocation5 + $0x7a8] sm:$0xf]  ;;  %v8992_v6 = vor.u32 %v12764_v3, %v8991_v60  ;;  %v9120_v61 = vor.u32 %v12796_v40, %v9119_v63  ;;  %v7008_v1 = vpop.f32.mrf.mxu0 }
 0x23c   :  { %7227 = vmatpush.bf16.msra.mxu1 %v8528_v52  ;;  %v12860_v4 = vld [vmem:[#allocation5 + $0x7b4] sm:$0xf0]  ;;  %v9248_v52 = vor.u32 %v12828_v51, %v9247_v27  ;;  %v9103_v24 = vld [vmem:[#allocation5 + $0x588] sm:$0xf]  ;;  %v7021_v32 = vpop.f32.mrf.mxu1 }
 0x23d   :  { %7240 = vmatpush.bf16.msra.mxu2 %v8656_v14  ;;  %v8975_v14 = vld [vmem:[#allocation5 + $0x488] sm:$0xf]  ;;  %v12760_v21 = vld [vmem:[#allocation5 + $0x494] sm:$0xf0] }
 0x23e   :  { %7253 = vmatpush.bf16.msra.mxu3 %v8784_v62  ;;  %7215 = vmatmul.bf16.vlgmr.msra.gmra.mxu0 %v13904_v19  ;;  %v9376_v62 = vor.u32 %v12860_v4, %v9375_v56  ;;  %v9359_v9 = vld [vmem:[#allocation5 + $0x788] sm:$0xf]  ;;  %v12856_v50 = vld [vmem:[#allocation5 + $0x794] sm:$0xf0]  ;;  %v8976_v8 = vor.u32 %v12760_v21, %v8975_v14 }
 0x23f   :  { %7259 = vmatpush.bf16.msrb.mxu0 %v9024_v48  ;;  %7228 = vmatmul.bf16.vlgmr.msra.gmra.mxu1 %v13908_v22  ;;  %v12792_v48 = vld [vmem:[#allocation5 + $0x594] sm:$0xf0]  ;;  %v8959_v15 = vld [vmem:[#allocation5 + $0x468] sm:$0xf] }
 0x240   :  { %7272 = vmatpush.bf16.msrb.mxu1 %v9152_v0  ;;  %7241 = vmatmul.bf16.vlgmr.msra.gmra.mxu2 %v13902_v18  ;;  %v9231_v0 = vld [vmem:[#allocation5 + $0x688] sm:$0xf]  ;;  %v9104_v58 = vor.u32 %v12792_v48, %v9103_v24  ;;  %v12788_v3 = vld [vmem:[#allocation5 + $0x574] sm:$0xf0] }
 0x241   :  { %7285 = vmatpush.bf16.msrb.mxu2 %v9280_v39  ;;  %7254 = vmatmul.bf16.vlgmr.msra.gmra.mxu3 %v13906_v20  ;;  %v12824_v39 = vld [vmem:[#allocation5 + $0x694] sm:$0xf0]  ;;  %v9215_v63 = vld [vmem:[#allocation5 + $0x668] sm:$0xf] }
 0x242   :  { %7298 = vmatpush.bf16.msrb.mxu3 %v9408_v43  ;;  %v7009_v43 = vadd.f32 %v7008_v1, %v14062_v59  ;;  %v9232_v26 = vor.u32 %v12824_v39, %v9231_v0  ;;  %v9343_v40 = vld [vmem:[#allocation5 + $0x768] sm:$0xf]  ;;  %v12852_v27 = vld [vmem:[#allocation5 + $0x774] sm:$0xf0] }
 0x243   :  { %7260 = vmatpush.bf16.msrb.mxu0 %v9008_v47  ;;  %v12756_v47 = vld [vmem:[#allocation5 + $0x474] sm:$0xf0]  ;;  %v8943_v4 = vld [vmem:[#allocation5 + $0x448] sm:$0xf]  ;;  %v7034_v14 = vpop.f32.mrf.mxu2 }
 0x244   :  { %7273 = vmatpush.bf16.msrb.mxu1 %v9136_v57  ;;  %v9087_v57 = vld [vmem:[#allocation5 + $0x568] sm:$0xf]  ;;  %v7022_v60 = vadd.f32 %v7021_v32, %v7009_v43  ;;  %v8960_v51 = vor.u32 %v12756_v47, %v8959_v15  ;;  %v12784_v21 = vld [vmem:[#allocation5 + $0x554] sm:$0xf0]  ;;  %v7047_v0 = vpop.f32.mrf.mxu3  ;;  %v7023_v43 = vpop.f32.mrf.mxu1 }
 0x245   :  { %7286 = vmatpush.bf16.msrb.mxu2 %v9264_v36  ;;  %v9360_v36 = vor.u32 %v12856_v50, %v9359_v9  ;;  %v9088_v59 = vor.u32 %v12788_v3, %v9087_v57  ;;  %v9199_v24 = vld [vmem:[#allocation5 + $0x648] sm:$0xf]  ;;  %v12848_v1 = vld [vmem:[#allocation5 + $0x754] sm:$0xf0]  ;;  %v7010_v9 = vpop.f32.mrf.mxu0 }
 0x246   :  { %7299 = vmatpush.bf16.msrb.mxu3 %v9392_v2  ;;  %v12820_v2 = vld [vmem:[#allocation5 + $0x674] sm:$0xf0]  ;;  %v7035_v48 = vadd.f32 %v7034_v14, %v7022_v60  ;;  %v9327_v39 = vld [vmem:[#allocation5 + $0x748] sm:$0xf] }
 0x247   :  { %7261 = vmatpush.bf16.msrb.mxu0 %v8992_v6  ;;  %v9216_v56 = vor.u32 %v12820_v2, %v9215_v63  ;;  %v12752_v6 = vld [vmem:[#allocation5 + $0x454] sm:$0xf0]  ;;  %v9055_v47 = vld [vmem:[#allocation5 + $0x528] sm:$0xf]  ;;  %v9328_v57 = vor.u32 %v12848_v1, %v9327_v39 }
 0x248   :  { %7274 = vmatpush.bf16.msrb.mxu1 %v9120_v61  ;;  %v9071_v61 = vld [vmem:[#allocation5 + $0x548] sm:$0xf]  ;;  %v8944_v50 = vor.u32 %v12752_v6, %v8943_v4  ;;  %v12748_v15 = vld [vmem:[#allocation5 + $0x434] sm:$0xf0] }
 0x249   :  { %7287 = vmatpush.bf16.msrb.mxu2 %v9248_v52  ;;  %v9344_v52 = vor.u32 %v12852_v27, %v9343_v40  ;;  %v9072_v32 = vor.u32 %v12784_v21, %v9071_v61  ;;  %v9183_v60 = vld [vmem:[#allocation5 + $0x628] sm:$0xf]  ;;  %v12812_v3 = vld [vmem:[#allocation5 + $0x634] sm:$0xf0] }
 0x24a   :  { %7300 = vmatpush.bf16.msrb.mxu3 %v9376_v62  ;;  %v12816_v62 = vld [vmem:[#allocation5 + $0x654] sm:$0xf0]  ;;  %v9311_v63 = vld [vmem:[#allocation5 + $0x728] sm:$0xf] }
 0x24b   :  { %7262 = vmatpush.bf16.msrb.mxu0 %v8976_v8  ;;  %v14069_v8 = vadd.f32 %v7047_v0, %v7035_v48  ;;  %v12844_v2 = vld [vmem:[#allocation5 + $0x734] sm:$0xf0]  ;;  %v8911_v27 = vld [vmem:[#allocation5 + $0x408] sm:$0xf] }
 0x24c   :  { %7275 = vmatpush.bf16.msrb.mxu1 %v9104_v58  ;;  %v9200_v58 = vor.u32 %v12816_v62, %v9199_v24  ;;  %v9039_v4 = vld [vmem:[#allocation5 + $0x508] sm:$0xf]  ;;  %v12776_v6 = vld [vmem:[#allocation5 + $0x514] sm:$0xf0]  ;;  %v9312_v14 = vor.u32 %v12844_v2, %v9311_v63  ;;  %v7036_v62 = vpop.f32.mrf.mxu2  ;;  %v7049_v1 = vpop.f32.mrf.mxu3 }
 0x24d   :  { %7288 = vmatpush.bf16.msrb.mxu2 %v9232_v26  ;;  %v8927_v26 = vld [vmem:[#allocation5 + $0x428] sm:$0xf]  ;;  %v12840_v24 = vld [vmem:[#allocation5 + $0x714] sm:$0xf0] }
 0x24e   :  { %7301 = vmatpush.bf16.msrb.mxu3 %v9360_v36  ;;  %v12780_v36 = vld [vmem:[#allocation5 + $0x534] sm:$0xf0]  ;;  %v8928_v40 = vor.u32 %v12748_v15, %v8927_v26  ;;  %v9167_v61 = vld [vmem:[#allocation5 + $0x608] sm:$0xf] }
 0x24f   :  { %7263 = vmatpush.bf16.msrb.mxu0 %v8960_v51  ;;  %v12744_v51 = vld [vmem:[#allocation5 + $0x414] sm:$0xf0]  ;;  %v9295_v21 = vld [vmem:[#allocation5 + $0x708] sm:$0xf] }
 0x250   :  { %7276 = vmatpush.bf16.msrb.mxu1 %v9088_v59  ;;  %v9056_v59 = vor.u32 %v12780_v36, %v9055_v47  ;;  %v9535_v48 = vld [vmem:[#allocation5 + $0x8e8] sm:$0xf]  ;;  %v12900_v0 = vld [vmem:[#allocation5 + $0x8f4] sm:$0xf0]  ;;  %v8912_v9 = vor.u32 %v12744_v51, %v8911_v27 }
 0x251   :  { %7289 = vmatpush.bf16.msrb.mxu2 %v9216_v56  ;;  %v9184_v56 = vor.u32 %v12812_v3, %v9183_v60  ;;  %v9663_v39 = vld [vmem:[#allocation5 + $0x9e8] sm:$0xf]  ;;  %v12996_v47 = vld [vmem:[#allocation5 + $0xbf4] sm:$0xf0]  ;;  %v9536_v36 = vor.u32 %v12900_v0, %v9535_v48 }
 0x252   :  { %7302 = vmatpush.bf16.msrb.mxu3 %v9344_v52  ;;  %v12808_v52 = vld [vmem:[#allocation5 + $0x614] sm:$0xf0]  ;;  %v9791_v43 = vld [vmem:[#allocation5 + $0xae8] sm:$0xf] }
 0x253   :  { %7264 = vmatpush.bf16.msrb.mxu0 %v8944_v50  ;;  %v12932_v50 = vld [vmem:[#allocation5 + $0x9f4] sm:$0xf0]  ;;  %v9168_v26 = vor.u32 %v12808_v52, %v9167_v61  ;;  %v9919_v15 = vld [vmem:[#allocation5 + $0xbe8] sm:$0xf] }
 0x254   :  { %7277 = vmatpush.bf16.msrb.mxu1 %v9072_v32  ;;  %v12964_v32 = vld [vmem:[#allocation5 + $0xaf4] sm:$0xf0]  ;;  %v9664_v60 = vor.u32 %v12932_v50, %v9663_v39  ;;  %v9519_v63 = vld [vmem:[#allocation5 + $0x8c8] sm:$0xf] }
 0x255   :  { %7290 = vmatpush.bf16.msrb.mxu2 %v9200_v58  ;;  %v9040_v58 = vor.u32 %v12776_v6, %v9039_v4  ;;  %v9792_v3 = vor.u32 %v12964_v32, %v9791_v43  ;;  %v12896_v2 = vld [vmem:[#allocation5 + $0x8d4] sm:$0xf0]  ;;  %v9647_v62 = vld [vmem:[#allocation5 + $0x9c8] sm:$0xf] }
 0x256   :  { %7303 = vmatpush.bf16.msrb.mxu3 %v9328_v57  ;;  %v9296_v57 = vor.u32 %v12840_v24, %v9295_v21  ;;  %v12928_v27 = vld [vmem:[#allocation5 + $0x9d4] sm:$0xf0]  ;;  %v9775_v51 = vld [vmem:[#allocation5 + $0xac8] sm:$0xf]  ;;  %v9520_v4 = vor.u32 %v12896_v2, %v9519_v63 }
 0x257   :  { %7265 = vmatpush.bf16.msrb.mxu0 %v8928_v40  ;;  %v9920_v40 = vor.u32 %v12996_v47, %v9919_v15  ;;  %v12960_v1 = vld [vmem:[#allocation5 + $0xad4] sm:$0xf0]  ;;  %v9648_v6 = vor.u32 %v12928_v27, %v9647_v62  ;;  %v9631_v21 = vld [vmem:[#allocation5 + $0x9a8] sm:$0xf] }
 0x258   :  { %7278 = vmatpush.bf16.msrb.mxu1 %v9056_v59  ;;  %v9903_v59 = vld [vmem:[#allocation5 + $0xbc8] sm:$0xf]  ;;  %v9776_v61 = vor.u32 %v12960_v1, %v9775_v51  ;;  %v12892_v52 = vld [vmem:[#allocation5 + $0x8b4] sm:$0xf0] }
 0x259   :  { %7291 = vmatpush.bf16.msrb.mxu2 %v9184_v56  ;;  %v12992_v56 = vld [vmem:[#allocation5 + $0xbd4] sm:$0xf0]  ;;  %v9759_v0 = vld [vmem:[#allocation5 + $0xaa8] sm:$0xf] }
 0x25a   :  { %7304 = vmatpush.bf16.msrb.mxu3 %v9312_v14  ;;  %v9503_v14 = vld [vmem:[#allocation5 + $0x8a8] sm:$0xf]  ;;  %v9904_v24 = vor.u32 %v12992_v56, %v9903_v59  ;;  %v12924_v48 = vld [vmem:[#allocation5 + $0x9b4] sm:$0xf0] }
 0x25b   :  { %7266 = vmatpush.bf16.msrb.mxu0 %v8912_v9  ;;  %v12956_v39 = vld [vmem:[#allocation5 + $0xab4] sm:$0xf0]  ;;  %v9887_v9 = vld [vmem:[#allocation5 + $0xba8] sm:$0xf]  ;;  %v9504_v43 = vor.u32 %v12892_v52, %v9503_v14  ;;  %v9632_v32 = vor.u32 %v12924_v48, %v9631_v21  ;;  %v7060_v63 = vpop.f32.mrf.mxu0 }
 0x25c   :  { %7279 = vmatpush.bf16.msrb.mxu1 %v9040_v58  ;;  %v12988_v50 = vld [vmem:[#allocation5 + $0xbb4] sm:$0xf0]  ;;  %v9760_v58 = vor.u32 %v12956_v39, %v9759_v0  ;;  %v9615_v47 = vld [vmem:[#allocation5 + $0x988] sm:$0xf]  ;;  %v7073_v51 = vpop.f32.mrf.mxu1 }
 0x25d   :  { %7292 = vmatpush.bf16.msrb.mxu2 %v9168_v26  ;;  %v9487_v26 = vld [vmem:[#allocation5 + $0x888] sm:$0xf]  ;;  %v12888_v15 = vld [vmem:[#allocation5 + $0x894] sm:$0xf0] }
 0x25e   :  { %7305 = vmatpush.bf16.msrb.mxu3 %v9296_v57  ;;  %7267 = vmatmul.bf16.vlgmr.msrb.gmra.mxu0 %v13916_v41  ;;  %v9888_v57 = vor.u32 %v12988_v50, %v9887_v9  ;;  %v9871_v2 = vld [vmem:[#allocation5 + $0xb88] sm:$0xf]  ;;  %v12984_v62 = vld [vmem:[#allocation5 + $0xb94] sm:$0xf0]  ;;  %v9488_v27 = vor.u32 %v12888_v15, %v9487_v26 }
 0x25f   :  { %7311 = vmatpush.bf16.msra.mxu0 %v9536_v36  ;;  %7280 = vmatmul.bf16.vlgmr.msrb.gmra.mxu1 %v13920_v44  ;;  %v12920_v36 = vld [vmem:[#allocation5 + $0x994] sm:$0xf0]  ;;  %v9471_v56 = vld [vmem:[#allocation5 + $0x868] sm:$0xf] }
 0x260   :  { %7324 = vmatpush.bf16.msra.mxu1 %v9664_v60  ;;  %7293 = vmatmul.bf16.vlgmr.msrb.gmra.mxu2 %v13914_v38  ;;  %v9743_v60 = vld [vmem:[#allocation5 + $0xa88] sm:$0xf]  ;;  %v9616_v1 = vor.u32 %v12920_v36, %v9615_v47  ;;  %v12916_v52 = vld [vmem:[#allocation5 + $0x974] sm:$0xf0] }
 0x261   :  { %7337 = vmatpush.bf16.msra.mxu2 %v9792_v3  ;;  %7306 = vmatmul.bf16.vlgmr.msrb.gmra.mxu3 %v13918_v42  ;;  %v12952_v3 = vld [vmem:[#allocation5 + $0xa94] sm:$0xf0]  ;;  %v9727_v21 = vld [vmem:[#allocation5 + $0xa68] sm:$0xf] }
 0x262   :  { %7350 = vmatpush.bf16.msra.mxu3 %v9920_v40  ;;  %v7061_v40 = vadd.f32 %v7060_v63, %v14069_v8  ;;  %v9744_v59 = vor.u32 %v12952_v3, %v9743_v60  ;;  %v9855_v48 = vld [vmem:[#allocation5 + $0xb68] sm:$0xf]  ;;  %v12980_v0 = vld [vmem:[#allocation5 + $0xb74] sm:$0xf0] }
 0x263   :  { %7312 = vmatpush.bf16.msra.mxu0 %v9520_v4  ;;  %v12884_v4 = vld [vmem:[#allocation5 + $0x874] sm:$0xf0]  ;;  %v9455_v50 = vld [vmem:[#allocation5 + $0x848] sm:$0xf]  ;;  %v7086_v26 = vpop.f32.mrf.mxu2 }
 0x264   :  { %7325 = vmatpush.bf16.msra.mxu1 %v9648_v6  ;;  %v9599_v6 = vld [vmem:[#allocation5 + $0x968] sm:$0xf]  ;;  %v7074_v14 = vadd.f32 %v7073_v51, %v7061_v40  ;;  %v9472_v39 = vor.u32 %v12884_v4, %v9471_v56  ;;  %v12912_v15 = vld [vmem:[#allocation5 + $0x954] sm:$0xf0]  ;;  %v7099_v60 = vpop.f32.mrf.mxu3  ;;  %v7075_v40 = vpop.f32.mrf.mxu1 }
 0x265   :  { %7338 = vmatpush.bf16.msra.mxu2 %v9776_v61  ;;  %v9872_v61 = vor.u32 %v12984_v62, %v9871_v2  ;;  %v9600_v8 = vor.u32 %v12916_v52, %v9599_v6  ;;  %v9711_v47 = vld [vmem:[#allocation5 + $0xa48] sm:$0xf]  ;;  %v12976_v63 = vld [vmem:[#allocation5 + $0xb54] sm:$0xf0]  ;;  %v7062_v2 = vpop.f32.mrf.mxu0 }
 0x266   :  { %7351 = vmatpush.bf16.msra.mxu3 %v9904_v24  ;;  %v12948_v24 = vld [vmem:[#allocation5 + $0xa74] sm:$0xf0]  ;;  %v7087_v36 = vadd.f32 %v7086_v26, %v7074_v14  ;;  %v9839_v3 = vld [vmem:[#allocation5 + $0xb48] sm:$0xf] }
 0x267   :  { %7313 = vmatpush.bf16.msra.mxu0 %v9504_v43  ;;  %v9728_v9 = vor.u32 %v12948_v24, %v9727_v21  ;;  %v12880_v43 = vld [vmem:[#allocation5 + $0x854] sm:$0xf0]  ;;  %v9567_v4 = vld [vmem:[#allocation5 + $0x928] sm:$0xf]  ;;  %v9840_v6 = vor.u32 %v12976_v63, %v9839_v3 }
 0x268   :  { %7326 = vmatpush.bf16.msra.mxu1 %v9632_v32  ;;  %v9583_v32 = vld [vmem:[#allocation5 + $0x948] sm:$0xf]  ;;  %v9456_v62 = vor.u32 %v12880_v43, %v9455_v50  ;;  %v12876_v56 = vld [vmem:[#allocation5 + $0x834] sm:$0xf0] }
 0x269   :  { %7339 = vmatpush.bf16.msra.mxu2 %v9760_v58  ;;  %v9856_v58 = vor.u32 %v12980_v0, %v9855_v48  ;;  %v9584_v51 = vor.u32 %v12912_v15, %v9583_v32  ;;  %v9695_v14 = vld [vmem:[#allocation5 + $0xa28] sm:$0xf]  ;;  %v12940_v52 = vld [vmem:[#allocation5 + $0xa34] sm:$0xf0] }
 0x26a   :  { %7352 = vmatpush.bf16.msra.mxu3 %v9888_v57  ;;  %v12944_v57 = vld [vmem:[#allocation5 + $0xa54] sm:$0xf0]  ;;  %v9823_v21 = vld [vmem:[#allocation5 + $0xb28] sm:$0xf] }
 0x26b   :  { %7314 = vmatpush.bf16.msra.mxu0 %v9488_v27  ;;  %v14076_v27 = vadd.f32 %v7099_v60, %v7087_v36  ;;  %v12972_v24 = vld [vmem:[#allocation5 + $0xb34] sm:$0xf0]  ;;  %v9423_v0 = vld [vmem:[#allocation5 + $0x808] sm:$0xf] }
 0x26c   :  { %7327 = vmatpush.bf16.msra.mxu1 %v9616_v1  ;;  %v9712_v1 = vor.u32 %v12944_v57, %v9711_v47  ;;  %v9551_v50 = vld [vmem:[#allocation5 + $0x908] sm:$0xf]  ;;  %v12904_v43 = vld [vmem:[#allocation5 + $0x914] sm:$0xf0]  ;;  %v9824_v26 = vor.u32 %v12972_v24, %v9823_v21  ;;  %v7088_v57 = vpop.f32.mrf.mxu2  ;;  %v7101_v63 = vpop.f32.mrf.mxu3 }
 0x26d   :  { %7340 = vmatpush.bf16.msra.mxu2 %v9744_v59  ;;  %v9439_v59 = vld [vmem:[#allocation5 + $0x828] sm:$0xf]  ;;  %v12968_v47 = vld [vmem:[#allocation5 + $0xb14] sm:$0xf0] }
 0x26e   :  { %7353 = vmatpush.bf16.msra.mxu3 %v9872_v61  ;;  %v12908_v61 = vld [vmem:[#allocation5 + $0x934] sm:$0xf0]  ;;  %v9440_v48 = vor.u32 %v12876_v56, %v9439_v59  ;;  %v9679_v32 = vld [vmem:[#allocation5 + $0xa08] sm:$0xf] }
 0x26f   :  { %7315 = vmatpush.bf16.msra.mxu0 %v9472_v39  ;;  %v12872_v39 = vld [vmem:[#allocation5 + $0x814] sm:$0xf0]  ;;  %v9807_v15 = vld [vmem:[#allocation5 + $0xb08] sm:$0xf] }
 0x270   :  { %7328 = vmatpush.bf16.msra.mxu1 %v9600_v8  ;;  %v9568_v8 = vor.u32 %v12908_v61, %v9567_v4  ;;  %v10047_v36 = vld [vmem:[#allocation5 + $0xce8] sm:$0xf]  ;;  %v13028_v60 = vld [vmem:[#allocation5 + $0xcf4] sm:$0xf0]  ;;  %v9424_v2 = vor.u32 %v12872_v39, %v9423_v0 }
 0x271   :  { %7341 = vmatpush.bf16.msra.mxu2 %v9728_v9  ;;  %v9696_v9 = vor.u32 %v12940_v52, %v9695_v14  ;;  %v10175_v3 = vld [vmem:[#allocation5 + $0xde8] sm:$0xf]  ;;  %v13124_v4 = vld [vmem:[#allocation5 + $0xff4] sm:$0xf0]  ;;  %v10048_v61 = vor.u32 %v13028_v60, %v10047_v36 }
 0x272   :  { %7354 = vmatpush.bf16.msra.mxu3 %v9856_v58  ;;  %v12936_v58 = vld [vmem:[#allocation5 + $0xa14] sm:$0xf0]  ;;  %v10303_v40 = vld [vmem:[#allocation5 + $0xee8] sm:$0xf] }
 0x273   :  { %7316 = vmatpush.bf16.msra.mxu0 %v9456_v62  ;;  %v13060_v62 = vld [vmem:[#allocation5 + $0xdf4] sm:$0xf0]  ;;  %v9680_v59 = vor.u32 %v12936_v58, %v9679_v32  ;;  %v10431_v56 = vld [vmem:[#allocation5 + $0xfe8] sm:$0xf] }
 0x274   :  { %7329 = vmatpush.bf16.msra.mxu1 %v9584_v51  ;;  %v13092_v51 = vld [vmem:[#allocation5 + $0xef4] sm:$0xf0]  ;;  %v10176_v14 = vor.u32 %v13060_v62, %v10175_v3  ;;  %v10031_v21 = vld [vmem:[#allocation5 + $0xcc8] sm:$0xf] }
 0x275   :  { %7342 = vmatpush.bf16.msra.mxu2 %v9712_v1  ;;  %v9552_v1 = vor.u32 %v12904_v43, %v9551_v50  ;;  %v10304_v52 = vor.u32 %v13092_v51, %v10303_v40  ;;  %v13024_v24 = vld [vmem:[#allocation5 + $0xcd4] sm:$0xf0]  ;;  %v10159_v57 = vld [vmem:[#allocation5 + $0xdc8] sm:$0xf] }
 0x276   :  { %7355 = vmatpush.bf16.msra.mxu3 %v9840_v6  ;;  %v9808_v6 = vor.u32 %v12968_v47, %v9807_v15  ;;  %v13056_v0 = vld [vmem:[#allocation5 + $0xdd4] sm:$0xf0]  ;;  %v10287_v39 = vld [vmem:[#allocation5 + $0xec8] sm:$0xf]  ;;  %v10032_v50 = vor.u32 %v13024_v24, %v10031_v21 }
 0x277   :  { %7317 = vmatpush.bf16.msra.mxu0 %v9440_v48  ;;  %v10432_v48 = vor.u32 %v13124_v4, %v10431_v56  ;;  %v13088_v63 = vld [vmem:[#allocation5 + $0xed4] sm:$0xf0]  ;;  %v10160_v43 = vor.u32 %v13056_v0, %v10159_v57  ;;  %v10143_v15 = vld [vmem:[#allocation5 + $0xda8] sm:$0xf] }
 0x278   :  { %7330 = vmatpush.bf16.msra.mxu1 %v9568_v8  ;;  %v10415_v8 = vld [vmem:[#allocation5 + $0xfc8] sm:$0xf]  ;;  %v10288_v32 = vor.u32 %v13088_v63, %v10287_v39  ;;  %v13020_v58 = vld [vmem:[#allocation5 + $0xcb4] sm:$0xf0] }
 0x279   :  { %7343 = vmatpush.bf16.msra.mxu2 %v9696_v9  ;;  %v13120_v9 = vld [vmem:[#allocation5 + $0xfd4] sm:$0xf0]  ;;  %v10271_v60 = vld [vmem:[#allocation5 + $0xea8] sm:$0xf] }
 0x27a   :  { %7356 = vmatpush.bf16.msra.mxu3 %v9824_v26  ;;  %v10015_v26 = vld [vmem:[#allocation5 + $0xca8] sm:$0xf]  ;;  %v10416_v47 = vor.u32 %v13120_v9, %v10415_v8  ;;  %v13052_v36 = vld [vmem:[#allocation5 + $0xdb4] sm:$0xf0] }
 0x27b   :  { %7318 = vmatpush.bf16.msra.mxu0 %v9424_v2  ;;  %v13084_v3 = vld [vmem:[#allocation5 + $0xeb4] sm:$0xf0]  ;;  %v10399_v2 = vld [vmem:[#allocation5 + $0xfa8] sm:$0xf]  ;;  %v10016_v40 = vor.u32 %v13020_v58, %v10015_v26  ;;  %v10144_v51 = vor.u32 %v13052_v36, %v10143_v15  ;;  %v7112_v21 = vpop.f32.mrf.mxu0 }
 0x27c   :  { %7331 = vmatpush.bf16.msra.mxu1 %v9552_v1  ;;  %v13116_v62 = vld [vmem:[#allocation5 + $0xfb4] sm:$0xf0]  ;;  %v10272_v1 = vor.u32 %v13084_v3, %v10271_v60  ;;  %v10127_v4 = vld [vmem:[#allocation5 + $0xd88] sm:$0xf]  ;;  %v7125_v39 = vpop.f32.mrf.mxu1 }
 0x27d   :  { %7344 = vmatpush.bf16.msra.mxu2 %v9680_v59  ;;  %v9999_v59 = vld [vmem:[#allocation5 + $0xc88] sm:$0xf]  ;;  %v13016_v56 = vld [vmem:[#allocation5 + $0xc94] sm:$0xf0] }
 0x27e   :  { %7357 = vmatpush.bf16.msra.mxu3 %v9808_v6  ;;  %7319 = vmatmul.bf16.vlgmr.msra.gmra.mxu0 %v13926_v25  ;;  %v10400_v6 = vor.u32 %v13116_v62, %v10399_v2  ;;  %v10383_v24 = vld [vmem:[#allocation5 + $0xf88] sm:$0xf]  ;;  %v13112_v57 = vld [vmem:[#allocation5 + $0xf94] sm:$0xf0]  ;;  %v10000_v0 = vor.u32 %v13016_v56, %v9999_v59 }
 0x27f   :  { %7363 = vmatpush.bf16.msrb.mxu0 %v10048_v61  ;;  %7332 = vmatmul.bf16.vlgmr.msra.gmra.mxu1 %v13930_v30  ;;  %v13048_v61 = vld [vmem:[#allocation5 + $0xd94] sm:$0xf0]  ;;  %v9983_v9 = vld [vmem:[#allocation5 + $0xc68] sm:$0xf] }
 0x280   :  { %7376 = vmatpush.bf16.msrb.mxu1 %v10176_v14  ;;  %7345 = vmatmul.bf16.vlgmr.msra.gmra.mxu2 %v13928_v29  ;;  %v10255_v14 = vld [vmem:[#allocation5 + $0xe88] sm:$0xf]  ;;  %v10128_v63 = vor.u32 %v13048_v61, %v10127_v4  ;;  %v13044_v58 = vld [vmem:[#allocation5 + $0xd74] sm:$0xf0] }
 0x281   :  { %7389 = vmatpush.bf16.msrb.mxu2 %v10304_v52  ;;  %7358 = vmatmul.bf16.vlgmr.msra.gmra.mxu3 %v13932_v33  ;;  %v13080_v52 = vld [vmem:[#allocation5 + $0xe94] sm:$0xf0]  ;;  %v10239_v15 = vld [vmem:[#allocation5 + $0xe68] sm:$0xf] }
 0x282   :  { %7402 = vmatpush.bf16.msrb.mxu3 %v10432_v48  ;;  %v7113_v48 = vadd.f32 %v7112_v21, %v14076_v27  ;;  %v10256_v8 = vor.u32 %v13080_v52, %v10255_v14  ;;  %v10367_v36 = vld [vmem:[#allocation5 + $0xf68] sm:$0xf]  ;;  %v13108_v60 = vld [vmem:[#allocation5 + $0xf74] sm:$0xf0] }
 0x283   :  { %7364 = vmatpush.bf16.msrb.mxu0 %v10032_v50  ;;  %v13012_v50 = vld [vmem:[#allocation5 + $0xc74] sm:$0xf0]  ;;  %v9967_v62 = vld [vmem:[#allocation5 + $0xc48] sm:$0xf]  ;;  %v7138_v59 = vpop.f32.mrf.mxu2 }
 0x284   :  { %7377 = vmatpush.bf16.msrb.mxu1 %v10160_v43  ;;  %v10111_v43 = vld [vmem:[#allocation5 + $0xd68] sm:$0xf]  ;;  %v7126_v26 = vadd.f32 %v7125_v39, %v7113_v48  ;;  %v9984_v3 = vor.u32 %v13012_v50, %v9983_v9  ;;  %v13040_v56 = vld [vmem:[#allocation5 + $0xd54] sm:$0xf0]  ;;  %v7151_v14 = vpop.f32.mrf.mxu3  ;;  %v7127_v48 = vpop.f32.mrf.mxu1 }
 0x285   :  { %7390 = vmatpush.bf16.msrb.mxu2 %v10288_v32  ;;  %v10384_v32 = vor.u32 %v13112_v57, %v10383_v24  ;;  %v10112_v27 = vor.u32 %v13044_v58, %v10111_v43  ;;  %v10223_v4 = vld [vmem:[#allocation5 + $0xe48] sm:$0xf]  ;;  %v13104_v21 = vld [vmem:[#allocation5 + $0xf54] sm:$0xf0]  ;;  %v7114_v24 = vpop.f32.mrf.mxu0 }
 0x286   :  { %7403 = vmatpush.bf16.msrb.mxu3 %v10416_v47  ;;  %v13076_v47 = vld [vmem:[#allocation5 + $0xe74] sm:$0xf0]  ;;  %v7139_v61 = vadd.f32 %v7138_v59, %v7126_v26  ;;  %v10351_v52 = vld [vmem:[#allocation5 + $0xf48] sm:$0xf] }
 0x287   :  { %7365 = vmatpush.bf16.msrb.mxu0 %v10016_v40  ;;  %v10240_v2 = vor.u32 %v13076_v47, %v10239_v15  ;;  %v13008_v40 = vld [vmem:[#allocation5 + $0xc54] sm:$0xf0]  ;;  %v10079_v50 = vld [vmem:[#allocation5 + $0xd28] sm:$0xf]  ;;  %v10352_v43 = vor.u32 %v13104_v21, %v10351_v52 }
 0x288   :  { %7378 = vmatpush.bf16.msrb.mxu1 %v10144_v51  ;;  %v10095_v51 = vld [vmem:[#allocation5 + $0xd48] sm:$0xf]  ;;  %v9968_v57 = vor.u32 %v13008_v40, %v9967_v62  ;;  %v13004_v9 = vld [vmem:[#allocation5 + $0xc34] sm:$0xf0] }
 0x289   :  { %7391 = vmatpush.bf16.msrb.mxu2 %v10272_v1  ;;  %v10368_v1 = vor.u32 %v13108_v60, %v10367_v36  ;;  %v10096_v39 = vor.u32 %v13040_v56, %v10095_v51  ;;  %v10207_v26 = vld [vmem:[#allocation5 + $0xe28] sm:$0xf]  ;;  %v13068_v58 = vld [vmem:[#allocation5 + $0xe34] sm:$0xf0] }
 0x28a   :  { %7404 = vmatpush.bf16.msrb.mxu3 %v10400_v6  ;;  %v13072_v6 = vld [vmem:[#allocation5 + $0xe54] sm:$0xf0]  ;;  %v10335_v15 = vld [vmem:[#allocation5 + $0xf28] sm:$0xf] }
 0x28b   :  { %7366 = vmatpush.bf16.msrb.mxu0 %v10000_v0  ;;  %v14083_v0 = vadd.f32 %v7151_v14, %v7139_v61  ;;  %v13100_v47 = vld [vmem:[#allocation5 + $0xf34] sm:$0xf0]  ;;  %v9935_v60 = vld [vmem:[#allocation5 + $0xc08] sm:$0xf] }
 0x28c   :  { %7379 = vmatpush.bf16.msrb.mxu1 %v10128_v63  ;;  %v10224_v63 = vor.u32 %v13072_v6, %v10223_v4  ;;  %v10063_v62 = vld [vmem:[#allocation5 + $0xd08] sm:$0xf]  ;;  %v13032_v40 = vld [vmem:[#allocation5 + $0xd14] sm:$0xf0]  ;;  %v10336_v59 = vor.u32 %v13100_v47, %v10335_v15  ;;  %v7140_v6 = vpop.f32.mrf.mxu2  ;;  %v7153_v21 = vpop.f32.mrf.mxu3 }
 0x28d   :  { %7392 = vmatpush.bf16.msrb.mxu2 %v10256_v8  ;;  %v9951_v8 = vld [vmem:[#allocation5 + $0xc28] sm:$0xf]  ;;  %v13096_v4 = vld [vmem:[#allocation5 + $0xf14] sm:$0xf0] }
 0x28e   :  { %7405 = vmatpush.bf16.msrb.mxu3 %v10384_v32  ;;  %v13036_v32 = vld [vmem:[#allocation5 + $0xd34] sm:$0xf0]  ;;  %v9952_v36 = vor.u32 %v13004_v9, %v9951_v8  ;;  %v10191_v51 = vld [vmem:[#allocation5 + $0xe08] sm:$0xf] }
 0x28f   :  { %7367 = vmatpush.bf16.msrb.mxu0 %v9984_v3  ;;  %v13000_v3 = vld [vmem:[#allocation5 + $0xc14] sm:$0xf0]  ;;  %v10319_v56 = vld [vmem:[#allocation5 + $0xf08] sm:$0xf] }
 0x290   :  { %7380 = vmatpush.bf16.msrb.mxu1 %v10112_v27  ;;  %v10080_v27 = vor.u32 %v13036_v32, %v10079_v50  ;;  %v10559_v61 = vld [vmem:[#allocation5 + $0x10e8] sm:$0xf]  ;;  %v13156_v14 = vld [vmem:[#allocation5 + $0x10f4] sm:$0xf0]  ;;  %v9936_v24 = vor.u32 %v13000_v3, %v9935_v60 }
 0x291   :  { %7393 = vmatpush.bf16.msrb.mxu2 %v10240_v2  ;;  %v10208_v2 = vor.u32 %v13068_v58, %v10207_v26  ;;  %v10687_v52 = vld [vmem:[#allocation5 + $0x11e8] sm:$0xf]  ;;  %v13252_v50 = vld [vmem:[#allocation5 + $0x13f4] sm:$0xf0]  ;;  %v10560_v32 = vor.u32 %v13156_v14, %v10559_v61 }
 0x292   :  { %7406 = vmatpush.bf16.msrb.mxu3 %v10368_v1  ;;  %v13064_v1 = vld [vmem:[#allocation5 + $0xe14] sm:$0xf0]  ;;  %v10815_v48 = vld [vmem:[#allocation5 + $0x12e8] sm:$0xf] }
 0x293   :  { %7368 = vmatpush.bf16.msrb.mxu0 %v9968_v57  ;;  %v13188_v57 = vld [vmem:[#allocation5 + $0x11f4] sm:$0xf0]  ;;  %v10192_v8 = vor.u32 %v13064_v1, %v10191_v51  ;;  %v10943_v9 = vld [vmem:[#allocation5 + $0x13e8] sm:$0xf] }
 0x294   :  { %7381 = vmatpush.bf16.msrb.mxu1 %v10096_v39  ;;  %v13220_v39 = vld [vmem:[#allocation5 + $0x12f4] sm:$0xf0]  ;;  %v10688_v26 = vor.u32 %v13188_v57, %v10687_v52  ;;  %v10543_v15 = vld [vmem:[#allocation5 + $0x10c8] sm:$0xf] }
 0x295   :  { %7394 = vmatpush.bf16.msrb.mxu2 %v10224_v63  ;;  %v10064_v63 = vor.u32 %v13032_v40, %v10063_v62  ;;  %v10816_v58 = vor.u32 %v13220_v39, %v10815_v48  ;;  %v13152_v47 = vld [vmem:[#allocation5 + $0x10d4] sm:$0xf0]  ;;  %v10671_v6 = vld [vmem:[#allocation5 + $0x11c8] sm:$0xf] }
 0x296   :  { %7407 = vmatpush.bf16.msrb.mxu3 %v10352_v43  ;;  %v10320_v43 = vor.u32 %v13096_v4, %v10319_v56  ;;  %v13184_v60 = vld [vmem:[#allocation5 + $0x11d4] sm:$0xf0]  ;;  %v10799_v3 = vld [vmem:[#allocation5 + $0x12c8] sm:$0xf]  ;;  %v10544_v62 = vor.u32 %v13152_v47, %v10543_v15 }
 0x297   :  { %7369 = vmatpush.bf16.msrb.mxu0 %v9952_v36  ;;  %v10944_v36 = vor.u32 %v13252_v50, %v10943_v9  ;;  %v13216_v21 = vld [vmem:[#allocation5 + $0x12d4] sm:$0xf0]  ;;  %v10672_v40 = vor.u32 %v13184_v60, %v10671_v6  ;;  %v10655_v56 = vld [vmem:[#allocation5 + $0x11a8] sm:$0xf] }
 0x298   :  { %7382 = vmatpush.bf16.msrb.mxu1 %v10080_v27  ;;  %v10927_v27 = vld [vmem:[#allocation5 + $0x13c8] sm:$0xf]  ;;  %v10800_v51 = vor.u32 %v13216_v21, %v10799_v3  ;;  %v13148_v1 = vld [vmem:[#allocation5 + $0x10b4] sm:$0xf0] }
 0x299   :  { %7395 = vmatpush.bf16.msrb.mxu2 %v10208_v2  ;;  %v13248_v2 = vld [vmem:[#allocation5 + $0x13d4] sm:$0xf0]  ;;  %v10783_v14 = vld [vmem:[#allocation5 + $0x12a8] sm:$0xf] }
 0x29a   :  { %7408 = vmatpush.bf16.msrb.mxu3 %v10336_v59  ;;  %v10527_v59 = vld [vmem:[#allocation5 + $0x10a8] sm:$0xf]  ;;  %v10928_v4 = vor.u32 %v13248_v2, %v10927_v27  ;;  %v13180_v61 = vld [vmem:[#allocation5 + $0x11b4] sm:$0xf0] }
 0x29b   :  { %7370 = vmatpush.bf16.msrb.mxu0 %v9936_v24  ;;  %v13212_v52 = vld [vmem:[#allocation5 + $0x12b4] sm:$0xf0]  ;;  %v10911_v24 = vld [vmem:[#allocation5 + $0x13a8] sm:$0xf]  ;;  %v10528_v48 = vor.u32 %v13148_v1, %v10527_v59  ;;  %v10656_v39 = vor.u32 %v13180_v61, %v10655_v56  ;;  %v7164_v15 = vpop.f32.mrf.mxu0 }
 0x29c   :  { %7383 = vmatpush.bf16.msrb.mxu1 %v10064_v63  ;;  %v13244_v57 = vld [vmem:[#allocation5 + $0x13b4] sm:$0xf0]  ;;  %v10784_v63 = vor.u32 %v13212_v52, %v10783_v14  ;;  %v10639_v50 = vld [vmem:[#allocation5 + $0x1188] sm:$0xf]  ;;  %v7177_v3 = vpop.f32.mrf.mxu1 }
 0x29d   :  { %7396 = vmatpush.bf16.msrb.mxu2 %v10192_v8  ;;  %v10511_v8 = vld [vmem:[#allocation5 + $0x1088] sm:$0xf]  ;;  %v13144_v9 = vld [vmem:[#allocation5 + $0x1094] sm:$0xf0] }
 0x29e   :  { %7409 = vmatpush.bf16.msrb.mxu3 %v10320_v43  ;;  %7371 = vmatmul.bf16.vlgmr.msrb.gmra.mxu0 %v13938_v23  ;;  %v10912_v43 = vor.u32 %v13244_v57, %v10911_v24  ;;  %v10895_v47 = vld [vmem:[#allocation5 + $0x1388] sm:$0xf]  ;;  %v13240_v6 = vld [vmem:[#allocation5 + $0x1394] sm:$0xf0]  ;;  %v10512_v60 = vor.u32 %v13144_v9, %v10511_v8 }
 0x29f   :  { %7415 = vmatpush.bf16.msra.mxu0 %v10560_v32  ;;  %7384 = vmatmul.bf16.vlgmr.msrb.gmra.mxu1 %v13942_v31  ;;  %v13176_v32 = vld [vmem:[#allocation5 + $0x1194] sm:$0xf0]  ;;  %v10495_v2 = vld [vmem:[#allocation5 + $0x1068] sm:$0xf] }
 0x2a0   :  { %7428 = vmatpush.bf16.msra.mxu1 %v10688_v26  ;;  %7397 = vmatmul.bf16.vlgmr.msrb.gmra.mxu2 %v13940_v28  ;;  %v10767_v26 = vld [vmem:[#allocation5 + $0x1288] sm:$0xf]  ;;  %v10640_v21 = vor.u32 %v13176_v32, %v10639_v50  ;;  %v13172_v1 = vld [vmem:[#allocation5 + $0x1174] sm:$0xf0] }
 0x2a1   :  { %7441 = vmatpush.bf16.msra.mxu2 %v10816_v58  ;;  %7410 = vmatmul.bf16.vlgmr.msrb.gmra.mxu3 %v13944_v35  ;;  %v13208_v58 = vld [vmem:[#allocation5 + $0x1294] sm:$0xf0]  ;;  %v10751_v56 = vld [vmem:[#allocation5 + $0x1268] sm:$0xf] }
 0x2a2   :  { %7454 = vmatpush.bf16.msra.mxu3 %v10944_v36  ;;  %v7165_v36 = vadd.f32 %v7164_v15, %v14083_v0  ;;  %v10768_v27 = vor.u32 %v13208_v58, %v10767_v26  ;;  %v10879_v61 = vld [vmem:[#allocation5 + $0x1368] sm:$0xf]  ;;  %v13236_v14 = vld [vmem:[#allocation5 + $0x1374] sm:$0xf0] }
 0x2a3   :  { %7416 = vmatpush.bf16.msra.mxu0 %v10544_v62  ;;  %v13140_v62 = vld [vmem:[#allocation5 + $0x1074] sm:$0xf0]  ;;  %v10479_v57 = vld [vmem:[#allocation5 + $0x1048] sm:$0xf]  ;;  %v7190_v8 = vpop.f32.mrf.mxu2 }
 0x2a4   :  { %7429 = vmatpush.bf16.msra.mxu1 %v10672_v40  ;;  %v10623_v40 = vld [vmem:[#allocation5 + $0x1168] sm:$0xf]  ;;  %v7178_v59 = vadd.f32 %v7177_v3, %v7165_v36  ;;  %v10496_v52 = vor.u32 %v13140_v62, %v10495_v2  ;;  %v13168_v9 = vld [vmem:[#allocation5 + $0x1154] sm:$0xf0]  ;;  %v7203_v26 = vpop.f32.mrf.mxu3  ;;  %v7179_v36 = vpop.f32.mrf.mxu1 }
 0x2a5   :  { %7442 = vmatpush.bf16.msra.mxu2 %v10800_v51  ;;  %v10896_v51 = vor.u32 %v13240_v6, %v10895_v47  ;;  %v10624_v0 = vor.u32 %v13172_v1, %v10623_v40  ;;  %v10735_v50 = vld [vmem:[#allocation5 + $0x1248] sm:$0xf]  ;;  %v13232_v15 = vld [vmem:[#allocation5 + $0x1354] sm:$0xf0]  ;;  %v7166_v47 = vpop.f32.mrf.mxu0 }
 0x2a6   :  { %7455 = vmatpush.bf16.msra.mxu3 %v10928_v4  ;;  %v13204_v4 = vld [vmem:[#allocation5 + $0x1274] sm:$0xf0]  ;;  %v7191_v32 = vadd.f32 %v7190_v8, %v7178_v59  ;;  %v10863_v58 = vld [vmem:[#allocation5 + $0x1348] sm:$0xf] }
 0x2a7   :  { %7417 = vmatpush.bf16.msra.mxu0 %v10528_v48  ;;  %v10752_v24 = vor.u32 %v13204_v4, %v10751_v56  ;;  %v13136_v48 = vld [vmem:[#allocation5 + $0x1054] sm:$0xf0]  ;;  %v10591_v62 = vld [vmem:[#allocation5 + $0x1128] sm:$0xf]  ;;  %v10864_v40 = vor.u32 %v13232_v15, %v10863_v58 }
 0x2a8   :  { %7430 = vmatpush.bf16.msra.mxu1 %v10656_v39  ;;  %v10607_v39 = vld [vmem:[#allocation5 + $0x1148] sm:$0xf]  ;;  %v10480_v6 = vor.u32 %v13136_v48, %v10479_v57  ;;  %v13132_v2 = vld [vmem:[#allocation5 + $0x1034] sm:$0xf0] }
 0x2a9   :  { %7443 = vmatpush.bf16.msra.mxu2 %v10784_v63  ;;  %v10880_v63 = vor.u32 %v13236_v14, %v10879_v61  ;;  %v10608_v3 = vor.u32 %v13168_v9, %v10607_v39  ;;  %v10719_v59 = vld [vmem:[#allocation5 + $0x1228] sm:$0xf]  ;;  %v13196_v1 = vld [vmem:[#allocation5 + $0x1234] sm:$0xf0] }
 0x2aa   :  { %7456 = vmatpush.bf16.msra.mxu3 %v10912_v43  ;;  %v13200_v43 = vld [vmem:[#allocation5 + $0x1254] sm:$0xf0]  ;;  %v10847_v56 = vld [vmem:[#allocation5 + $0x1328] sm:$0xf] }
 0x2ab   :  { %7418 = vmatpush.bf16.msra.mxu0 %v10512_v60  ;;  %v14090_v60 = vadd.f32 %v7203_v26, %v7191_v32  ;;  %v13228_v4 = vld [vmem:[#allocation5 + $0x1334] sm:$0xf0]  ;;  %v10447_v14 = vld [vmem:[#allocation5 + $0x1008] sm:$0xf] }
 0x2ac   :  { %7431 = vmatpush.bf16.msra.mxu1 %v10640_v21  ;;  %v10736_v21 = vor.u32 %v13200_v43, %v10735_v50  ;;  %v10575_v57 = vld [vmem:[#allocation5 + $0x1108] sm:$0xf]  ;;  %v13160_v48 = vld [vmem:[#allocation5 + $0x1114] sm:$0xf0]  ;;  %v10848_v8 = vor.u32 %v13228_v4, %v10847_v56  ;;  %v7192_v43 = vpop.f32.mrf.mxu2  ;;  %v7205_v15 = vpop.f32.mrf.mxu3 }
 0x2ad   :  { %7444 = vmatpush.bf16.msra.mxu2 %v10768_v27  ;;  %14185 = vst [vmem:[#allocation17_spill] sm:$0xff] %v14090_v60  ;;  %v10463_v27 = vld [vmem:[#allocation5 + $0x1028] sm:$0xf]  ;;  %v13224_v50 = vld [vmem:[#allocation5 + $0x1314] sm:$0xf0] }
 0x2ae   :  { %7457 = vmatpush.bf16.msra.mxu3 %v10896_v51  ;;  %v13164_v51 = vld [vmem:[#allocation5 + $0x1134] sm:$0xf0]  ;;  %v10464_v61 = vor.u32 %v13132_v2, %v10463_v27  ;;  %v10703_v39 = vld [vmem:[#allocation5 + $0x1208] sm:$0xf] }
 0x2af   :  { %7419 = vmatpush.bf16.msra.mxu0 %v10496_v52  ;;  %v13128_v52 = vld [vmem:[#allocation5 + $0x1014] sm:$0xf0]  ;;  %v10831_v9 = vld [vmem:[#allocation5 + $0x1308] sm:$0xf] }
 0x2b0   :  { %7432 = vmatpush.bf16.msra.mxu1 %v10624_v0  ;;  %v10592_v0 = vor.u32 %v13164_v51, %v10591_v62  ;;  %v11071_v32 = vld [vmem:[#allocation5 + $0x14e8] sm:$0xf]  ;;  %v13284_v26 = vld [vmem:[#allocation5 + $0x14f4] sm:$0xf0]  ;;  %v10448_v47 = vor.u32 %v13128_v52, %v10447_v14 }
 0x2b1   :  { %7445 = vmatpush.bf16.msra.mxu2 %v10752_v24  ;;  %v10720_v24 = vor.u32 %v13196_v1, %v10719_v59  ;;  %v11199_v58 = vld [vmem:[#allocation5 + $0x15e8] sm:$0xf]  ;;  %v13380_v62 = vld [vmem:[#allocation5 + $0x17f4] sm:$0xf0]  ;;  %v11072_v51 = vor.u32 %v13284_v26, %v11071_v32 }
 0x2b2   :  { %7458 = vmatpush.bf16.msra.mxu3 %v10880_v63  ;;  %v13192_v63 = vld [vmem:[#allocation5 + $0x1214] sm:$0xf0]  ;;  %v11327_v36 = vld [vmem:[#allocation5 + $0x16e8] sm:$0xf] }
 0x2b3   :  { %7420 = vmatpush.bf16.msra.mxu0 %v10480_v6  ;;  %v13316_v6 = vld [vmem:[#allocation5 + $0x15f4] sm:$0xf0]  ;;  %v10704_v27 = vor.u32 %v13192_v63, %v10703_v39  ;;  %v11455_v2 = vld [vmem:[#allocation5 + $0x17e8] sm:$0xf] }
 0x2b4   :  { %7433 = vmatpush.bf16.msra.mxu1 %v10608_v3  ;;  %v13348_v3 = vld [vmem:[#allocation5 + $0x16f4] sm:$0xf0]  ;;  %v11200_v59 = vor.u32 %v13316_v6, %v11199_v58  ;;  %v11055_v56 = vld [vmem:[#allocation5 + $0x14c8] sm:$0xf] }
 0x2b5   :  { %7446 = vmatpush.bf16.msra.mxu2 %v10736_v21  ;;  %v10576_v21 = vor.u32 %v13160_v48, %v10575_v57  ;;  %v11328_v1 = vor.u32 %v13348_v3, %v11327_v36  ;;  %v13280_v4 = vld [vmem:[#allocation5 + $0x14d4] sm:$0xf0]  ;;  %v11183_v43 = vld [vmem:[#allocation5 + $0x15c8] sm:$0xf] }
 0x2b6   :  { %7459 = vmatpush.bf16.msra.mxu3 %v10864_v40  ;;  %v10832_v40 = vor.u32 %v13224_v50, %v10831_v9  ;;  %v13312_v14 = vld [vmem:[#allocation5 + $0x15d4] sm:$0xf0]  ;;  %v11311_v52 = vld [vmem:[#allocation5 + $0x16c8] sm:$0xf]  ;;  %v11056_v57 = vor.u32 %v13280_v4, %v11055_v56 }
 0x2b7   :  { %7421 = vmatpush.bf16.msra.mxu0 %v10464_v61  ;;  %v11456_v61 = vor.u32 %v13380_v62, %v11455_v2  ;;  %v13344_v15 = vld [vmem:[#allocation5 + $0x16d4] sm:$0xf0]  ;;  %v11184_v48 = vor.u32 %v13312_v14, %v11183_v43  ;;  %v11167_v9 = vld [vmem:[#allocation5 + $0x15a8] sm:$0xf] }
 0x2b8   :  { %7434 = vmatpush.bf16.msra.mxu1 %v10592_v0  ;;  %v11439_v0 = vld [vmem:[#allocation5 + $0x17c8] sm:$0xf]  ;;  %v11312_v39 = vor.u32 %v13344_v15, %v11311_v52  ;;  %v13276_v63 = vld [vmem:[#allocation5 + $0x14b4] sm:$0xf0] }
 0x2b9   :  { %7447 = vmatpush.bf16.msra.mxu2 %v10720_v24  ;;  %v13376_v24 = vld [vmem:[#allocation5 + $0x17d4] sm:$0xf0]  ;;  %v11295_v26 = vld [vmem:[#allocation5 + $0x16a8] sm:$0xf] }
 0x2ba   :  { %7460 = vmatpush.bf16.msra.mxu3 %v10848_v8  ;;  %v11039_v8 = vld [vmem:[#allocation5 + $0x14a8] sm:$0xf]  ;;  %v11440_v50 = vor.u32 %v13376_v24, %v11439_v0  ;;  %v13308_v32 = vld [vmem:[#allocation5 + $0x15b4] sm:$0xf0] }
 0x2bb   :  { %7422 = vmatpush.bf16.msra.mxu0 %v10448_v47  ;;  %v13340_v58 = vld [vmem:[#allocation5 + $0x16b4] sm:$0xf0]  ;;  %v11423_v47 = vld [vmem:[#allocation5 + $0x17a8] sm:$0xf]  ;;  %v11040_v36 = vor.u32 %v13276_v63, %v11039_v8  ;;  %v7216_v52 = vpop.f32.mrf.mxu0 }
 0x2bc   :  { %7435 = vmatpush.bf16.msra.mxu1 %v10576_v21  ;;  %v13372_v6 = vld [vmem:[#allocation5 + $0x17b4] sm:$0xf0]  ;;  %v11023_v3 = vld [vmem:[#allocation5 + $0x1488] sm:$0xf]  ;;  %v11168_v21 = vor.u32 %v13308_v32, %v11167_v9  ;;  %v7229_v8 = vpop.f32.mrf.mxu1 }
 0x2bd   :  { %7448 = vmatpush.bf16.msra.mxu2 %v10704_v27  ;;  %v11296_v27 = vor.u32 %v13340_v58, %v11295_v26  ;;  %v13272_v2 = vld [vmem:[#allocation5 + $0x1494] sm:$0xf0]  ;;  %v11151_v62 = vld [vmem:[#allocation5 + $0x1588] sm:$0xf] }
 0x2be   :  { %7461 = vmatpush.bf16.msra.mxu3 %v10832_v40  ;;  %7423 = vmatmul.bf16.vlgmr.msra.gmra.mxu0 %v13950_v37  ;;  %v13693_v40 = vld [vmem:[#allocation7] sm:$0xf]  ;;  %v11279_v56 = vld [vmem:[#allocation5 + $0x1688] sm:$0xf]  ;;  %v13336_v4 = vld [vmem:[#allocation5 + $0x1694] sm:$0xf0]  ;;  %v11024_v14 = vor.u32 %v13272_v2, %v11023_v3 }
 0x2bf   :  { %7467 = vmatpush.bf16.msrb.mxu0 %v11072_v51  ;;  %7436 = vmatmul.bf16.vlgmr.msra.gmra.mxu1 %v13954_v46  ;;  %v1137_v51 = vperm.slane %v13693_v40, 2  ;;  %v11407_v43 = vld [vmem:[#allocation5 + $0x1788] sm:$0xf]  ;;  %v11280_v0 = vor.u32 %v13336_v4, %v11279_v56  ;;  %v13300_v9 = vld [vmem:[#allocation5 + $0x1574] sm:$0xf0] }
 0x2c0   :  { %7480 = vmatpush.bf16.msrb.mxu1 %v11200_v59  ;;  %7449 = vmatmul.bf16.vlgmr.msra.gmra.mxu2 %v13952_v45  ;;  %v11424_v59 = vor.u32 %v13372_v6, %v11423_v47  ;;  %v11007_v24 = vld [vmem:[#allocation5 + $0x1468] sm:$0xf]  ;;  %v13332_v32 = vld [vmem:[#allocation5 + $0x1674] sm:$0xf0] }
 0x2c1   :  { %7493 = vmatpush.bf16.msrb.mxu2 %v11328_v1  ;;  %7462 = vmatmul.bf16.vlgmr.msra.gmra.mxu3 %v13956_v49  ;;  %v13304_v1 = vld [vmem:[#allocation5 + $0x1594] sm:$0xf0]  ;;  %v11391_v26 = vld [vmem:[#allocation5 + $0x1768] sm:$0xf] }
 0x2c2   :  { %7506 = vmatpush.bf16.msrb.mxu3 %v11456_v61  ;;  %v13368_v61 = vld [vmem:[#allocation5 + $0x1794] sm:$0xf0]  ;;  %v11152_v15 = vor.u32 %v13304_v1, %v11151_v62  ;;  %v11119_v2 = vld [vmem:[#allocation5 + $0x1548] sm:$0xf] }
 0x2c3   :  { %7468 = vmatpush.bf16.msrb.mxu0 %v11056_v57  ;;  %v13268_v57 = vld [vmem:[#allocation5 + $0x1474] sm:$0xf0]  ;;  %v11408_v63 = vor.u32 %v13368_v61, %v11407_v43  ;;  %v7242_v62 = vpop.f32.mrf.mxu2  ;;  %v11375_v43 = vld [vmem:[#allocation5 + $0x1748] sm:$0xf] }
 0x2c4   :  { %7481 = vmatpush.bf16.msrb.mxu1 %v11184_v48  ;;  %v11135_v48 = vld [vmem:[#allocation5 + $0x1568] sm:$0xf]  ;;  %v13364_v58 = vld [vmem:[#allocation5 + $0x1774] sm:$0xf0]  ;;  %v11008_v6 = vor.u32 %v13268_v57, %v11007_v24  ;;  %v7255_v4 = vpop.f32.mrf.mxu3 }
 0x2c5   :  { %7494 = vmatpush.bf16.msrb.mxu2 %v11312_v39  ;;  %v7217_v39 = vadd.f32 %v7216_v52, %v1137_v51  ;;  %v11392_v40 = vor.u32 %v13364_v58, %v11391_v26  ;;  %v13296_v51 = vld [vmem:[#allocation5 + $0x1554] sm:$0xf0]  ;;  %v10975_v57 = vld [vmem:[#allocation5 + $0x1428] sm:$0xf] }
 0x2c6   :  { %7507 = vmatpush.bf16.msrb.mxu3 %v11440_v50  ;;  %v11263_v50 = vld [vmem:[#allocation5 + $0x1668] sm:$0xf]  ;;  %v13328_v1 = vld [vmem:[#allocation5 + $0x1654] sm:$0xf0] }
 0x2c7   :  { %7469 = vmatpush.bf16.msrb.mxu0 %v11040_v36  ;;  %v7230_v47 = vadd.f32 %v7229_v8, %v7217_v39  ;;  %v11136_v36 = vor.u32 %v13300_v9, %v11135_v48  ;;  %v11264_v3 = vor.u32 %v13332_v32, %v11263_v50  ;;  %v13360_v61 = vld [vmem:[#allocation5 + $0x1754] sm:$0xf0]  ;;  %v11103_v39 = vld [vmem:[#allocation5 + $0x1528] sm:$0xf]  ;;  %v7231_v8 = vpop.f32.mrf.mxu1 }
 0x2c8   :  { %7482 = vmatpush.bf16.msrb.mxu1 %v11168_v21  ;;  %v10991_v21 = vld [vmem:[#allocation5 + $0x1448] sm:$0xf]  ;;  %v13260_v48 = vld [vmem:[#allocation5 + $0x1434] sm:$0xf0] }
 0x2c9   :  { %7495 = vmatpush.bf16.msrb.mxu2 %v11296_v27  ;;  %v13264_v27 = vld [vmem:[#allocation5 + $0x1454] sm:$0xf0]  ;;  %v7243_v56 = vadd.f32 %v7242_v62, %v7230_v47  ;;  %v11231_v50 = vld [vmem:[#allocation5 + $0x1628] sm:$0xf]  ;;  %v10976_v47 = vor.u32 %v13260_v48, %v10975_v57 }
 0x2ca   :  { %7508 = vmatpush.bf16.msrb.mxu3 %v11424_v59  ;;  %v11247_v59 = vld [vmem:[#allocation5 + $0x1648] sm:$0xf]  ;;  %v13292_v9 = vld [vmem:[#allocation5 + $0x1534] sm:$0xf0] }
 0x2cb   :  { %7470 = vmatpush.bf16.msrb.mxu0 %v11024_v14  ;;  %v10992_v14 = vor.u32 %v13264_v27, %v10991_v21  ;;  %v14096_v52 = vadd.f32 %v7255_v4, %v7243_v56  ;;  %v11248_v24 = vor.u32 %v13328_v1, %v11247_v59  ;;  %v13324_v32 = vld [vmem:[#allocation5 + $0x1634] sm:$0xf0]  ;;  %v11359_v26 = vld [vmem:[#allocation5 + $0x1728] sm:$0xf] }
 0x2cc   :  { %7483 = vmatpush.bf16.msrb.mxu1 %v11152_v15  ;;  %v7218_v15 = vpop.f32.mrf.mxu0  ;;  %v13356_v58 = vld [vmem:[#allocation5 + $0x1734] sm:$0xf0]  ;;  %v11087_v27 = vld [vmem:[#allocation5 + $0x1508] sm:$0xf]  ;;  %v7257_v4 = vpop.f32.mrf.mxu3 }
 0x2cd   :  { %7496 = vmatpush.bf16.msrb.mxu2 %v11280_v0  ;;  %v11120_v0 = vor.u32 %v13296_v51, %v11119_v2  ;;  %v13256_v21 = vld [vmem:[#allocation5 + $0x1414] sm:$0xf0]  ;;  %v11215_v62 = vld [vmem:[#allocation5 + $0x1608] sm:$0xf]  ;;  %v7244_v51 = vpop.f32.mrf.mxu2 }
 0x2ce   :  { %7509 = vmatpush.bf16.msrb.mxu3 %v11408_v63  ;;  %v11376_v63 = vor.u32 %v13360_v61, %v11375_v43  ;;  %v13288_v2 = vld [vmem:[#allocation5 + $0x1514] sm:$0xf0]  ;;  %v11343_v1 = vld [vmem:[#allocation5 + $0x1708] sm:$0xf] }
 0x2cf   :  { %7471 = vmatpush.bf16.msrb.mxu0 %v11008_v6  ;;  %v10959_v6 = vld [vmem:[#allocation5 + $0x1408] sm:$0xf]  ;;  %v13320_v59 = vld [vmem:[#allocation5 + $0x1614] sm:$0xf0]  ;;  %v11088_v48 = vor.u32 %v13288_v2, %v11087_v27 }
 0x2d0   :  { %7484 = vmatpush.bf16.msrb.mxu1 %v11136_v36  ;;  %v11104_v36 = vor.u32 %v13292_v9, %v11103_v39  ;;  %v13352_v56 = vld [vmem:[#allocation5 + $0x1714] sm:$0xf0]  ;;  %v11583_v43 = vld [vmem:[#allocation5 + $0x18e8] sm:$0xf]  ;;  %v10960_v15 = vor.u32 %v13256_v21, %v10959_v6  ;;  %v11216_v39 = vor.u32 %v13320_v59, %v11215_v62 }
 0x2d1   :  { %7497 = vmatpush.bf16.msrb.mxu2 %v11264_v3  ;;  %v11232_v3 = vor.u32 %v13324_v32, %v11231_v50  ;;  %v13412_v61 = vld [vmem:[#allocation5 + $0x18f4] sm:$0xf0]  ;;  %v11967_v8 = vld [vmem:[#allocation5 + $0x1be8] sm:$0xf] }
 0x2d2   :  { %7510 = vmatpush.bf16.msrb.mxu3 %v11392_v40  ;;  %v11360_v40 = vor.u32 %v13356_v58, %v11359_v26  ;;  %v13444_v57 = vld [vmem:[#allocation5 + $0x19f4] sm:$0xf0]  ;;  %v11584_v50 = vor.u32 %v13412_v61, %v11583_v43  ;;  %v11567_v58 = vld [vmem:[#allocation5 + $0x18c8] sm:$0xf] }
 0x2d3   :  { %7472 = vmatpush.bf16.msrb.mxu0 %v10992_v14  ;;  %v11711_v14 = vld [vmem:[#allocation5 + $0x19e8] sm:$0xf]  ;;  %v13508_v9 = vld [vmem:[#allocation5 + $0x1bf4] sm:$0xf0] }
 0x2d4   :  { %7485 = vmatpush.bf16.msrb.mxu1 %v11120_v0  ;;  %v11839_v0 = vld [vmem:[#allocation5 + $0x1ae8] sm:$0xf]  ;;  %v11712_v32 = vor.u32 %v13444_v57, %v11711_v14  ;;  %v13408_v51 = vld [vmem:[#allocation5 + $0x18d4] sm:$0xf0] }
 0x2d5   :  { %7498 = vmatpush.bf16.msrb.mxu2 %v11248_v24  ;;  %v13476_v24 = vld [vmem:[#allocation5 + $0x1af4] sm:$0xf0]  ;;  %v11695_v4 = vld [vmem:[#allocation5 + $0x19c8] sm:$0xf]  ;;  %v11568_v27 = vor.u32 %v13408_v51, %v11567_v58 }
 0x2d6   :  { %7511 = vmatpush.bf16.msrb.mxu3 %v11376_v63  ;;  %v11344_v63 = vor.u32 %v13352_v56, %v11343_v1  ;;  %v11840_v26 = vor.u32 %v13476_v24, %v11839_v0  ;;  %v13440_v6 = vld [vmem:[#allocation5 + $0x19d4] sm:$0xf0]  ;;  %v11823_v21 = vld [vmem:[#allocation5 + $0x1ac8] sm:$0xf] }
 0x2d7   :  { %7473 = vmatpush.bf16.msrb.mxu0 %v10976_v47  ;;  %v11968_v47 = vor.u32 %v13508_v9, %v11967_v8  ;;  %v13472_v60 = vld [vmem:[#allocation5 + $0x1ad4] sm:$0xf0]  ;;  %v11696_v2 = vor.u32 %v13440_v6, %v11695_v4  ;;  %v11679_v1 = vld [vmem:[#allocation5 + $0x19a8] sm:$0xf] }
 0x2d8   :  { %7486 = vmatpush.bf16.msrb.mxu1 %v11104_v36  ;;  %v11951_v36 = vld [vmem:[#allocation5 + $0x1bc8] sm:$0xf]  ;;  %v11824_v62 = vor.u32 %v13472_v60, %v11823_v21  ;;  %v13404_v59 = vld [vmem:[#allocation5 + $0x18b4] sm:$0xf0] }
 0x2d9   :  { %7499 = vmatpush.bf16.msrb.mxu2 %v11232_v3  ;;  %v13504_v3 = vld [vmem:[#allocation5 + $0x1bd4] sm:$0xf0]  ;;  %v11807_v61 = vld [vmem:[#allocation5 + $0x1aa8] sm:$0xf] }
 0x2da   :  { %7512 = vmatpush.bf16.msrb.mxu3 %v11360_v40  ;;  %v11551_v40 = vld [vmem:[#allocation5 + $0x18a8] sm:$0xf]  ;;  %v11952_v56 = vor.u32 %v13504_v3, %v11951_v36  ;;  %v13436_v43 = vld [vmem:[#allocation5 + $0x19b4] sm:$0xf0] }
 0x2db   :  { %7474 = vmatpush.bf16.msrb.mxu0 %v10960_v15  ;;  %v13468_v14 = vld [vmem:[#allocation5 + $0x1ab4] sm:$0xf0]  ;;  %v11935_v15 = vld [vmem:[#allocation5 + $0x1ba8] sm:$0xf]  ;;  %v11552_v60 = vor.u32 %v13404_v59, %v11551_v40  ;;  %v11680_v0 = vor.u32 %v13436_v43, %v11679_v1  ;;  %v7268_v4 = vpop.f32.mrf.mxu0 }
 0x2dc   :  { %7487 = vmatpush.bf16.msrb.mxu1 %v11088_v48  ;;  %v13500_v57 = vld [vmem:[#allocation5 + $0x1bb4] sm:$0xf0]  ;;  %v11808_v24 = vor.u32 %v13468_v14, %v11807_v61  ;;  %v11535_v48 = vld [vmem:[#allocation5 + $0x1888] sm:$0xf] }
 0x2dd   :  { %7500 = vmatpush.bf16.msrb.mxu2 %v11216_v39  ;;  %v13400_v39 = vld [vmem:[#allocation5 + $0x1894] sm:$0xf0]  ;;  %v11663_v8 = vld [vmem:[#allocation5 + $0x1988] sm:$0xf]  ;;  %v11936_v9 = vor.u32 %v13500_v57, %v11935_v15 }
 0x2de   :  { %7513 = vmatpush.bf16.msrb.mxu3 %v11344_v63  ;;  %7475 = vmatmul.bf16.vlgmr.msrb.gmra.mxu0 %v13964_v7  ;;  %v13432_v63 = vld [vmem:[#allocation5 + $0x1994] sm:$0xf0]  ;;  %v11536_v51 = vor.u32 %v13400_v39, %v11535_v48  ;;  %v11519_v21 = vld [vmem:[#allocation5 + $0x1868] sm:$0xf] }
 0x2df   :  { %7519 = vmatpush.bf16.msra.mxu0 %v11584_v50  ;;  %7488 = vmatmul.bf16.vlgmr.msrb.gmra.mxu1 %v13968_v12  ;;  %v11791_v50 = vld [vmem:[#allocation5 + $0x1a88] sm:$0xf]  ;;  %v13496_v58 = vld [vmem:[#allocation5 + $0x1b94] sm:$0xf0] }
 0x2e0   :  { %7532 = vmatpush.bf16.msra.mxu1 %v11712_v32  ;;  %7501 = vmatmul.bf16.vlgmr.msrb.gmra.mxu2 %v13966_v11  ;;  %v13464_v32 = vld [vmem:[#allocation5 + $0x1a94] sm:$0xf0]  ;;  %v11647_v3 = vld [vmem:[#allocation5 + $0x1968] sm:$0xf] }
 0x2e1   :  { %7545 = vmatpush.bf16.msra.mxu2 %v11840_v26  ;;  %7514 = vmatmul.bf16.vlgmr.msrb.gmra.mxu3 %v13970_v16  ;;  %v11919_v26 = vld [vmem:[#allocation5 + $0x1b88] sm:$0xf]  ;;  %v11792_v6 = vor.u32 %v13464_v32, %v11791_v50  ;;  %v13396_v36 = vld [vmem:[#allocation5 + $0x1874] sm:$0xf0] }
 0x2e2   :  { %7558 = vmatpush.bf16.msra.mxu3 %v11968_v47  ;;  %v11664_v47 = vor.u32 %v13432_v63, %v11663_v8  ;;  %v13428_v40 = vld [vmem:[#allocation5 + $0x1974] sm:$0xf0]  ;;  %v11775_v59 = vld [vmem:[#allocation5 + $0x1a68] sm:$0xf]  ;;  %v11520_v14 = vor.u32 %v13396_v36, %v11519_v21 }
 0x2e3   :  { %7520 = vmatpush.bf16.msra.mxu0 %v11568_v27  ;;  %v7269_v27 = vadd.f32 %v7268_v4, %v14096_v52  ;;  %v13460_v1 = vld [vmem:[#allocation5 + $0x1a74] sm:$0xf0]  ;;  %v11648_v15 = vor.u32 %v13428_v40, %v11647_v3  ;;  %v7294_v48 = vpop.f32.mrf.mxu2  ;;  %v11759_v8 = vld [vmem:[#allocation5 + $0x1a48] sm:$0xf]  ;;  %v7270_v4 = vpop.f32.mrf.mxu0 }
 0x2e4   :  { %7533 = vmatpush.bf16.msra.mxu1 %v11696_v2  ;;  %v7281_v2 = vpop.f32.mrf.mxu1  ;;  %v13492_v43 = vld [vmem:[#allocation5 + $0x1b74] sm:$0xf0]  ;;  %v11776_v57 = vor.u32 %v13460_v1, %v11775_v59  ;;  %v7307_v50 = vpop.f32.mrf.mxu3  ;;  %v11887_v32 = vld [vmem:[#allocation5 + $0x1b48] sm:$0xf] }
 0x2e5   :  { %7546 = vmatpush.bf16.msra.mxu2 %v11824_v62  ;;  %v11920_v62 = vor.u32 %v13496_v58, %v11919_v26  ;;  %v7282_v61 = vadd.f32 %v7281_v2, %v7269_v27  ;;  %v13424_v39 = vld [vmem:[#allocation5 + $0x1954] sm:$0xf0]  ;;  %v11487_v21 = vld [vmem:[#allocation5 + $0x1828] sm:$0xf] }
 0x2e6   :  { %7559 = vmatpush.bf16.msra.mxu3 %v11952_v56  ;;  %v11903_v56 = vld [vmem:[#allocation5 + $0x1b68] sm:$0xf]  ;;  %v13488_v26 = vld [vmem:[#allocation5 + $0x1b54] sm:$0xf0] }
 0x2e7   :  { %7521 = vmatpush.bf16.msra.mxu0 %v11552_v60  ;;  %v11503_v60 = vld [vmem:[#allocation5 + $0x1848] sm:$0xf]  ;;  %v11904_v52 = vor.u32 %v13492_v43, %v11903_v56  ;;  %v7295_v63 = vadd.f32 %v7294_v48, %v7282_v61  ;;  %v13388_v36 = vld [vmem:[#allocation5 + $0x1834] sm:$0xf0]  ;;  %v11888_v2 = vor.u32 %v13488_v26, %v11887_v32 }
 0x2e8   :  { %7534 = vmatpush.bf16.msra.mxu1 %v11680_v0  ;;  %v13392_v0 = vld [vmem:[#allocation5 + $0x1854] sm:$0xf0]  ;;  %v11615_v3 = vld [vmem:[#allocation5 + $0x1928] sm:$0xf]  ;;  %v11488_v43 = vor.u32 %v13388_v36, %v11487_v21 }
 0x2e9   :  { %7547 = vmatpush.bf16.msra.mxu2 %v11808_v24  ;;  %v11631_v24 = vld [vmem:[#allocation5 + $0x1948] sm:$0xf]  ;;  %v11504_v58 = vor.u32 %v13392_v0, %v11503_v60  ;;  %v13452_v59 = vld [vmem:[#allocation5 + $0x1a34] sm:$0xf0] }
 0x2ea   :  { %7560 = vmatpush.bf16.msra.mxu3 %v11936_v9  ;;  %v13456_v9 = vld [vmem:[#allocation5 + $0x1a54] sm:$0xf0]  ;;  %v11743_v40 = vld [vmem:[#allocation5 + $0x1a28] sm:$0xf] }
 0x2eb   :  { %7522 = vmatpush.bf16.msra.mxu0 %v11536_v51  ;;  %v14103_v51 = vadd.f32 %v7307_v50, %v7295_v63  ;;  %v11871_v1 = vld [vmem:[#allocation5 + $0x1b28] sm:$0xf]  ;;  %v13484_v56 = vld [vmem:[#allocation5 + $0x1b34] sm:$0xf0]  ;;  %v7296_v48 = vpop.f32.mrf.mxu2 }
 0x2ec   :  { %7535 = vmatpush.bf16.msra.mxu1 %v11664_v47  ;;  %v11632_v47 = vor.u32 %v13424_v39, %v11631_v24  ;;  %v7283_v27 = vpop.f32.mrf.mxu1  ;;  %v11471_v61 = vld [vmem:[#allocation5 + $0x1808] sm:$0xf]  ;;  %v13416_v0 = vld [vmem:[#allocation5 + $0x1914] sm:$0xf0]  ;;  %v7309_v63 = vpop.f32.mrf.mxu3 }
 0x2ed   :  { %7548 = vmatpush.bf16.msra.mxu2 %v11792_v6  ;;  %v11760_v6 = vor.u32 %v13456_v9, %v11759_v8  ;;  %v11599_v60 = vld [vmem:[#allocation5 + $0x1908] sm:$0xf]  ;;  %v13448_v39 = vld [vmem:[#allocation5 + $0x1a14] sm:$0xf0] }
 0x2ee   :  { %7561 = vmatpush.bf16.msra.mxu3 %v11920_v62  ;;  %v13420_v62 = vld [vmem:[#allocation5 + $0x1934] sm:$0xf0]  ;;  %v11727_v24 = vld [vmem:[#allocation5 + $0x1a08] sm:$0xf]  ;;  %v11600_v21 = vor.u32 %v13416_v0, %v11599_v60 }
 0x2ef   :  { %7523 = vmatpush.bf16.msra.mxu0 %v11520_v14  ;;  %v13384_v14 = vld [vmem:[#allocation5 + $0x1814] sm:$0xf0]  ;;  %v11855_v8 = vld [vmem:[#allocation5 + $0x1b08] sm:$0xf]  ;;  %v11728_v36 = vor.u32 %v13448_v39, %v11727_v24 }
 0x2f0   :  { %7536 = vmatpush.bf16.msra.mxu1 %v11648_v15  ;;  %v11616_v15 = vor.u32 %v13420_v62, %v11615_v3  ;;  %v13480_v9 = vld [vmem:[#allocation5 + $0x1b14] sm:$0xf0]  ;;  %v12095_v50 = vld [vmem:[#allocation5 + $0x1ce8] sm:$0xf] }
 0x2f1   :  { %7549 = vmatpush.bf16.msra.mxu2 %v11776_v57  ;;  %v11744_v57 = vor.u32 %v13452_v59, %v11743_v40  ;;  %v13540_v32 = vld [vmem:[#allocation5 + $0x1cf4] sm:$0xf0]  ;;  %v12223_v26 = vld [vmem:[#allocation5 + $0x1de8] sm:$0xf] }
 0x2f2   :  { %7562 = vmatpush.bf16.msra.mxu3 %v11904_v52  ;;  %v11872_v52 = vor.u32 %v13484_v56, %v11871_v1  ;;  %v13572_v4 = vld [vmem:[#allocation5 + $0x1df4] sm:$0xf0]  ;;  %v12479_v3 = vld [vmem:[#allocation5 + $0x1fe8] sm:$0xf]  ;;  %v12096_v62 = vor.u32 %v13540_v32, %v12095_v50 }
 0x2f3   :  { %7524 = vmatpush.bf16.msra.mxu0 %v11504_v58  ;;  %v11472_v58 = vor.u32 %v13384_v14, %v11471_v61  ;;  %v13636_v27 = vld [vmem:[#allocation5 + $0x1ff4] sm:$0xf0]  ;;  %v12224_v40 = vor.u32 %v13572_v4, %v12223_v26  ;;  %v12079_v1 = vld [vmem:[#allocation5 + $0x1cc8] sm:$0xf] }
 0x2f4   :  { %7537 = vmatpush.bf16.msra.mxu1 %v11632_v47  ;;  %v12351_v47 = vld [vmem:[#allocation5 + $0x1ee8] sm:$0xf]  ;;  %v13536_v56 = vld [vmem:[#allocation5 + $0x1cd4] sm:$0xf0] }
 0x2f5   :  { %7550 = vmatpush.bf16.msra.mxu2 %v11760_v6  ;;  %v13604_v6 = vld [vmem:[#allocation5 + $0x1ef4] sm:$0xf0]  ;;  %v12207_v48 = vld [vmem:[#allocation5 + $0x1dc8] sm:$0xf]  ;;  %v12080_v60 = vor.u32 %v13536_v56, %v12079_v1 }
 0x2f6   :  { %7563 = vmatpush.bf16.msra.mxu3 %v11888_v2  ;;  %v11856_v2 = vor.u32 %v13480_v9, %v11855_v8  ;;  %v12352_v59 = vor.u32 %v13604_v6, %v12351_v47  ;;  %v13568_v61 = vld [vmem:[#allocation5 + $0x1dd4] sm:$0xf0]  ;;  %v12335_v14 = vld [vmem:[#allocation5 + $0x1ec8] sm:$0xf] }
 0x2f7   :  { %7525 = vmatpush.bf16.msra.mxu0 %v11488_v43  ;;  %v12480_v43 = vor.u32 %v13636_v27, %v12479_v3  ;;  %v13600_v63 = vld [vmem:[#allocation5 + $0x1ed4] sm:$0xf0]  ;;  %v12208_v0 = vor.u32 %v13568_v61, %v12207_v48  ;;  %v12191_v8 = vld [vmem:[#allocation5 + $0x1da8] sm:$0xf] }
 0x2f8   :  { %7538 = vmatpush.bf16.msra.mxu1 %v11616_v15  ;;  %v12463_v15 = vld [vmem:[#allocation5 + $0x1fc8] sm:$0xf]  ;;  %v12336_v24 = vor.u32 %v13600_v63, %v12335_v14  ;;  %v13532_v39 = vld [vmem:[#allocation5 + $0x1cb4] sm:$0xf0] }
 0x2f9   :  { %7551 = vmatpush.bf16.msra.mxu2 %v11744_v57  ;;  %v13632_v57 = vld [vmem:[#allocation5 + $0x1fd4] sm:$0xf0]  ;;  %v12319_v32 = vld [vmem:[#allocation5 + $0x1ea8] sm:$0xf] }
 0x2fa   :  { %7564 = vmatpush.bf16.msra.mxu3 %v11872_v52  ;;  %v12063_v52 = vld [vmem:[#allocation5 + $0x1ca8] sm:$0xf]  ;;  %v12464_v9 = vor.u32 %v13632_v57, %v12463_v15  ;;  %v13564_v50 = vld [vmem:[#allocation5 + $0x1db4] sm:$0xf0] }
 0x2fb   :  { %7526 = vmatpush.bf16.msra.mxu0 %v11472_v58  ;;  %v13596_v26 = vld [vmem:[#allocation5 + $0x1eb4] sm:$0xf0]  ;;  %v12447_v58 = vld [vmem:[#allocation5 + $0x1fa8] sm:$0xf]  ;;  %v12064_v47 = vor.u32 %v13532_v39, %v12063_v52  ;;  %v12192_v6 = vor.u32 %v13564_v50, %v12191_v8  ;;  %v7320_v1 = vpop.f32.mrf.mxu0 }
 0x2fc   :  { %7539 = vmatpush.bf16.msra.mxu1 %v11600_v21  ;;  %v13628_v4 = vld [vmem:[#allocation5 + $0x1fb4] sm:$0xf0]  ;;  %v12320_v21 = vor.u32 %v13596_v26, %v12319_v32  ;;  %v12175_v27 = vld [vmem:[#allocation5 + $0x1d88] sm:$0xf]  ;;  %v7333_v14 = vpop.f32.mrf.mxu1 }
 0x2fd   :  { %7552 = vmatpush.bf16.msra.mxu2 %v11728_v36  ;;  %v12047_v36 = vld [vmem:[#allocation5 + $0x1c88] sm:$0xf]  ;;  %v13528_v3 = vld [vmem:[#allocation5 + $0x1c94] sm:$0xf0] }
 0x2fe   :  { %7565 = vmatpush.bf16.msra.mxu3 %v11856_v2  ;;  %7527 = vmatmul.bf16.vlgmr.msra.gmra.mxu0 %v13979_v5  ;;  %v12448_v2 = vor.u32 %v13628_v4, %v12447_v58  ;;  %v12431_v56 = vld [vmem:[#allocation5 + $0x1f88] sm:$0xf]  ;;  %v13624_v48 = vld [vmem:[#allocation5 + $0x1f94] sm:$0xf0]  ;;  %v12048_v61 = vor.u32 %v13528_v3, %v12047_v36 }
 0x2ff   :  { %7571 = vmatpush.bf16.msrb.mxu0 %v12096_v62  ;;  %7540 = vmatmul.bf16.vlgmr.msra.gmra.mxu1 %v13983_v13  ;;  %v13560_v62 = vld [vmem:[#allocation5 + $0x1d94] sm:$0xf0]  ;;  %v12031_v57 = vld [vmem:[#allocation5 + $0x1c68] sm:$0xf] }
 0x300   :  { %7584 = vmatpush.bf16.msrb.mxu1 %v12224_v40  ;;  %7553 = vmatmul.bf16.vlgmr.msra.gmra.mxu2 %v13981_v10  ;;  %v12303_v40 = vld [vmem:[#allocation5 + $0x1e88] sm:$0xf]  ;;  %v12176_v63 = vor.u32 %v13560_v62, %v12175_v27  ;;  %v13556_v39 = vld [vmem:[#allocation5 + $0x1d74] sm:$0xf0] }
 0x301   :  { %7597 = vmatpush.bf16.msrb.mxu2 %v12352_v59  ;;  %7566 = vmatmul.bf16.vlgmr.msra.gmra.mxu3 %v13985_v17  ;;  %v13592_v59 = vld [vmem:[#allocation5 + $0x1e94] sm:$0xf0]  ;;  %v12287_v8 = vld [vmem:[#allocation5 + $0x1e68] sm:$0xf] }
 0x302   :  { %7610 = vmatpush.bf16.msrb.mxu3 %v12480_v43  ;;  %v7321_v43 = vadd.f32 %v7320_v1, %v14103_v51  ;;  %v12304_v15 = vor.u32 %v13592_v59, %v12303_v40  ;;  %v12415_v50 = vld [vmem:[#allocation5 + $0x1f68] sm:$0xf]  ;;  %v13620_v32 = vld [vmem:[#allocation5 + $0x1f74] sm:$0xf0] }
 0x303   :  { %7572 = vmatpush.bf16.msrb.mxu0 %v12080_v60  ;;  %v13524_v60 = vld [vmem:[#allocation5 + $0x1c74] sm:$0xf0]  ;;  %v12015_v4 = vld [vmem:[#allocation5 + $0x1c48] sm:$0xf]  ;;  %v7346_v36 = vpop.f32.mrf.mxu2 }
 0x304   :  { %7585 = vmatpush.bf16.msrb.mxu1 %v12208_v0  ;;  %v12159_v0 = vld [vmem:[#allocation5 + $0x1d68] sm:$0xf]  ;;  %v7334_v52 = vadd.f32 %v7333_v14, %v7321_v43  ;;  %v12032_v26 = vor.u32 %v13524_v60, %v12031_v57  ;;  %v13552_v3 = vld [vmem:[#allocation5 + $0x1d54] sm:$0xf0]  ;;  %v7359_v40 = vpop.f32.mrf.mxu3  ;;  %v7335_v43 = vpop.f32.mrf.mxu1 }
 0x305   :  { %7598 = vmatpush.bf16.msrb.mxu2 %v12336_v24  ;;  %v12432_v24 = vor.u32 %v13624_v48, %v12431_v56  ;;  %v12160_v51 = vor.u32 %v13556_v39, %v12159_v0  ;;  %v12271_v27 = vld [vmem:[#allocation5 + $0x1e48] sm:$0xf]  ;;  %v13616_v1 = vld [vmem:[#allocation5 + $0x1f54] sm:$0xf0]  ;;  %v7322_v56 = vpop.f32.mrf.mxu0  ;;  %v12706_v43 = vld [vmem:[#allocation5 + $0x2ec] sm:$0xf] }
 0x306   :  { %7611 = vmatpush.bf16.msrb.mxu3 %v12464_v9  ;;  %v13588_v9 = vld [vmem:[#allocation5 + $0x1e74] sm:$0xf0]  ;;  %v7347_v62 = vadd.f32 %v7346_v36, %v7334_v52  ;;  %v12399_v59 = vld [vmem:[#allocation5 + $0x1f48] sm:$0xf] }
 0x307   :  { %7573 = vmatpush.bf16.msrb.mxu0 %v12064_v47  ;;  %v12288_v58 = vor.u32 %v13588_v9, %v12287_v8  ;;  %v13520_v47 = vld [vmem:[#allocation5 + $0x1c54] sm:$0xf0]  ;;  %v12127_v60 = vld [vmem:[#allocation5 + $0x1d28] sm:$0xf]  ;;  %v12400_v0 = vor.u32 %v13616_v1, %v12399_v59  ;;  %v12674_v59 = vld [vmem:[#allocation5 + $0x1ec] sm:$0xf] }
 0x308   :  { %7586 = vmatpush.bf16.msrb.mxu1 %v12192_v6  ;;  %v12143_v6 = vld [vmem:[#allocation5 + $0x1d48] sm:$0xf]  ;;  %v12016_v48 = vor.u32 %v13520_v47, %v12015_v4  ;;  %v13516_v57 = vld [vmem:[#allocation5 + $0x1c34] sm:$0xf0] }
 0x309   :  { %7599 = vmatpush.bf16.msrb.mxu2 %v12320_v21  ;;  %v12416_v21 = vor.u32 %v13620_v32, %v12415_v50  ;;  %v12144_v14 = vor.u32 %v13552_v3, %v12143_v6  ;;  %v12255_v52 = vld [vmem:[#allocation5 + $0x1e28] sm:$0xf]  ;;  %v13580_v39 = vld [vmem:[#allocation5 + $0x1e34] sm:$0xf0] }
 0x30a   :  { %7612 = vmatpush.bf16.msrb.mxu3 %v12448_v2  ;;  %v13584_v2 = vld [vmem:[#allocation5 + $0x1e54] sm:$0xf0]  ;;  %v12383_v8 = vld [vmem:[#allocation5 + $0x1f28] sm:$0xf] }
 0x30b   :  { %7574 = vmatpush.bf16.msrb.mxu0 %v12048_v61  ;;  %v14110_v61 = vadd.f32 %v7359_v40, %v7347_v62  ;;  %v13612_v9 = vld [vmem:[#allocation5 + $0x1f34] sm:$0xf0]  ;;  %v11983_v32 = vld [vmem:[#allocation5 + $0x1c08] sm:$0xf]  ;;  %v12642_v62 = vld [vmem:[#allocation5 + $0xec] sm:$0xf] }
 0x30c   :  { %7587 = vmatpush.bf16.msrb.mxu1 %v12176_v63  ;;  %v12272_v63 = vor.u32 %v13584_v2, %v12271_v27  ;;  %v12111_v4 = vld [vmem:[#allocation5 + $0x1d08] sm:$0xf]  ;;  %v13544_v47 = vld [vmem:[#allocation5 + $0x1d14] sm:$0xf0]  ;;  %v12384_v36 = vor.u32 %v13612_v9, %v12383_v8  ;;  %v7348_v2 = vpop.f32.mrf.mxu2  ;;  %v8513_v40 = vld [vmem:[#allocation5 + $0xf8] sm:$0xf0]  ;;  %v7361_v1 = vpop.f32.mrf.mxu3 }
 0x30d   :  { %7600 = vmatpush.bf16.msrb.mxu2 %v12304_v15  ;;  %v11999_v15 = vld [vmem:[#allocation5 + $0x1c28] sm:$0xf]  ;;  %v13608_v27 = vld [vmem:[#allocation5 + $0x1f14] sm:$0xf0]  ;;  %v12638_v8 = vld [vmem:[#allocation5 + $0xcc] sm:$0xf] }
 0x30e   :  { %7613 = vmatpush.bf16.msrb.mxu3 %v12432_v24  ;;  %v13548_v24 = vld [vmem:[#allocation5 + $0x1d34] sm:$0xf0]  ;;  %v12000_v50 = vor.u32 %v13516_v57, %v11999_v15  ;;  %v12239_v6 = vld [vmem:[#allocation5 + $0x1e08] sm:$0xf]  ;;  %v12738_v57 = vld [vmem:[#allocation5 + $0x3ec] sm:$0xf] }
 0x30f   :  { %7575 = vmatpush.bf16.msrb.mxu0 %v12032_v26  ;;  %v13512_v26 = vld [vmem:[#allocation5 + $0x1c14] sm:$0xf0]  ;;  %v12367_v3 = vld [vmem:[#allocation5 + $0x1f08] sm:$0xf]  ;;  %v8497_v9 = vld [vmem:[#allocation5 + $0xd8] sm:$0xf0] }
 0x310   :  { %7588 = vmatpush.bf16.msrb.mxu1 %v12160_v51  ;;  %v12128_v51 = vor.u32 %v13548_v24, %v12127_v60  ;;  %v11984_v56 = vor.u32 %v13512_v26, %v11983_v32  ;;  %v8897_v60 = vld [vmem:[#allocation5 + $0x3f8] sm:$0xf0]  ;;  %v8516_v24 = vor.u32 %v12642_v62, %v8513_v40  ;;  %v12670_v2 = vld [vmem:[#allocation5 + $0x1cc] sm:$0xf] }
 0x311   :  { %7601 = vmatpush.bf16.msrb.mxu2 %v12288_v58  ;;  %v12256_v58 = vor.u32 %v13580_v39, %v12255_v52  ;;  %v8625_v32 = vld [vmem:[#allocation5 + $0x1d8] sm:$0xf0]  ;;  %v12702_v26 = vld [vmem:[#allocation5 + $0x2cc] sm:$0xf] }
 0x312   :  { %7614 = vmatpush.bf16.msrb.mxu3 %v12416_v21  ;;  %v13576_v21 = vld [vmem:[#allocation5 + $0x1e14] sm:$0xf0]  ;;  %v8753_v1 = vld [vmem:[#allocation5 + $0x2d8] sm:$0xf0]  ;;  %v12698_v40 = vld [vmem:[#allocation5 + $0x2ac] sm:$0xf] }
 0x313   :  { %7576 = vmatpush.bf16.msrb.mxu0 %v12016_v48  ;;  %v8641_v48 = vld [vmem:[#allocation5 + $0x1f8] sm:$0xf0]  ;;  %v12240_v15 = vor.u32 %v13576_v21, %v12239_v6  ;;  %v8756_v6 = vor.u32 %v12702_v26, %v8753_v1 }
 0x314   :  { %7589 = vmatpush.bf16.msrb.mxu1 %v12144_v14  ;;  %v8769_v14 = vld [vmem:[#allocation5 + $0x2f8] sm:$0xf0]  ;;  %v8644_v52 = vor.u32 %v12674_v59, %v8641_v48 }
 0x315   :  { %7602 = vmatpush.bf16.msrb.mxu2 %v12272_v63  ;;  %v12112_v63 = vor.u32 %v13544_v47, %v12111_v4  ;;  %v8772_v39 = vor.u32 %v12706_v43, %v8769_v14  ;;  %v8500_v4 = vor.u32 %v12638_v8, %v8497_v9  ;;  %v8628_v47 = vor.u32 %v12670_v2, %v8625_v32  ;;  %v8481_v21 = vld [vmem:[#allocation5 + $0xb8] sm:$0xf0]  ;;  %v12726_v9 = vld [vmem:[#allocation5 + $0x38c] sm:$0xf] }
 0x316   :  { %7615 = vmatpush.bf16.msrb.mxu3 %v12400_v0  ;;  %v12368_v0 = vor.u32 %v13608_v27, %v12367_v3  ;;  %v12666_v3 = vld [vmem:[#allocation5 + $0x1ac] sm:$0xf]  ;;  %v8609_v62 = vld [vmem:[#allocation5 + $0x1b8] sm:$0xf0] }
 0x317   :  { %7577 = vmatpush.bf16.msrb.mxu0 %v12000_v50  ;;  %v8900_v50 = vor.u32 %v12738_v57, %v8897_v60  ;;  %v8737_v59 = vld [vmem:[#allocation5 + $0x2b8] sm:$0xf0]  ;;  %v8612_v14 = vor.u32 %v12666_v3, %v8609_v62  ;;  %v12662_v60 = vld [vmem:[#allocation5 + $0x18c] sm:$0xf] }
 0x318   :  { %7590 = vmatpush.bf16.msrb.mxu1 %v12128_v51  ;;  %v12734_v51 = vld [vmem:[#allocation5 + $0x3cc] sm:$0xf]  ;;  %v8865_v48 = vld [vmem:[#allocation5 + $0x3b8] sm:$0xf0] }
 0x319   :  { %7603 = vmatpush.bf16.msrb.mxu2 %v12256_v58  ;;  %v8881_v58 = vld [vmem:[#allocation5 + $0x3d8] sm:$0xf0]  ;;  %v12690_v3 = vld [vmem:[#allocation5 + $0x26c] sm:$0xf] }
 0x31a   :  { %7616 = vmatpush.bf16.msrb.mxu3 %v12384_v36  ;;  %v12634_v36 = vld [vmem:[#allocation5 + $0xac] sm:$0xf]  ;;  %v8884_v27 = vor.u32 %v12734_v51, %v8881_v58  ;;  %v8465_v57 = vld [vmem:[#allocation5 + $0x98] sm:$0xf0] }
 0x31b   :  { %7578 = vmatpush.bf16.msrb.mxu0 %v11984_v56  ;;  %v12730_v56 = vld [vmem:[#allocation5 + $0x3ac] sm:$0xf]  ;;  %v8484_v43 = vor.u32 %v12634_v36, %v8481_v21  ;;  %v7372_v8 = vpop.f32.mrf.mxu0  ;;  %v8849_v2 = vld [vmem:[#allocation5 + $0x398] sm:$0xf0] }
 0x31c   :  { %7591 = vmatpush.bf16.msrb.mxu1 %v12112_v63  ;;  %v8740_v63 = vor.u32 %v12698_v40, %v8737_v59  ;;  %v7385_v26 = vpop.f32.mrf.mxu1  ;;  %v12626_v58 = vld [vmem:[#allocation5 + $0x6c] sm:$0xf]  ;;  %v8577_v21 = vld [vmem:[#allocation5 + $0x178] sm:$0xf0] }
 0x31d   :  { %7604 = vmatpush.bf16.msrb.mxu2 %v12240_v15  ;;  %v12630_v15 = vld [vmem:[#allocation5 + $0x8c] sm:$0xf]  ;;  %v8833_v40 = vld [vmem:[#allocation5 + $0x378] sm:$0xf0] }
 0x31e   :  { %7617 = vmatpush.bf16.msrb.mxu3 %v12368_v0  ;;  %7579 = vmatmul.bf16.vlgmr.msrb.gmra.mxu0 %v13994_v54  ;;  %v8868_v0 = vor.u32 %v12730_v56, %v8865_v48  ;;  %v8468_v32 = vor.u32 %v12630_v15, %v8465_v57  ;;  %v12722_v62 = vld [vmem:[#allocation5 + $0x36c] sm:$0xf]  ;;  %v8561_v57 = vld [vmem:[#allocation5 + $0x158] sm:$0xf0] }
 0x31f   :  { %7623 = vmatpush.bf16.msra.mxu0 %v8516_v24  ;;  %7592 = vmatmul.bf16.vlgmr.msrb.gmra.mxu1 %v13998_v55  ;;  %v8593_v24 = vld [vmem:[#allocation5 + $0x198] sm:$0xf0]  ;;  %v12622_v48 = vld [vmem:[#allocation5 + $0x4c] sm:$0xf] }
 0x320   :  { %7636 = vmatpush.bf16.msra.mxu1 %v8644_v52  ;;  %7605 = vmatmul.bf16.vlgmr.msrb.gmra.mxu2 %v13996_v34  ;;  %v12694_v52 = vld [vmem:[#allocation5 + $0x28c] sm:$0xf]  ;;  %v8596_v1 = vor.u32 %v12662_v60, %v8593_v24 }
 0x321   :  { %7649 = vmatpush.bf16.msra.mxu2 %v8772_v39  ;;  %7618 = vmatmul.bf16.vlgmr.msrb.gmra.mxu3 %v14000_v53  ;;  %v8721_v39 = vld [vmem:[#allocation5 + $0x298] sm:$0xf0]  ;;  %v12686_v60 = vld [vmem:[#allocation5 + $0x24c] sm:$0xf] }
 0x322   :  { %7662 = vmatpush.bf16.msra.mxu3 %v8900_v50  ;;  %v7373_v50 = vadd.f32 %v7372_v8, %v14110_v61  ;;  %v8724_v51 = vor.u32 %v12694_v52, %v8721_v39  ;;  %v12718_v39 = vld [vmem:[#allocation5 + $0x34c] sm:$0xf]  ;;  %v8817_v8 = vld [vmem:[#allocation5 + $0x358] sm:$0xf0] }
 0x323   :  { %7624 = vmatpush.bf16.msra.mxu0 %v8500_v4  ;;  %v8449_v4 = vld [vmem:[#allocation5 + $0x78] sm:$0xf0]  ;;  %v7398_v15 = vpop.f32.mrf.mxu2 }
 0x324   :  { %7637 = vmatpush.bf16.msra.mxu1 %v8628_v47  ;;  %v12658_v47 = vld [vmem:[#allocation5 + $0x16c] sm:$0xf]  ;;  %v7386_v36 = vadd.f32 %v7385_v26, %v7373_v50  ;;  %v8452_v59 = vor.u32 %v12626_v58, %v8449_v4  ;;  %v7411_v52 = vpop.f32.mrf.mxu3  ;;  %v7387_v50 = vpop.f32.mrf.mxu1  ;;  %v8417_v58 = vld [vmem:[#allocation5 + $0x38] sm:$0xf0] }
 0x325   :  { %7650 = vmatpush.bf16.msra.mxu2 %v8756_v6  ;;  %v8852_v6 = vor.u32 %v12726_v9, %v8849_v2  ;;  %v8580_v61 = vor.u32 %v12658_v47, %v8577_v21  ;;  %v7374_v9 = vpop.f32.mrf.mxu0  ;;  %v12650_v4 = vld [vmem:[#allocation5 + $0x12c] sm:$0xf]  ;;  %v8820_v47 = vor.u32 %v12718_v39, %v8817_v8  ;;  %v8673_v21 = vld [vmem:[#allocation5 + $0x238] sm:$0xf0] }
 0x326   :  { %7663 = vmatpush.bf16.msra.mxu3 %v8884_v27  ;;  %v8705_v27 = vld [vmem:[#allocation5 + $0x278] sm:$0xf0]  ;;  %v7399_v24 = vadd.f32 %v7398_v15, %v7386_v36  ;;  %v12682_v36 = vld [vmem:[#allocation5 + $0x22c] sm:$0xf] }
 0x327   :  { %7625 = vmatpush.bf16.msra.mxu0 %v8484_v43  ;;  %v8708_v56 = vor.u32 %v12690_v3, %v8705_v27  ;;  %v8433_v43 = vld [vmem:[#allocation5 + $0x58] sm:$0xf0]  ;;  %v12714_v3 = vld [vmem:[#allocation5 + $0x32c] sm:$0xf] }
 0x328   :  { %7638 = vmatpush.bf16.msra.mxu1 %v8612_v14  ;;  %v12654_v14 = vld [vmem:[#allocation5 + $0x14c] sm:$0xf]  ;;  %v8436_v2 = vor.u32 %v12622_v48, %v8433_v43  ;;  %v8801_v27 = vld [vmem:[#allocation5 + $0x338] sm:$0xf0] }
 0x329   :  { %7651 = vmatpush.bf16.msra.mxu2 %v8740_v63  ;;  %v8836_v63 = vor.u32 %v12722_v62, %v8833_v40  ;;  %v8564_v26 = vor.u32 %v12654_v14, %v8561_v57  ;;  %v12614_v40 = vld [vmem:[#allocation5 + $0xc] sm:$0xf]  ;;  %v8529_v43 = vld [vmem:[#allocation5 + $0x118] sm:$0xf0]  ;;  %v8804_v15 = vor.u32 %v12714_v3, %v8801_v27 }
 0x32a   :  { %7664 = vmatpush.bf16.msra.mxu3 %v8868_v0  ;;  %v8689_v0 = vld [vmem:[#allocation5 + $0x258] sm:$0xf0]  ;;  %v12646_v48 = vld [vmem:[#allocation5 + $0x10c] sm:$0xf] }
 0x32b   :  { %7626 = vmatpush.bf16.msra.mxu0 %v8468_v32  ;;  %v14117_v32 = vadd.f32 %v7411_v52, %v7399_v24  ;;  %v12678_v14 = vld [vmem:[#allocation5 + $0x20c] sm:$0xf]  ;;  %v9025_v52 = vld [vmem:[#allocation5 + $0x4f8] sm:$0xf0] }
 0x32c   :  { %7639 = vmatpush.bf16.msra.mxu1 %v8596_v1  ;;  %v8692_v1 = vor.u32 %v12686_v60, %v8689_v0  ;;  %v12710_v57 = vld [vmem:[#allocation5 + $0x30c] sm:$0xf]  ;;  %v8785_v60 = vld [vmem:[#allocation5 + $0x318] sm:$0xf0]  ;;  %v7400_v0 = vpop.f32.mrf.mxu2  ;;  %v7413_v8 = vpop.f32.mrf.mxu3 }
 0x32d   :  { %7652 = vmatpush.bf16.msra.mxu2 %v8724_v51  ;;  %v12618_v51 = vld [vmem:[#allocation5 + $0x2c] sm:$0xf]  ;;  %v9009_v27 = vld [vmem:[#allocation5 + $0x4d8] sm:$0xf0] }
 0x32e   :  { %7665 = vmatpush.bf16.msra.mxu3 %v8852_v6  ;;  %v8545_v6 = vld [vmem:[#allocation5 + $0x138] sm:$0xf0]  ;;  %v8420_v62 = vor.u32 %v12618_v51, %v8417_v58  ;;  %v12770_v24 = vld [vmem:[#allocation5 + $0x4ec] sm:$0xf] }
 0x32f   :  { %7627 = vmatpush.bf16.msra.mxu0 %v8452_v59  ;;  %v8401_v59 = vld [vmem:[#allocation5 + $0x18] sm:$0xf0]  ;;  %v12802_v39 = vld [vmem:[#allocation5 + $0x5ec] sm:$0xf] }
 0x330   :  { %7640 = vmatpush.bf16.msra.mxu1 %v8580_v61  ;;  %v8548_v61 = vor.u32 %v12650_v4, %v8545_v6  ;;  %v8404_v9 = vor.u32 %v12614_v40, %v8401_v59  ;;  %v12834_v50 = vld [vmem:[#allocation5 + $0x6ec] sm:$0xf]  ;;  %v9409_v4 = vld [vmem:[#allocation5 + $0x7f8] sm:$0xf0]  ;;  %v9028_v6 = vor.u32 %v12770_v24, %v9025_v52 }
 0x331   :  { %7653 = vmatpush.bf16.msra.mxu2 %v8708_v56  ;;  %v8676_v56 = vor.u32 %v12682_v36, %v8673_v21  ;;  %v12866_v58 = vld [vmem:[#allocation5 + $0x7ec] sm:$0xf]  ;;  %v9137_v40 = vld [vmem:[#allocation5 + $0x5d8] sm:$0xf0] }
 0x332   :  { %7666 = vmatpush.bf16.msra.mxu3 %v8836_v63  ;;  %v8657_v63 = vld [vmem:[#allocation5 + $0x218] sm:$0xf0]  ;;  %v12766_v3 = vld [vmem:[#allocation5 + $0x4cc] sm:$0xf] }
 0x333   :  { %7628 = vmatpush.bf16.msra.mxu0 %v8436_v2  ;;  %v9153_v2 = vld [vmem:[#allocation5 + $0x5f8] sm:$0xf0]  ;;  %v8660_v51 = vor.u32 %v12678_v14, %v8657_v63  ;;  %v12798_v0 = vld [vmem:[#allocation5 + $0x5cc] sm:$0xf] }
 0x334   :  { %7641 = vmatpush.bf16.msra.mxu1 %v8564_v26  ;;  %v9281_v26 = vld [vmem:[#allocation5 + $0x6f8] sm:$0xf0]  ;;  %v9156_v36 = vor.u32 %v12802_v39, %v9153_v2  ;;  %v12830_v59 = vld [vmem:[#allocation5 + $0x6cc] sm:$0xf] }
 0x335   :  { %7654 = vmatpush.bf16.msra.mxu2 %v8692_v1  ;;  %v8532_v1 = vor.u32 %v12646_v48, %v8529_v43  ;;  %v9284_v21 = vor.u32 %v12834_v50, %v9281_v26  ;;  %v9265_v8 = vld [vmem:[#allocation5 + $0x6d8] sm:$0xf0]  ;;  %v9012_v48 = vor.u32 %v12766_v3, %v9009_v27  ;;  %v9140_v43 = vor.u32 %v12798_v0, %v9137_v40  ;;  %v12826_v52 = vld [vmem:[#allocation5 + $0x6ac] sm:$0xf] }
 0x336   :  { %7667 = vmatpush.bf16.msra.mxu3 %v8820_v47  ;;  %v8788_v47 = vor.u32 %v12710_v57, %v8785_v60  ;;  %v9268_v14 = vor.u32 %v12830_v59, %v9265_v8  ;;  %v8993_v63 = vld [vmem:[#allocation5 + $0x4b8] sm:$0xf0]  ;;  %v12794_v57 = vld [vmem:[#allocation5 + $0x5ac] sm:$0xf] }
 0x337   :  { %7629 = vmatpush.bf16.msra.mxu0 %v8420_v62  ;;  %v9412_v62 = vor.u32 %v12866_v58, %v9409_v4  ;;  %v9121_v24 = vld [vmem:[#allocation5 + $0x5b8] sm:$0xf0]  ;;  %v12790_v4 = vld [vmem:[#allocation5 + $0x58c] sm:$0xf] }
 0x338   :  { %7642 = vmatpush.bf16.msra.mxu1 %v8548_v61  ;;  %v12862_v61 = vld [vmem:[#allocation5 + $0x7cc] sm:$0xf]  ;;  %v9249_v39 = vld [vmem:[#allocation5 + $0x6b8] sm:$0xf0]  ;;  %v9124_v26 = vor.u32 %v12794_v57, %v9121_v24 }
 0x339   :  { %7655 = vmatpush.bf16.msra.mxu2 %v8676_v56  ;;  %v9393_v56 = vld [vmem:[#allocation5 + $0x7d8] sm:$0xf0]  ;;  %v12754_v40 = vld [vmem:[#allocation5 + $0x46c] sm:$0xf] }
 0x33a   :  { %7668 = vmatpush.bf16.msra.mxu3 %v8804_v15  ;;  %v12762_v15 = vld [vmem:[#allocation5 + $0x4ac] sm:$0xf]  ;;  %v9396_v60 = vor.u32 %v12862_v61, %v9393_v56  ;;  %v9377_v2 = vld [vmem:[#allocation5 + $0x7b8] sm:$0xf0] }
 0x33b   :  { %7630 = vmatpush.bf16.msra.mxu0 %v8404_v9  ;;  %v12858_v9 = vld [vmem:[#allocation5 + $0x7ac] sm:$0xf]  ;;  %v8996_v50 = vor.u32 %v12762_v15, %v8993_v63  ;;  %v8977_v58 = vld [vmem:[#allocation5 + $0x498] sm:$0xf0] }
 0x33c   :  { %7643 = vmatpush.bf16.msra.mxu1 %v8532_v1  ;;  %v9252_v1 = vor.u32 %v12826_v52, %v9249_v39  ;;  %v9361_v3 = vld [vmem:[#allocation5 + $0x798] sm:$0xf0]  ;;  %v12786_v8 = vld [vmem:[#allocation5 + $0x56c] sm:$0xf] }
 0x33d   :  { %7656 = vmatpush.bf16.msra.mxu2 %v8660_v51  ;;  %v12758_v51 = vld [vmem:[#allocation5 + $0x48c] sm:$0xf]  ;;  %v8961_v59 = vld [vmem:[#allocation5 + $0x478] sm:$0xf0] }
 0x33e   :  { %7669 = vmatpush.bf16.msra.mxu3 %v8788_v47  ;;  %7631 = vmatmul.bf16.vlgmr.msra.gmra.mxu0 %v13904_v19  ;;  %v9380_v47 = vor.u32 %v12858_v9, %v9377_v2  ;;  %v12854_v19 = vld [vmem:[#allocation5 + $0x78c] sm:$0xf]  ;;  %v8980_v27 = vor.u32 %v12758_v51, %v8977_v58  ;;  %v9345_v63 = vld [vmem:[#allocation5 + $0x778] sm:$0xf0]  ;;  %v8964_v57 = vor.u32 %v12754_v40, %v8961_v59 }
 0x33f   :  { %7675 = vmatpush.bf16.msrb.mxu0 %v9028_v6  ;;  %7644 = vmatmul.bf16.vlgmr.msra.gmra.mxu1 %v13908_v22  ;;  %v12822_v6 = vld [vmem:[#allocation5 + $0x68c] sm:$0xf]  ;;  %v7437_v22 = vpop.f32.mrf.mxu1  ;;  %v9364_v61 = vor.u32 %v12854_v19, %v9361_v3  ;;  %v8945_v52 = vld [vmem:[#allocation5 + $0x458] sm:$0xf0] }
 0x340   :  { %7688 = vmatpush.bf16.msrb.mxu1 %v9156_v36  ;;  %7657 = vmatmul.bf16.vlgmr.msra.gmra.mxu2 %v13902_v18  ;;  %v9105_v18 = vld [vmem:[#allocation5 + $0x598] sm:$0xf0]  ;;  %v12850_v15 = vld [vmem:[#allocation5 + $0x76c] sm:$0xf] }
 0x341   :  { %7701 = vmatpush.bf16.msrb.mxu2 %v9284_v21  ;;  %7670 = vmatmul.bf16.vlgmr.msra.gmra.mxu3 %v13906_v20  ;;  %v9233_v36 = vld [vmem:[#allocation5 + $0x698] sm:$0xf0]  ;;  %v7424_v21 = vpop.f32.mrf.mxu0  ;;  %v9108_v0 = vor.u32 %v12790_v4, %v9105_v18  ;;  %v12750_v24 = vld [vmem:[#allocation5 + $0x44c] sm:$0xf]  ;;  %v9348_v9 = vor.u32 %v12850_v15, %v9345_v63 }
 0x342   :  { %7714 = vmatpush.bf16.msrb.mxu3 %v9412_v62  ;;  %v7425_v20 = vadd.f32 %v7424_v21, %v14117_v32  ;;  %v9236_v62 = vor.u32 %v12822_v6, %v9233_v36  ;;  %v12782_v39 = vld [vmem:[#allocation5 + $0x54c] sm:$0xf]  ;;  %v8948_v6 = vor.u32 %v12750_v24, %v8945_v52  ;;  %v9185_v59 = vld [vmem:[#allocation5 + $0x638] sm:$0xf0] }
 0x343   :  { %7676 = vmatpush.bf16.msrb.mxu0 %v9012_v48  ;;  %v9089_v48 = vld [vmem:[#allocation5 + $0x578] sm:$0xf0]  ;;  %v7450_v2 = vpop.f32.mrf.mxu2  ;;  %v12846_v4 = vld [vmem:[#allocation5 + $0x74c] sm:$0xf] }
 0x344   :  { %7689 = vmatpush.bf16.msrb.mxu1 %v9140_v43  ;;  %v7438_v56 = vadd.f32 %v7437_v22, %v7425_v20  ;;  %v12818_v43 = vld [vmem:[#allocation5 + $0x66c] sm:$0xf]  ;;  %v9092_v32 = vor.u32 %v12786_v8, %v9089_v48  ;;  %v7463_v58 = vpop.f32.mrf.mxu3  ;;  %v9169_v24 = vld [vmem:[#allocation5 + $0x618] sm:$0xf0] }
 0x345   :  { %7702 = vmatpush.bf16.msrb.mxu2 %v9268_v14  ;;  %v9217_v14 = vld [vmem:[#allocation5 + $0x678] sm:$0xf0]  ;;  %v12746_v20 = vld [vmem:[#allocation5 + $0x42c] sm:$0xf] }
 0x346   :  { %7715 = vmatpush.bf16.msrb.mxu3 %v9396_v60  ;;  %v9220_v60 = vor.u32 %v12818_v43, %v9217_v14  ;;  %v7451_v51 = vadd.f32 %v7450_v2, %v7438_v56  ;;  %v12778_v22 = vld [vmem:[#allocation5 + $0x52c] sm:$0xf]  ;;  %v8913_v43 = vld [vmem:[#allocation5 + $0x418] sm:$0xf0] }
 0x347   :  { %7677 = vmatpush.bf16.msrb.mxu0 %v8996_v50  ;;  %v9073_v50 = vld [vmem:[#allocation5 + $0x558] sm:$0xf0]  ;;  %v7439_v36 = vpop.f32.mrf.mxu1  ;;  %v12810_v40 = vld [vmem:[#allocation5 + $0x62c] sm:$0xf] }
 0x348   :  { %7690 = vmatpush.bf16.msrb.mxu1 %v9124_v26  ;;  %v12814_v26 = vld [vmem:[#allocation5 + $0x64c] sm:$0xf]  ;;  %v14124_v21 = vadd.f32 %v7463_v58, %v7451_v51  ;;  %v9076_v19 = vor.u32 %v12782_v39, %v9073_v50  ;;  %v9188_v15 = vor.u32 %v12810_v40, %v9185_v59  ;;  %v9297_v39 = vld [vmem:[#allocation5 + $0x718] sm:$0xf0] }
 0x349   :  { %7703 = vmatpush.bf16.msrb.mxu2 %v9252_v1  ;;  %v9201_v1 = vld [vmem:[#allocation5 + $0x658] sm:$0xf0]  ;;  %v7426_v18 = vpop.f32.mrf.mxu0  ;;  %v12842_v8 = vld [vmem:[#allocation5 + $0x72c] sm:$0xf] }
 0x34a   :  { %7716 = vmatpush.bf16.msrb.mxu3 %v9380_v47  ;;  %v9329_v47 = vld [vmem:[#allocation5 + $0x758] sm:$0xf0]  ;;  %v9204_v3 = vor.u32 %v12814_v26, %v9201_v1  ;;  %v12742_v48 = vld [vmem:[#allocation5 + $0x40c] sm:$0xf] }
 0x34b   :  { %7678 = vmatpush.bf16.msrb.mxu0 %v8980_v27  ;;  %v8929_v27 = vld [vmem:[#allocation5 + $0x438] sm:$0xf0]  ;;  %v12774_v63 = vld [vmem:[#allocation5 + $0x50c] sm:$0xf]  ;;  %v8916_v51 = vor.u32 %v12742_v48, %v8913_v43 }
 0x34c   :  { %7691 = vmatpush.bf16.msrb.mxu1 %v9108_v0  ;;  %v9332_v0 = vor.u32 %v12846_v4, %v9329_v47  ;;  %v8932_v56 = vor.u32 %v12746_v20, %v8929_v27  ;;  %v12838_v52 = vld [vmem:[#allocation5 + $0x70c] sm:$0xf]  ;;  %v9537_v50 = vld [vmem:[#allocation5 + $0x8f8] sm:$0xf0]  ;;  %v7465_v1 = vpop.f32.mrf.mxu3 }
 0x34d   :  { %7704 = vmatpush.bf16.msrb.mxu2 %v9236_v62  ;;  %v9057_v62 = vld [vmem:[#allocation5 + $0x538] sm:$0xf0]  ;;  %v12898_v2 = vld [vmem:[#allocation5 + $0x8ec] sm:$0xf] }
 0x34e   :  { %7717 = vmatpush.bf16.msrb.mxu3 %v9364_v61  ;;  %v9313_v61 = vld [vmem:[#allocation5 + $0x738] sm:$0xf0]  ;;  %v9060_v14 = vor.u32 %v12778_v22, %v9057_v62  ;;  %v12930_v26 = vld [vmem:[#allocation5 + $0x9ec] sm:$0xf]  ;;  %v9540_v20 = vor.u32 %v12898_v2, %v9537_v50 }
 0x34f   :  { %7679 = vmatpush.bf16.msrb.mxu0 %v8964_v57  ;;  %v9041_v57 = vld [vmem:[#allocation5 + $0x518] sm:$0xf0]  ;;  %v12962_v4 = vld [vmem:[#allocation5 + $0xaec] sm:$0xf] }
 0x350   :  { %7692 = vmatpush.bf16.msrb.mxu1 %v9092_v32  ;;  %v12806_v32 = vld [vmem:[#allocation5 + $0x60c] sm:$0xf]  ;;  %v9665_v58 = vld [vmem:[#allocation5 + $0x9f8] sm:$0xf0]  ;;  %v9044_v18 = vor.u32 %v12774_v63, %v9041_v57 }
 0x351   :  { %7705 = vmatpush.bf16.msrb.mxu2 %v9220_v60  ;;  %v9316_v60 = vor.u32 %v12842_v8, %v9313_v61  ;;  %v9793_v47 = vld [vmem:[#allocation5 + $0xaf8] sm:$0xf0]  ;;  %v12994_v36 = vld [vmem:[#allocation5 + $0xbec] sm:$0xf]  ;;  %v9668_v27 = vor.u32 %v12930_v26, %v9665_v58 }
 0x352   :  { %7718 = vmatpush.bf16.msrb.mxu3 %v9348_v9  ;;  %v7452_v9 = vpop.f32.mrf.mxu2  ;;  %v9796_v22 = vor.u32 %v12962_v4, %v9793_v47  ;;  %v9521_v62 = vld [vmem:[#allocation5 + $0x8d8] sm:$0xf0]  ;;  %v12926_v40 = vld [vmem:[#allocation5 + $0x9cc] sm:$0xf] }
 0x353   :  { %7680 = vmatpush.bf16.msrb.mxu0 %v8948_v6  ;;  %v9172_v6 = vor.u32 %v12806_v32, %v9169_v24  ;;  %v9649_v8 = vld [vmem:[#allocation5 + $0x9d8] sm:$0xf0]  ;;  %v12958_v61 = vld [vmem:[#allocation5 + $0xacc] sm:$0xf] }
 0x354   :  { %7693 = vmatpush.bf16.msrb.mxu1 %v9076_v19  ;;  %v9921_v19 = vld [vmem:[#allocation5 + $0xbf8] sm:$0xf0]  ;;  %v12990_v48 = vld [vmem:[#allocation5 + $0xbcc] sm:$0xf] }
 0x355   :  { %7706 = vmatpush.bf16.msrb.mxu2 %v9204_v3  ;;  %v9300_v3 = vor.u32 %v12838_v52, %v9297_v39  ;;  %v9924_v59 = vor.u32 %v12994_v36, %v9921_v19  ;;  %v9905_v43 = vld [vmem:[#allocation5 + $0xbd8] sm:$0xf0]  ;;  %v12890_v57 = vld [vmem:[#allocation5 + $0x8ac] sm:$0xf] }
 0x356   :  { %7719 = vmatpush.bf16.msrb.mxu3 %v9332_v0  ;;  %v12894_v0 = vld [vmem:[#allocation5 + $0x8cc] sm:$0xf]  ;;  %v9505_v32 = vld [vmem:[#allocation5 + $0x8b8] sm:$0xf0]  ;;  %v9908_v24 = vor.u32 %v12990_v48, %v9905_v43 }
 0x357   :  { %7681 = vmatpush.bf16.msrb.mxu0 %v8932_v56  ;;  %v9777_v56 = vld [vmem:[#allocation5 + $0xad8] sm:$0xf0]  ;;  %v12954_v39 = vld [vmem:[#allocation5 + $0xaac] sm:$0xf]  ;;  %v9508_v26 = vor.u32 %v12890_v57, %v9505_v32 }
 0x358   :  { %7694 = vmatpush.bf16.msrb.mxu1 %v9060_v14  ;;  %v9524_v14 = vor.u32 %v12894_v0, %v9521_v62  ;;  %v9780_v63 = vor.u32 %v12958_v61, %v9777_v56  ;;  %v9633_v52 = vld [vmem:[#allocation5 + $0x9b8] sm:$0xf0]  ;;  %v12986_v2 = vld [vmem:[#allocation5 + $0xbac] sm:$0xf] }
 0x359   :  { %7707 = vmatpush.bf16.msrb.mxu2 %v9188_v15  ;;  %v9652_v15 = vor.u32 %v12926_v40, %v9649_v8  ;;  %v9761_v9 = vld [vmem:[#allocation5 + $0xab8] sm:$0xf0]  ;;  %v12886_v58 = vld [vmem:[#allocation5 + $0x88c] sm:$0xf] }
 0x35a   :  { %7720 = vmatpush.bf16.msrb.mxu3 %v9316_v60  ;;  %v12922_v60 = vld [vmem:[#allocation5 + $0x9ac] sm:$0xf]  ;;  %v9889_v50 = vld [vmem:[#allocation5 + $0xbb8] sm:$0xf0] }
 0x35b   :  { %7682 = vmatpush.bf16.msrb.mxu0 %v8916_v51  ;;  %v9636_v1 = vor.u32 %v12922_v60, %v9633_v52  ;;  %v9764_v51 = vor.u32 %v12954_v39, %v9761_v9  ;;  %v9489_v4 = vld [vmem:[#allocation5 + $0x898] sm:$0xf0]  ;;  %v9892_v47 = vor.u32 %v12986_v2, %v9889_v50  ;;  %v7476_v19 = vpop.f32.mrf.mxu0  ;;  %v12882_v0 = vld [vmem:[#allocation5 + $0x86c] sm:$0xf] }
 0x35c   :  { %7695 = vmatpush.bf16.msrb.mxu1 %v9044_v18  ;;  %v9617_v18 = vld [vmem:[#allocation5 + $0x998] sm:$0xf0]  ;;  %v12914_v40 = vld [vmem:[#allocation5 + $0x96c] sm:$0xf] }
 0x35d   :  { %7708 = vmatpush.bf16.msrb.mxu2 %v9172_v6  ;;  %v12950_v6 = vld [vmem:[#allocation5 + $0xa8c] sm:$0xf]  ;;  %v9745_v36 = vld [vmem:[#allocation5 + $0xa98] sm:$0xf0] }
 0x35e   :  { %7721 = vmatpush.bf16.msrb.mxu3 %v9300_v3  ;;  %7683 = vmatmul.bf16.vlgmr.msrb.gmra.mxu0 %v13916_v41  ;;  %v12982_v41 = vld [vmem:[#allocation5 + $0xb8c] sm:$0xf]  ;;  %v9873_v3 = vld [vmem:[#allocation5 + $0xb98] sm:$0xf0] }
 0x35f   :  { %7727 = vmatpush.bf16.msra.mxu0 %v9540_v20  ;;  %7696 = vmatmul.bf16.vlgmr.msrb.gmra.mxu1 %v13920_v44  ;;  %v9492_v20 = vor.u32 %v12886_v58, %v9489_v4  ;;  %v7489_v44 = vpop.f32.mrf.mxu1  ;;  %v9473_v62 = vld [vmem:[#allocation5 + $0x878] sm:$0xf0]  ;;  %v12946_v56 = vld [vmem:[#allocation5 + $0xa6c] sm:$0xf] }
 0x360   :  { %7740 = vmatpush.bf16.msra.mxu1 %v9668_v27  ;;  %7709 = vmatmul.bf16.vlgmr.msrb.gmra.mxu2 %v13914_v38  ;;  %v12918_v38 = vld [vmem:[#allocation5 + $0x98c] sm:$0xf]  ;;  %v9601_v61 = vld [vmem:[#allocation5 + $0x978] sm:$0xf0] }
 0x361   :  { %7753 = vmatpush.bf16.msra.mxu2 %v9796_v22  ;;  %7722 = vmatmul.bf16.vlgmr.msrb.gmra.mxu3 %v13918_v42  ;;  %v7477_v42 = vadd.f32 %v7476_v19, %v14124_v21  ;;  %v9620_v27 = vor.u32 %v12918_v38, %v9617_v18  ;;  %v9748_v22 = vor.u32 %v12950_v6, %v9745_v36  ;;  %v9729_v48 = vld [vmem:[#allocation5 + $0xa78] sm:$0xf0]  ;;  %v12978_v43 = vld [vmem:[#allocation5 + $0xb6c] sm:$0xf] }
 0x362   :  { %7766 = vmatpush.bf16.msra.mxu3 %v9924_v59  ;;  %v9876_v59 = vor.u32 %v12982_v41, %v9873_v3  ;;  %v9604_v21 = vor.u32 %v12914_v40, %v9601_v61  ;;  %v12878_v57 = vld [vmem:[#allocation5 + $0x84c] sm:$0xf]  ;;  %v9457_v32 = vld [vmem:[#allocation5 + $0x858] sm:$0xf0] }
 0x363   :  { %7728 = vmatpush.bf16.msra.mxu0 %v9524_v14  ;;  %v7490_v8 = vadd.f32 %v7489_v44, %v7477_v42  ;;  %v9857_v14 = vld [vmem:[#allocation5 + $0xb78] sm:$0xf0]  ;;  %v12910_v60 = vld [vmem:[#allocation5 + $0x94c] sm:$0xf]  ;;  %v7502_v52 = vpop.f32.mrf.mxu2  ;;  %v7478_v58 = vpop.f32.mrf.mxu0  ;;  %v9460_v4 = vor.u32 %v12878_v57, %v9457_v32 }
 0x364   :  { %7741 = vmatpush.bf16.msra.mxu1 %v9652_v15  ;;  %v9476_v15 = vor.u32 %v12882_v0, %v9473_v62  ;;  %v9585_v39 = vld [vmem:[#allocation5 + $0x958] sm:$0xf0]  ;;  %v12942_v9 = vld [vmem:[#allocation5 + $0xa4c] sm:$0xf] }
 0x365   :  { %7754 = vmatpush.bf16.msra.mxu2 %v9780_v63  ;;  %v9732_v63 = vor.u32 %v12946_v56, %v9729_v48  ;;  %v9713_v2 = vld [vmem:[#allocation5 + $0xa58] sm:$0xf0]  ;;  %v7503_v50 = vadd.f32 %v7502_v52, %v7490_v8  ;;  %v9588_v18 = vor.u32 %v12910_v60, %v9585_v39  ;;  %v12874_v36 = vld [vmem:[#allocation5 + $0x82c] sm:$0xf] }
 0x366   :  { %7767 = vmatpush.bf16.msra.mxu3 %v9908_v24  ;;  %v9860_v24 = vor.u32 %v12978_v43, %v9857_v14  ;;  %v9716_v6 = vor.u32 %v12942_v9, %v9713_v2  ;;  %v9441_v19 = vld [vmem:[#allocation5 + $0x838] sm:$0xf0]  ;;  %v12906_v41 = vld [vmem:[#allocation5 + $0x92c] sm:$0xf] }
 0x367   :  { %7729 = vmatpush.bf16.msra.mxu0 %v9508_v26  ;;  %v7515_v26 = vpop.f32.mrf.mxu3  ;;  %v7491_v38 = vpop.f32.mrf.mxu1  ;;  %v9569_v42 = vld [vmem:[#allocation5 + $0x938] sm:$0xf0]  ;;  %v9444_v0 = vor.u32 %v12874_v36, %v9441_v19  ;;  %v12870_v62 = vld [vmem:[#allocation5 + $0x80c] sm:$0xf] }
 0x368   :  { %7742 = vmatpush.bf16.msra.mxu1 %v9636_v1  ;;  %v12974_v1 = vld [vmem:[#allocation5 + $0xb4c] sm:$0xf]  ;;  %v9697_v44 = vld [vmem:[#allocation5 + $0xa38] sm:$0xf0] }
 0x369   :  { %7755 = vmatpush.bf16.msra.mxu2 %v9764_v51  ;;  %v9841_v51 = vld [vmem:[#allocation5 + $0xb58] sm:$0xf0]  ;;  %v12902_v61 = vld [vmem:[#allocation5 + $0x90c] sm:$0xf] }
 0x36a   :  { %7768 = vmatpush.bf16.msra.mxu3 %v9892_v47  ;;  %v14131_v47 = vadd.f32 %v7515_v26, %v7503_v50  ;;  %v9844_v3 = vor.u32 %v12974_v1, %v9841_v51  ;;  %v9425_v40 = vld [vmem:[#allocation5 + $0x818] sm:$0xf0]  ;;  %v12934_v48 = vld [vmem:[#allocation5 + $0xa0c] sm:$0xf] }
 0x36b   :  { %7730 = vmatpush.bf16.msra.mxu0 %v9492_v20  ;;  %v12938_v20 = vld [vmem:[#allocation5 + $0xa2c] sm:$0xf]  ;;  %v9553_v56 = vld [vmem:[#allocation5 + $0x918] sm:$0xf0]  ;;  %v9428_v52 = vor.u32 %v12870_v62, %v9425_v40 }
 0x36c   :  { %7743 = vmatpush.bf16.msra.mxu1 %v9620_v27  ;;  %v12970_v27 = vld [vmem:[#allocation5 + $0xb2c] sm:$0xf]  ;;  %v9700_v8 = vor.u32 %v12938_v20, %v9697_v44  ;;  %v9681_v14 = vld [vmem:[#allocation5 + $0xa18] sm:$0xf0]  ;;  %v9556_v50 = vor.u32 %v12902_v61, %v9553_v56 }
 0x36d   :  { %7756 = vmatpush.bf16.msra.mxu2 %v9748_v22  ;;  %v9825_v22 = vld [vmem:[#allocation5 + $0xb38] sm:$0xf0]  ;;  %v13026_v57 = vld [vmem:[#allocation5 + $0xcec] sm:$0xf]  ;;  %v9684_v26 = vor.u32 %v12934_v48, %v9681_v14 }
 0x36e   :  { %7769 = vmatpush.bf16.msra.mxu3 %v9876_v59  ;;  %v9572_v59 = vor.u32 %v12906_v41, %v9569_v42  ;;  %v9828_v43 = vor.u32 %v12970_v27, %v9825_v22  ;;  %v10049_v32 = vld [vmem:[#allocation5 + $0xcf8] sm:$0xf0]  ;;  %v13058_v60 = vld [vmem:[#allocation5 + $0xdec] sm:$0xf] }
 0x36f   :  { %7731 = vmatpush.bf16.msra.mxu0 %v9476_v15  ;;  %v12966_v15 = vld [vmem:[#allocation5 + $0xb0c] sm:$0xf]  ;;  %v10177_v39 = vld [vmem:[#allocation5 + $0xdf8] sm:$0xf0] }
 0x370   :  { %7744 = vmatpush.bf16.msra.mxu1 %v9604_v21  ;;  %v9809_v21 = vld [vmem:[#allocation5 + $0xb18] sm:$0xf0]  ;;  %v13090_v9 = vld [vmem:[#allocation5 + $0xeec] sm:$0xf]  ;;  %v10180_v38 = vor.u32 %v13058_v60, %v10177_v39 }
 0x371   :  { %7757 = vmatpush.bf16.msra.mxu2 %v9732_v63  ;;  %v7504_v63 = vpop.f32.mrf.mxu2  ;;  %v10305_v2 = vld [vmem:[#allocation5 + $0xef8] sm:$0xf0]  ;;  %v13122_v1 = vld [vmem:[#allocation5 + $0xfec] sm:$0xf]  ;;  %v9812_v58 = vor.u32 %v12966_v15, %v9809_v21 }
 0x372   :  { %7770 = vmatpush.bf16.msra.mxu3 %v9860_v24  ;;  %v7517_v24 = vpop.f32.mrf.mxu3  ;;  %v10433_v51 = vld [vmem:[#allocation5 + $0xff8] sm:$0xf0]  ;;  %v13054_v19 = vld [vmem:[#allocation5 + $0xdcc] sm:$0xf] }
 0x373   :  { %7732 = vmatpush.bf16.msra.mxu0 %v9460_v4  ;;  %v10052_v4 = vor.u32 %v13026_v57, %v10049_v32  ;;  %v10033_v36 = vld [vmem:[#allocation5 + $0xcd8] sm:$0xf0]  ;;  %v10436_v41 = vor.u32 %v13122_v1, %v10433_v51  ;;  %v13086_v42 = vld [vmem:[#allocation5 + $0xecc] sm:$0xf] }
 0x374   :  { %7745 = vmatpush.bf16.msra.mxu1 %v9588_v18  ;;  %v10308_v18 = vor.u32 %v13090_v9, %v10305_v2  ;;  %v10289_v20 = vld [vmem:[#allocation5 + $0xed8] sm:$0xf0]  ;;  %v13118_v44 = vld [vmem:[#allocation5 + $0xfcc] sm:$0xf] }
 0x375   :  { %7758 = vmatpush.bf16.msra.mxu2 %v9716_v6  ;;  %v13022_v6 = vld [vmem:[#allocation5 + $0xccc] sm:$0xf]  ;;  %v10417_v27 = vld [vmem:[#allocation5 + $0xfd8] sm:$0xf0]  ;;  %v10292_v62 = vor.u32 %v13086_v42, %v10289_v20 }
 0x376   :  { %7771 = vmatpush.bf16.msra.mxu3 %v9844_v3  ;;  %v10161_v3 = vld [vmem:[#allocation5 + $0xdd8] sm:$0xf0]  ;;  %v10036_v22 = vor.u32 %v13022_v6, %v10033_v36  ;;  %v13018_v40 = vld [vmem:[#allocation5 + $0xcac] sm:$0xf]  ;;  %v10420_v61 = vor.u32 %v13118_v44, %v10417_v27 }
 0x377   :  { %7733 = vmatpush.bf16.msra.mxu0 %v9444_v0  ;;  %v10164_v0 = vor.u32 %v13054_v19, %v10161_v3  ;;  %v10145_v56 = vld [vmem:[#allocation5 + $0xdb8] sm:$0xf0]  ;;  %v13082_v48 = vld [vmem:[#allocation5 + $0xeac] sm:$0xf] }
 0x378   :  { %7746 = vmatpush.bf16.msra.mxu1 %v9572_v59  ;;  %v10017_v59 = vld [vmem:[#allocation5 + $0xcb8] sm:$0xf0]  ;;  %v13114_v14 = vld [vmem:[#allocation5 + $0xfac] sm:$0xf] }
 0x379   :  { %7759 = vmatpush.bf16.msra.mxu2 %v9700_v8  ;;  %v13050_v8 = vld [vmem:[#allocation5 + $0xdac] sm:$0xf]  ;;  %v10401_v15 = vld [vmem:[#allocation5 + $0xfb8] sm:$0xf0]  ;;  %v10020_v21 = vor.u32 %v13018_v40, %v10017_v59 }
 0x37a   :  { %7772 = vmatpush.bf16.msra.mxu3 %v9828_v43  ;;  %v10273_v43 = vld [vmem:[#allocation5 + $0xeb8] sm:$0xf0]  ;;  %v10148_v63 = vor.u32 %v13050_v8, %v10145_v56  ;;  %v13014_v32 = vld [vmem:[#allocation5 + $0xc8c] sm:$0xf]  ;;  %v10404_v24 = vor.u32 %v13114_v14, %v10401_v15 }
 0x37b   :  { %7734 = vmatpush.bf16.msra.mxu0 %v9428_v52  ;;  %v10276_v57 = vor.u32 %v13082_v48, %v10273_v43  ;;  %v13046_v60 = vld [vmem:[#allocation5 + $0xd8c] sm:$0xf]  ;;  %v10129_v52 = vld [vmem:[#allocation5 + $0xd98] sm:$0xf0]  ;;  %v7528_v9 = vpop.f32.mrf.mxu0 }
 0x37c   :  { %7747 = vmatpush.bf16.msra.mxu1 %v9556_v50  ;;  %v13078_v39 = vld [vmem:[#allocation5 + $0xe8c] sm:$0xf]  ;;  %v10385_v2 = vld [vmem:[#allocation5 + $0xf98] sm:$0xf0]  ;;  %v10132_v1 = vor.u32 %v13046_v60, %v10129_v52 }
 0x37d   :  { %7760 = vmatpush.bf16.msra.mxu2 %v9684_v26  ;;  %v7541_v26 = vpop.f32.mrf.mxu1  ;;  %v10113_v36 = vld [vmem:[#allocation5 + $0xd78] sm:$0xf0]  ;;  %v13074_v19 = vld [vmem:[#allocation5 + $0xe6c] sm:$0xf] }
 0x37e   :  { %7773 = vmatpush.bf16.msra.mxu3 %v9812_v58  ;;  %7735 = vmatmul.bf16.vlgmr.msra.gmra.mxu0 %v13926_v25  ;;  %v10001_v25 = vld [vmem:[#allocation5 + $0xc98] sm:$0xf0]  ;;  %v13010_v58 = vld [vmem:[#allocation5 + $0xc6c] sm:$0xf] }
 0x37f   :  { %7779 = vmatpush.bf16.msrb.mxu0 %v10052_v4  ;;  %7748 = vmatmul.bf16.vlgmr.msra.gmra.mxu1 %v13930_v30  ;;  %v13110_v30 = vld [vmem:[#allocation5 + $0xf8c] sm:$0xf]  ;;  %v10004_v50 = vor.u32 %v13014_v32, %v10001_v25  ;;  %v9985_v4 = vld [vmem:[#allocation5 + $0xc78] sm:$0xf0] }
 0x380   :  { %7792 = vmatpush.bf16.msrb.mxu1 %v10180_v38  ;;  %7761 = vmatmul.bf16.vlgmr.msra.gmra.mxu2 %v13928_v29  ;;  %v10257_v29 = vld [vmem:[#allocation5 + $0xe98] sm:$0xf0]  ;;  %v13042_v38 = vld [vmem:[#allocation5 + $0xd6c] sm:$0xf]  ;;  %v9988_v20 = vor.u32 %v13010_v58, %v9985_v4 }
 0x381   :  { %7805 = vmatpush.bf16.msrb.mxu2 %v10308_v18  ;;  %7774 = vmatmul.bf16.vlgmr.msra.gmra.mxu3 %v13932_v33  ;;  %v7529_v33 = vadd.f32 %v7528_v9, %v14131_v47  ;;  %v10260_v51 = vor.u32 %v13078_v39, %v10257_v29  ;;  %v10388_v18 = vor.u32 %v13110_v30, %v10385_v2  ;;  %v13106_v3 = vld [vmem:[#allocation5 + $0xf6c] sm:$0xf]  ;;  %v10369_v42 = vld [vmem:[#allocation5 + $0xf78] sm:$0xf0] }
 0x382   :  { %7818 = vmatpush.bf16.msrb.mxu3 %v10436_v41  ;;  %v10241_v41 = vld [vmem:[#allocation5 + $0xe78] sm:$0xf0]  ;;  %v10116_v47 = vor.u32 %v13042_v38, %v10113_v36  ;;  %v13006_v27 = vld [vmem:[#allocation5 + $0xc4c] sm:$0xf] }
 0x383   :  { %7780 = vmatpush.bf16.msrb.mxu0 %v10036_v22  ;;  %v7542_v6 = vadd.f32 %v7541_v26, %v7529_v33  ;;  %v10244_v44 = vor.u32 %v13074_v19, %v10241_v41  ;;  %v9969_v22 = vld [vmem:[#allocation5 + $0xc58] sm:$0xf0]  ;;  %v7554_v40 = vpop.f32.mrf.mxu2  ;;  %v13070_v8 = vld [vmem:[#allocation5 + $0xe4c] sm:$0xf]  ;;  %v7530_v15 = vpop.f32.mrf.mxu0 }
 0x384   :  { %7793 = vmatpush.bf16.msrb.mxu1 %v10164_v0  ;;  %v13038_v0 = vld [vmem:[#allocation5 + $0xd4c] sm:$0xf]  ;;  %v10097_v59 = vld [vmem:[#allocation5 + $0xd58] sm:$0xf0]  ;;  %v7567_v48 = vpop.f32.mrf.mxu3 }
 0x385   :  { %7806 = vmatpush.bf16.msrb.mxu2 %v10292_v62  ;;  %v10372_v62 = vor.u32 %v13106_v3, %v10369_v42  ;;  %v7555_v56 = vadd.f32 %v7554_v40, %v7542_v6  ;;  %v13102_v43 = vld [vmem:[#allocation5 + $0xf4c] sm:$0xf]  ;;  %v10353_v14 = vld [vmem:[#allocation5 + $0xf58] sm:$0xf0]  ;;  %v10100_v32 = vor.u32 %v13038_v0, %v10097_v59 }
 0x386   :  { %7819 = vmatpush.bf16.msrb.mxu3 %v10420_v61  ;;  %v10225_v61 = vld [vmem:[#allocation5 + $0xe58] sm:$0xf0]  ;;  %v13002_v60 = vld [vmem:[#allocation5 + $0xc2c] sm:$0xf]  ;;  %v10356_v39 = vor.u32 %v13102_v43, %v10353_v14 }
 0x387   :  { %7781 = vmatpush.bf16.msrb.mxu0 %v10020_v21  ;;  %v9972_v21 = vor.u32 %v13006_v27, %v9969_v22  ;;  %v10228_v25 = vor.u32 %v13070_v8, %v10225_v61  ;;  %v13034_v52 = vld [vmem:[#allocation5 + $0xd2c] sm:$0xf]  ;;  %v10081_v29 = vld [vmem:[#allocation5 + $0xd38] sm:$0xf0] }
 0x388   :  { %7794 = vmatpush.bf16.msrb.mxu1 %v10148_v63  ;;  %v7543_v63 = vpop.f32.mrf.mxu1  ;;  %v13066_v9 = vld [vmem:[#allocation5 + $0xe2c] sm:$0xf]  ;;  %v10209_v30 = vld [vmem:[#allocation5 + $0xe38] sm:$0xf0] }
 0x389   :  { %7807 = vmatpush.bf16.msrb.mxu2 %v10276_v57  ;;  %v14138_v57 = vadd.f32 %v7567_v48, %v7555_v56  ;;  %v13098_v2 = vld [vmem:[#allocation5 + $0xf2c] sm:$0xf]  ;;  %v10337_v33 = vld [vmem:[#allocation5 + $0xf38] sm:$0xf0]  ;;  %v10212_v58 = vor.u32 %v13066_v9, %v10209_v30 }
 0x38a   :  { %7820 = vmatpush.bf16.msrb.mxu3 %v10404_v24  ;;  %v9953_v24 = vld [vmem:[#allocation5 + $0xc38] sm:$0xf0]  ;;  %v12998_v26 = vld [vmem:[#allocation5 + $0xc0c] sm:$0xf]  ;;  %v10340_v6 = vor.u32 %v13098_v2, %v10337_v33 }
 0x38b   :  { %7782 = vmatpush.bf16.msrb.mxu0 %v10004_v50  ;;  %v9956_v50 = vor.u32 %v13002_v60, %v9953_v24  ;;  %v13030_v4 = vld [vmem:[#allocation5 + $0xd0c] sm:$0xf]  ;;  %v10065_v38 = vld [vmem:[#allocation5 + $0xd18] sm:$0xf0]  ;;  %v7556_v3 = vpop.f32.mrf.mxu2 }
 0x38c   :  { %7795 = vmatpush.bf16.msrb.mxu1 %v10132_v1  ;;  %v9937_v1 = vld [vmem:[#allocation5 + $0xc18] sm:$0xf0]  ;;  %v13094_v19 = vld [vmem:[#allocation5 + $0xf0c] sm:$0xf]  ;;  %v10068_v40 = vor.u32 %v13030_v4, %v10065_v38 }
 0x38d   :  { %7808 = vmatpush.bf16.msrb.mxu2 %v10260_v51  ;;  %v10084_v51 = vor.u32 %v13034_v52, %v10081_v29  ;;  %v10193_v36 = vld [vmem:[#allocation5 + $0xe18] sm:$0xf0]  ;;  %v13154_v42 = vld [vmem:[#allocation5 + $0x10ec] sm:$0xf]  ;;  %v9940_v27 = vor.u32 %v12998_v26, %v9937_v1 }
 0x38e   :  { %7821 = vmatpush.bf16.msrb.mxu3 %v10388_v18  ;;  %v13062_v18 = vld [vmem:[#allocation5 + $0xe0c] sm:$0xf]  ;;  %v10321_v41 = vld [vmem:[#allocation5 + $0xf18] sm:$0xf0] }
 0x38f   :  { %7783 = vmatpush.bf16.msrb.mxu0 %v9988_v20  ;;  %v10561_v20 = vld [vmem:[#allocation5 + $0x10f8] sm:$0xf0]  ;;  %v13218_v0 = vld [vmem:[#allocation5 + $0x12ec] sm:$0xf]  ;;  %v10196_v59 = vor.u32 %v13062_v18, %v10193_v36  ;;  %v10324_v56 = vor.u32 %v13094_v19, %v10321_v41 }
 0x390   :  { %7796 = vmatpush.bf16.msrb.mxu1 %v10116_v47  ;;  %v13186_v47 = vld [vmem:[#allocation5 + $0x11ec] sm:$0xf]  ;;  %v10689_v22 = vld [vmem:[#allocation5 + $0x11f8] sm:$0xf0]  ;;  %v10564_v48 = vor.u32 %v13154_v42, %v10561_v20 }
 0x391   :  { %7809 = vmatpush.bf16.msrb.mxu2 %v10244_v44  ;;  %v7569_v44 = vpop.f32.mrf.mxu3  ;;  %v13250_v8 = vld [vmem:[#allocation5 + $0x13ec] sm:$0xf]  ;;  %v10945_v61 = vld [vmem:[#allocation5 + $0x13f8] sm:$0xf0]  ;;  %v10692_v43 = vor.u32 %v13186_v47, %v10689_v22 }
 0x392   :  { %7822 = vmatpush.bf16.msrb.mxu3 %v10372_v62  ;;  %v10817_v62 = vld [vmem:[#allocation5 + $0x12f8] sm:$0xf0]  ;;  %v13150_v15 = vld [vmem:[#allocation5 + $0x10cc] sm:$0xf] }
 0x393   :  { %7784 = vmatpush.bf16.msrb.mxu0 %v9972_v21  ;;  %v10820_v14 = vor.u32 %v13218_v0, %v10817_v62  ;;  %v10545_v21 = vld [vmem:[#allocation5 + $0x10d8] sm:$0xf0]  ;;  %v13182_v63 = vld [vmem:[#allocation5 + $0x11cc] sm:$0xf] }
 0x394   :  { %7797 = vmatpush.bf16.msrb.mxu1 %v10100_v32  ;;  %v10948_v32 = vor.u32 %v13250_v8, %v10945_v61  ;;  %v13214_v60 = vld [vmem:[#allocation5 + $0x12cc] sm:$0xf]  ;;  %v10801_v24 = vld [vmem:[#allocation5 + $0x12d8] sm:$0xf0]  ;;  %v10548_v29 = vor.u32 %v13150_v15, %v10545_v21 }
 0x395   :  { %7810 = vmatpush.bf16.msrb.mxu2 %v10228_v25  ;;  %v10673_v25 = vld [vmem:[#allocation5 + $0x11d8] sm:$0xf0]  ;;  %v13246_v52 = vld [vmem:[#allocation5 + $0x13cc] sm:$0xf]  ;;  %v10804_v30 = vor.u32 %v13214_v60, %v10801_v24 }
 0x396   :  { %7823 = vmatpush.bf16.msrb.mxu3 %v10356_v39  ;;  %v10929_v39 = vld [vmem:[#allocation5 + $0x13d8] sm:$0xf0]  ;;  %v10676_v9 = vor.u32 %v13182_v63, %v10673_v25  ;;  %v13146_v2 = vld [vmem:[#allocation5 + $0x10ac] sm:$0xf] }
 0x397   :  { %7785 = vmatpush.bf16.msrb.mxu0 %v9956_v50  ;;  %v10529_v33 = vld [vmem:[#allocation5 + $0x10b8] sm:$0xf0]  ;;  %v13178_v50 = vld [vmem:[#allocation5 + $0x11ac] sm:$0xf]  ;;  %v10932_v26 = vor.u32 %v13246_v52, %v10929_v39 }
 0x398   :  { %7798 = vmatpush.bf16.msrb.mxu1 %v10084_v51  ;;  %v10657_v1 = vld [vmem:[#allocation5 + $0x11b8] sm:$0xf0]  ;;  %v13210_v51 = vld [vmem:[#allocation5 + $0x12ac] sm:$0xf]  ;;  %v10532_v18 = vor.u32 %v13146_v2, %v10529_v33 }
 0x399   :  { %7811 = vmatpush.bf16.msrb.mxu2 %v10212_v58  ;;  %v10785_v58 = vld [vmem:[#allocation5 + $0x12b8] sm:$0xf0]  ;;  %v13242_v4 = vld [vmem:[#allocation5 + $0x13ac] sm:$0xf] }
 0x39a   :  { %7824 = vmatpush.bf16.msrb.mxu3 %v10340_v6  ;;  %v10913_v38 = vld [vmem:[#allocation5 + $0x13b8] sm:$0xf0]  ;;  %v10660_v6 = vor.u32 %v13178_v50, %v10657_v1  ;;  %v10788_v36 = vor.u32 %v13210_v51, %v10785_v58  ;;  %v13142_v19 = vld [vmem:[#allocation5 + $0x108c] sm:$0xf] }
 0x39b   :  { %7786 = vmatpush.bf16.msrb.mxu0 %v9940_v27  ;;  %v13174_v41 = vld [vmem:[#allocation5 + $0x118c] sm:$0xf]  ;;  %v10916_v3 = vor.u32 %v13242_v4, %v10913_v38  ;;  %v10641_v42 = vld [vmem:[#allocation5 + $0x1198] sm:$0xf0]  ;;  %v7580_v47 = vpop.f32.mrf.mxu0 }
 0x39c   :  { %7799 = vmatpush.bf16.msrb.mxu1 %v10068_v40  ;;  %v13206_v20 = vld [vmem:[#allocation5 + $0x128c] sm:$0xf]  ;;  %v10897_v44 = vld [vmem:[#allocation5 + $0x1398] sm:$0xf0]  ;;  %v7593_v22 = vpop.f32.mrf.mxu1  ;;  %v10644_v0 = vor.u32 %v13174_v41, %v10641_v42 }
 0x39d   :  { %7812 = vmatpush.bf16.msrb.mxu2 %v10196_v59  ;;  %v13138_v40 = vld [vmem:[#allocation5 + $0x106c] sm:$0xf]  ;;  %v10497_v59 = vld [vmem:[#allocation5 + $0x1078] sm:$0xf0] }
 0x39e   :  { %7825 = vmatpush.bf16.msrb.mxu3 %v10324_v56  ;;  %7787 = vmatmul.bf16.vlgmr.msrb.gmra.mxu0 %v13938_v23  ;;  %v10513_v23 = vld [vmem:[#allocation5 + $0x1098] sm:$0xf0]  ;;  %v13170_v8 = vld [vmem:[#allocation5 + $0x116c] sm:$0xf]  ;;  %v10500_v63 = vor.u32 %v13138_v40, %v10497_v59 }
 0x39f   :  { %7831 = vmatpush.bf16.msra.mxu0 %v10564_v48  ;;  %7800 = vmatmul.bf16.vlgmr.msrb.gmra.mxu1 %v13942_v31  ;;  %v13238_v31 = vld [vmem:[#allocation5 + $0x138c] sm:$0xf]  ;;  %v10516_v27 = vor.u32 %v13142_v19, %v10513_v23  ;;  %v10625_v48 = vld [vmem:[#allocation5 + $0x1178] sm:$0xf0] }
 0x3a0   :  { %7844 = vmatpush.bf16.msra.mxu1 %v10692_v43  ;;  %7813 = vmatmul.bf16.vlgmr.msrb.gmra.mxu2 %v13940_v28  ;;  %v10769_v28 = vld [vmem:[#allocation5 + $0x1298] sm:$0xf0]  ;;  %v10900_v61 = vor.u32 %v13238_v31, %v10897_v44  ;;  %v13202_v43 = vld [vmem:[#allocation5 + $0x126c] sm:$0xf] }
 0x3a1   :  { %7857 = vmatpush.bf16.msra.mxu2 %v10820_v14  ;;  %7826 = vmatmul.bf16.vlgmr.msrb.gmra.mxu3 %v13944_v35  ;;  %v7581_v35 = vadd.f32 %v7580_v47, %v14138_v57  ;;  %v10772_v62 = vor.u32 %v13206_v20, %v10769_v28  ;;  %v10753_v14 = vld [vmem:[#allocation5 + $0x1278] sm:$0xf0]  ;;  %v13234_v15 = vld [vmem:[#allocation5 + $0x136c] sm:$0xf]  ;;  %v10628_v57 = vor.u32 %v13170_v8, %v10625_v48 }
 0x3a2   :  { %7870 = vmatpush.bf16.msra.mxu3 %v10948_v32  ;;  %v10881_v21 = vld [vmem:[#allocation5 + $0x1378] sm:$0xf0]  ;;  %v10756_v32 = vor.u32 %v13202_v43, %v10753_v14  ;;  %v13134_v25 = vld [vmem:[#allocation5 + $0x104c] sm:$0xf] }
 0x3a3   :  { %7832 = vmatpush.bf16.msra.mxu0 %v10548_v29  ;;  %v7594_v56 = vadd.f32 %v7593_v22, %v7581_v35  ;;  %v10481_v60 = vld [vmem:[#allocation5 + $0x1058] sm:$0xf0]  ;;  %v13166_v24 = vld [vmem:[#allocation5 + $0x114c] sm:$0xf]  ;;  %v10884_v52 = vor.u32 %v13234_v15, %v10881_v21  ;;  %v7606_v39 = vpop.f32.mrf.mxu2  ;;  %v7582_v1 = vpop.f32.mrf.mxu0 }
 0x3a4   :  { %7845 = vmatpush.bf16.msra.mxu1 %v10676_v9  ;;  %v10609_v29 = vld [vmem:[#allocation5 + $0x1158] sm:$0xf0]  ;;  %v13198_v9 = vld [vmem:[#allocation5 + $0x124c] sm:$0xf]  ;;  %v7619_v33 = vpop.f32.mrf.mxu3  ;;  %v10484_v51 = vor.u32 %v13134_v25, %v10481_v60  ;;  %v7595_v58 = vpop.f32.mrf.mxu1 }
 0x3a5   :  { %7858 = vmatpush.bf16.msra.mxu2 %v10804_v30  ;;  %v10737_v30 = vld [vmem:[#allocation5 + $0x1258] sm:$0xf0]  ;;  %v7607_v2 = vadd.f32 %v7606_v39, %v7594_v56  ;;  %v13230_v50 = vld [vmem:[#allocation5 + $0x134c] sm:$0xf]  ;;  %v10612_v38 = vor.u32 %v13166_v24, %v10609_v29 }
 0x3a6   :  { %7871 = vmatpush.bf16.msra.mxu3 %v10932_v26  ;;  %v10865_v26 = vld [vmem:[#allocation5 + $0x1358] sm:$0xf0]  ;;  %v13162_v19 = vld [vmem:[#allocation5 + $0x112c] sm:$0xf] }
 0x3a7   :  { %7833 = vmatpush.bf16.msra.mxu0 %v10532_v18  ;;  %v14145_v4 = vadd.f32 %v7619_v33, %v7607_v2  ;;  %v10740_v18 = vor.u32 %v13198_v9, %v10737_v30  ;;  %v10868_v23 = vor.u32 %v13230_v50, %v10865_v26  ;;  %v10593_v41 = vld [vmem:[#allocation5 + $0x1138] sm:$0xf0]  ;;  %v13226_v20 = vld [vmem:[#allocation5 + $0x132c] sm:$0xf] }
 0x3a8   :  { %7846 = vmatpush.bf16.msra.mxu1 %v10660_v6  ;;  %v13130_v6 = vld [vmem:[#allocation5 + $0x102c] sm:$0xf]  ;;  %v10721_v42 = vld [vmem:[#allocation5 + $0x1238] sm:$0xf0]  ;;  %v10596_v35 = vor.u32 %v13162_v19, %v10593_v41 }
 0x3a9   :  { %7859 = vmatpush.bf16.msra.mxu2 %v10788_v36  ;;  %v10465_v36 = vld [vmem:[#allocation5 + $0x1038] sm:$0xf0]  ;;  %v13126_v31 = vld [vmem:[#allocation5 + $0x100c] sm:$0xf] }
 0x3aa   :  { %7872 = vmatpush.bf16.msra.mxu3 %v10916_v3  ;;  %v13194_v3 = vld [vmem:[#allocation5 + $0x122c] sm:$0xf]  ;;  %v10849_v28 = vld [vmem:[#allocation5 + $0x1338] sm:$0xf0]  ;;  %v10468_v47 = vor.u32 %v13130_v6, %v10465_v36 }
 0x3ab   :  { %7834 = vmatpush.bf16.msra.mxu0 %v10516_v27  ;;  %v10449_v44 = vld [vmem:[#allocation5 + $0x1018] sm:$0xf0]  ;;  %v10724_v27 = vor.u32 %v13194_v3, %v10721_v42  ;;  %v13158_v22 = vld [vmem:[#allocation5 + $0x110c] sm:$0xf]  ;;  %v10852_v40 = vor.u32 %v13226_v20, %v10849_v28  ;;  %v7608_v56 = vpop.f32.mrf.mxu2 }
 0x3ac   :  { %7847 = vmatpush.bf16.msra.mxu1 %v10644_v0  ;;  %v10577_v0 = vld [vmem:[#allocation5 + $0x1118] sm:$0xf0]  ;;  %v13222_v8 = vld [vmem:[#allocation5 + $0x130c] sm:$0xf]  ;;  %v7621_v15 = vpop.f32.mrf.mxu3  ;;  %v10452_v21 = vor.u32 %v13126_v31, %v10449_v44 }
 0x3ad   :  { %7860 = vmatpush.bf16.msra.mxu2 %v10772_v62  ;;  %v13190_v62 = vld [vmem:[#allocation5 + $0x120c] sm:$0xf]  ;;  %v10705_v59 = vld [vmem:[#allocation5 + $0x1218] sm:$0xf0]  ;;  %v10580_v25 = vor.u32 %v13158_v22, %v10577_v0 }
 0x3ae   :  { %7873 = vmatpush.bf16.msra.mxu3 %v10900_v61  ;;  %v10833_v61 = vld [vmem:[#allocation5 + $0x1318] sm:$0xf0]  ;;  %v13282_v48 = vld [vmem:[#allocation5 + $0x14ec] sm:$0xf]  ;;  %v10708_v60 = vor.u32 %v13190_v62, %v10705_v59 }
 0x3af   :  { %7835 = vmatpush.bf16.msra.mxu0 %v10500_v63  ;;  %v11073_v43 = vld [vmem:[#allocation5 + $0x14f8] sm:$0xf0]  ;;  %v13314_v14 = vld [vmem:[#allocation5 + $0x15ec] sm:$0xf]  ;;  %v10836_v39 = vor.u32 %v13222_v8, %v10833_v61 }
 0x3b0   :  { %7848 = vmatpush.bf16.msra.mxu1 %v10628_v57  ;;  %v11201_v63 = vld [vmem:[#allocation5 + $0x15f8] sm:$0xf0]  ;;  %v13346_v57 = vld [vmem:[#allocation5 + $0x16ec] sm:$0xf]  ;;  %v11076_v29 = vor.u32 %v13282_v48, %v11073_v43 }
 0x3b1   :  { %7861 = vmatpush.bf16.msra.mxu2 %v10756_v32  ;;  %v11329_v32 = vld [vmem:[#allocation5 + $0x16f8] sm:$0xf0]  ;;  %v13378_v24 = vld [vmem:[#allocation5 + $0x17ec] sm:$0xf]  ;;  %v11204_v9 = vor.u32 %v13314_v14, %v11201_v63 }
 0x3b2   :  { %7874 = vmatpush.bf16.msra.mxu3 %v10884_v52  ;;  %v11457_v52 = vld [vmem:[#allocation5 + $0x17f8] sm:$0xf0]  ;;  %v11332_v30 = vor.u32 %v13346_v57, %v11329_v32  ;;  %v13278_v2 = vld [vmem:[#allocation5 + $0x14cc] sm:$0xf] }
 0x3b3   :  { %7836 = vmatpush.bf16.msra.mxu0 %v10484_v51  ;;  %v11057_v33 = vld [vmem:[#allocation5 + $0x14d8] sm:$0xf0]  ;;  %v13310_v50 = vld [vmem:[#allocation5 + $0x15cc] sm:$0xf]  ;;  %v11460_v26 = vor.u32 %v13378_v24, %v11457_v52 }
 0x3b4   :  { %7849 = vmatpush.bf16.msra.mxu1 %v10612_v38  ;;  %v11185_v1 = vld [vmem:[#allocation5 + $0x15d8] sm:$0xf0]  ;;  %v13342_v51 = vld [vmem:[#allocation5 + $0x16cc] sm:$0xf]  ;;  %v11060_v6 = vor.u32 %v13278_v2, %v11057_v33 }
 0x3b5   :  { %7862 = vmatpush.bf16.msra.mxu2 %v10740_v18  ;;  %v11313_v58 = vld [vmem:[#allocation5 + $0x16d8] sm:$0xf0]  ;;  %v13374_v38 = vld [vmem:[#allocation5 + $0x17cc] sm:$0xf]  ;;  %v11188_v36 = vor.u32 %v13310_v50, %v11185_v1 }
 0x3b6   :  { %7875 = vmatpush.bf16.msra.mxu3 %v10868_v23  ;;  %v11441_v18 = vld [vmem:[#allocation5 + $0x17d8] sm:$0xf0]  ;;  %v11316_v19 = vor.u32 %v13342_v51, %v11313_v58  ;;  %v13274_v23 = vld [vmem:[#allocation5 + $0x14ac] sm:$0xf] }
 0x3b7   :  { %7837 = vmatpush.bf16.msra.mxu0 %v10468_v47  ;;  %v11041_v41 = vld [vmem:[#allocation5 + $0x14b8] sm:$0xf0]  ;;  %v13306_v3 = vld [vmem:[#allocation5 + $0x15ac] sm:$0xf]  ;;  %v11444_v42 = vor.u32 %v13374_v38, %v11441_v18 }
 0x3b8   :  { %7850 = vmatpush.bf16.msra.mxu1 %v10596_v35  ;;  %v11169_v20 = vld [vmem:[#allocation5 + $0x15b8] sm:$0xf0]  ;;  %v13338_v28 = vld [vmem:[#allocation5 + $0x16ac] sm:$0xf]  ;;  %v11044_v35 = vor.u32 %v13274_v23, %v11041_v41 }
 0x3b9   :  { %7863 = vmatpush.bf16.msra.mxu2 %v10724_v27  ;;  %v11297_v47 = vld [vmem:[#allocation5 + $0x16b8] sm:$0xf0]  ;;  %v13370_v31 = vld [vmem:[#allocation5 + $0x17ac] sm:$0xf]  ;;  %v11172_v22 = vor.u32 %v13306_v3, %v11169_v20 }
 0x3ba   :  { %7876 = vmatpush.bf16.msra.mxu3 %v10852_v40  ;;  %v11425_v44 = vld [vmem:[#allocation5 + $0x17b8] sm:$0xf0]  ;;  %v13270_v27 = vld [vmem:[#allocation5 + $0x148c] sm:$0xf]  ;;  %v11300_v0 = vor.u32 %v13338_v28, %v11297_v47  ;;  %v13694_v40 = vld [vmem:[#allocation7] sm:$0xf] }
 0x3bb   :  { %7838 = vmatpush.bf16.msra.mxu0 %v10452_v21  ;;  %v13302_v62 = vld [vmem:[#allocation5 + $0x158c] sm:$0xf]  ;;  %v1138_v59 = vperm.slane %v13694_v40, 3  ;;  %v11428_v8 = vor.u32 %v13370_v31, %v11425_v44  ;;  %v11409_v48 = vld [vmem:[#allocation5 + $0x1798] sm:$0xf0]  ;;  %v7632_v43 = vpop.f32.mrf.mxu0 }
 0x3bc   :  { %7851 = vmatpush.bf16.msra.mxu1 %v10580_v25  ;;  %v13334_v61 = vld [vmem:[#allocation5 + $0x168c] sm:$0xf]  ;;  %v11009_v63 = vld [vmem:[#allocation5 + $0x1478] sm:$0xf0]  ;;  %v7645_v25 = vpop.f32.mrf.mxu1 }
 0x3bd   :  { %7864 = vmatpush.bf16.msra.mxu2 %v10708_v60  ;;  %v13366_v56 = vld [vmem:[#allocation5 + $0x178c] sm:$0xf]  ;;  %v7633_v32 = vadd.f32 %v7632_v43, %v1138_v59  ;;  %v11137_v24 = vld [vmem:[#allocation5 + $0x1578] sm:$0xf0] }
 0x3be   :  { %7877 = vmatpush.bf16.msra.mxu3 %v10836_v39  ;;  %7839 = vmatmul.bf16.vlgmr.msra.gmra.mxu0 %v13950_v37  ;;  %v11025_v37 = vld [vmem:[#allocation5 + $0x1498] sm:$0xf0]  ;;  %v13266_v21 = vld [vmem:[#allocation5 + $0x146c] sm:$0xf]  ;;  %v11412_v60 = vor.u32 %v13366_v56, %v11409_v48 }
 0x3bf   :  { %7883 = vmatpush.bf16.msrb.mxu0 %v11076_v29  ;;  %7852 = vmatmul.bf16.vlgmr.msra.gmra.mxu1 %v13954_v46  ;;  %v11281_v46 = vld [vmem:[#allocation5 + $0x1698] sm:$0xf0]  ;;  %v13298_v57 = vld [vmem:[#allocation5 + $0x156c] sm:$0xf]  ;;  %v11012_v2 = vor.u32 %v13266_v21, %v11009_v63 }
 0x3c0   :  { %7896 = vmatpush.bf16.msrb.mxu1 %v11204_v9  ;;  %7865 = vmatmul.bf16.vlgmr.msra.gmra.mxu2 %v13952_v45  ;;  %v11153_v45 = vld [vmem:[#allocation5 + $0x1598] sm:$0xf0]  ;;  %v11284_v15 = vor.u32 %v13334_v61, %v11281_v46  ;;  %v13330_v52 = vld [vmem:[#allocation5 + $0x166c] sm:$0xf]  ;;  %v11140_v33 = vor.u32 %v13298_v57, %v11137_v24 }
 0x3c1   :  { %7909 = vmatpush.bf16.msrb.mxu2 %v11332_v30  ;;  %7878 = vmatmul.bf16.vlgmr.msra.gmra.mxu3 %v13956_v49  ;;  %v11028_v49 = vor.u32 %v13270_v27, %v11025_v37  ;;  %v11156_v14 = vor.u32 %v13302_v62, %v11153_v45  ;;  %v11265_v39 = vld [vmem:[#allocation5 + $0x1678] sm:$0xf0]  ;;  %v13362_v29 = vld [vmem:[#allocation5 + $0x176c] sm:$0xf]  ;;  %v7646_v30 = vadd.f32 %v7645_v25, %v7633_v32 }
 0x3c2   :  { %7922 = vmatpush.bf16.msrb.mxu3 %v11460_v26  ;;  %v11393_v9 = vld [vmem:[#allocation5 + $0x1778] sm:$0xf0]  ;;  %v11268_v50 = vor.u32 %v13330_v52, %v11265_v39  ;;  %v13262_v26 = vld [vmem:[#allocation5 + $0x144c] sm:$0xf] }
 0x3c3   :  { %7884 = vmatpush.bf16.msrb.mxu0 %v11060_v6  ;;  %v10993_v1 = vld [vmem:[#allocation5 + $0x1458] sm:$0xf0]  ;;  %v13294_v51 = vld [vmem:[#allocation5 + $0x154c] sm:$0xf]  ;;  %v7658_v58 = vpop.f32.mrf.mxu2  ;;  %v11396_v38 = vor.u32 %v13362_v29, %v11393_v9  ;;  %v7634_v28 = vpop.f32.mrf.mxu0 }
 0x3c4   :  { %7897 = vmatpush.bf16.msrb.mxu1 %v11188_v36  ;;  %v11121_v18 = vld [vmem:[#allocation5 + $0x1558] sm:$0xf0]  ;;  %v13326_v6 = vld [vmem:[#allocation5 + $0x164c] sm:$0xf]  ;;  %v7671_v23 = vpop.f32.mrf.mxu3 }
 0x3c5   :  { %7910 = vmatpush.bf16.msrb.mxu2 %v11316_v19  ;;  %v11249_v36 = vld [vmem:[#allocation5 + $0x1658] sm:$0xf0]  ;;  %v7659_v19 = vadd.f32 %v7658_v58, %v7646_v30  ;;  %v13358_v41 = vld [vmem:[#allocation5 + $0x174c] sm:$0xf]  ;;  %v11124_v47 = vor.u32 %v13294_v51, %v11121_v18 }
 0x3c6   :  { %7923 = vmatpush.bf16.msrb.mxu3 %v11444_v42  ;;  %v11377_v3 = vld [vmem:[#allocation5 + $0x1758] sm:$0xf0]  ;;  %v10996_v42 = vor.u32 %v13262_v26, %v10993_v1  ;;  %v11252_v31 = vor.u32 %v13326_v6, %v11249_v36  ;;  %v13258_v44 = vld [vmem:[#allocation5 + $0x142c] sm:$0xf] }
 0x3c7   :  { %7885 = vmatpush.bf16.msrb.mxu0 %v11044_v35  ;;  %v14151_v20 = vadd.f32 %v7671_v23, %v7659_v19  ;;  %v10977_v35 = vld [vmem:[#allocation5 + $0x1438] sm:$0xf0]  ;;  %v13290_v27 = vld [vmem:[#allocation5 + $0x152c] sm:$0xf] }
 0x3c8   :  { %7898 = vmatpush.bf16.msrb.mxu1 %v11172_v22  ;;  %v7647_v22 = vpop.f32.mrf.mxu1  ;;  %v11105_v37 = vld [vmem:[#allocation5 + $0x1538] sm:$0xf0]  ;;  %v13322_v62 = vld [vmem:[#allocation5 + $0x162c] sm:$0xf]  ;;  %v10980_v45 = vor.u32 %v13258_v44, %v10977_v35 }
 0x3c9   :  { %7911 = vmatpush.bf16.msrb.mxu2 %v11300_v0  ;;  %v11380_v0 = vor.u32 %v13358_v41, %v11377_v3  ;;  %v11233_v40 = vld [vmem:[#allocation5 + $0x1638] sm:$0xf0]  ;;  %v13354_v59 = vld [vmem:[#allocation5 + $0x172c] sm:$0xf]  ;;  %v11108_v56 = vor.u32 %v13290_v27, %v11105_v37 }
 0x3ca   :  { %7924 = vmatpush.bf16.msrb.mxu3 %v11428_v8  ;;  %v11361_v8 = vld [vmem:[#allocation5 + $0x1738] sm:$0xf0]  ;;  %v13254_v61 = vld [vmem:[#allocation5 + $0x140c] sm:$0xf]  ;;  %v11236_v48 = vor.u32 %v13322_v62, %v11233_v40 }
 0x3cb   :  { %7886 = vmatpush.bf16.msrb.mxu0 %v11028_v49  ;;  %v10961_v46 = vld [vmem:[#allocation5 + $0x1418] sm:$0xf0]  ;;  %v13286_v49 = vld [vmem:[#allocation5 + $0x150c] sm:$0xf]  ;;  %v11364_v21 = vor.u32 %v13354_v59, %v11361_v8 }
 0x3cc   :  { %7899 = vmatpush.bf16.msrb.mxu1 %v11156_v14  ;;  %v11089_v43 = vld [vmem:[#allocation5 + $0x1518] sm:$0xf0]  ;;  %v13318_v14 = vld [vmem:[#allocation5 + $0x160c] sm:$0xf]  ;;  %v7673_v25 = vpop.f32.mrf.mxu3  ;;  %v10964_v39 = vor.u32 %v13254_v61, %v10961_v46 }
 0x3cd   :  { %7912 = vmatpush.bf16.msrb.mxu2 %v11284_v15  ;;  %v7660_v15 = vpop.f32.mrf.mxu2  ;;  %v11217_v63 = vld [vmem:[#allocation5 + $0x1618] sm:$0xf0]  ;;  %v13350_v57 = vld [vmem:[#allocation5 + $0x170c] sm:$0xf] }
 0x3ce   :  { %7925 = vmatpush.bf16.msrb.mxu3 %v11412_v60  ;;  %v11345_v32 = vld [vmem:[#allocation5 + $0x1718] sm:$0xf0]  ;;  %v13410_v60 = vld [vmem:[#allocation5 + $0x18ec] sm:$0xf] }
 0x3cf   :  { %7887 = vmatpush.bf16.msrb.mxu0 %v11012_v2  ;;  %v11585_v24 = vld [vmem:[#allocation5 + $0x18f8] sm:$0xf0]  ;;  %v13442_v52 = vld [vmem:[#allocation5 + $0x19ec] sm:$0xf]  ;;  %v11092_v2 = vor.u32 %v13286_v49, %v11089_v43  ;;  %v11348_v1 = vor.u32 %v13350_v57, %v11345_v32 }
 0x3d0   :  { %7900 = vmatpush.bf16.msrb.mxu1 %v11140_v33  ;;  %v11713_v29 = vld [vmem:[#allocation5 + $0x19f8] sm:$0xf0]  ;;  %v13474_v9 = vld [vmem:[#allocation5 + $0x1aec] sm:$0xf]  ;;  %v11220_v33 = vor.u32 %v13318_v14, %v11217_v63  ;;  %v11588_v51 = vor.u32 %v13410_v60, %v11585_v24 }
 0x3d1   :  { %7913 = vmatpush.bf16.msrb.mxu2 %v11268_v50  ;;  %v11841_v30 = vld [vmem:[#allocation5 + $0x1af8] sm:$0xf0]  ;;  %v13506_v50 = vld [vmem:[#allocation5 + $0x1bec] sm:$0xf]  ;;  %v11716_v58 = vor.u32 %v13442_v52, %v11713_v29 }
 0x3d2   :  { %7926 = vmatpush.bf16.msrb.mxu3 %v11396_v38  ;;  %v11969_v26 = vld [vmem:[#allocation5 + $0x1bf8] sm:$0xf0]  ;;  %v11844_v38 = vor.u32 %v13474_v9, %v11841_v30  ;;  %v13406_v18 = vld [vmem:[#allocation5 + $0x18cc] sm:$0xf] }
 0x3d3   :  { %7888 = vmatpush.bf16.msrb.mxu0 %v10996_v42  ;;  %v11569_v6 = vld [vmem:[#allocation5 + $0x18d8] sm:$0xf0]  ;;  %v13438_v36 = vld [vmem:[#allocation5 + $0x19cc] sm:$0xf]  ;;  %v11972_v19 = vor.u32 %v13506_v50, %v11969_v26 }
 0x3d4   :  { %7901 = vmatpush.bf16.msrb.mxu1 %v11124_v47  ;;  %v11697_v23 = vld [vmem:[#allocation5 + $0x19d8] sm:$0xf0]  ;;  %v13470_v41 = vld [vmem:[#allocation5 + $0x1acc] sm:$0xf]  ;;  %v11572_v47 = vor.u32 %v13406_v18, %v11569_v6 }
 0x3d5   :  { %7914 = vmatpush.bf16.msrb.mxu2 %v11252_v31  ;;  %v11825_v3 = vld [vmem:[#allocation5 + $0x1ad8] sm:$0xf0]  ;;  %v13502_v42 = vld [vmem:[#allocation5 + $0x1bcc] sm:$0xf]  ;;  %v11700_v31 = vor.u32 %v13438_v36, %v11697_v23 }
 0x3d6   :  { %7927 = vmatpush.bf16.msrb.mxu3 %v11380_v0  ;;  %v11953_v28 = vld [vmem:[#allocation5 + $0x1bd8] sm:$0xf0]  ;;  %v11828_v44 = vor.u32 %v13470_v41, %v11825_v3  ;;  %v13402_v35 = vld [vmem:[#allocation5 + $0x18ac] sm:$0xf] }
 0x3d7   :  { %7889 = vmatpush.bf16.msrb.mxu0 %v10980_v45  ;;  %v11553_v27 = vld [vmem:[#allocation5 + $0x18b8] sm:$0xf0]  ;;  %v13434_v22 = vld [vmem:[#allocation5 + $0x19ac] sm:$0xf]  ;;  %v11956_v0 = vor.u32 %v13502_v42, %v11953_v28 }
 0x3d8   :  { %7902 = vmatpush.bf16.msrb.mxu1 %v11108_v56  ;;  %v11681_v37 = vld [vmem:[#allocation5 + $0x19b8] sm:$0xf0]  ;;  %v13466_v62 = vld [vmem:[#allocation5 + $0x1aac] sm:$0xf]  ;;  %v11556_v45 = vor.u32 %v13402_v35, %v11553_v27 }
 0x3d9   :  { %7915 = vmatpush.bf16.msrb.mxu2 %v11236_v48  ;;  %v11809_v40 = vld [vmem:[#allocation5 + $0x1ab8] sm:$0xf0]  ;;  %v13498_v59 = vld [vmem:[#allocation5 + $0x1bac] sm:$0xf]  ;;  %v11684_v61 = vor.u32 %v13434_v22, %v11681_v37 }
 0x3da   :  { %7928 = vmatpush.bf16.msrb.mxu3 %v11364_v21  ;;  %v11937_v8 = vld [vmem:[#allocation5 + $0x1bb8] sm:$0xf0]  ;;  %v11812_v46 = vor.u32 %v13466_v62, %v11809_v40  ;;  %v13398_v56 = vld [vmem:[#allocation5 + $0x188c] sm:$0xf] }
 0x3db   :  { %7890 = vmatpush.bf16.msrb.mxu0 %v10964_v39  ;;  %v13430_v48 = vld [vmem:[#allocation5 + $0x198c] sm:$0xf]  ;;  %v11940_v49 = vor.u32 %v13498_v59, %v11937_v8  ;;  %v11665_v43 = vld [vmem:[#allocation5 + $0x1998] sm:$0xf0]  ;;  %v7684_v63 = vpop.f32.mrf.mxu0 }
 0x3dc   :  { %7903 = vmatpush.bf16.msrb.mxu1 %v11092_v2  ;;  %v13462_v14 = vld [vmem:[#allocation5 + $0x1a8c] sm:$0xf]  ;;  %v11521_v25 = vld [vmem:[#allocation5 + $0x1878] sm:$0xf0]  ;;  %v7685_v24 = vadd.f32 %v7684_v63, %v14151_v20  ;;  %v7697_v52 = vpop.f32.mrf.mxu1 }
 0x3dd   :  { %7916 = vmatpush.bf16.msrb.mxu2 %v11220_v33  ;;  %v13494_v15 = vld [vmem:[#allocation5 + $0x1b8c] sm:$0xf]  ;;  %v11649_v29 = vld [vmem:[#allocation5 + $0x1978] sm:$0xf0] }
 0x3de   :  { %7929 = vmatpush.bf16.msrb.mxu3 %v11348_v1  ;;  %7891 = vmatmul.bf16.vlgmr.msrb.gmra.mxu0 %v13964_v7  ;;  %v11537_v7 = vld [vmem:[#allocation5 + $0x1898] sm:$0xf0]  ;;  %v13394_v32 = vld [vmem:[#allocation5 + $0x186c] sm:$0xf]  ;;  %v7698_v50 = vadd.f32 %v7697_v52, %v7685_v24 }
 0x3df   :  { %7935 = vmatpush.bf16.msra.mxu0 %v11588_v51  ;;  %7904 = vmatmul.bf16.vlgmr.msrb.gmra.mxu1 %v13968_v12  ;;  %v11921_v12 = vld [vmem:[#allocation5 + $0x1b98] sm:$0xf0]  ;;  %v11540_v21 = vor.u32 %v13398_v56, %v11537_v7  ;;  %v13426_v60 = vld [vmem:[#allocation5 + $0x196c] sm:$0xf]  ;;  %v11524_v26 = vor.u32 %v13394_v32, %v11521_v25 }
 0x3e0   :  { %7948 = vmatpush.bf16.msra.mxu1 %v11716_v58  ;;  %7917 = vmatmul.bf16.vlgmr.msrb.gmra.mxu2 %v13966_v11  ;;  %v11793_v11 = vld [vmem:[#allocation5 + $0x1a98] sm:$0xf0]  ;;  %v11924_v39 = vor.u32 %v13494_v15, %v11921_v12  ;;  %v13458_v9 = vld [vmem:[#allocation5 + $0x1a6c] sm:$0xf]  ;;  %v11652_v1 = vor.u32 %v13426_v60, %v11649_v29 }
 0x3e1   :  { %7961 = vmatpush.bf16.msra.mxu2 %v11844_v38  ;;  %7930 = vmatmul.bf16.vlgmr.msrb.gmra.mxu3 %v13970_v16  ;;  %v11668_v16 = vor.u32 %v13430_v48, %v11665_v43  ;;  %v11796_v57 = vor.u32 %v13462_v14, %v11793_v11  ;;  %v11777_v30 = vld [vmem:[#allocation5 + $0x1a78] sm:$0xf0]  ;;  %v13490_v2 = vld [vmem:[#allocation5 + $0x1b6c] sm:$0xf] }
 0x3e2   :  { %7974 = vmatpush.bf16.msra.mxu3 %v11972_v19  ;;  %v11905_v33 = vld [vmem:[#allocation5 + $0x1b78] sm:$0xf0]  ;;  %v11780_v51 = vor.u32 %v13458_v9, %v11777_v30  ;;  %v13390_v58 = vld [vmem:[#allocation5 + $0x184c] sm:$0xf] }
 0x3e3   :  { %7936 = vmatpush.bf16.msra.mxu0 %v11572_v47  ;;  %v11505_v38 = vld [vmem:[#allocation5 + $0x1858] sm:$0xf0]  ;;  %v13422_v18 = vld [vmem:[#allocation5 + $0x194c] sm:$0xf]  ;;  %v7710_v6 = vpop.f32.mrf.mxu2  ;;  %v11908_v20 = vor.u32 %v13490_v2, %v11905_v33 }
 0x3e4   :  { %7949 = vmatpush.bf16.msra.mxu1 %v11700_v31  ;;  %v11633_v36 = vld [vmem:[#allocation5 + $0x1958] sm:$0xf0]  ;;  %v13454_v19 = vld [vmem:[#allocation5 + $0x1a4c] sm:$0xf]  ;;  %v7711_v41 = vadd.f32 %v7710_v6, %v7698_v50  ;;  %v7723_v3 = vpop.f32.mrf.mxu3  ;;  %v11508_v47 = vor.u32 %v13390_v58, %v11505_v38  ;;  %v7699_v62 = vpop.f32.mrf.mxu1 }
 0x3e5   :  { %7962 = vmatpush.bf16.msra.mxu2 %v11828_v44  ;;  %v11761_v23 = vld [vmem:[#allocation5 + $0x1a58] sm:$0xf0]  ;;  %v13486_v42 = vld [vmem:[#allocation5 + $0x1b4c] sm:$0xf]  ;;  %v7686_v44 = vpop.f32.mrf.mxu0  ;;  %v11636_v35 = vor.u32 %v13422_v18, %v11633_v36 }
 0x3e6   :  { %7975 = vmatpush.bf16.msra.mxu3 %v11956_v0  ;;  %v11889_v28 = vld [vmem:[#allocation5 + $0x1b58] sm:$0xf0]  ;;  %v14158_v31 = vadd.f32 %v7723_v3, %v7711_v41  ;;  %v11764_v27 = vor.u32 %v13454_v19, %v11761_v23  ;;  %v13386_v22 = vld [vmem:[#allocation5 + $0x182c] sm:$0xf] }
 0x3e7   :  { %7937 = vmatpush.bf16.msra.mxu0 %v11556_v45  ;;  %v11489_v0 = vld [vmem:[#allocation5 + $0x1838] sm:$0xf0]  ;;  %v13418_v37 = vld [vmem:[#allocation5 + $0x192c] sm:$0xf]  ;;  %v11892_v40 = vor.u32 %v13486_v42, %v11889_v28 }
 0x3e8   :  { %7950 = vmatpush.bf16.msra.mxu1 %v11684_v61  ;;  %v11617_v59 = vld [vmem:[#allocation5 + $0x1938] sm:$0xf0]  ;;  %v13450_v8 = vld [vmem:[#allocation5 + $0x1a2c] sm:$0xf]  ;;  %v11492_v56 = vor.u32 %v13386_v22, %v11489_v0 }
 0x3e9   :  { %7963 = vmatpush.bf16.msra.mxu2 %v11812_v46  ;;  %v11745_v45 = vld [vmem:[#allocation5 + $0x1a38] sm:$0xf0]  ;;  %v13482_v61 = vld [vmem:[#allocation5 + $0x1b2c] sm:$0xf] }
 0x3ea   :  { %7976 = vmatpush.bf16.msra.mxu3 %v11940_v49  ;;  %v11873_v46 = vld [vmem:[#allocation5 + $0x1b38] sm:$0xf0]  ;;  %v13382_v7 = vld [vmem:[#allocation5 + $0x180c] sm:$0xf]  ;;  %v11620_v49 = vor.u32 %v13418_v37, %v11617_v59  ;;  %v11748_v43 = vor.u32 %v13450_v8, %v11745_v45 }
 0x3eb   :  { %7938 = vmatpush.bf16.msra.mxu0 %v11540_v21  ;;  %v11473_v48 = vld [vmem:[#allocation5 + $0x1818] sm:$0xf0]  ;;  %v13414_v14 = vld [vmem:[#allocation5 + $0x190c] sm:$0xf]  ;;  %v7712_v12 = vpop.f32.mrf.mxu2  ;;  %v11876_v21 = vor.u32 %v13482_v61, %v11873_v46 }
 0x3ec   :  { %7951 = vmatpush.bf16.msra.mxu1 %v11668_v16  ;;  %v11601_v11 = vld [vmem:[#allocation5 + $0x1918] sm:$0xf0]  ;;  %v13446_v15 = vld [vmem:[#allocation5 + $0x1a0c] sm:$0xf]  ;;  %v7725_v32 = vpop.f32.mrf.mxu3  ;;  %v11476_v52 = vor.u32 %v13382_v7, %v11473_v48 }
 0x3ed   :  { %7964 = vmatpush.bf16.msra.mxu2 %v11796_v57  ;;  %v11729_v63 = vld [vmem:[#allocation5 + $0x1a18] sm:$0xf0]  ;;  %v13478_v16 = vld [vmem:[#allocation5 + $0x1b0c] sm:$0xf]  ;;  %v11604_v30 = vor.u32 %v13414_v14, %v11601_v11 }
 0x3ee   :  { %7977 = vmatpush.bf16.msra.mxu3 %v11924_v39  ;;  %v11857_v57 = vld [vmem:[#allocation5 + $0x1b18] sm:$0xf0]  ;;  %v13538_v25 = vld [vmem:[#allocation5 + $0x1cec] sm:$0xf]  ;;  %v11732_v2 = vor.u32 %v13446_v15, %v11729_v63 }
 0x3ef   :  { %7939 = vmatpush.bf16.msra.mxu0 %v11524_v26  ;;  %v12097_v60 = vld [vmem:[#allocation5 + $0x1cf8] sm:$0xf0]  ;;  %v13570_v24 = vld [vmem:[#allocation5 + $0x1dec] sm:$0xf]  ;;  %v11860_v26 = vor.u32 %v13478_v16, %v11857_v57 }
 0x3f0   :  { %7952 = vmatpush.bf16.msra.mxu1 %v11652_v1  ;;  %v12225_v39 = vld [vmem:[#allocation5 + $0x1df8] sm:$0xf0]  ;;  %v13602_v29 = vld [vmem:[#allocation5 + $0x1eec] sm:$0xf]  ;;  %v12100_v1 = vor.u32 %v13538_v25, %v12097_v60 }
 0x3f1   :  { %7965 = vmatpush.bf16.msra.mxu2 %v11780_v51  ;;  %v12353_v9 = vld [vmem:[#allocation5 + $0x1ef8] sm:$0xf0]  ;;  %v13634_v33 = vld [vmem:[#allocation5 + $0x1fec] sm:$0xf]  ;;  %v12228_v51 = vor.u32 %v13570_v24, %v12225_v39 }
 0x3f2   :  { %7978 = vmatpush.bf16.msra.mxu3 %v11908_v20  ;;  %v12481_v50 = vld [vmem:[#allocation5 + $0x1ff8] sm:$0xf0]  ;;  %v12356_v58 = vor.u32 %v13602_v29, %v12353_v9  ;;  %v13534_v38 = vld [vmem:[#allocation5 + $0x1ccc] sm:$0xf] }
 0x3f3   :  { %7940 = vmatpush.bf16.msra.mxu0 %v11508_v47  ;;  %v12081_v18 = vld [vmem:[#allocation5 + $0x1cd8] sm:$0xf0]  ;;  %v13566_v6 = vld [vmem:[#allocation5 + $0x1dcc] sm:$0xf]  ;;  %v12484_v20 = vor.u32 %v13634_v33, %v12481_v50 }
 0x3f4   :  { %7953 = vmatpush.bf16.msra.mxu1 %v11636_v35  ;;  %v12209_v36 = vld [vmem:[#allocation5 + $0x1dd8] sm:$0xf0]  ;;  %v13598_v19 = vld [vmem:[#allocation5 + $0x1ecc] sm:$0xf]  ;;  %v12084_v42 = vor.u32 %v13534_v38, %v12081_v18 }
 0x3f5   :  { %7966 = vmatpush.bf16.msra.mxu2 %v11764_v27  ;;  %v12337_v23 = vld [vmem:[#allocation5 + $0x1ed8] sm:$0xf0]  ;;  %v13630_v41 = vld [vmem:[#allocation5 + $0x1fcc] sm:$0xf]  ;;  %v12212_v28 = vor.u32 %v13566_v6, %v12209_v36 }
 0x3f6   :  { %7979 = vmatpush.bf16.msra.mxu3 %v11892_v40  ;;  %v12465_v3 = vld [vmem:[#allocation5 + $0x1fd8] sm:$0xf0]  ;;  %v12340_v47 = vor.u32 %v13598_v19, %v12337_v23  ;;  %v13530_v44 = vld [vmem:[#allocation5 + $0x1cac] sm:$0xf] }
 0x3f7   :  { %7941 = vmatpush.bf16.msra.mxu0 %v11492_v56  ;;  %v12065_v35 = vld [vmem:[#allocation5 + $0x1cb8] sm:$0xf0]  ;;  %v13562_v27 = vld [vmem:[#allocation5 + $0x1dac] sm:$0xf]  ;;  %v12468_v22 = vor.u32 %v13630_v41, %v12465_v3 }
 0x3f8   :  { %7954 = vmatpush.bf16.msra.mxu1 %v11620_v49  ;;  %v12193_v0 = vld [vmem:[#allocation5 + $0x1db8] sm:$0xf0]  ;;  %v13594_v37 = vld [vmem:[#allocation5 + $0x1eac] sm:$0xf]  ;;  %v12068_v8 = vor.u32 %v13530_v44, %v12065_v35 }
 0x3f9   :  { %7967 = vmatpush.bf16.msra.mxu2 %v11748_v43  ;;  %v12321_v62 = vld [vmem:[#allocation5 + $0x1eb8] sm:$0xf0]  ;;  %v13626_v40 = vld [vmem:[#allocation5 + $0x1fac] sm:$0xf]  ;;  %v12196_v45 = vor.u32 %v13562_v27, %v12193_v0 }
 0x3fa   :  { %7980 = vmatpush.bf16.msra.mxu3 %v11876_v21  ;;  %v12449_v59 = vld [vmem:[#allocation5 + $0x1fb8] sm:$0xf0]  ;;  %v12324_v61 = vor.u32 %v13594_v37, %v12321_v62  ;;  %v13526_v46 = vld [vmem:[#allocation5 + $0x1c8c] sm:$0xf] }
 0x3fb   :  { %7942 = vmatpush.bf16.msra.mxu0 %v11476_v52  ;;  %v13558_v56 = vld [vmem:[#allocation5 + $0x1d8c] sm:$0xf]  ;;  %v12452_v7 = vor.u32 %v13626_v40, %v12449_v59  ;;  %v12177_v48 = vld [vmem:[#allocation5 + $0x1d98] sm:$0xf0]  ;;  %v7736_v43 = vpop.f32.mrf.mxu0 }
 0x3fc   :  { %7955 = vmatpush.bf16.msra.mxu1 %v11604_v30  ;;  %v13590_v49 = vld [vmem:[#allocation5 + $0x1e8c] sm:$0xf]  ;;  %v12433_v14 = vld [vmem:[#allocation5 + $0x1f98] sm:$0xf0]  ;;  %v7749_v15 = vpop.f32.mrf.mxu1  ;;  %v12180_v12 = vor.u32 %v13558_v56, %v12177_v48 }
 0x3fd   :  { %7968 = vmatpush.bf16.msra.mxu2 %v11732_v2  ;;  %v13522_v63 = vld [vmem:[#allocation5 + $0x1c6c] sm:$0xf]  ;;  %v12033_v16 = vld [vmem:[#allocation5 + $0x1c78] sm:$0xf0] }
 0x3fe   :  { %7981 = vmatpush.bf16.msra.mxu3 %v11860_v26  ;;  %7943 = vmatmul.bf16.vlgmr.msra.gmra.mxu0 %v13979_v5  ;;  %v12049_v5 = vld [vmem:[#allocation5 + $0x1c98] sm:$0xf0]  ;;  %v13554_v57 = vld [vmem:[#allocation5 + $0x1d6c] sm:$0xf]  ;;  %v12036_v9 = vor.u32 %v13522_v63, %v12033_v16 }
 0x3ff   :  { %7987 = vmatpush.bf16.msrb.mxu0 %v12100_v1  ;;  %7956 = vmatmul.bf16.vlgmr.msra.gmra.mxu1 %v13983_v13  ;;  %v13622_v13 = vld [vmem:[#allocation5 + $0x1f8c] sm:$0xf]  ;;  %v12052_v11 = vor.u32 %v13526_v46, %v12049_v5  ;;  %v12161_v60 = vld [vmem:[#allocation5 + $0x1d78] sm:$0xf0] }
 0x400   :  { %8000 = vmatpush.bf16.msrb.mxu1 %v12228_v51  ;;  %7969 = vmatmul.bf16.vlgmr.msra.gmra.mxu2 %v13981_v10  ;;  %v12305_v10 = vld [vmem:[#allocation5 + $0x1e98] sm:$0xf0]  ;;  %v12436_v32 = vor.u32 %v13622_v13, %v12433_v14  ;;  %v13586_v24 = vld [vmem:[#allocation5 + $0x1e6c] sm:$0xf] }
 0x401   :  { %8013 = vmatpush.bf16.msrb.mxu2 %v12356_v58  ;;  %7982 = vmatmul.bf16.vlgmr.msra.gmra.mxu3 %v13985_v17  ;;  %v7737_v17 = vadd.f32 %v7736_v43, %v14158_v31  ;;  %v12308_v21 = vor.u32 %v13590_v49, %v12305_v10  ;;  %v12289_v52 = vld [vmem:[#allocation5 + $0x1e78] sm:$0xf0]  ;;  %v13618_v39 = vld [vmem:[#allocation5 + $0x1f6c] sm:$0xf]  ;;  %v12164_v31 = vor.u32 %v13554_v57, %v12161_v60  ;;  %v13643_v57 = vld [vmem:[#allocation8 + $0x30] sm:$0xff] }
 0x402   :  { %8026 = vmatpush.bf16.msrb.mxu3 %v12484_v20  ;;  %v12417_v29 = vld [vmem:[#allocation5 + $0x1f78] sm:$0xf0]  ;;  %v12292_v30 = vor.u32 %v13586_v24, %v12289_v52  ;;  %v13518_v2 = vld [vmem:[#allocation5 + $0x1c4c] sm:$0xf] }
 0x403   :  { %7988 = vmatpush.bf16.msrb.mxu0 %v12084_v42  ;;  %v7750_v25 = vadd.f32 %v7749_v15, %v7737_v17  ;;  %v12017_v33 = vld [vmem:[#allocation5 + $0x1c58] sm:$0xf0]  ;;  %v13550_v50 = vld [vmem:[#allocation5 + $0x1d4c] sm:$0xf]  ;;  %v12420_v26 = vor.u32 %v13618_v39, %v12417_v29  ;;  %v7762_v1 = vpop.f32.mrf.mxu2  ;;  %v7738_v19 = vpop.f32.mrf.mxu0 }
 0x404   :  { %8001 = vmatpush.bf16.msrb.mxu1 %v12212_v28  ;;  %v12145_v51 = vld [vmem:[#allocation5 + $0x1d58] sm:$0xf0]  ;;  %v13582_v58 = vld [vmem:[#allocation5 + $0x1e4c] sm:$0xf]  ;;  %v7775_v6 = vpop.f32.mrf.mxu3  ;;  %v12020_v23 = vor.u32 %v13518_v2, %v12017_v33  ;;  %v7751_v41 = vpop.f32.mrf.mxu1 }
 0x405   :  { %8014 = vmatpush.bf16.msrb.mxu2 %v12340_v47  ;;  %v12273_v38 = vld [vmem:[#allocation5 + $0x1e58] sm:$0xf0]  ;;  %v7763_v18 = vadd.f32 %v7762_v1, %v7750_v25  ;;  %v13614_v20 = vld [vmem:[#allocation5 + $0x1f4c] sm:$0xf]  ;;  %v12148_v42 = vor.u32 %v13550_v50, %v12145_v51  ;;  %v13659_v25 = vld [vmem:[#allocation8 + $0xb0] sm:$0xff] }
 0x406   :  { %8027 = vmatpush.bf16.msrb.mxu3 %v12468_v22  ;;  %v12401_v36 = vld [vmem:[#allocation5 + $0x1f58] sm:$0xf0]  ;;  %v12276_v28 = vor.u32 %v13582_v58, %v12273_v38  ;;  %v13514_v47 = vld [vmem:[#allocation5 + $0x1c2c] sm:$0xf]  ;;  %v13639_v51 = vld [vmem:[#allocation8 + $0x10] sm:$0xff] }
 0x407   :  { %7989 = vmatpush.bf16.msrb.mxu0 %v12068_v8  ;;  %v14165_v3 = vadd.f32 %v7775_v6, %v7763_v18  ;;  %v12001_v44 = vld [vmem:[#allocation5 + $0x1c38] sm:$0xf0]  ;;  %v13546_v35 = vld [vmem:[#allocation5 + $0x1d2c] sm:$0xf]  ;;  %v12404_v27 = vor.u32 %v13614_v20, %v12401_v36  ;;  %v13647_v18 = vld [vmem:[#allocation8 + $0x50] sm:$0xff] }
 0x408   :  { %8002 = vmatpush.bf16.msrb.mxu1 %v12196_v45  ;;  %v12129_v22 = vld [vmem:[#allocation5 + $0x1d38] sm:$0xf0]  ;;  %v13578_v0 = vld [vmem:[#allocation5 + $0x1e2c] sm:$0xf]  ;;  %v12004_v59 = vor.u32 %v13514_v47, %v12001_v44  ;;  %v13655_v6 = vld [vmem:[#allocation8 + $0x90] sm:$0xff] }
 0x409   :  { %8015 = vmatpush.bf16.msrb.mxu2 %v12324_v61  ;;  %v12257_v37 = vld [vmem:[#allocation5 + $0x1e38] sm:$0xf0]  ;;  %v13610_v62 = vld [vmem:[#allocation5 + $0x1f2c] sm:$0xf]  ;;  %v12132_v8 = vor.u32 %v13546_v35, %v12129_v22  ;;  %v13645_v44 = vld [vmem:[#allocation8 + $0x40] sm:$0xff] }
 0x40a   :  { %8028 = vmatpush.bf16.msrb.mxu3 %v12452_v7  ;;  %v12385_v40 = vld [vmem:[#allocation5 + $0x1f38] sm:$0xf0]  ;;  %v12260_v45 = vor.u32 %v13578_v0, %v12257_v37  ;;  %v13510_v61 = vld [vmem:[#allocation5 + $0x1c0c] sm:$0xf]  ;;  %v13653_v35 = vld [vmem:[#allocation8 + $0x80] sm:$0xff] }
 0x40b   :  { %7990 = vmatpush.bf16.msrb.mxu0 %v12052_v11  ;;  %v11985_v46 = vld [vmem:[#allocation5 + $0x1c18] sm:$0xf0]  ;;  %v13542_v5 = vld [vmem:[#allocation5 + $0x1d0c] sm:$0xf]  ;;  %v12388_v56 = vor.u32 %v13610_v62, %v12385_v40  ;;  %v7764_v10 = vpop.f32.mrf.mxu2 }
 0x40c   :  { %8003 = vmatpush.bf16.msrb.mxu1 %v12180_v12  ;;  %v12113_v7 = vld [vmem:[#allocation5 + $0x1d18] sm:$0xf0]  ;;  %v13574_v48 = vld [vmem:[#allocation5 + $0x1e0c] sm:$0xf]  ;;  %v7777_v14 = vpop.f32.mrf.mxu3  ;;  %v11988_v17 = vor.u32 %v13510_v61, %v11985_v46 }
 0x40d   :  { %8016 = vmatpush.bf16.msrb.mxu2 %v12308_v21  ;;  %v12241_v49 = vld [vmem:[#allocation5 + $0x1e18] sm:$0xf0]  ;;  %v13606_v43 = vld [vmem:[#allocation5 + $0x1f0c] sm:$0xf]  ;;  %v12116_v11 = vor.u32 %v13542_v5, %v12113_v7 }
 0x40e   :  { %8029 = vmatpush.bf16.msrb.mxu3 %v12436_v32  ;;  %v12369_v13 = vld [vmem:[#allocation5 + $0x1f18] sm:$0xf0]  ;;  %v12244_v15 = vor.u32 %v13574_v48, %v12241_v49  ;;  %v13651_v32 = vld [vmem:[#allocation8 + $0x70] sm:$0xff]  ;;  %v13642_v60 = vld [vmem:[#allocation8 + $0x28] sm:$0xff] }
 0x40f   :  { %7991 = vmatpush.bf16.msrb.mxu0 %v12036_v9  ;;  %v12372_v12 = vor.u32 %v13606_v43, %v12369_v13  ;;  %v13644_v21 = vld [vmem:[#allocation8 + $0x38] sm:$0xff]  ;;  %v13650_v24 = vld [vmem:[#allocation8 + $0x68] sm:$0xff]  ;;  %v13641_v9 = vld [vmem:[#allocation8 + $0x20] sm:$0xff] }
 0x410   :  { %8004 = vmatpush.bf16.msrb.mxu1 %v12164_v31  ;;  %v13652_v63 = vld [vmem:[#allocation8 + $0x78] sm:$0xff]  ;;  %v13658_v52 = vld [vmem:[#allocation8 + $0xa8] sm:$0xff] }
 0x411   :  { %8017 = vmatpush.bf16.msrb.mxu2 %v12292_v30  ;;  %v13660_v16 = vld [vmem:[#allocation8 + $0xb8] sm:$0xff]  ;;  %v14186_v20 = vld [vmem:[#allocation16_spill] sm:$0xff] }
 0x412   :  { %8030 = vmatpush.bf16.msrb.mxu3 %v12420_v26  ;;  %v13656_v2 = vld [vmem:[#allocation8 + $0x98] sm:$0xff]  ;;  %13680 = vtanh.f32 %v14186_v20  ;;  %v13638_v19 = vld [vmem:[#allocation8 + $0x8] sm:$0xff] }
 0x413   :  { %7992 = vmatpush.bf16.msrb.mxu0 %v12020_v23  ;;  %v14187_v36 = vld [vmem:[#allocation17_spill] sm:$0xff]  ;;  %v13646_v23 = vld [vmem:[#allocation8 + $0x48] sm:$0xff] }
 0x414   :  { %8005 = vmatpush.bf16.msrb.mxu1 %v12148_v42  ;;  %13682 = vtanh.f32 %v14187_v36  ;;  %v13654_v41 = vld [vmem:[#allocation8 + $0x88] sm:$0xff] }
 0x415   :  { %8018 = vmatpush.bf16.msrb.mxu2 %v12276_v28  ;;  %13684 = vtanh.f32 %v14145_v4  ;;  %v13637_v28 = vld [vmem:[#allocation8] sm:$0xff] }
 0x416   :  { %8031 = vmatpush.bf16.msrb.mxu3 %v12404_v27 }
 0x417   :  { %7993 = vmatpush.bf16.msrb.mxu0 %v12004_v59 }
 0x418   :  { %8006 = vmatpush.bf16.msrb.mxu1 %v12132_v8  ;;  %v13681_v47 = vpop.eup %13680 }
 0x419   :  { %8019 = vmatpush.bf16.msrb.mxu2 %v12260_v45  ;;  %v8043_v0 = vpack.c.bf16 %v13681_v47, %v13681_v47 }
 0x41a   :  { %8032 = vmatpush.bf16.msrb.mxu3 %v12388_v56  ;;  %v13683_v27 = vpop.eup %13682 }
 0x41b   :  { %7994 = vmatpush.bf16.msrb.mxu0 %v11988_v17  ;;  %v7788_v39 = vpop.f32.mrf.mxu0  ;;  %v13685_v22 = vpop.eup %13684  ;;  %v8044_v4 = vpack.c.bf16 %v13683_v27, %v13683_v27 }
 0x41c   :  { %8007 = vmatpush.bf16.msrb.mxu1 %v12116_v11  ;;  %v7789_v29 = vadd.f32 %v7788_v39, %v14165_v3  ;;  %v7801_v31 = vpop.f32.mrf.mxu1  ;;  %v8045_v37 = vpack.c.bf16 %v13685_v22, %v13685_v22  ;;  %v13668_v11 = vld [vmem:[#allocation8 + $0xf8] sm:$0xff] }
 0x41d   :  { %8020 = vmatpush.bf16.msrb.mxu2 %v12244_v15 }
 0x41e   :  { %8033 = vmatpush.bf16.msrb.mxu3 %v12372_v12  ;;  %7995 = vmatmul.bf16.vlgmr.msrb.gmra.mxu0 %v13994_v54  ;;  %v13649_v54 = vld [vmem:[#allocation8 + $0x60] sm:$0xff]  ;;  %v7802_v30 = vadd.f32 %v7801_v31, %v7789_v29  ;;  %v13667_v12 = vld [vmem:[#allocation8 + $0xf0] sm:$0xff] }
 0x41f   :  { %8307 = vmatpush.bf16.msra.mxu0 %v13644_v21  ;;  %8008 = vmatmul.bf16.vlgmr.msrb.gmra.mxu1 %v13998_v55  ;;  %v13657_v55 = vld [vmem:[#allocation8 + $0xa0] sm:$0xff] }
 0x420   :  { %8320 = vmatpush.bf16.msra.mxu1 %v13652_v63  ;;  %8021 = vmatmul.bf16.vlgmr.msrb.gmra.mxu2 %v13996_v34  ;;  %v13640_v34 = vld [vmem:[#allocation8 + $0x18] sm:$0xff] }
 0x421   :  { %8333 = vmatpush.bf16.msra.mxu2 %v13660_v16  ;;  %8034 = vmatmul.bf16.vlgmr.msrb.gmra.mxu3 %v14000_v53  ;;  %v13648_v53 = vld [vmem:[#allocation8 + $0x58] sm:$0xff]  ;;  %v13666_v16 = vld [vmem:[#allocation8 + $0xe8] sm:$0xff] }
 0x422   :  { %8346 = vmatpush.bf16.msra.mxu3 %v13668_v11 }
 0x423   :  { %8308 = vmatpush.bf16.msra.mxu0 %v13643_v57  ;;  %v7814_v33 = vpop.f32.mrf.mxu2  ;;  %v7790_v1 = vpop.f32.mrf.mxu0  ;;  %v13665_v57 = vld [vmem:[#allocation8 + $0xe0] sm:$0xff] }
 0x424   :  { %8321 = vmatpush.bf16.msra.mxu1 %v13651_v32  ;;  %v7815_v50 = vadd.f32 %v7814_v33, %v7802_v30  ;;  %v7827_v26 = vpop.f32.mrf.mxu3  ;;  %v7803_v58 = vpop.f32.mrf.mxu1 }
 0x425   :  { %8334 = vmatpush.bf16.msra.mxu2 %v13659_v25 }
 0x426   :  { %v7828_v38 = vadd.f32 %v7827_v26, %v7815_v50  ;;  %8347 = vmatpush.bf16.msra.mxu3 %v13667_v12 }
 0x427   :  { %8309 = vmatpush.bf16.msra.mxu0 %v13642_v60  ;;  %v13664_v60 = vld [vmem:[#allocation8 + $0xd8] sm:$0xff] }
 0x428   :  { %8322 = vmatpush.bf16.msra.mxu1 %v13650_v24  ;;  %v13663_v24 = vld [vmem:[#allocation8 + $0xd0] sm:$0xff] }
 0x429   :  { %8335 = vmatpush.bf16.msra.mxu2 %v13658_v52 }
 0x42a   :  { %8348 = vmatpush.bf16.msra.mxu3 %v13666_v16 }
 0x42b   :  { %8310 = vmatpush.bf16.msra.mxu0 %v13641_v9  ;;  %v7816_v3 = vpop.f32.mrf.mxu2 }
 0x42c   :  { %8323 = vmatpush.bf16.msra.mxu1 %v13649_v54  ;;  %v7829_v42 = vpop.f32.mrf.mxu3  ;;  %v13662_v54 = vld [vmem:[#allocation8 + $0xc8] sm:$0xff] }
 0x42d   :  { %8336 = vmatpush.bf16.msra.mxu2 %v13657_v55 }
 0x42e   :  { %8349 = vmatpush.bf16.msra.mxu3 %v13665_v57 }
 0x42f   :  { %8311 = vmatpush.bf16.msra.mxu0 %v13640_v34  ;;  %v13661_v34 = vld [vmem:[#allocation8 + $0xc0] sm:$0xff] }
 0x430   :  { %8324 = vmatpush.bf16.msra.mxu1 %v13648_v53 }
 0x431   :  { %8337 = vmatpush.bf16.msra.mxu2 %v13656_v2 }
 0x432   :  { %8350 = vmatpush.bf16.msra.mxu3 %v13664_v60 }
 0x433   :  { %8312 = vmatpush.bf16.msra.mxu0 %v13639_v51 }
 0x434   :  { %8325 = vmatpush.bf16.msra.mxu1 %v13647_v18 }
 0x435   :  { %8338 = vmatpush.bf16.msra.mxu2 %v13655_v6 }
 0x436   :  { %8351 = vmatpush.bf16.msra.mxu3 %v13663_v24 }
 0x437   :  { %8313 = vmatpush.bf16.msra.mxu0 %v13638_v19 }
 0x438   :  { %8326 = vmatpush.bf16.msra.mxu1 %v13646_v23 }
 0x439   :  { %8339 = vmatpush.bf16.msra.mxu2 %v13654_v41 }
 0x43a   :  { %8352 = vmatpush.bf16.msra.mxu3 %v13662_v54 }
 0x43b   :  { %8314 = vmatpush.bf16.msra.mxu0 %v13637_v28  ;;  %v7840_v62 = vpop.f32.mrf.mxu0 }
 0x43c   :  { %8327 = vmatpush.bf16.msra.mxu1 %v13645_v44  ;;  %v7841_v40 = vadd.f32 %v7840_v62, %v7828_v38  ;;  %v7853_v59 = vpop.f32.mrf.mxu1 }
 0x43d   :  { %8340 = vmatpush.bf16.msra.mxu2 %v13653_v35  ;;  %v13679_v35 = vld [vmem:[#allocation10] ss:$0 sm:$0xff] }
 0x43e   :  { %8315 = vmatmul.bf16.vlgmr.msra.gmra.mxu0 %v8043_v0  ;;  %v7854_v8 = vadd.f32 %v7853_v59, %v7841_v40  ;;  %8353 = vmatpush.bf16.msra.mxu3 %v13661_v34 }
 0x43f   :  { %8328 = vmatmul.bf16.vlgmr.msra.gmra.mxu1 %v8044_v4 }
 0x440   :  { %8341 = vmatmul.bf16.vlgmr.msra.gmra.mxu2 %v8045_v37 }
 0x443   :  { %v7866_v45 = vpop.f32.mrf.mxu2  ;;  %v7842_v5 = vpop.f32.mrf.mxu0 }
 0x444   :  { %v7867_v61 = vadd.f32 %v7866_v45, %v7854_v8  ;;  %v7879_v46 = vpop.f32.mrf.mxu3  ;;  %v7855_v56 = vpop.f32.mrf.mxu1 }
 0x446   :  { %v7880_v7 = vadd.f32 %v7879_v46, %v7867_v61 }
 0x44b   :  { %v7868_v48 = vpop.f32.mrf.mxu2 }
 0x44c   :  { %v7881_v49 = vpop.f32.mrf.mxu3 }
 0x45b   :  { %v7892_v10 = vpop.f32.mrf.mxu0 }
 0x45c   :  { %v7905_v43 = vpop.f32.mrf.mxu1  ;;  %v7893_v39 = vadd.f32 %v7892_v10, %v7880_v7 }
 0x45e   :  { %v7906_v55 = vadd.f32 %v7905_v43, %v7893_v39 }
 0x463   :  { %v7918_v13 = vpop.f32.mrf.mxu2  ;;  %v7894_v17 = vpop.f32.mrf.mxu0 }
 0x464   :  { %v7931_v14 = vpop.f32.mrf.mxu3  ;;  %v7907_v15 = vpop.f32.mrf.mxu1  ;;  %v7919_v30 = vadd.f32 %v7918_v13, %v7906_v55 }
 0x466   :  { %v7932_v33 = vadd.f32 %v7931_v14, %v7919_v30 }
 0x46b   :  { %v7920_v21 = vpop.f32.mrf.mxu2 }
 0x46c   :  { %v7933_v63 = vpop.f32.mrf.mxu3 }
 0x47b   :  { %v7944_v32 = vpop.f32.mrf.mxu0 }
 0x47c   :  { %v7957_v25 = vpop.f32.mrf.mxu1  ;;  %v7945_v50 = vadd.f32 %v7944_v32, %v7932_v33 }
 0x47e   :  { %v7958_v26 = vadd.f32 %v7957_v25, %v7945_v50 }
 0x483   :  { %v7970_v52 = vpop.f32.mrf.mxu2  ;;  %v7946_v9 = vpop.f32.mrf.mxu0 }
 0x484   :  { %v7983_v29 = vpop.f32.mrf.mxu3  ;;  %v7959_v31 = vpop.f32.mrf.mxu1  ;;  %v7971_v1 = vadd.f32 %v7970_v52, %v7958_v26 }
 0x486   :  { %v7984_v51 = vadd.f32 %v7983_v29, %v7971_v1 }
 0x48b   :  { %v7972_v53 = vpop.f32.mrf.mxu2 }
 0x48c   :  { %v7985_v2 = vpop.f32.mrf.mxu3 }
 0x49b   :  { %v7996_v58 = vpop.f32.mrf.mxu0 }
 0x49c   :  { %v8009_v38 = vpop.f32.mrf.mxu1  ;;  %v7997_v18 = vadd.f32 %v7996_v58, %v7984_v51 }
 0x49e   :  { %v8010_v6 = vadd.f32 %v8009_v38, %v7997_v18 }
 0x4a3   :  { %v8022_v20 = vpop.f32.mrf.mxu2  ;;  %v7998_v23 = vpop.f32.mrf.mxu0 }
 0x4a4   :  { %v8035_v36 = vpop.f32.mrf.mxu3  ;;  %v8023_v19 = vadd.f32 %v8022_v20, %v8010_v6  ;;  %v8011_v41 = vpop.f32.mrf.mxu1 }
 0x4a6   :  { %v8036_v3 = vadd.f32 %v8035_v36, %v8023_v19 }
 0x4a8   :  { %13686 = vtanh.f32 %v8036_v3 }
 0x4ab   :  { %v8024_v42 = vpop.f32.mrf.mxu2 }
 0x4ac   :  { %v8037_v28 = vpop.f32.mrf.mxu3 }
 0x4ae   :  { %v13687_v47 = vpop.eup %13686 }
 0x4af   :  { %v8046_v44 = vpack.c.bf16 %v13687_v47, %v13687_v47 }
 0x4b1   :  { %8354 = vmatmul.bf16.vlgmr.msra.gmra.mxu3 %v8046_v44 }
 0x4bb   :  { %v8316_v27 = vpop.f32.mrf.mxu0 }
 0x4bc   :  { %v8317_v22 = vadd.f32 %v13679_v35, %v8316_v27  ;;  %v8329_v0 = vpop.f32.mrf.mxu1 }
 0x4be   :  { %v8330_v4 = vadd.f32 %v8329_v0, %v8317_v22 }
 0x4c3   :  { %v8342_v37 = vpop.f32.mrf.mxu2  ;;  %v8318_v40 = vpop.f32.mrf.mxu0 }
 0x4c4   :  { %v8343_v62 = vadd.f32 %v8342_v37, %v8330_v4  ;;  %v8331_v59 = vpop.f32.mrf.mxu1 }
 0x4cb   :  { %v8344_v8 = vpop.f32.mrf.mxu2 }
 0x534   :  { %v8355_v45 = vpop.f32.mrf.mxu3 }
 0x535   :  { %v8356_v61 = vadd.f32 %v8355_v45, %v8343_v62 }
 0x537   :  { %8359 = vmax.xlane.f32.xlu0 %v8356_v61 }
 0x53c   :  { %v8357_v46 = vpop.f32.mrf.mxu3 }
 0x5aa   :  { %v8360_v5 = vpop.xlane.xlu0 %8359 }
 0x5ab   :  { %v8361_v56 = vsub.f32 %v8356_v61, %v8360_v5 }
 0x5ad   :  { %v8362_v7 = vmul.f32 1.442695, %v8361_v56 }
 0x5af   :  { %13688 = vpow2.f32 %v8362_v7 }
 0x5b5   :  { %v13689_v48 = vpop.eup %13688 }
 0x5b6   :  { %8364 = vadd.xlane.f32.xlu0 %v13689_v48 }
 0x629   :  { %v8365_v49 = vpop.xlane.xlu0 %8364 }
 0x62a   :  { %13690 = vlog2.f32 %v8365_v49 }
 0x630   :  { %v13691_v10 = vpop.eup %13690 }
 0x631   :  { %v8367_v43 = vmul.f32 0.6931472, %v13691_v10 }
 0x633   :  { %v8368_v13 = vsub.f32 %v8361_v56, %v8367_v43 }
 0x635   :  { %8369 = vst [vmem:[#allocation11] sm:$0xff] %v8368_v13 }
 0x636   :  { %8380 = dma.vmem_to_hbm [thread:$0]  %s8376_s4, 128, %s8378_s21, [#allocation4]  }
 0x637   :  { %13845 = dma.done.wait [#allocation4], 128  }
 0x638   :  { %13846 = vsyncadd [#allocation4], 4294967168 }
 0x639   :  { %8385 = vsyncpa [#allocation3], 1 }
 0x63a   :  { %8386 = vsyncpa [#allocation6], 1 }
 0x63b   :  { %8387 = vsyncpa [#allocation9], 1 }
 0x63c   :  { %8388 = vsyncpa [#allocation4], 1 }

</bundles_post_ra>
